<compile_context>
chip_gen: v7x
topology: tpu7x:2x2x1
jax: 0.10.0
libtpu: 0.0.40
codegen_flags: <defaults>
</compile_context>

<pallas_src>
import functools

import jax
import jax.numpy as jnp
from jax.experimental import pallas as pl
from jax.experimental.pallas import tpu as pltpu


def _round_up(v, m):
    return ((v + m - 1) // m) * m


def _fused_conv_relu_kernel(x_ref, w1_ref, b1_ref, w2_ref, b2_ref, o_ref, h1_ref,
                            *, W, KH, KW, OH2, OW2, C1P, CH, n_chunks):
    # ---------- layer 1: Conv2d(1, OC1, KxK) + ReLU  (VPU tap-MACs, chunked) ----------
    # x_ref : (1, HWP, 1)   one image in row space (row = h*W + w), zero-padded tail
    # w1_ref: (KH*KW, C1P), b1_ref: (1, C1P)
    # h1_ref: (n_chunks*CH, C1P) VMEM scratch — layer-1 activation in row space
    for c in range(n_chunks):
        base = c * CH
        acc = jnp.zeros((CH, C1P), jnp.float32)
        for i in range(KH):
            for j in range(KW):
                s = base + i * W + j
                acc = acc + x_ref[0, s:s + CH, :] * w1_ref[i * KW + j:i * KW + j + 1, :]
        h1_ref[base:base + CH, :] = jnp.maximum(acc + b1_ref[...], 0.0)

    # ---------- layer 2: Conv2d(OC1, OC2, KxK) + ReLU  (one K=KH*KW*C1P matmul) --------
    # Compact im2col LHS over VALID output rows only:
    #   lhs[oh*OW2 + ow, (i*KW + j)*C1P + c] = h1[(oh + i)*W + (ow + j), c]
    pieces = []
    for i in range(KH):
        for j in range(KW):
            rows = [h1_ref[(oh + i) * W + j:(oh + i) * W + j + OW2, :]
                    for oh in range(OH2)]
            pieces.append(jnp.concatenate(rows, axis=0))        # (OH2*OW2, C1P)
    lhs = jnp.concatenate(pieces, axis=-1)                       # (OH2*OW2, KH*KW*C1P)

    out = jnp.dot(lhs, w2_ref[...], preferred_element_type=jnp.float32)
    # Single dense, lane-wide store of the whole per-image block.
    o_ref[0, :, :] = jnp.maximum(out + b2_ref[...], 0.0)


@jax.jit
def _forward(x, w1, b1, w2, b2):
    N, Cin, H, W = x.shape
    OC1, _, KH, KW = w1.shape
    OC2, C2in, KH2, KW2 = w2.shape
    assert Cin == 1 and C2in == OC1 and (KH, KW) == (KH2, KW2)

    OH1, OW1 = H - KH + 1, W - KW + 1
    OH2, OW2 = OH1 - KH + 1, OW1 - KW + 1

    C1P = _round_up(OC1, 32)          # intermediate channels on lanes
    OC2P = _round_up(OC2, 128)        # final channels on lanes (lane-dense store)

    L1 = (OH1 - 1) * W + OW1          # last needed layer-1 row-space row + 1
    CH = 64                           # layer-1 chunk rows (bounds accumulator live range)
    n_chunks = pl.cdiv(L1, CH)
    L1P = n_chunks * CH               # h1 scratch rows (tail rows are unread garbage)
    HWP = _round_up((L1P - 1) + (KH - 1) * W + (KW - 1) + 1, 8)  # padded x rows

    # Layout prep (runs as a few tiny XLA ops under this jit).
    x_rows = x.reshape(N, H * W, 1).astype(jnp.float32)
    x_rows = jnp.pad(x_rows, ((0, 0), (0, HWP - H * W), (0, 0)))
    w1p = jnp.zeros((KH * KW, C1P), jnp.float32).at[:, :OC1].set(
        w1.reshape(OC1, KH * KW).T.astype(jnp.float32))
    b1p = jnp.zeros((1, C1P), jnp.float32).at[:, :OC1].set(b1.reshape(1, OC1))
    w2p = jnp.zeros((KH * KW, C1P, OC2P), jnp.float32).at[:, :OC1, :OC2].set(
        w2.transpose(2, 3, 1, 0).reshape(KH * KW, OC1, OC2).astype(jnp.float32))
    w2p = w2p.reshape(KH * KW * C1P, OC2P)
    b2p = jnp.zeros((1, OC2P), jnp.float32).at[:, :OC2].set(b2.reshape(1, OC2))

    kernel = functools.partial(
        _fused_conv_relu_kernel, W=W, KH=KH, KW=KW, OH2=OH2, OW2=OW2,
        C1P=C1P, CH=CH, n_chunks=n_chunks)

    out_k = pl.pallas_call(
        kernel,
        out_shape=jax.ShapeDtypeStruct((N, OH2 * OW2, OC2P), jnp.float32),
        grid=(N,),
        in_specs=[
            pl.BlockSpec((1, HWP, 1), lambda n: (n, 0, 0)),             # per-image input
            pl.BlockSpec((KH * KW, C1P), lambda n: (0, 0)),             # conv1 weights
            pl.BlockSpec((1, C1P), lambda n: (0, 0)),                   # conv1 bias
            pl.BlockSpec((KH * KW * C1P, OC2P), lambda n: (0, 0)),      # conv2 weights
            pl.BlockSpec((1, OC2P), lambda n: (0, 0)),                  # conv2 bias
        ],
        out_specs=pl.BlockSpec((1, OH2 * OW2, OC2P), lambda n: (n, 0, 0)),
        scratch_shapes=[pltpu.VMEM((L1P, C1P), jnp.float32)],           # layer-1 activation
        compiler_params=pltpu.CompilerParams(dimension_semantics=("parallel",)),
    )(x_rows, w1p, b1p, w2p, b2p)

    # Drop channel padding and return NCHW to match PyTorch semantics.
    return out_k[:, :, :OC2].reshape(N, OH2, OW2, OC2).transpose(0, 3, 1, 2)


def sequential_forward(x, params):
    """Equivalent of Sequential(Conv2d(1,20,5), ReLU(), Conv2d(20,64,5), ReLU())."""
    (w1, b1), (w2, b2) = params
    return _forward(x, w1, b1, w2, b2)


def _reference(x, params):
    """Pure-JAX reference (lax conv) for correctness check."""
    (w1, b1), (w2, b2) = params

    def conv(x, w, b):
        y = jax.lax.conv_general_dilated(
            x, w, window_strides=(1, 1), padding="VALID",
            dimension_numbers=("NCHW", "OIHW", "NCHW"))
        return jnp.maximum(y + b.reshape(1, -1, 1, 1), 0.0)

    return conv(conv(x, w1, b1), w2, b2)


if __name__ == "__main__":
    key = jax.random.PRNGKey(0)
    kx, kw1, kb1, kw2, kb2 = jax.random.split(key, 5)

    # Input consistent with Conv2d(1, 20, 5): N=2, C=1, H=W=16
    x = jax.random.normal(kx, (2, 1, 16, 16), dtype=jnp.float32)

    # Deterministic parameter init (fan-in scaled normals)
    w1 = jax.random.normal(kw1, (20, 1, 5, 5), dtype=jnp.float32) * (1.0 / (1 * 5 * 5)) ** 0.5
    b1 = jax.random.normal(kb1, (20,), dtype=jnp.float32) * 0.01
    w2 = jax.random.normal(kw2, (64, 20, 5, 5), dtype=jnp.float32) * (1.0 / (20 * 5 * 5)) ** 0.5
    b2 = jax.random.normal(kb2, (64,), dtype=jnp.float32) * 0.01
    params = ((w1, b1), (w2, b2))

    out = jax.block_until_ready(sequential_forward(x, params))

    assert out.shape == (2, 64, 8, 8), out.shape
    ref = jax.block_until_ready(_reference(x, params))
    assert jnp.allclose(out, ref, atol=1e-4, rtol=1e-4), "mismatch vs reference"

    print("KERNEL_OK")
</pallas_src>

<mosaic_0001>
module attributes {stable_mosaic.version = 11 : i64} {
  func.func @_fused_conv_relu_kernel(%arg0: i32, %arg1: memref<1x264x1xf32, #tpu.memory_space<vmem>>, %arg2: memref<25x32xf32, #tpu.memory_space<vmem>>, %arg3: memref<1x32xf32, #tpu.memory_space<vmem>>, %arg4: memref<800x128xf32, #tpu.memory_space<vmem>>, %arg5: memref<1x128xf32, #tpu.memory_space<vmem>>, %arg6: memref<1x64x128xf32, #tpu.memory_space<vmem>>, %arg7: memref<192x32xf32, #tpu.memory_space<vmem>>) attributes {dimension_semantics = [#tpu.dimension_semantics<parallel>], iteration_bounds = array<i64: 2>, scalar_prefetch = 0 : i64, scratch_operands = 1 : i64, tpu.core_type = #tpu.core_type<tc>, window_params = [{transform_indices = @transform_0, window_bounds = array<i64: 1, 264, 1>}, {pipeline_mode = #tpu.pipeline_mode<synchronous>, transform_indices = @transform_1, window_bounds = array<i64: 25, 32>}, {pipeline_mode = #tpu.pipeline_mode<synchronous>, transform_indices = @transform_2, window_bounds = array<i64: 1, 32>}, {pipeline_mode = #tpu.pipeline_mode<synchronous>, transform_indices = @transform_3, window_bounds = array<i64: 800, 128>}, {pipeline_mode = #tpu.pipeline_mode<synchronous>, transform_indices = @transform_4, window_bounds = array<i64: 1, 128>}, {transform_indices = @transform_5, window_bounds = array<i64: 1, 64, 128>}]} {
    %cst = arith.constant 0.000000e+00 : f32
    %0 = vector.broadcast %cst : f32 to vector<64x32xf32>
    %c0 = arith.constant 0 : index
    %c0_0 = arith.constant 0 : index
    %c0_1 = arith.constant 0 : index
    %1 = vector.load %arg1[%c0, %c0_0, %c0_1] : memref<1x264x1xf32, #tpu.memory_space<vmem>>, vector<1x64x1xf32>
    %2 = vector.shape_cast %1 : vector<1x64x1xf32> to vector<64x1xf32>
    %c0_2 = arith.constant 0 : index
    %c0_3 = arith.constant 0 : index
    %3 = vector.load %arg2[%c0_2, %c0_3] : memref<25x32xf32, #tpu.memory_space<vmem>>, vector<1x32xf32>
    %4 = vector.broadcast %2 : vector<64x1xf32> to vector<64x32xf32>
    %5 = vector.broadcast %3 : vector<1x32xf32> to vector<64x32xf32>
    %6 = arith.mulf %4, %5 : vector<64x32xf32>
    %7 = arith.addf %0, %6 : vector<64x32xf32>
    %c0_4 = arith.constant 0 : index
    %c1 = arith.constant 1 : index
    %c0_5 = arith.constant 0 : index
    %8 = vector.load %arg1[%c0_4, %c1, %c0_5] : memref<1x264x1xf32, #tpu.memory_space<vmem>>, vector<1x64x1xf32>
    %9 = vector.shape_cast %8 : vector<1x64x1xf32> to vector<64x1xf32>
    %c1_6 = arith.constant 1 : index
    %c0_7 = arith.constant 0 : index
    %10 = vector.load %arg2[%c1_6, %c0_7] : memref<25x32xf32, #tpu.memory_space<vmem>>, vector<1x32xf32>
    %11 = vector.broadcast %9 : vector<64x1xf32> to vector<64x32xf32>
    %12 = vector.broadcast %10 : vector<1x32xf32> to vector<64x32xf32>
    %13 = arith.mulf %11, %12 : vector<64x32xf32>
    %14 = arith.addf %7, %13 : vector<64x32xf32>
    %c0_8 = arith.constant 0 : index
    %c2 = arith.constant 2 : index
    %c0_9 = arith.constant 0 : index
    %15 = vector.load %arg1[%c0_8, %c2, %c0_9] : memref<1x264x1xf32, #tpu.memory_space<vmem>>, vector<1x64x1xf32>
    %16 = vector.shape_cast %15 : vector<1x64x1xf32> to vector<64x1xf32>
    %c2_10 = arith.constant 2 : index
    %c0_11 = arith.constant 0 : index
    %17 = vector.load %arg2[%c2_10, %c0_11] : memref<25x32xf32, #tpu.memory_space<vmem>>, vector<1x32xf32>
    %18 = vector.broadcast %16 : vector<64x1xf32> to vector<64x32xf32>
    %19 = vector.broadcast %17 : vector<1x32xf32> to vector<64x32xf32>
    %20 = arith.mulf %18, %19 : vector<64x32xf32>
    %21 = arith.addf %14, %20 : vector<64x32xf32>
    %c0_12 = arith.constant 0 : index
    %c3 = arith.constant 3 : index
    %c0_13 = arith.constant 0 : index
    %22 = vector.load %arg1[%c0_12, %c3, %c0_13] : memref<1x264x1xf32, #tpu.memory_space<vmem>>, vector<1x64x1xf32>
    %23 = vector.shape_cast %22 : vector<1x64x1xf32> to vector<64x1xf32>
    %c3_14 = arith.constant 3 : index
    %c0_15 = arith.constant 0 : index
    %24 = vector.load %arg2[%c3_14, %c0_15] : memref<25x32xf32, #tpu.memory_space<vmem>>, vector<1x32xf32>
    %25 = vector.broadcast %23 : vector<64x1xf32> to vector<64x32xf32>
    %26 = vector.broadcast %24 : vector<1x32xf32> to vector<64x32xf32>
    %27 = arith.mulf %25, %26 : vector<64x32xf32>
    %28 = arith.addf %21, %27 : vector<64x32xf32>
    %c0_16 = arith.constant 0 : index
    %c4 = arith.constant 4 : index
    %c0_17 = arith.constant 0 : index
    %29 = vector.load %arg1[%c0_16, %c4, %c0_17] : memref<1x264x1xf32, #tpu.memory_space<vmem>>, vector<1x64x1xf32>
    %30 = vector.shape_cast %29 : vector<1x64x1xf32> to vector<64x1xf32>
    %c4_18 = arith.constant 4 : index
    %c0_19 = arith.constant 0 : index
    %31 = vector.load %arg2[%c4_18, %c0_19] : memref<25x32xf32, #tpu.memory_space<vmem>>, vector<1x32xf32>
    %32 = vector.broadcast %30 : vector<64x1xf32> to vector<64x32xf32>
    %33 = vector.broadcast %31 : vector<1x32xf32> to vector<64x32xf32>
    %34 = arith.mulf %32, %33 : vector<64x32xf32>
    %35 = arith.addf %28, %34 : vector<64x32xf32>
    %c0_20 = arith.constant 0 : index
    %c16 = arith.constant 16 : index
    %c0_21 = arith.constant 0 : index
    %36 = vector.load %arg1[%c0_20, %c16, %c0_21] : memref<1x264x1xf32, #tpu.memory_space<vmem>>, vector<1x64x1xf32>
    %37 = vector.shape_cast %36 : vector<1x64x1xf32> to vector<64x1xf32>
    %c5 = arith.constant 5 : index
    %c0_22 = arith.constant 0 : index
    %38 = vector.load %arg2[%c5, %c0_22] : memref<25x32xf32, #tpu.memory_space<vmem>>, vector<1x32xf32>
    %39 = vector.broadcast %37 : vector<64x1xf32> to vector<64x32xf32>
    %40 = vector.broadcast %38 : vector<1x32xf32> to vector<64x32xf32>
    %41 = arith.mulf %39, %40 : vector<64x32xf32>
    %42 = arith.addf %35, %41 : vector<64x32xf32>
    %c0_23 = arith.constant 0 : index
    %c17 = arith.constant 17 : index
    %c0_24 = arith.constant 0 : index
    %43 = vector.load %arg1[%c0_23, %c17, %c0_24] : memref<1x264x1xf32, #tpu.memory_space<vmem>>, vector<1x64x1xf32>
    %44 = vector.shape_cast %43 : vector<1x64x1xf32> to vector<64x1xf32>
    %c6 = arith.constant 6 : index
    %c0_25 = arith.constant 0 : index
    %45 = vector.load %arg2[%c6, %c0_25] : memref<25x32xf32, #tpu.memory_space<vmem>>, vector<1x32xf32>
    %46 = vector.broadcast %44 : vector<64x1xf32> to vector<64x32xf32>
    %47 = vector.broadcast %45 : vector<1x32xf32> to vector<64x32xf32>
    %48 = arith.mulf %46, %47 : vector<64x32xf32>
    %49 = arith.addf %42, %48 : vector<64x32xf32>
    %c0_26 = arith.constant 0 : index
    %c18 = arith.constant 18 : index
    %c0_27 = arith.constant 0 : index
    %50 = vector.load %arg1[%c0_26, %c18, %c0_27] : memref<1x264x1xf32, #tpu.memory_space<vmem>>, vector<1x64x1xf32>
    %51 = vector.shape_cast %50 : vector<1x64x1xf32> to vector<64x1xf32>
    %c7 = arith.constant 7 : index
    %c0_28 = arith.constant 0 : index
    %52 = vector.load %arg2[%c7, %c0_28] : memref<25x32xf32, #tpu.memory_space<vmem>>, vector<1x32xf32>
    %53 = vector.broadcast %51 : vector<64x1xf32> to vector<64x32xf32>
    %54 = vector.broadcast %52 : vector<1x32xf32> to vector<64x32xf32>
    %55 = arith.mulf %53, %54 : vector<64x32xf32>
    %56 = arith.addf %49, %55 : vector<64x32xf32>
    %c0_29 = arith.constant 0 : index
    %c19 = arith.constant 19 : index
    %c0_30 = arith.constant 0 : index
    %57 = vector.load %arg1[%c0_29, %c19, %c0_30] : memref<1x264x1xf32, #tpu.memory_space<vmem>>, vector<1x64x1xf32>
    %58 = vector.shape_cast %57 : vector<1x64x1xf32> to vector<64x1xf32>
    %c8 = arith.constant 8 : index
    %c0_31 = arith.constant 0 : index
    %59 = vector.load %arg2[%c8, %c0_31] : memref<25x32xf32, #tpu.memory_space<vmem>>, vector<1x32xf32>
    %60 = vector.broadcast %58 : vector<64x1xf32> to vector<64x32xf32>
    %61 = vector.broadcast %59 : vector<1x32xf32> to vector<64x32xf32>
    %62 = arith.mulf %60, %61 : vector<64x32xf32>
    %63 = arith.addf %56, %62 : vector<64x32xf32>
    %c0_32 = arith.constant 0 : index
    %c20 = arith.constant 20 : index
    %c0_33 = arith.constant 0 : index
    %64 = vector.load %arg1[%c0_32, %c20, %c0_33] : memref<1x264x1xf32, #tpu.memory_space<vmem>>, vector<1x64x1xf32>
    %65 = vector.shape_cast %64 : vector<1x64x1xf32> to vector<64x1xf32>
    %c9 = arith.constant 9 : index
    %c0_34 = arith.constant 0 : index
    %66 = vector.load %arg2[%c9, %c0_34] : memref<25x32xf32, #tpu.memory_space<vmem>>, vector<1x32xf32>
    %67 = vector.broadcast %65 : vector<64x1xf32> to vector<64x32xf32>
    %68 = vector.broadcast %66 : vector<1x32xf32> to vector<64x32xf32>
    %69 = arith.mulf %67, %68 : vector<64x32xf32>
    %70 = arith.addf %63, %69 : vector<64x32xf32>
    %c0_35 = arith.constant 0 : index
    %c32 = arith.constant 32 : index
    %c0_36 = arith.constant 0 : index
    %71 = vector.load %arg1[%c0_35, %c32, %c0_36] : memref<1x264x1xf32, #tpu.memory_space<vmem>>, vector<1x64x1xf32>
    %72 = vector.shape_cast %71 : vector<1x64x1xf32> to vector<64x1xf32>
    %c10 = arith.constant 10 : index
    %c0_37 = arith.constant 0 : index
    %73 = vector.load %arg2[%c10, %c0_37] : memref<25x32xf32, #tpu.memory_space<vmem>>, vector<1x32xf32>
    %74 = vector.broadcast %72 : vector<64x1xf32> to vector<64x32xf32>
    %75 = vector.broadcast %73 : vector<1x32xf32> to vector<64x32xf32>
    %76 = arith.mulf %74, %75 : vector<64x32xf32>
    %77 = arith.addf %70, %76 : vector<64x32xf32>
    %c0_38 = arith.constant 0 : index
    %c33 = arith.constant 33 : index
    %c0_39 = arith.constant 0 : index
    %78 = vector.load %arg1[%c0_38, %c33, %c0_39] : memref<1x264x1xf32, #tpu.memory_space<vmem>>, vector<1x64x1xf32>
    %79 = vector.shape_cast %78 : vector<1x64x1xf32> to vector<64x1xf32>
    %c11 = arith.constant 11 : index
    %c0_40 = arith.constant 0 : index
    %80 = vector.load %arg2[%c11, %c0_40] : memref<25x32xf32, #tpu.memory_space<vmem>>, vector<1x32xf32>
    %81 = vector.broadcast %79 : vector<64x1xf32> to vector<64x32xf32>
    %82 = vector.broadcast %80 : vector<1x32xf32> to vector<64x32xf32>
    %83 = arith.mulf %81, %82 : vector<64x32xf32>
    %84 = arith.addf %77, %83 : vector<64x32xf32>
    %c0_41 = arith.constant 0 : index
    %c34 = arith.constant 34 : index
    %c0_42 = arith.constant 0 : index
    %85 = vector.load %arg1[%c0_41, %c34, %c0_42] : memref<1x264x1xf32, #tpu.memory_space<vmem>>, vector<1x64x1xf32>
    %86 = vector.shape_cast %85 : vector<1x64x1xf32> to vector<64x1xf32>
    %c12 = arith.constant 12 : index
    %c0_43 = arith.constant 0 : index
    %87 = vector.load %arg2[%c12, %c0_43] : memref<25x32xf32, #tpu.memory_space<vmem>>, vector<1x32xf32>
    %88 = vector.broadcast %86 : vector<64x1xf32> to vector<64x32xf32>
    %89 = vector.broadcast %87 : vector<1x32xf32> to vector<64x32xf32>
    %90 = arith.mulf %88, %89 : vector<64x32xf32>
    %91 = arith.addf %84, %90 : vector<64x32xf32>
    %c0_44 = arith.constant 0 : index
    %c35 = arith.constant 35 : index
    %c0_45 = arith.constant 0 : index
    %92 = vector.load %arg1[%c0_44, %c35, %c0_45] : memref<1x264x1xf32, #tpu.memory_space<vmem>>, vector<1x64x1xf32>
    %93 = vector.shape_cast %92 : vector<1x64x1xf32> to vector<64x1xf32>
    %c13 = arith.constant 13 : index
    %c0_46 = arith.constant 0 : index
    %94 = vector.load %arg2[%c13, %c0_46] : memref<25x32xf32, #tpu.memory_space<vmem>>, vector<1x32xf32>
    %95 = vector.broadcast %93 : vector<64x1xf32> to vector<64x32xf32>
    %96 = vector.broadcast %94 : vector<1x32xf32> to vector<64x32xf32>
    %97 = arith.mulf %95, %96 : vector<64x32xf32>
    %98 = arith.addf %91, %97 : vector<64x32xf32>
    %c0_47 = arith.constant 0 : index
    %c36 = arith.constant 36 : index
    %c0_48 = arith.constant 0 : index
    %99 = vector.load %arg1[%c0_47, %c36, %c0_48] : memref<1x264x1xf32, #tpu.memory_space<vmem>>, vector<1x64x1xf32>
    %100 = vector.shape_cast %99 : vector<1x64x1xf32> to vector<64x1xf32>
    %c14 = arith.constant 14 : index
    %c0_49 = arith.constant 0 : index
    %101 = vector.load %arg2[%c14, %c0_49] : memref<25x32xf32, #tpu.memory_space<vmem>>, vector<1x32xf32>
    %102 = vector.broadcast %100 : vector<64x1xf32> to vector<64x32xf32>
    %103 = vector.broadcast %101 : vector<1x32xf32> to vector<64x32xf32>
    %104 = arith.mulf %102, %103 : vector<64x32xf32>
    %105 = arith.addf %98, %104 : vector<64x32xf32>
    %c0_50 = arith.constant 0 : index
    %c48 = arith.constant 48 : index
    %c0_51 = arith.constant 0 : index
    %106 = vector.load %arg1[%c0_50, %c48, %c0_51] : memref<1x264x1xf32, #tpu.memory_space<vmem>>, vector<1x64x1xf32>
    %107 = vector.shape_cast %106 : vector<1x64x1xf32> to vector<64x1xf32>
    %c15 = arith.constant 15 : index
    %c0_52 = arith.constant 0 : index
    %108 = vector.load %arg2[%c15, %c0_52] : memref<25x32xf32, #tpu.memory_space<vmem>>, vector<1x32xf32>
    %109 = vector.broadcast %107 : vector<64x1xf32> to vector<64x32xf32>
    %110 = vector.broadcast %108 : vector<1x32xf32> to vector<64x32xf32>
    %111 = arith.mulf %109, %110 : vector<64x32xf32>
    %112 = arith.addf %105, %111 : vector<64x32xf32>
    %c0_53 = arith.constant 0 : index
    %c49 = arith.constant 49 : index
    %c0_54 = arith.constant 0 : index
    %113 = vector.load %arg1[%c0_53, %c49, %c0_54] : memref<1x264x1xf32, #tpu.memory_space<vmem>>, vector<1x64x1xf32>
    %114 = vector.shape_cast %113 : vector<1x64x1xf32> to vector<64x1xf32>
    %c16_55 = arith.constant 16 : index
    %c0_56 = arith.constant 0 : index
    %115 = vector.load %arg2[%c16_55, %c0_56] : memref<25x32xf32, #tpu.memory_space<vmem>>, vector<1x32xf32>
    %116 = vector.broadcast %114 : vector<64x1xf32> to vector<64x32xf32>
    %117 = vector.broadcast %115 : vector<1x32xf32> to vector<64x32xf32>
    %118 = arith.mulf %116, %117 : vector<64x32xf32>
    %119 = arith.addf %112, %118 : vector<64x32xf32>
    %c0_57 = arith.constant 0 : index
    %c50 = arith.constant 50 : index
    %c0_58 = arith.constant 0 : index
    %120 = vector.load %arg1[%c0_57, %c50, %c0_58] : memref<1x264x1xf32, #tpu.memory_space<vmem>>, vector<1x64x1xf32>
    %121 = vector.shape_cast %120 : vector<1x64x1xf32> to vector<64x1xf32>
    %c17_59 = arith.constant 17 : index
    %c0_60 = arith.constant 0 : index
    %122 = vector.load %arg2[%c17_59, %c0_60] : memref<25x32xf32, #tpu.memory_space<vmem>>, vector<1x32xf32>
    %123 = vector.broadcast %121 : vector<64x1xf32> to vector<64x32xf32>
    %124 = vector.broadcast %122 : vector<1x32xf32> to vector<64x32xf32>
    %125 = arith.mulf %123, %124 : vector<64x32xf32>
    %126 = arith.addf %119, %125 : vector<64x32xf32>
    %c0_61 = arith.constant 0 : index
    %c51 = arith.constant 51 : index
    %c0_62 = arith.constant 0 : index
    %127 = vector.load %arg1[%c0_61, %c51, %c0_62] : memref<1x264x1xf32, #tpu.memory_space<vmem>>, vector<1x64x1xf32>
    %128 = vector.shape_cast %127 : vector<1x64x1xf32> to vector<64x1xf32>
    %c18_63 = arith.constant 18 : index
    %c0_64 = arith.constant 0 : index
    %129 = vector.load %arg2[%c18_63, %c0_64] : memref<25x32xf32, #tpu.memory_space<vmem>>, vector<1x32xf32>
    %130 = vector.broadcast %128 : vector<64x1xf32> to vector<64x32xf32>
    %131 = vector.broadcast %129 : vector<1x32xf32> to vector<64x32xf32>
    %132 = arith.mulf %130, %131 : vector<64x32xf32>
    %133 = arith.addf %126, %132 : vector<64x32xf32>
    %c0_65 = arith.constant 0 : index
    %c52 = arith.constant 52 : index
    %c0_66 = arith.constant 0 : index
    %134 = vector.load %arg1[%c0_65, %c52, %c0_66] : memref<1x264x1xf32, #tpu.memory_space<vmem>>, vector<1x64x1xf32>
    %135 = vector.shape_cast %134 : vector<1x64x1xf32> to vector<64x1xf32>
    %c19_67 = arith.constant 19 : index
    %c0_68 = arith.constant 0 : index
    %136 = vector.load %arg2[%c19_67, %c0_68] : memref<25x32xf32, #tpu.memory_space<vmem>>, vector<1x32xf32>
    %137 = vector.broadcast %135 : vector<64x1xf32> to vector<64x32xf32>
    %138 = vector.broadcast %136 : vector<1x32xf32> to vector<64x32xf32>
    %139 = arith.mulf %137, %138 : vector<64x32xf32>
    %140 = arith.addf %133, %139 : vector<64x32xf32>
    %c0_69 = arith.constant 0 : index
    %c64 = arith.constant 64 : index
    %c0_70 = arith.constant 0 : index
    %141 = vector.load %arg1[%c0_69, %c64, %c0_70] : memref<1x264x1xf32, #tpu.memory_space<vmem>>, vector<1x64x1xf32>
    %142 = vector.shape_cast %141 : vector<1x64x1xf32> to vector<64x1xf32>
    %c20_71 = arith.constant 20 : index
    %c0_72 = arith.constant 0 : index
    %143 = vector.load %arg2[%c20_71, %c0_72] : memref<25x32xf32, #tpu.memory_space<vmem>>, vector<1x32xf32>
    %144 = vector.broadcast %142 : vector<64x1xf32> to vector<64x32xf32>
    %145 = vector.broadcast %143 : vector<1x32xf32> to vector<64x32xf32>
    %146 = arith.mulf %144, %145 : vector<64x32xf32>
    %147 = arith.addf %140, %146 : vector<64x32xf32>
    %c0_73 = arith.constant 0 : index
    %c65 = arith.constant 65 : index
    %c0_74 = arith.constant 0 : index
    %148 = vector.load %arg1[%c0_73, %c65, %c0_74] : memref<1x264x1xf32, #tpu.memory_space<vmem>>, vector<1x64x1xf32>
    %149 = vector.shape_cast %148 : vector<1x64x1xf32> to vector<64x1xf32>
    %c21 = arith.constant 21 : index
    %c0_75 = arith.constant 0 : index
    %150 = vector.load %arg2[%c21, %c0_75] : memref<25x32xf32, #tpu.memory_space<vmem>>, vector<1x32xf32>
    %151 = vector.broadcast %149 : vector<64x1xf32> to vector<64x32xf32>
    %152 = vector.broadcast %150 : vector<1x32xf32> to vector<64x32xf32>
    %153 = arith.mulf %151, %152 : vector<64x32xf32>
    %154 = arith.addf %147, %153 : vector<64x32xf32>
    %c0_76 = arith.constant 0 : index
    %c66 = arith.constant 66 : index
    %c0_77 = arith.constant 0 : index
    %155 = vector.load %arg1[%c0_76, %c66, %c0_77] : memref<1x264x1xf32, #tpu.memory_space<vmem>>, vector<1x64x1xf32>
    %156 = vector.shape_cast %155 : vector<1x64x1xf32> to vector<64x1xf32>
    %c22 = arith.constant 22 : index
    %c0_78 = arith.constant 0 : index
    %157 = vector.load %arg2[%c22, %c0_78] : memref<25x32xf32, #tpu.memory_space<vmem>>, vector<1x32xf32>
    %158 = vector.broadcast %156 : vector<64x1xf32> to vector<64x32xf32>
    %159 = vector.broadcast %157 : vector<1x32xf32> to vector<64x32xf32>
    %160 = arith.mulf %158, %159 : vector<64x32xf32>
    %161 = arith.addf %154, %160 : vector<64x32xf32>
    %c0_79 = arith.constant 0 : index
    %c67 = arith.constant 67 : index
    %c0_80 = arith.constant 0 : index
    %162 = vector.load %arg1[%c0_79, %c67, %c0_80] : memref<1x264x1xf32, #tpu.memory_space<vmem>>, vector<1x64x1xf32>
    %163 = vector.shape_cast %162 : vector<1x64x1xf32> to vector<64x1xf32>
    %c23 = arith.constant 23 : index
    %c0_81 = arith.constant 0 : index
    %164 = vector.load %arg2[%c23, %c0_81] : memref<25x32xf32, #tpu.memory_space<vmem>>, vector<1x32xf32>
    %165 = vector.broadcast %163 : vector<64x1xf32> to vector<64x32xf32>
    %166 = vector.broadcast %164 : vector<1x32xf32> to vector<64x32xf32>
    %167 = arith.mulf %165, %166 : vector<64x32xf32>
    %168 = arith.addf %161, %167 : vector<64x32xf32>
    %c0_82 = arith.constant 0 : index
    %c68 = arith.constant 68 : index
    %c0_83 = arith.constant 0 : index
    %169 = vector.load %arg1[%c0_82, %c68, %c0_83] : memref<1x264x1xf32, #tpu.memory_space<vmem>>, vector<1x64x1xf32>
    %170 = vector.shape_cast %169 : vector<1x64x1xf32> to vector<64x1xf32>
    %c24 = arith.constant 24 : index
    %c0_84 = arith.constant 0 : index
    %171 = vector.load %arg2[%c24, %c0_84] : memref<25x32xf32, #tpu.memory_space<vmem>>, vector<1x32xf32>
    %172 = vector.broadcast %170 : vector<64x1xf32> to vector<64x32xf32>
    %173 = vector.broadcast %171 : vector<1x32xf32> to vector<64x32xf32>
    %174 = arith.mulf %172, %173 : vector<64x32xf32>
    %175 = arith.addf %168, %174 : vector<64x32xf32>
    %c0_85 = arith.constant 0 : index
    %c0_86 = arith.constant 0 : index
    %176 = vector.load %arg3[%c0_85, %c0_86] : memref<1x32xf32, #tpu.memory_space<vmem>>, vector<1x32xf32>
    %177 = vector.broadcast %176 : vector<1x32xf32> to vector<64x32xf32>
    %178 = arith.addf %175, %177 : vector<64x32xf32>
    %cst_87 = arith.constant 0.000000e+00 : f32
    %179 = vector.broadcast %cst_87 : f32 to vector<64x32xf32>
    %180 = arith.maximumf %178, %179 : vector<64x32xf32>
    %c0_88 = arith.constant 0 : index
    %c0_89 = arith.constant 0 : index
    %181 = vector.load %arg7[%c0_88, %c0_89] : memref<192x32xf32, #tpu.memory_space<vmem>>, vector<64x32xf32>
    tpu.vector_store %arg7[%c0_88, %c0_89], %180 {strides = array<i32>} : memref<192x32xf32, #tpu.memory_space<vmem>>, vector<64x32xf32>,
    %cst_90 = arith.constant 0.000000e+00 : f32
    %182 = vector.broadcast %cst_90 : f32 to vector<64x32xf32>
    %c0_91 = arith.constant 0 : index
    %c64_92 = arith.constant 64 : index
    %c0_93 = arith.constant 0 : index
    %183 = vector.load %arg1[%c0_91, %c64_92, %c0_93] : memref<1x264x1xf32, #tpu.memory_space<vmem>>, vector<1x64x1xf32>
    %184 = vector.shape_cast %183 : vector<1x64x1xf32> to vector<64x1xf32>
    %c0_94 = arith.constant 0 : index
    %c0_95 = arith.constant 0 : index
    %185 = vector.load %arg2[%c0_94, %c0_95] : memref<25x32xf32, #tpu.memory_space<vmem>>, vector<1x32xf32>
    %186 = vector.broadcast %184 : vector<64x1xf32> to vector<64x32xf32>
    %187 = vector.broadcast %185 : vector<1x32xf32> to vector<64x32xf32>
    %188 = arith.mulf %186, %187 : vector<64x32xf32>
    %189 = arith.addf %182, %188 : vector<64x32xf32>
    %c0_96 = arith.constant 0 : index
    %c65_97 = arith.constant 65 : index
    %c0_98 = arith.constant 0 : index
    %190 = vector.load %arg1[%c0_96, %c65_97, %c0_98] : memref<1x264x1xf32, #tpu.memory_space<vmem>>, vector<1x64x1xf32>
    %191 = vector.shape_cast %190 : vector<1x64x1xf32> to vector<64x1xf32>
    %c1_99 = arith.constant 1 : index
    %c0_100 = arith.constant 0 : index
    %192 = vector.load %arg2[%c1_99, %c0_100] : memref<25x32xf32, #tpu.memory_space<vmem>>, vector<1x32xf32>
    %193 = vector.broadcast %191 : vector<64x1xf32> to vector<64x32xf32>
    %194 = vector.broadcast %192 : vector<1x32xf32> to vector<64x32xf32>
    %195 = arith.mulf %193, %194 : vector<64x32xf32>
    %196 = arith.addf %189, %195 : vector<64x32xf32>
    %c0_101 = arith.constant 0 : index
    %c66_102 = arith.constant 66 : index
    %c0_103 = arith.constant 0 : index
    %197 = vector.load %arg1[%c0_101, %c66_102, %c0_103] : memref<1x264x1xf32, #tpu.memory_space<vmem>>, vector<1x64x1xf32>
    %198 = vector.shape_cast %197 : vector<1x64x1xf32> to vector<64x1xf32>
    %c2_104 = arith.constant 2 : index
    %c0_105 = arith.constant 0 : index
    %199 = vector.load %arg2[%c2_104, %c0_105] : memref<25x32xf32, #tpu.memory_space<vmem>>, vector<1x32xf32>
    %200 = vector.broadcast %198 : vector<64x1xf32> to vector<64x32xf32>
    %201 = vector.broadcast %199 : vector<1x32xf32> to vector<64x32xf32>
    %202 = arith.mulf %200, %201 : vector<64x32xf32>
    %203 = arith.addf %196, %202 : vector<64x32xf32>
    %c0_106 = arith.constant 0 : index
    %c67_107 = arith.constant 67 : index
    %c0_108 = arith.constant 0 : index
    %204 = vector.load %arg1[%c0_106, %c67_107, %c0_108] : memref<1x264x1xf32, #tpu.memory_space<vmem>>, vector<1x64x1xf32>
    %205 = vector.shape_cast %204 : vector<1x64x1xf32> to vector<64x1xf32>
    %c3_109 = arith.constant 3 : index
    %c0_110 = arith.constant 0 : index
    %206 = vector.load %arg2[%c3_109, %c0_110] : memref<25x32xf32, #tpu.memory_space<vmem>>, vector<1x32xf32>
    %207 = vector.broadcast %205 : vector<64x1xf32> to vector<64x32xf32>
    %208 = vector.broadcast %206 : vector<1x32xf32> to vector<64x32xf32>
    %209 = arith.mulf %207, %208 : vector<64x32xf32>
    %210 = arith.addf %203, %209 : vector<64x32xf32>
    %c0_111 = arith.constant 0 : index
    %c68_112 = arith.constant 68 : index
    %c0_113 = arith.constant 0 : index
    %211 = vector.load %arg1[%c0_111, %c68_112, %c0_113] : memref<1x264x1xf32, #tpu.memory_space<vmem>>, vector<1x64x1xf32>
    %212 = vector.shape_cast %211 : vector<1x64x1xf32> to vector<64x1xf32>
    %c4_114 = arith.constant 4 : index
    %c0_115 = arith.constant 0 : index
    %213 = vector.load %arg2[%c4_114, %c0_115] : memref<25x32xf32, #tpu.memory_space<vmem>>, vector<1x32xf32>
    %214 = vector.broadcast %212 : vector<64x1xf32> to vector<64x32xf32>
    %215 = vector.broadcast %213 : vector<1x32xf32> to vector<64x32xf32>
    %216 = arith.mulf %214, %215 : vector<64x32xf32>
    %217 = arith.addf %210, %216 : vector<64x32xf32>
    %c0_116 = arith.constant 0 : index
    %c80 = arith.constant 80 : index
    %c0_117 = arith.constant 0 : index
    %218 = vector.load %arg1[%c0_116, %c80, %c0_117] : memref<1x264x1xf32, #tpu.memory_space<vmem>>, vector<1x64x1xf32>
    %219 = vector.shape_cast %218 : vector<1x64x1xf32> to vector<64x1xf32>
    %c5_118 = arith.constant 5 : index
    %c0_119 = arith.constant 0 : index
    %220 = vector.load %arg2[%c5_118, %c0_119] : memref<25x32xf32, #tpu.memory_space<vmem>>, vector<1x32xf32>
    %221 = vector.broadcast %219 : vector<64x1xf32> to vector<64x32xf32>
    %222 = vector.broadcast %220 : vector<1x32xf32> to vector<64x32xf32>
    %223 = arith.mulf %221, %222 : vector<64x32xf32>
    %224 = arith.addf %217, %223 : vector<64x32xf32>
    %c0_120 = arith.constant 0 : index
    %c81 = arith.constant 81 : index
    %c0_121 = arith.constant 0 : index
    %225 = vector.load %arg1[%c0_120, %c81, %c0_121] : memref<1x264x1xf32, #tpu.memory_space<vmem>>, vector<1x64x1xf32>
    %226 = vector.shape_cast %225 : vector<1x64x1xf32> to vector<64x1xf32>
    %c6_122 = arith.constant 6 : index
    %c0_123 = arith.constant 0 : index
    %227 = vector.load %arg2[%c6_122, %c0_123] : memref<25x32xf32, #tpu.memory_space<vmem>>, vector<1x32xf32>
    %228 = vector.broadcast %226 : vector<64x1xf32> to vector<64x32xf32>
    %229 = vector.broadcast %227 : vector<1x32xf32> to vector<64x32xf32>
    %230 = arith.mulf %228, %229 : vector<64x32xf32>
    %231 = arith.addf %224, %230 : vector<64x32xf32>
    %c0_124 = arith.constant 0 : index
    %c82 = arith.constant 82 : index
    %c0_125 = arith.constant 0 : index
    %232 = vector.load %arg1[%c0_124, %c82, %c0_125] : memref<1x264x1xf32, #tpu.memory_space<vmem>>, vector<1x64x1xf32>
    %233 = vector.shape_cast %232 : vector<1x64x1xf32> to vector<64x1xf32>
    %c7_126 = arith.constant 7 : index
    %c0_127 = arith.constant 0 : index
    %234 = vector.load %arg2[%c7_126, %c0_127] : memref<25x32xf32, #tpu.memory_space<vmem>>, vector<1x32xf32>
    %235 = vector.broadcast %233 : vector<64x1xf32> to vector<64x32xf32>
    %236 = vector.broadcast %234 : vector<1x32xf32> to vector<64x32xf32>
    %237 = arith.mulf %235, %236 : vector<64x32xf32>
    %238 = arith.addf %231, %237 : vector<64x32xf32>
    %c0_128 = arith.constant 0 : index
    %c83 = arith.constant 83 : index
    %c0_129 = arith.constant 0 : index
    %239 = vector.load %arg1[%c0_128, %c83, %c0_129] : memref<1x264x1xf32, #tpu.memory_space<vmem>>, vector<1x64x1xf32>
    %240 = vector.shape_cast %239 : vector<1x64x1xf32> to vector<64x1xf32>
    %c8_130 = arith.constant 8 : index
    %c0_131 = arith.constant 0 : index
    %241 = vector.load %arg2[%c8_130, %c0_131] : memref<25x32xf32, #tpu.memory_space<vmem>>, vector<1x32xf32>
    %242 = vector.broadcast %240 : vector<64x1xf32> to vector<64x32xf32>
    %243 = vector.broadcast %241 : vector<1x32xf32> to vector<64x32xf32>
    %244 = arith.mulf %242, %243 : vector<64x32xf32>
    %245 = arith.addf %238, %244 : vector<64x32xf32>
    %c0_132 = arith.constant 0 : index
    %c84 = arith.constant 84 : index
    %c0_133 = arith.constant 0 : index
    %246 = vector.load %arg1[%c0_132, %c84, %c0_133] : memref<1x264x1xf32, #tpu.memory_space<vmem>>, vector<1x64x1xf32>
    %247 = vector.shape_cast %246 : vector<1x64x1xf32> to vector<64x1xf32>
    %c9_134 = arith.constant 9 : index
    %c0_135 = arith.constant 0 : index
    %248 = vector.load %arg2[%c9_134, %c0_135] : memref<25x32xf32, #tpu.memory_space<vmem>>, vector<1x32xf32>
    %249 = vector.broadcast %247 : vector<64x1xf32> to vector<64x32xf32>
    %250 = vector.broadcast %248 : vector<1x32xf32> to vector<64x32xf32>
    %251 = arith.mulf %249, %250 : vector<64x32xf32>
    %252 = arith.addf %245, %251 : vector<64x32xf32>
    %c0_136 = arith.constant 0 : index
    %c96 = arith.constant 96 : index
    %c0_137 = arith.constant 0 : index
    %253 = vector.load %arg1[%c0_136, %c96, %c0_137] : memref<1x264x1xf32, #tpu.memory_space<vmem>>, vector<1x64x1xf32>
    %254 = vector.shape_cast %253 : vector<1x64x1xf32> to vector<64x1xf32>
    %c10_138 = arith.constant 10 : index
    %c0_139 = arith.constant 0 : index
    %255 = vector.load %arg2[%c10_138, %c0_139] : memref<25x32xf32, #tpu.memory_space<vmem>>, vector<1x32xf32>
    %256 = vector.broadcast %254 : vector<64x1xf32> to vector<64x32xf32>
    %257 = vector.broadcast %255 : vector<1x32xf32> to vector<64x32xf32>
    %258 = arith.mulf %256, %257 : vector<64x32xf32>
    %259 = arith.addf %252, %258 : vector<64x32xf32>
    %c0_140 = arith.constant 0 : index
    %c97 = arith.constant 97 : index
    %c0_141 = arith.constant 0 : index
    %260 = vector.load %arg1[%c0_140, %c97, %c0_141] : memref<1x264x1xf32, #tpu.memory_space<vmem>>, vector<1x64x1xf32>
    %261 = vector.shape_cast %260 : vector<1x64x1xf32> to vector<64x1xf32>
    %c11_142 = arith.constant 11 : index
    %c0_143 = arith.constant 0 : index
    %262 = vector.load %arg2[%c11_142, %c0_143] : memref<25x32xf32, #tpu.memory_space<vmem>>, vector<1x32xf32>
    %263 = vector.broadcast %261 : vector<64x1xf32> to vector<64x32xf32>
    %264 = vector.broadcast %262 : vector<1x32xf32> to vector<64x32xf32>
    %265 = arith.mulf %263, %264 : vector<64x32xf32>
    %266 = arith.addf %259, %265 : vector<64x32xf32>
    %c0_144 = arith.constant 0 : index
    %c98 = arith.constant 98 : index
    %c0_145 = arith.constant 0 : index
    %267 = vector.load %arg1[%c0_144, %c98, %c0_145] : memref<1x264x1xf32, #tpu.memory_space<vmem>>, vector<1x64x1xf32>
    %268 = vector.shape_cast %267 : vector<1x64x1xf32> to vector<64x1xf32>
    %c12_146 = arith.constant 12 : index
    %c0_147 = arith.constant 0 : index
    %269 = vector.load %arg2[%c12_146, %c0_147] : memref<25x32xf32, #tpu.memory_space<vmem>>, vector<1x32xf32>
    %270 = vector.broadcast %268 : vector<64x1xf32> to vector<64x32xf32>
    %271 = vector.broadcast %269 : vector<1x32xf32> to vector<64x32xf32>
    %272 = arith.mulf %270, %271 : vector<64x32xf32>
    %273 = arith.addf %266, %272 : vector<64x32xf32>
    %c0_148 = arith.constant 0 : index
    %c99 = arith.constant 99 : index
    %c0_149 = arith.constant 0 : index
    %274 = vector.load %arg1[%c0_148, %c99, %c0_149] : memref<1x264x1xf32, #tpu.memory_space<vmem>>, vector<1x64x1xf32>
    %275 = vector.shape_cast %274 : vector<1x64x1xf32> to vector<64x1xf32>
    %c13_150 = arith.constant 13 : index
    %c0_151 = arith.constant 0 : index
    %276 = vector.load %arg2[%c13_150, %c0_151] : memref<25x32xf32, #tpu.memory_space<vmem>>, vector<1x32xf32>
    %277 = vector.broadcast %275 : vector<64x1xf32> to vector<64x32xf32>
    %278 = vector.broadcast %276 : vector<1x32xf32> to vector<64x32xf32>
    %279 = arith.mulf %277, %278 : vector<64x32xf32>
    %280 = arith.addf %273, %279 : vector<64x32xf32>
    %c0_152 = arith.constant 0 : index
    %c100 = arith.constant 100 : index
    %c0_153 = arith.constant 0 : index
    %281 = vector.load %arg1[%c0_152, %c100, %c0_153] : memref<1x264x1xf32, #tpu.memory_space<vmem>>, vector<1x64x1xf32>
    %282 = vector.shape_cast %281 : vector<1x64x1xf32> to vector<64x1xf32>
    %c14_154 = arith.constant 14 : index
    %c0_155 = arith.constant 0 : index
    %283 = vector.load %arg2[%c14_154, %c0_155] : memref<25x32xf32, #tpu.memory_space<vmem>>, vector<1x32xf32>
    %284 = vector.broadcast %282 : vector<64x1xf32> to vector<64x32xf32>
    %285 = vector.broadcast %283 : vector<1x32xf32> to vector<64x32xf32>
    %286 = arith.mulf %284, %285 : vector<64x32xf32>
    %287 = arith.addf %280, %286 : vector<64x32xf32>
    %c0_156 = arith.constant 0 : index
    %c112 = arith.constant 112 : index
    %c0_157 = arith.constant 0 : index
    %288 = vector.load %arg1[%c0_156, %c112, %c0_157] : memref<1x264x1xf32, #tpu.memory_space<vmem>>, vector<1x64x1xf32>
    %289 = vector.shape_cast %288 : vector<1x64x1xf32> to vector<64x1xf32>
    %c15_158 = arith.constant 15 : index
    %c0_159 = arith.constant 0 : index
    %290 = vector.load %arg2[%c15_158, %c0_159] : memref<25x32xf32, #tpu.memory_space<vmem>>, vector<1x32xf32>
    %291 = vector.broadcast %289 : vector<64x1xf32> to vector<64x32xf32>
    %292 = vector.broadcast %290 : vector<1x32xf32> to vector<64x32xf32>
    %293 = arith.mulf %291, %292 : vector<64x32xf32>
    %294 = arith.addf %287, %293 : vector<64x32xf32>
    %c0_160 = arith.constant 0 : index
    %c113 = arith.constant 113 : index
    %c0_161 = arith.constant 0 : index
    %295 = vector.load %arg1[%c0_160, %c113, %c0_161] : memref<1x264x1xf32, #tpu.memory_space<vmem>>, vector<1x64x1xf32>
    %296 = vector.shape_cast %295 : vector<1x64x1xf32> to vector<64x1xf32>
    %c16_162 = arith.constant 16 : index
    %c0_163 = arith.constant 0 : index
    %297 = vector.load %arg2[%c16_162, %c0_163] : memref<25x32xf32, #tpu.memory_space<vmem>>, vector<1x32xf32>
    %298 = vector.broadcast %296 : vector<64x1xf32> to vector<64x32xf32>
    %299 = vector.broadcast %297 : vector<1x32xf32> to vector<64x32xf32>
    %300 = arith.mulf %298, %299 : vector<64x32xf32>
    %301 = arith.addf %294, %300 : vector<64x32xf32>
    %c0_164 = arith.constant 0 : index
    %c114 = arith.constant 114 : index
    %c0_165 = arith.constant 0 : index
    %302 = vector.load %arg1[%c0_164, %c114, %c0_165] : memref<1x264x1xf32, #tpu.memory_space<vmem>>, vector<1x64x1xf32>
    %303 = vector.shape_cast %302 : vector<1x64x1xf32> to vector<64x1xf32>
    %c17_166 = arith.constant 17 : index
    %c0_167 = arith.constant 0 : index
    %304 = vector.load %arg2[%c17_166, %c0_167] : memref<25x32xf32, #tpu.memory_space<vmem>>, vector<1x32xf32>
    %305 = vector.broadcast %303 : vector<64x1xf32> to vector<64x32xf32>
    %306 = vector.broadcast %304 : vector<1x32xf32> to vector<64x32xf32>
    %307 = arith.mulf %305, %306 : vector<64x32xf32>
    %308 = arith.addf %301, %307 : vector<64x32xf32>
    %c0_168 = arith.constant 0 : index
    %c115 = arith.constant 115 : index
    %c0_169 = arith.constant 0 : index
    %309 = vector.load %arg1[%c0_168, %c115, %c0_169] : memref<1x264x1xf32, #tpu.memory_space<vmem>>, vector<1x64x1xf32>
    %310 = vector.shape_cast %309 : vector<1x64x1xf32> to vector<64x1xf32>
    %c18_170 = arith.constant 18 : index
    %c0_171 = arith.constant 0 : index
    %311 = vector.load %arg2[%c18_170, %c0_171] : memref<25x32xf32, #tpu.memory_space<vmem>>, vector<1x32xf32>
    %312 = vector.broadcast %310 : vector<64x1xf32> to vector<64x32xf32>
    %313 = vector.broadcast %311 : vector<1x32xf32> to vector<64x32xf32>
    %314 = arith.mulf %312, %313 : vector<64x32xf32>
    %315 = arith.addf %308, %314 : vector<64x32xf32>
    %c0_172 = arith.constant 0 : index
    %c116 = arith.constant 116 : index
    %c0_173 = arith.constant 0 : index
    %316 = vector.load %arg1[%c0_172, %c116, %c0_173] : memref<1x264x1xf32, #tpu.memory_space<vmem>>, vector<1x64x1xf32>
    %317 = vector.shape_cast %316 : vector<1x64x1xf32> to vector<64x1xf32>
    %c19_174 = arith.constant 19 : index
    %c0_175 = arith.constant 0 : index
    %318 = vector.load %arg2[%c19_174, %c0_175] : memref<25x32xf32, #tpu.memory_space<vmem>>, vector<1x32xf32>
    %319 = vector.broadcast %317 : vector<64x1xf32> to vector<64x32xf32>
    %320 = vector.broadcast %318 : vector<1x32xf32> to vector<64x32xf32>
    %321 = arith.mulf %319, %320 : vector<64x32xf32>
    %322 = arith.addf %315, %321 : vector<64x32xf32>
    %c0_176 = arith.constant 0 : index
    %c128 = arith.constant 128 : index
    %c0_177 = arith.constant 0 : index
    %323 = vector.load %arg1[%c0_176, %c128, %c0_177] : memref<1x264x1xf32, #tpu.memory_space<vmem>>, vector<1x64x1xf32>
    %324 = vector.shape_cast %323 : vector<1x64x1xf32> to vector<64x1xf32>
    %c20_178 = arith.constant 20 : index
    %c0_179 = arith.constant 0 : index
    %325 = vector.load %arg2[%c20_178, %c0_179] : memref<25x32xf32, #tpu.memory_space<vmem>>, vector<1x32xf32>
    %326 = vector.broadcast %324 : vector<64x1xf32> to vector<64x32xf32>
    %327 = vector.broadcast %325 : vector<1x32xf32> to vector<64x32xf32>
    %328 = arith.mulf %326, %327 : vector<64x32xf32>
    %329 = arith.addf %322, %328 : vector<64x32xf32>
    %c0_180 = arith.constant 0 : index
    %c129 = arith.constant 129 : index
    %c0_181 = arith.constant 0 : index
    %330 = vector.load %arg1[%c0_180, %c129, %c0_181] : memref<1x264x1xf32, #tpu.memory_space<vmem>>, vector<1x64x1xf32>
    %331 = vector.shape_cast %330 : vector<1x64x1xf32> to vector<64x1xf32>
    %c21_182 = arith.constant 21 : index
    %c0_183 = arith.constant 0 : index
    %332 = vector.load %arg2[%c21_182, %c0_183] : memref<25x32xf32, #tpu.memory_space<vmem>>, vector<1x32xf32>
    %333 = vector.broadcast %331 : vector<64x1xf32> to vector<64x32xf32>
    %334 = vector.broadcast %332 : vector<1x32xf32> to vector<64x32xf32>
    %335 = arith.mulf %333, %334 : vector<64x32xf32>
    %336 = arith.addf %329, %335 : vector<64x32xf32>
    %c0_184 = arith.constant 0 : index
    %c130 = arith.constant 130 : index
    %c0_185 = arith.constant 0 : index
    %337 = vector.load %arg1[%c0_184, %c130, %c0_185] : memref<1x264x1xf32, #tpu.memory_space<vmem>>, vector<1x64x1xf32>
    %338 = vector.shape_cast %337 : vector<1x64x1xf32> to vector<64x1xf32>
    %c22_186 = arith.constant 22 : index
    %c0_187 = arith.constant 0 : index
    %339 = vector.load %arg2[%c22_186, %c0_187] : memref<25x32xf32, #tpu.memory_space<vmem>>, vector<1x32xf32>
    %340 = vector.broadcast %338 : vector<64x1xf32> to vector<64x32xf32>
    %341 = vector.broadcast %339 : vector<1x32xf32> to vector<64x32xf32>
    %342 = arith.mulf %340, %341 : vector<64x32xf32>
    %343 = arith.addf %336, %342 : vector<64x32xf32>
    %c0_188 = arith.constant 0 : index
    %c131 = arith.constant 131 : index
    %c0_189 = arith.constant 0 : index
    %344 = vector.load %arg1[%c0_188, %c131, %c0_189] : memref<1x264x1xf32, #tpu.memory_space<vmem>>, vector<1x64x1xf32>
    %345 = vector.shape_cast %344 : vector<1x64x1xf32> to vector<64x1xf32>
    %c23_190 = arith.constant 23 : index
    %c0_191 = arith.constant 0 : index
    %346 = vector.load %arg2[%c23_190, %c0_191] : memref<25x32xf32, #tpu.memory_space<vmem>>, vector<1x32xf32>
    %347 = vector.broadcast %345 : vector<64x1xf32> to vector<64x32xf32>
    %348 = vector.broadcast %346 : vector<1x32xf32> to vector<64x32xf32>
    %349 = arith.mulf %347, %348 : vector<64x32xf32>
    %350 = arith.addf %343, %349 : vector<64x32xf32>
    %c0_192 = arith.constant 0 : index
    %c132 = arith.constant 132 : index
    %c0_193 = arith.constant 0 : index
    %351 = vector.load %arg1[%c0_192, %c132, %c0_193] : memref<1x264x1xf32, #tpu.memory_space<vmem>>, vector<1x64x1xf32>
    %352 = vector.shape_cast %351 : vector<1x64x1xf32> to vector<64x1xf32>
    %c24_194 = arith.constant 24 : index
    %c0_195 = arith.constant 0 : index
    %353 = vector.load %arg2[%c24_194, %c0_195] : memref<25x32xf32, #tpu.memory_space<vmem>>, vector<1x32xf32>
    %354 = vector.broadcast %352 : vector<64x1xf32> to vector<64x32xf32>
    %355 = vector.broadcast %353 : vector<1x32xf32> to vector<64x32xf32>
    %356 = arith.mulf %354, %355 : vector<64x32xf32>
    %357 = arith.addf %350, %356 : vector<64x32xf32>
    %c0_196 = arith.constant 0 : index
    %c0_197 = arith.constant 0 : index
    %358 = vector.load %arg3[%c0_196, %c0_197] : memref<1x32xf32, #tpu.memory_space<vmem>>, vector<1x32xf32>
    %359 = vector.broadcast %358 : vector<1x32xf32> to vector<64x32xf32>
    %360 = arith.addf %357, %359 : vector<64x32xf32>
    %cst_198 = arith.constant 0.000000e+00 : f32
    %361 = vector.broadcast %cst_198 : f32 to vector<64x32xf32>
    %362 = arith.maximumf %360, %361 : vector<64x32xf32>
    %c64_199 = arith.constant 64 : index
    %c0_200 = arith.constant 0 : index
    %363 = vector.load %arg7[%c64_199, %c0_200] : memref<192x32xf32, #tpu.memory_space<vmem>>, vector<64x32xf32>
    tpu.vector_store %arg7[%c64_199, %c0_200], %362 {strides = array<i32>} : memref<192x32xf32, #tpu.memory_space<vmem>>, vector<64x32xf32>,
    %cst_201 = arith.constant 0.000000e+00 : f32
    %364 = vector.broadcast %cst_201 : f32 to vector<64x32xf32>
    %c0_202 = arith.constant 0 : index
    %c128_203 = arith.constant 128 : index
    %c0_204 = arith.constant 0 : index
    %365 = vector.load %arg1[%c0_202, %c128_203, %c0_204] : memref<1x264x1xf32, #tpu.memory_space<vmem>>, vector<1x64x1xf32>
    %366 = vector.shape_cast %365 : vector<1x64x1xf32> to vector<64x1xf32>
    %c0_205 = arith.constant 0 : index
    %c0_206 = arith.constant 0 : index
    %367 = vector.load %arg2[%c0_205, %c0_206] : memref<25x32xf32, #tpu.memory_space<vmem>>, vector<1x32xf32>
    %368 = vector.broadcast %366 : vector<64x1xf32> to vector<64x32xf32>
    %369 = vector.broadcast %367 : vector<1x32xf32> to vector<64x32xf32>
    %370 = arith.mulf %368, %369 : vector<64x32xf32>
    %371 = arith.addf %364, %370 : vector<64x32xf32>
    %c0_207 = arith.constant 0 : index
    %c129_208 = arith.constant 129 : index
    %c0_209 = arith.constant 0 : index
    %372 = vector.load %arg1[%c0_207, %c129_208, %c0_209] : memref<1x264x1xf32, #tpu.memory_space<vmem>>, vector<1x64x1xf32>
    %373 = vector.shape_cast %372 : vector<1x64x1xf32> to vector<64x1xf32>
    %c1_210 = arith.constant 1 : index
    %c0_211 = arith.constant 0 : index
    %374 = vector.load %arg2[%c1_210, %c0_211] : memref<25x32xf32, #tpu.memory_space<vmem>>, vector<1x32xf32>
    %375 = vector.broadcast %373 : vector<64x1xf32> to vector<64x32xf32>
    %376 = vector.broadcast %374 : vector<1x32xf32> to vector<64x32xf32>
    %377 = arith.mulf %375, %376 : vector<64x32xf32>
    %378 = arith.addf %371, %377 : vector<64x32xf32>
    %c0_212 = arith.constant 0 : index
    %c130_213 = arith.constant 130 : index
    %c0_214 = arith.constant 0 : index
    %379 = vector.load %arg1[%c0_212, %c130_213, %c0_214] : memref<1x264x1xf32, #tpu.memory_space<vmem>>, vector<1x64x1xf32>
    %380 = vector.shape_cast %379 : vector<1x64x1xf32> to vector<64x1xf32>
    %c2_215 = arith.constant 2 : index
    %c0_216 = arith.constant 0 : index
    %381 = vector.load %arg2[%c2_215, %c0_216] : memref<25x32xf32, #tpu.memory_space<vmem>>, vector<1x32xf32>
    %382 = vector.broadcast %380 : vector<64x1xf32> to vector<64x32xf32>
    %383 = vector.broadcast %381 : vector<1x32xf32> to vector<64x32xf32>
    %384 = arith.mulf %382, %383 : vector<64x32xf32>
    %385 = arith.addf %378, %384 : vector<64x32xf32>
    %c0_217 = arith.constant 0 : index
    %c131_218 = arith.constant 131 : index
    %c0_219 = arith.constant 0 : index
    %386 = vector.load %arg1[%c0_217, %c131_218, %c0_219] : memref<1x264x1xf32, #tpu.memory_space<vmem>>, vector<1x64x1xf32>
    %387 = vector.shape_cast %386 : vector<1x64x1xf32> to vector<64x1xf32>
    %c3_220 = arith.constant 3 : index
    %c0_221 = arith.constant 0 : index
    %388 = vector.load %arg2[%c3_220, %c0_221] : memref<25x32xf32, #tpu.memory_space<vmem>>, vector<1x32xf32>
    %389 = vector.broadcast %387 : vector<64x1xf32> to vector<64x32xf32>
    %390 = vector.broadcast %388 : vector<1x32xf32> to vector<64x32xf32>
    %391 = arith.mulf %389, %390 : vector<64x32xf32>
    %392 = arith.addf %385, %391 : vector<64x32xf32>
    %c0_222 = arith.constant 0 : index
    %c132_223 = arith.constant 132 : index
    %c0_224 = arith.constant 0 : index
    %393 = vector.load %arg1[%c0_222, %c132_223, %c0_224] : memref<1x264x1xf32, #tpu.memory_space<vmem>>, vector<1x64x1xf32>
    %394 = vector.shape_cast %393 : vector<1x64x1xf32> to vector<64x1xf32>
    %c4_225 = arith.constant 4 : index
    %c0_226 = arith.constant 0 : index
    %395 = vector.load %arg2[%c4_225, %c0_226] : memref<25x32xf32, #tpu.memory_space<vmem>>, vector<1x32xf32>
    %396 = vector.broadcast %394 : vector<64x1xf32> to vector<64x32xf32>
    %397 = vector.broadcast %395 : vector<1x32xf32> to vector<64x32xf32>
    %398 = arith.mulf %396, %397 : vector<64x32xf32>
    %399 = arith.addf %392, %398 : vector<64x32xf32>
    %c0_227 = arith.constant 0 : index
    %c144 = arith.constant 144 : index
    %c0_228 = arith.constant 0 : index
    %400 = vector.load %arg1[%c0_227, %c144, %c0_228] : memref<1x264x1xf32, #tpu.memory_space<vmem>>, vector<1x64x1xf32>
    %401 = vector.shape_cast %400 : vector<1x64x1xf32> to vector<64x1xf32>
    %c5_229 = arith.constant 5 : index
    %c0_230 = arith.constant 0 : index
    %402 = vector.load %arg2[%c5_229, %c0_230] : memref<25x32xf32, #tpu.memory_space<vmem>>, vector<1x32xf32>
    %403 = vector.broadcast %401 : vector<64x1xf32> to vector<64x32xf32>
    %404 = vector.broadcast %402 : vector<1x32xf32> to vector<64x32xf32>
    %405 = arith.mulf %403, %404 : vector<64x32xf32>
    %406 = arith.addf %399, %405 : vector<64x32xf32>
    %c0_231 = arith.constant 0 : index
    %c145 = arith.constant 145 : index
    %c0_232 = arith.constant 0 : index
    %407 = vector.load %arg1[%c0_231, %c145, %c0_232] : memref<1x264x1xf32, #tpu.memory_space<vmem>>, vector<1x64x1xf32>
    %408 = vector.shape_cast %407 : vector<1x64x1xf32> to vector<64x1xf32>
    %c6_233 = arith.constant 6 : index
    %c0_234 = arith.constant 0 : index
    %409 = vector.load %arg2[%c6_233, %c0_234] : memref<25x32xf32, #tpu.memory_space<vmem>>, vector<1x32xf32>
    %410 = vector.broadcast %408 : vector<64x1xf32> to vector<64x32xf32>
    %411 = vector.broadcast %409 : vector<1x32xf32> to vector<64x32xf32>
    %412 = arith.mulf %410, %411 : vector<64x32xf32>
    %413 = arith.addf %406, %412 : vector<64x32xf32>
    %c0_235 = arith.constant 0 : index
    %c146 = arith.constant 146 : index
    %c0_236 = arith.constant 0 : index
    %414 = vector.load %arg1[%c0_235, %c146, %c0_236] : memref<1x264x1xf32, #tpu.memory_space<vmem>>, vector<1x64x1xf32>
    %415 = vector.shape_cast %414 : vector<1x64x1xf32> to vector<64x1xf32>
    %c7_237 = arith.constant 7 : index
    %c0_238 = arith.constant 0 : index
    %416 = vector.load %arg2[%c7_237, %c0_238] : memref<25x32xf32, #tpu.memory_space<vmem>>, vector<1x32xf32>
    %417 = vector.broadcast %415 : vector<64x1xf32> to vector<64x32xf32>
    %418 = vector.broadcast %416 : vector<1x32xf32> to vector<64x32xf32>
    %419 = arith.mulf %417, %418 : vector<64x32xf32>
    %420 = arith.addf %413, %419 : vector<64x32xf32>
    %c0_239 = arith.constant 0 : index
    %c147 = arith.constant 147 : index
    %c0_240 = arith.constant 0 : index
    %421 = vector.load %arg1[%c0_239, %c147, %c0_240] : memref<1x264x1xf32, #tpu.memory_space<vmem>>, vector<1x64x1xf32>
    %422 = vector.shape_cast %421 : vector<1x64x1xf32> to vector<64x1xf32>
    %c8_241 = arith.constant 8 : index
    %c0_242 = arith.constant 0 : index
    %423 = vector.load %arg2[%c8_241, %c0_242] : memref<25x32xf32, #tpu.memory_space<vmem>>, vector<1x32xf32>
    %424 = vector.broadcast %422 : vector<64x1xf32> to vector<64x32xf32>
    %425 = vector.broadcast %423 : vector<1x32xf32> to vector<64x32xf32>
    %426 = arith.mulf %424, %425 : vector<64x32xf32>
    %427 = arith.addf %420, %426 : vector<64x32xf32>
    %c0_243 = arith.constant 0 : index
    %c148 = arith.constant 148 : index
    %c0_244 = arith.constant 0 : index
    %428 = vector.load %arg1[%c0_243, %c148, %c0_244] : memref<1x264x1xf32, #tpu.memory_space<vmem>>, vector<1x64x1xf32>
    %429 = vector.shape_cast %428 : vector<1x64x1xf32> to vector<64x1xf32>
    %c9_245 = arith.constant 9 : index
    %c0_246 = arith.constant 0 : index
    %430 = vector.load %arg2[%c9_245, %c0_246] : memref<25x32xf32, #tpu.memory_space<vmem>>, vector<1x32xf32>
    %431 = vector.broadcast %429 : vector<64x1xf32> to vector<64x32xf32>
    %432 = vector.broadcast %430 : vector<1x32xf32> to vector<64x32xf32>
    %433 = arith.mulf %431, %432 : vector<64x32xf32>
    %434 = arith.addf %427, %433 : vector<64x32xf32>
    %c0_247 = arith.constant 0 : index
    %c160 = arith.constant 160 : index
    %c0_248 = arith.constant 0 : index
    %435 = vector.load %arg1[%c0_247, %c160, %c0_248] : memref<1x264x1xf32, #tpu.memory_space<vmem>>, vector<1x64x1xf32>
    %436 = vector.shape_cast %435 : vector<1x64x1xf32> to vector<64x1xf32>
    %c10_249 = arith.constant 10 : index
    %c0_250 = arith.constant 0 : index
    %437 = vector.load %arg2[%c10_249, %c0_250] : memref<25x32xf32, #tpu.memory_space<vmem>>, vector<1x32xf32>
    %438 = vector.broadcast %436 : vector<64x1xf32> to vector<64x32xf32>
    %439 = vector.broadcast %437 : vector<1x32xf32> to vector<64x32xf32>
    %440 = arith.mulf %438, %439 : vector<64x32xf32>
    %441 = arith.addf %434, %440 : vector<64x32xf32>
    %c0_251 = arith.constant 0 : index
    %c161 = arith.constant 161 : index
    %c0_252 = arith.constant 0 : index
    %442 = vector.load %arg1[%c0_251, %c161, %c0_252] : memref<1x264x1xf32, #tpu.memory_space<vmem>>, vector<1x64x1xf32>
    %443 = vector.shape_cast %442 : vector<1x64x1xf32> to vector<64x1xf32>
    %c11_253 = arith.constant 11 : index
    %c0_254 = arith.constant 0 : index
    %444 = vector.load %arg2[%c11_253, %c0_254] : memref<25x32xf32, #tpu.memory_space<vmem>>, vector<1x32xf32>
    %445 = vector.broadcast %443 : vector<64x1xf32> to vector<64x32xf32>
    %446 = vector.broadcast %444 : vector<1x32xf32> to vector<64x32xf32>
    %447 = arith.mulf %445, %446 : vector<64x32xf32>
    %448 = arith.addf %441, %447 : vector<64x32xf32>
    %c0_255 = arith.constant 0 : index
    %c162 = arith.constant 162 : index
    %c0_256 = arith.constant 0 : index
    %449 = vector.load %arg1[%c0_255, %c162, %c0_256] : memref<1x264x1xf32, #tpu.memory_space<vmem>>, vector<1x64x1xf32>
    %450 = vector.shape_cast %449 : vector<1x64x1xf32> to vector<64x1xf32>
    %c12_257 = arith.constant 12 : index
    %c0_258 = arith.constant 0 : index
    %451 = vector.load %arg2[%c12_257, %c0_258] : memref<25x32xf32, #tpu.memory_space<vmem>>, vector<1x32xf32>
    %452 = vector.broadcast %450 : vector<64x1xf32> to vector<64x32xf32>
    %453 = vector.broadcast %451 : vector<1x32xf32> to vector<64x32xf32>
    %454 = arith.mulf %452, %453 : vector<64x32xf32>
    %455 = arith.addf %448, %454 : vector<64x32xf32>
    %c0_259 = arith.constant 0 : index
    %c163 = arith.constant 163 : index
    %c0_260 = arith.constant 0 : index
    %456 = vector.load %arg1[%c0_259, %c163, %c0_260] : memref<1x264x1xf32, #tpu.memory_space<vmem>>, vector<1x64x1xf32>
    %457 = vector.shape_cast %456 : vector<1x64x1xf32> to vector<64x1xf32>
    %c13_261 = arith.constant 13 : index
    %c0_262 = arith.constant 0 : index
    %458 = vector.load %arg2[%c13_261, %c0_262] : memref<25x32xf32, #tpu.memory_space<vmem>>, vector<1x32xf32>
    %459 = vector.broadcast %457 : vector<64x1xf32> to vector<64x32xf32>
    %460 = vector.broadcast %458 : vector<1x32xf32> to vector<64x32xf32>
    %461 = arith.mulf %459, %460 : vector<64x32xf32>
    %462 = arith.addf %455, %461 : vector<64x32xf32>
    %c0_263 = arith.constant 0 : index
    %c164 = arith.constant 164 : index
    %c0_264 = arith.constant 0 : index
    %463 = vector.load %arg1[%c0_263, %c164, %c0_264] : memref<1x264x1xf32, #tpu.memory_space<vmem>>, vector<1x64x1xf32>
    %464 = vector.shape_cast %463 : vector<1x64x1xf32> to vector<64x1xf32>
    %c14_265 = arith.constant 14 : index
    %c0_266 = arith.constant 0 : index
    %465 = vector.load %arg2[%c14_265, %c0_266] : memref<25x32xf32, #tpu.memory_space<vmem>>, vector<1x32xf32>
    %466 = vector.broadcast %464 : vector<64x1xf32> to vector<64x32xf32>
    %467 = vector.broadcast %465 : vector<1x32xf32> to vector<64x32xf32>
    %468 = arith.mulf %466, %467 : vector<64x32xf32>
    %469 = arith.addf %462, %468 : vector<64x32xf32>
    %c0_267 = arith.constant 0 : index
    %c176 = arith.constant 176 : index
    %c0_268 = arith.constant 0 : index
    %470 = vector.load %arg1[%c0_267, %c176, %c0_268] : memref<1x264x1xf32, #tpu.memory_space<vmem>>, vector<1x64x1xf32>
    %471 = vector.shape_cast %470 : vector<1x64x1xf32> to vector<64x1xf32>
    %c15_269 = arith.constant 15 : index
    %c0_270 = arith.constant 0 : index
    %472 = vector.load %arg2[%c15_269, %c0_270] : memref<25x32xf32, #tpu.memory_space<vmem>>, vector<1x32xf32>
    %473 = vector.broadcast %471 : vector<64x1xf32> to vector<64x32xf32>
    %474 = vector.broadcast %472 : vector<1x32xf32> to vector<64x32xf32>
    %475 = arith.mulf %473, %474 : vector<64x32xf32>
    %476 = arith.addf %469, %475 : vector<64x32xf32>
    %c0_271 = arith.constant 0 : index
    %c177 = arith.constant 177 : index
    %c0_272 = arith.constant 0 : index
    %477 = vector.load %arg1[%c0_271, %c177, %c0_272] : memref<1x264x1xf32, #tpu.memory_space<vmem>>, vector<1x64x1xf32>
    %478 = vector.shape_cast %477 : vector<1x64x1xf32> to vector<64x1xf32>
    %c16_273 = arith.constant 16 : index
    %c0_274 = arith.constant 0 : index
    %479 = vector.load %arg2[%c16_273, %c0_274] : memref<25x32xf32, #tpu.memory_space<vmem>>, vector<1x32xf32>
    %480 = vector.broadcast %478 : vector<64x1xf32> to vector<64x32xf32>
    %481 = vector.broadcast %479 : vector<1x32xf32> to vector<64x32xf32>
    %482 = arith.mulf %480, %481 : vector<64x32xf32>
    %483 = arith.addf %476, %482 : vector<64x32xf32>
    %c0_275 = arith.constant 0 : index
    %c178 = arith.constant 178 : index
    %c0_276 = arith.constant 0 : index
    %484 = vector.load %arg1[%c0_275, %c178, %c0_276] : memref<1x264x1xf32, #tpu.memory_space<vmem>>, vector<1x64x1xf32>
    %485 = vector.shape_cast %484 : vector<1x64x1xf32> to vector<64x1xf32>
    %c17_277 = arith.constant 17 : index
    %c0_278 = arith.constant 0 : index
    %486 = vector.load %arg2[%c17_277, %c0_278] : memref<25x32xf32, #tpu.memory_space<vmem>>, vector<1x32xf32>
    %487 = vector.broadcast %485 : vector<64x1xf32> to vector<64x32xf32>
    %488 = vector.broadcast %486 : vector<1x32xf32> to vector<64x32xf32>
    %489 = arith.mulf %487, %488 : vector<64x32xf32>
    %490 = arith.addf %483, %489 : vector<64x32xf32>
    %c0_279 = arith.constant 0 : index
    %c179 = arith.constant 179 : index
    %c0_280 = arith.constant 0 : index
    %491 = vector.load %arg1[%c0_279, %c179, %c0_280] : memref<1x264x1xf32, #tpu.memory_space<vmem>>, vector<1x64x1xf32>
    %492 = vector.shape_cast %491 : vector<1x64x1xf32> to vector<64x1xf32>
    %c18_281 = arith.constant 18 : index
    %c0_282 = arith.constant 0 : index
    %493 = vector.load %arg2[%c18_281, %c0_282] : memref<25x32xf32, #tpu.memory_space<vmem>>, vector<1x32xf32>
    %494 = vector.broadcast %492 : vector<64x1xf32> to vector<64x32xf32>
    %495 = vector.broadcast %493 : vector<1x32xf32> to vector<64x32xf32>
    %496 = arith.mulf %494, %495 : vector<64x32xf32>
    %497 = arith.addf %490, %496 : vector<64x32xf32>
    %c0_283 = arith.constant 0 : index
    %c180 = arith.constant 180 : index
    %c0_284 = arith.constant 0 : index
    %498 = vector.load %arg1[%c0_283, %c180, %c0_284] : memref<1x264x1xf32, #tpu.memory_space<vmem>>, vector<1x64x1xf32>
    %499 = vector.shape_cast %498 : vector<1x64x1xf32> to vector<64x1xf32>
    %c19_285 = arith.constant 19 : index
    %c0_286 = arith.constant 0 : index
    %500 = vector.load %arg2[%c19_285, %c0_286] : memref<25x32xf32, #tpu.memory_space<vmem>>, vector<1x32xf32>
    %501 = vector.broadcast %499 : vector<64x1xf32> to vector<64x32xf32>
    %502 = vector.broadcast %500 : vector<1x32xf32> to vector<64x32xf32>
    %503 = arith.mulf %501, %502 : vector<64x32xf32>
    %504 = arith.addf %497, %503 : vector<64x32xf32>
    %c0_287 = arith.constant 0 : index
    %c192 = arith.constant 192 : index
    %c0_288 = arith.constant 0 : index
    %505 = vector.load %arg1[%c0_287, %c192, %c0_288] : memref<1x264x1xf32, #tpu.memory_space<vmem>>, vector<1x64x1xf32>
    %506 = vector.shape_cast %505 : vector<1x64x1xf32> to vector<64x1xf32>
    %c20_289 = arith.constant 20 : index
    %c0_290 = arith.constant 0 : index
    %507 = vector.load %arg2[%c20_289, %c0_290] : memref<25x32xf32, #tpu.memory_space<vmem>>, vector<1x32xf32>
    %508 = vector.broadcast %506 : vector<64x1xf32> to vector<64x32xf32>
    %509 = vector.broadcast %507 : vector<1x32xf32> to vector<64x32xf32>
    %510 = arith.mulf %508, %509 : vector<64x32xf32>
    %511 = arith.addf %504, %510 : vector<64x32xf32>
    %c0_291 = arith.constant 0 : index
    %c193 = arith.constant 193 : index
    %c0_292 = arith.constant 0 : index
    %512 = vector.load %arg1[%c0_291, %c193, %c0_292] : memref<1x264x1xf32, #tpu.memory_space<vmem>>, vector<1x64x1xf32>
    %513 = vector.shape_cast %512 : vector<1x64x1xf32> to vector<64x1xf32>
    %c21_293 = arith.constant 21 : index
    %c0_294 = arith.constant 0 : index
    %514 = vector.load %arg2[%c21_293, %c0_294] : memref<25x32xf32, #tpu.memory_space<vmem>>, vector<1x32xf32>
    %515 = vector.broadcast %513 : vector<64x1xf32> to vector<64x32xf32>
    %516 = vector.broadcast %514 : vector<1x32xf32> to vector<64x32xf32>
    %517 = arith.mulf %515, %516 : vector<64x32xf32>
    %518 = arith.addf %511, %517 : vector<64x32xf32>
    %c0_295 = arith.constant 0 : index
    %c194 = arith.constant 194 : index
    %c0_296 = arith.constant 0 : index
    %519 = vector.load %arg1[%c0_295, %c194, %c0_296] : memref<1x264x1xf32, #tpu.memory_space<vmem>>, vector<1x64x1xf32>
    %520 = vector.shape_cast %519 : vector<1x64x1xf32> to vector<64x1xf32>
    %c22_297 = arith.constant 22 : index
    %c0_298 = arith.constant 0 : index
    %521 = vector.load %arg2[%c22_297, %c0_298] : memref<25x32xf32, #tpu.memory_space<vmem>>, vector<1x32xf32>
    %522 = vector.broadcast %520 : vector<64x1xf32> to vector<64x32xf32>
    %523 = vector.broadcast %521 : vector<1x32xf32> to vector<64x32xf32>
    %524 = arith.mulf %522, %523 : vector<64x32xf32>
    %525 = arith.addf %518, %524 : vector<64x32xf32>
    %c0_299 = arith.constant 0 : index
    %c195 = arith.constant 195 : index
    %c0_300 = arith.constant 0 : index
    %526 = vector.load %arg1[%c0_299, %c195, %c0_300] : memref<1x264x1xf32, #tpu.memory_space<vmem>>, vector<1x64x1xf32>
    %527 = vector.shape_cast %526 : vector<1x64x1xf32> to vector<64x1xf32>
    %c23_301 = arith.constant 23 : index
    %c0_302 = arith.constant 0 : index
    %528 = vector.load %arg2[%c23_301, %c0_302] : memref<25x32xf32, #tpu.memory_space<vmem>>, vector<1x32xf32>
    %529 = vector.broadcast %527 : vector<64x1xf32> to vector<64x32xf32>
    %530 = vector.broadcast %528 : vector<1x32xf32> to vector<64x32xf32>
    %531 = arith.mulf %529, %530 : vector<64x32xf32>
    %532 = arith.addf %525, %531 : vector<64x32xf32>
    %c0_303 = arith.constant 0 : index
    %c196 = arith.constant 196 : index
    %c0_304 = arith.constant 0 : index
    %533 = vector.load %arg1[%c0_303, %c196, %c0_304] : memref<1x264x1xf32, #tpu.memory_space<vmem>>, vector<1x64x1xf32>
    %534 = vector.shape_cast %533 : vector<1x64x1xf32> to vector<64x1xf32>
    %c24_305 = arith.constant 24 : index
    %c0_306 = arith.constant 0 : index
    %535 = vector.load %arg2[%c24_305, %c0_306] : memref<25x32xf32, #tpu.memory_space<vmem>>, vector<1x32xf32>
    %536 = vector.broadcast %534 : vector<64x1xf32> to vector<64x32xf32>
    %537 = vector.broadcast %535 : vector<1x32xf32> to vector<64x32xf32>
    %538 = arith.mulf %536, %537 : vector<64x32xf32>
    %539 = arith.addf %532, %538 : vector<64x32xf32>
    %c0_307 = arith.constant 0 : index
    %c0_308 = arith.constant 0 : index
    %540 = vector.load %arg3[%c0_307, %c0_308] : memref<1x32xf32, #tpu.memory_space<vmem>>, vector<1x32xf32>
    %541 = vector.broadcast %540 : vector<1x32xf32> to vector<64x32xf32>
    %542 = arith.addf %539, %541 : vector<64x32xf32>
    %cst_309 = arith.constant 0.000000e+00 : f32
    %543 = vector.broadcast %cst_309 : f32 to vector<64x32xf32>
    %544 = arith.maximumf %542, %543 : vector<64x32xf32>
    %c128_310 = arith.constant 128 : index
    %c0_311 = arith.constant 0 : index
    %545 = vector.load %arg7[%c128_310, %c0_311] : memref<192x32xf32, #tpu.memory_space<vmem>>, vector<64x32xf32>
    tpu.vector_store %arg7[%c128_310, %c0_311], %544 {strides = array<i32>} : memref<192x32xf32, #tpu.memory_space<vmem>>, vector<64x32xf32>,
    %c0_312 = arith.constant 0 : index
    %c0_313 = arith.constant 0 : index
    %546 = vector.load %arg7[%c0_312, %c0_313] : memref<192x32xf32, #tpu.memory_space<vmem>>, vector<8x32xf32>
    %c16_314 = arith.constant 16 : index
    %c0_315 = arith.constant 0 : index
    %547 = vector.load %arg7[%c16_314, %c0_315] : memref<192x32xf32, #tpu.memory_space<vmem>>, vector<8x32xf32>
    %c32_316 = arith.constant 32 : index
    %c0_317 = arith.constant 0 : index
    %548 = vector.load %arg7[%c32_316, %c0_317] : memref<192x32xf32, #tpu.memory_space<vmem>>, vector<8x32xf32>
    %c48_318 = arith.constant 48 : index
    %c0_319 = arith.constant 0 : index
    %549 = vector.load %arg7[%c48_318, %c0_319] : memref<192x32xf32, #tpu.memory_space<vmem>>, vector<8x32xf32>
    %c64_320 = arith.constant 64 : index
    %c0_321 = arith.constant 0 : index
    %550 = vector.load %arg7[%c64_320, %c0_321] : memref<192x32xf32, #tpu.memory_space<vmem>>, vector<8x32xf32>
    %c80_322 = arith.constant 80 : index
    %c0_323 = arith.constant 0 : index
    %551 = vector.load %arg7[%c80_322, %c0_323] : memref<192x32xf32, #tpu.memory_space<vmem>>, vector<8x32xf32>
    %c96_324 = arith.constant 96 : index
    %c0_325 = arith.constant 0 : index
    %552 = vector.load %arg7[%c96_324, %c0_325] : memref<192x32xf32, #tpu.memory_space<vmem>>, vector<8x32xf32>
    %c112_326 = arith.constant 112 : index
    %c0_327 = arith.constant 0 : index
    %553 = vector.load %arg7[%c112_326, %c0_327] : memref<192x32xf32, #tpu.memory_space<vmem>>, vector<8x32xf32>
    %554 = tpu.concatenate %546, %547, %548, %549, %550, %551, %552, %553 in 0 : vector<8x32xf32>, vector<8x32xf32>, vector<8x32xf32>, vector<8x32xf32>, vector<8x32xf32>, vector<8x32xf32>, vector<8x32xf32>, vector<8x32xf32> -> vector<64x32xf32>
    %c1_328 = arith.constant 1 : index
    %c0_329 = arith.constant 0 : index
    %555 = vector.load %arg7[%c1_328, %c0_329] : memref<192x32xf32, #tpu.memory_space<vmem>>, vector<8x32xf32>
    %c17_330 = arith.constant 17 : index
    %c0_331 = arith.constant 0 : index
    %556 = vector.load %arg7[%c17_330, %c0_331] : memref<192x32xf32, #tpu.memory_space<vmem>>, vector<8x32xf32>
    %c33_332 = arith.constant 33 : index
    %c0_333 = arith.constant 0 : index
    %557 = vector.load %arg7[%c33_332, %c0_333] : memref<192x32xf32, #tpu.memory_space<vmem>>, vector<8x32xf32>
    %c49_334 = arith.constant 49 : index
    %c0_335 = arith.constant 0 : index
    %558 = vector.load %arg7[%c49_334, %c0_335] : memref<192x32xf32, #tpu.memory_space<vmem>>, vector<8x32xf32>
    %c65_336 = arith.constant 65 : index
    %c0_337 = arith.constant 0 : index
    %559 = vector.load %arg7[%c65_336, %c0_337] : memref<192x32xf32, #tpu.memory_space<vmem>>, vector<8x32xf32>
    %c81_338 = arith.constant 81 : index
    %c0_339 = arith.constant 0 : index
    %560 = vector.load %arg7[%c81_338, %c0_339] : memref<192x32xf32, #tpu.memory_space<vmem>>, vector<8x32xf32>
    %c97_340 = arith.constant 97 : index
    %c0_341 = arith.constant 0 : index
    %561 = vector.load %arg7[%c97_340, %c0_341] : memref<192x32xf32, #tpu.memory_space<vmem>>, vector<8x32xf32>
    %c113_342 = arith.constant 113 : index
    %c0_343 = arith.constant 0 : index
    %562 = vector.load %arg7[%c113_342, %c0_343] : memref<192x32xf32, #tpu.memory_space<vmem>>, vector<8x32xf32>
    %563 = tpu.concatenate %555, %556, %557, %558, %559, %560, %561, %562 in 0 : vector<8x32xf32>, vector<8x32xf32>, vector<8x32xf32>, vector<8x32xf32>, vector<8x32xf32>, vector<8x32xf32>, vector<8x32xf32>, vector<8x32xf32> -> vector<64x32xf32>
    %c2_344 = arith.constant 2 : index
    %c0_345 = arith.constant 0 : index
    %564 = vector.load %arg7[%c2_344, %c0_345] : memref<192x32xf32, #tpu.memory_space<vmem>>, vector<8x32xf32>
    %c18_346 = arith.constant 18 : index
    %c0_347 = arith.constant 0 : index
    %565 = vector.load %arg7[%c18_346, %c0_347] : memref<192x32xf32, #tpu.memory_space<vmem>>, vector<8x32xf32>
    %c34_348 = arith.constant 34 : index
    %c0_349 = arith.constant 0 : index
    %566 = vector.load %arg7[%c34_348, %c0_349] : memref<192x32xf32, #tpu.memory_space<vmem>>, vector<8x32xf32>
    %c50_350 = arith.constant 50 : index
    %c0_351 = arith.constant 0 : index
    %567 = vector.load %arg7[%c50_350, %c0_351] : memref<192x32xf32, #tpu.memory_space<vmem>>, vector<8x32xf32>
    %c66_352 = arith.constant 66 : index
    %c0_353 = arith.constant 0 : index
    %568 = vector.load %arg7[%c66_352, %c0_353] : memref<192x32xf32, #tpu.memory_space<vmem>>, vector<8x32xf32>
    %c82_354 = arith.constant 82 : index
    %c0_355 = arith.constant 0 : index
    %569 = vector.load %arg7[%c82_354, %c0_355] : memref<192x32xf32, #tpu.memory_space<vmem>>, vector<8x32xf32>
    %c98_356 = arith.constant 98 : index
    %c0_357 = arith.constant 0 : index
    %570 = vector.load %arg7[%c98_356, %c0_357] : memref<192x32xf32, #tpu.memory_space<vmem>>, vector<8x32xf32>
    %c114_358 = arith.constant 114 : index
    %c0_359 = arith.constant 0 : index
    %571 = vector.load %arg7[%c114_358, %c0_359] : memref<192x32xf32, #tpu.memory_space<vmem>>, vector<8x32xf32>
    %572 = tpu.concatenate %564, %565, %566, %567, %568, %569, %570, %571 in 0 : vector<8x32xf32>, vector<8x32xf32>, vector<8x32xf32>, vector<8x32xf32>, vector<8x32xf32>, vector<8x32xf32>, vector<8x32xf32>, vector<8x32xf32> -> vector<64x32xf32>
    %c3_360 = arith.constant 3 : index
    %c0_361 = arith.constant 0 : index
    %573 = vector.load %arg7[%c3_360, %c0_361] : memref<192x32xf32, #tpu.memory_space<vmem>>, vector<8x32xf32>
    %c19_362 = arith.constant 19 : index
    %c0_363 = arith.constant 0 : index
    %574 = vector.load %arg7[%c19_362, %c0_363] : memref<192x32xf32, #tpu.memory_space<vmem>>, vector<8x32xf32>
    %c35_364 = arith.constant 35 : index
    %c0_365 = arith.constant 0 : index
    %575 = vector.load %arg7[%c35_364, %c0_365] : memref<192x32xf32, #tpu.memory_space<vmem>>, vector<8x32xf32>
    %c51_366 = arith.constant 51 : index
    %c0_367 = arith.constant 0 : index
    %576 = vector.load %arg7[%c51_366, %c0_367] : memref<192x32xf32, #tpu.memory_space<vmem>>, vector<8x32xf32>
    %c67_368 = arith.constant 67 : index
    %c0_369 = arith.constant 0 : index
    %577 = vector.load %arg7[%c67_368, %c0_369] : memref<192x32xf32, #tpu.memory_space<vmem>>, vector<8x32xf32>
    %c83_370 = arith.constant 83 : index
    %c0_371 = arith.constant 0 : index
    %578 = vector.load %arg7[%c83_370, %c0_371] : memref<192x32xf32, #tpu.memory_space<vmem>>, vector<8x32xf32>
    %c99_372 = arith.constant 99 : index
    %c0_373 = arith.constant 0 : index
    %579 = vector.load %arg7[%c99_372, %c0_373] : memref<192x32xf32, #tpu.memory_space<vmem>>, vector<8x32xf32>
    %c115_374 = arith.constant 115 : index
    %c0_375 = arith.constant 0 : index
    %580 = vector.load %arg7[%c115_374, %c0_375] : memref<192x32xf32, #tpu.memory_space<vmem>>, vector<8x32xf32>
    %581 = tpu.concatenate %573, %574, %575, %576, %577, %578, %579, %580 in 0 : vector<8x32xf32>, vector<8x32xf32>, vector<8x32xf32>, vector<8x32xf32>, vector<8x32xf32>, vector<8x32xf32>, vector<8x32xf32>, vector<8x32xf32> -> vector<64x32xf32>
    %c4_376 = arith.constant 4 : index
    %c0_377 = arith.constant 0 : index
    %582 = vector.load %arg7[%c4_376, %c0_377] : memref<192x32xf32, #tpu.memory_space<vmem>>, vector<8x32xf32>
    %c20_378 = arith.constant 20 : index
    %c0_379 = arith.constant 0 : index
    %583 = vector.load %arg7[%c20_378, %c0_379] : memref<192x32xf32, #tpu.memory_space<vmem>>, vector<8x32xf32>
    %c36_380 = arith.constant 36 : index
    %c0_381 = arith.constant 0 : index
    %584 = vector.load %arg7[%c36_380, %c0_381] : memref<192x32xf32, #tpu.memory_space<vmem>>, vector<8x32xf32>
    %c52_382 = arith.constant 52 : index
    %c0_383 = arith.constant 0 : index
    %585 = vector.load %arg7[%c52_382, %c0_383] : memref<192x32xf32, #tpu.memory_space<vmem>>, vector<8x32xf32>
    %c68_384 = arith.constant 68 : index
    %c0_385 = arith.constant 0 : index
    %586 = vector.load %arg7[%c68_384, %c0_385] : memref<192x32xf32, #tpu.memory_space<vmem>>, vector<8x32xf32>
    %c84_386 = arith.constant 84 : index
    %c0_387 = arith.constant 0 : index
    %587 = vector.load %arg7[%c84_386, %c0_387] : memref<192x32xf32, #tpu.memory_space<vmem>>, vector<8x32xf32>
    %c100_388 = arith.constant 100 : index
    %c0_389 = arith.constant 0 : index
    %588 = vector.load %arg7[%c100_388, %c0_389] : memref<192x32xf32, #tpu.memory_space<vmem>>, vector<8x32xf32>
    %c116_390 = arith.constant 116 : index
    %c0_391 = arith.constant 0 : index
    %589 = vector.load %arg7[%c116_390, %c0_391] : memref<192x32xf32, #tpu.memory_space<vmem>>, vector<8x32xf32>
    %590 = tpu.concatenate %582, %583, %584, %585, %586, %587, %588, %589 in 0 : vector<8x32xf32>, vector<8x32xf32>, vector<8x32xf32>, vector<8x32xf32>, vector<8x32xf32>, vector<8x32xf32>, vector<8x32xf32>, vector<8x32xf32> -> vector<64x32xf32>
    %c16_392 = arith.constant 16 : index
    %c0_393 = arith.constant 0 : index
    %591 = vector.load %arg7[%c16_392, %c0_393] : memref<192x32xf32, #tpu.memory_space<vmem>>, vector<8x32xf32>
    %c32_394 = arith.constant 32 : index
    %c0_395 = arith.constant 0 : index
    %592 = vector.load %arg7[%c32_394, %c0_395] : memref<192x32xf32, #tpu.memory_space<vmem>>, vector<8x32xf32>
    %c48_396 = arith.constant 48 : index
    %c0_397 = arith.constant 0 : index
    %593 = vector.load %arg7[%c48_396, %c0_397] : memref<192x32xf32, #tpu.memory_space<vmem>>, vector<8x32xf32>
    %c64_398 = arith.constant 64 : index
    %c0_399 = arith.constant 0 : index
    %594 = vector.load %arg7[%c64_398, %c0_399] : memref<192x32xf32, #tpu.memory_space<vmem>>, vector<8x32xf32>
    %c80_400 = arith.constant 80 : index
    %c0_401 = arith.constant 0 : index
    %595 = vector.load %arg7[%c80_400, %c0_401] : memref<192x32xf32, #tpu.memory_space<vmem>>, vector<8x32xf32>
    %c96_402 = arith.constant 96 : index
    %c0_403 = arith.constant 0 : index
    %596 = vector.load %arg7[%c96_402, %c0_403] : memref<192x32xf32, #tpu.memory_space<vmem>>, vector<8x32xf32>
    %c112_404 = arith.constant 112 : index
    %c0_405 = arith.constant 0 : index
    %597 = vector.load %arg7[%c112_404, %c0_405] : memref<192x32xf32, #tpu.memory_space<vmem>>, vector<8x32xf32>
    %c128_406 = arith.constant 128 : index
    %c0_407 = arith.constant 0 : index
    %598 = vector.load %arg7[%c128_406, %c0_407] : memref<192x32xf32, #tpu.memory_space<vmem>>, vector<8x32xf32>
    %599 = tpu.concatenate %591, %592, %593, %594, %595, %596, %597, %598 in 0 : vector<8x32xf32>, vector<8x32xf32>, vector<8x32xf32>, vector<8x32xf32>, vector<8x32xf32>, vector<8x32xf32>, vector<8x32xf32>, vector<8x32xf32> -> vector<64x32xf32>
    %c17_408 = arith.constant 17 : index
    %c0_409 = arith.constant 0 : index
    %600 = vector.load %arg7[%c17_408, %c0_409] : memref<192x32xf32, #tpu.memory_space<vmem>>, vector<8x32xf32>
    %c33_410 = arith.constant 33 : index
    %c0_411 = arith.constant 0 : index
    %601 = vector.load %arg7[%c33_410, %c0_411] : memref<192x32xf32, #tpu.memory_space<vmem>>, vector<8x32xf32>
    %c49_412 = arith.constant 49 : index
    %c0_413 = arith.constant 0 : index
    %602 = vector.load %arg7[%c49_412, %c0_413] : memref<192x32xf32, #tpu.memory_space<vmem>>, vector<8x32xf32>
    %c65_414 = arith.constant 65 : index
    %c0_415 = arith.constant 0 : index
    %603 = vector.load %arg7[%c65_414, %c0_415] : memref<192x32xf32, #tpu.memory_space<vmem>>, vector<8x32xf32>
    %c81_416 = arith.constant 81 : index
    %c0_417 = arith.constant 0 : index
    %604 = vector.load %arg7[%c81_416, %c0_417] : memref<192x32xf32, #tpu.memory_space<vmem>>, vector<8x32xf32>
    %c97_418 = arith.constant 97 : index
    %c0_419 = arith.constant 0 : index
    %605 = vector.load %arg7[%c97_418, %c0_419] : memref<192x32xf32, #tpu.memory_space<vmem>>, vector<8x32xf32>
    %c113_420 = arith.constant 113 : index
    %c0_421 = arith.constant 0 : index
    %606 = vector.load %arg7[%c113_420, %c0_421] : memref<192x32xf32, #tpu.memory_space<vmem>>, vector<8x32xf32>
    %c129_422 = arith.constant 129 : index
    %c0_423 = arith.constant 0 : index
    %607 = vector.load %arg7[%c129_422, %c0_423] : memref<192x32xf32, #tpu.memory_space<vmem>>, vector<8x32xf32>
    %608 = tpu.concatenate %600, %601, %602, %603, %604, %605, %606, %607 in 0 : vector<8x32xf32>, vector<8x32xf32>, vector<8x32xf32>, vector<8x32xf32>, vector<8x32xf32>, vector<8x32xf32>, vector<8x32xf32>, vector<8x32xf32> -> vector<64x32xf32>
    %c18_424 = arith.constant 18 : index
    %c0_425 = arith.constant 0 : index
    %609 = vector.load %arg7[%c18_424, %c0_425] : memref<192x32xf32, #tpu.memory_space<vmem>>, vector<8x32xf32>
    %c34_426 = arith.constant 34 : index
    %c0_427 = arith.constant 0 : index
    %610 = vector.load %arg7[%c34_426, %c0_427] : memref<192x32xf32, #tpu.memory_space<vmem>>, vector<8x32xf32>
    %c50_428 = arith.constant 50 : index
    %c0_429 = arith.constant 0 : index
    %611 = vector.load %arg7[%c50_428, %c0_429] : memref<192x32xf32, #tpu.memory_space<vmem>>, vector<8x32xf32>
    %c66_430 = arith.constant 66 : index
    %c0_431 = arith.constant 0 : index
    %612 = vector.load %arg7[%c66_430, %c0_431] : memref<192x32xf32, #tpu.memory_space<vmem>>, vector<8x32xf32>
    %c82_432 = arith.constant 82 : index
    %c0_433 = arith.constant 0 : index
    %613 = vector.load %arg7[%c82_432, %c0_433] : memref<192x32xf32, #tpu.memory_space<vmem>>, vector<8x32xf32>
    %c98_434 = arith.constant 98 : index
    %c0_435 = arith.constant 0 : index
    %614 = vector.load %arg7[%c98_434, %c0_435] : memref<192x32xf32, #tpu.memory_space<vmem>>, vector<8x32xf32>
    %c114_436 = arith.constant 114 : index
    %c0_437 = arith.constant 0 : index
    %615 = vector.load %arg7[%c114_436, %c0_437] : memref<192x32xf32, #tpu.memory_space<vmem>>, vector<8x32xf32>
    %c130_438 = arith.constant 130 : index
    %c0_439 = arith.constant 0 : index
    %616 = vector.load %arg7[%c130_438, %c0_439] : memref<192x32xf32, #tpu.memory_space<vmem>>, vector<8x32xf32>
    %617 = tpu.concatenate %609, %610, %611, %612, %613, %614, %615, %616 in 0 : vector<8x32xf32>, vector<8x32xf32>, vector<8x32xf32>, vector<8x32xf32>, vector<8x32xf32>, vector<8x32xf32>, vector<8x32xf32>, vector<8x32xf32> -> vector<64x32xf32>
    %c19_440 = arith.constant 19 : index
    %c0_441 = arith.constant 0 : index
    %618 = vector.load %arg7[%c19_440, %c0_441] : memref<192x32xf32, #tpu.memory_space<vmem>>, vector<8x32xf32>
    %c35_442 = arith.constant 35 : index
    %c0_443 = arith.constant 0 : index
    %619 = vector.load %arg7[%c35_442, %c0_443] : memref<192x32xf32, #tpu.memory_space<vmem>>, vector<8x32xf32>
    %c51_444 = arith.constant 51 : index
    %c0_445 = arith.constant 0 : index
    %620 = vector.load %arg7[%c51_444, %c0_445] : memref<192x32xf32, #tpu.memory_space<vmem>>, vector<8x32xf32>
    %c67_446 = arith.constant 67 : index
    %c0_447 = arith.constant 0 : index
    %621 = vector.load %arg7[%c67_446, %c0_447] : memref<192x32xf32, #tpu.memory_space<vmem>>, vector<8x32xf32>
    %c83_448 = arith.constant 83 : index
    %c0_449 = arith.constant 0 : index
    %622 = vector.load %arg7[%c83_448, %c0_449] : memref<192x32xf32, #tpu.memory_space<vmem>>, vector<8x32xf32>
    %c99_450 = arith.constant 99 : index
    %c0_451 = arith.constant 0 : index
    %623 = vector.load %arg7[%c99_450, %c0_451] : memref<192x32xf32, #tpu.memory_space<vmem>>, vector<8x32xf32>
    %c115_452 = arith.constant 115 : index
    %c0_453 = arith.constant 0 : index
    %624 = vector.load %arg7[%c115_452, %c0_453] : memref<192x32xf32, #tpu.memory_space<vmem>>, vector<8x32xf32>
    %c131_454 = arith.constant 131 : index
    %c0_455 = arith.constant 0 : index
    %625 = vector.load %arg7[%c131_454, %c0_455] : memref<192x32xf32, #tpu.memory_space<vmem>>, vector<8x32xf32>
    %626 = tpu.concatenate %618, %619, %620, %621, %622, %623, %624, %625 in 0 : vector<8x32xf32>, vector<8x32xf32>, vector<8x32xf32>, vector<8x32xf32>, vector<8x32xf32>, vector<8x32xf32>, vector<8x32xf32>, vector<8x32xf32> -> vector<64x32xf32>
    %c20_456 = arith.constant 20 : index
    %c0_457 = arith.constant 0 : index
    %627 = vector.load %arg7[%c20_456, %c0_457] : memref<192x32xf32, #tpu.memory_space<vmem>>, vector<8x32xf32>
    %c36_458 = arith.constant 36 : index
    %c0_459 = arith.constant 0 : index
    %628 = vector.load %arg7[%c36_458, %c0_459] : memref<192x32xf32, #tpu.memory_space<vmem>>, vector<8x32xf32>
    %c52_460 = arith.constant 52 : index
    %c0_461 = arith.constant 0 : index
    %629 = vector.load %arg7[%c52_460, %c0_461] : memref<192x32xf32, #tpu.memory_space<vmem>>, vector<8x32xf32>
    %c68_462 = arith.constant 68 : index
    %c0_463 = arith.constant 0 : index
    %630 = vector.load %arg7[%c68_462, %c0_463] : memref<192x32xf32, #tpu.memory_space<vmem>>, vector<8x32xf32>
    %c84_464 = arith.constant 84 : index
    %c0_465 = arith.constant 0 : index
    %631 = vector.load %arg7[%c84_464, %c0_465] : memref<192x32xf32, #tpu.memory_space<vmem>>, vector<8x32xf32>
    %c100_466 = arith.constant 100 : index
    %c0_467 = arith.constant 0 : index
    %632 = vector.load %arg7[%c100_466, %c0_467] : memref<192x32xf32, #tpu.memory_space<vmem>>, vector<8x32xf32>
    %c116_468 = arith.constant 116 : index
    %c0_469 = arith.constant 0 : index
    %633 = vector.load %arg7[%c116_468, %c0_469] : memref<192x32xf32, #tpu.memory_space<vmem>>, vector<8x32xf32>
    %c132_470 = arith.constant 132 : index
    %c0_471 = arith.constant 0 : index
    %634 = vector.load %arg7[%c132_470, %c0_471] : memref<192x32xf32, #tpu.memory_space<vmem>>, vector<8x32xf32>
    %635 = tpu.concatenate %627, %628, %629, %630, %631, %632, %633, %634 in 0 : vector<8x32xf32>, vector<8x32xf32>, vector<8x32xf32>, vector<8x32xf32>, vector<8x32xf32>, vector<8x32xf32>, vector<8x32xf32>, vector<8x32xf32> -> vector<64x32xf32>
    %c32_472 = arith.constant 32 : index
    %c0_473 = arith.constant 0 : index
    %636 = vector.load %arg7[%c32_472, %c0_473] : memref<192x32xf32, #tpu.memory_space<vmem>>, vector<8x32xf32>
    %c48_474 = arith.constant 48 : index
    %c0_475 = arith.constant 0 : index
    %637 = vector.load %arg7[%c48_474, %c0_475] : memref<192x32xf32, #tpu.memory_space<vmem>>, vector<8x32xf32>
    %c64_476 = arith.constant 64 : index
    %c0_477 = arith.constant 0 : index
    %638 = vector.load %arg7[%c64_476, %c0_477] : memref<192x32xf32, #tpu.memory_space<vmem>>, vector<8x32xf32>
    %c80_478 = arith.constant 80 : index
    %c0_479 = arith.constant 0 : index
    %639 = vector.load %arg7[%c80_478, %c0_479] : memref<192x32xf32, #tpu.memory_space<vmem>>, vector<8x32xf32>
    %c96_480 = arith.constant 96 : index
    %c0_481 = arith.constant 0 : index
    %640 = vector.load %arg7[%c96_480, %c0_481] : memref<192x32xf32, #tpu.memory_space<vmem>>, vector<8x32xf32>
    %c112_482 = arith.constant 112 : index
    %c0_483 = arith.constant 0 : index
    %641 = vector.load %arg7[%c112_482, %c0_483] : memref<192x32xf32, #tpu.memory_space<vmem>>, vector<8x32xf32>
    %c128_484 = arith.constant 128 : index
    %c0_485 = arith.constant 0 : index
    %642 = vector.load %arg7[%c128_484, %c0_485] : memref<192x32xf32, #tpu.memory_space<vmem>>, vector<8x32xf32>
    %c144_486 = arith.constant 144 : index
    %c0_487 = arith.constant 0 : index
    %643 = vector.load %arg7[%c144_486, %c0_487] : memref<192x32xf32, #tpu.memory_space<vmem>>, vector<8x32xf32>
    %644 = tpu.concatenate %636, %637, %638, %639, %640, %641, %642, %643 in 0 : vector<8x32xf32>, vector<8x32xf32>, vector<8x32xf32>, vector<8x32xf32>, vector<8x32xf32>, vector<8x32xf32>, vector<8x32xf32>, vector<8x32xf32> -> vector<64x32xf32>
    %c33_488 = arith.constant 33 : index
    %c0_489 = arith.constant 0 : index
    %645 = vector.load %arg7[%c33_488, %c0_489] : memref<192x32xf32, #tpu.memory_space<vmem>>, vector<8x32xf32>
    %c49_490 = arith.constant 49 : index
    %c0_491 = arith.constant 0 : index
    %646 = vector.load %arg7[%c49_490, %c0_491] : memref<192x32xf32, #tpu.memory_space<vmem>>, vector<8x32xf32>
    %c65_492 = arith.constant 65 : index
    %c0_493 = arith.constant 0 : index
    %647 = vector.load %arg7[%c65_492, %c0_493] : memref<192x32xf32, #tpu.memory_space<vmem>>, vector<8x32xf32>
    %c81_494 = arith.constant 81 : index
    %c0_495 = arith.constant 0 : index
    %648 = vector.load %arg7[%c81_494, %c0_495] : memref<192x32xf32, #tpu.memory_space<vmem>>, vector<8x32xf32>
    %c97_496 = arith.constant 97 : index
    %c0_497 = arith.constant 0 : index
    %649 = vector.load %arg7[%c97_496, %c0_497] : memref<192x32xf32, #tpu.memory_space<vmem>>, vector<8x32xf32>
    %c113_498 = arith.constant 113 : index
    %c0_499 = arith.constant 0 : index
    %650 = vector.load %arg7[%c113_498, %c0_499] : memref<192x32xf32, #tpu.memory_space<vmem>>, vector<8x32xf32>
    %c129_500 = arith.constant 129 : index
    %c0_501 = arith.constant 0 : index
    %651 = vector.load %arg7[%c129_500, %c0_501] : memref<192x32xf32, #tpu.memory_space<vmem>>, vector<8x32xf32>
    %c145_502 = arith.constant 145 : index
    %c0_503 = arith.constant 0 : index
    %652 = vector.load %arg7[%c145_502, %c0_503] : memref<192x32xf32, #tpu.memory_space<vmem>>, vector<8x32xf32>
    %653 = tpu.concatenate %645, %646, %647, %648, %649, %650, %651, %652 in 0 : vector<8x32xf32>, vector<8x32xf32>, vector<8x32xf32>, vector<8x32xf32>, vector<8x32xf32>, vector<8x32xf32>, vector<8x32xf32>, vector<8x32xf32> -> vector<64x32xf32>
    %c34_504 = arith.constant 34 : index
    %c0_505 = arith.constant 0 : index
    %654 = vector.load %arg7[%c34_504, %c0_505] : memref<192x32xf32, #tpu.memory_space<vmem>>, vector<8x32xf32>
    %c50_506 = arith.constant 50 : index
    %c0_507 = arith.constant 0 : index
    %655 = vector.load %arg7[%c50_506, %c0_507] : memref<192x32xf32, #tpu.memory_space<vmem>>, vector<8x32xf32>
    %c66_508 = arith.constant 66 : index
    %c0_509 = arith.constant 0 : index
    %656 = vector.load %arg7[%c66_508, %c0_509] : memref<192x32xf32, #tpu.memory_space<vmem>>, vector<8x32xf32>
    %c82_510 = arith.constant 82 : index
    %c0_511 = arith.constant 0 : index
    %657 = vector.load %arg7[%c82_510, %c0_511] : memref<192x32xf32, #tpu.memory_space<vmem>>, vector<8x32xf32>
    %c98_512 = arith.constant 98 : index
    %c0_513 = arith.constant 0 : index
    %658 = vector.load %arg7[%c98_512, %c0_513] : memref<192x32xf32, #tpu.memory_space<vmem>>, vector<8x32xf32>
    %c114_514 = arith.constant 114 : index
    %c0_515 = arith.constant 0 : index
    %659 = vector.load %arg7[%c114_514, %c0_515] : memref<192x32xf32, #tpu.memory_space<vmem>>, vector<8x32xf32>
    %c130_516 = arith.constant 130 : index
    %c0_517 = arith.constant 0 : index
    %660 = vector.load %arg7[%c130_516, %c0_517] : memref<192x32xf32, #tpu.memory_space<vmem>>, vector<8x32xf32>
    %c146_518 = arith.constant 146 : index
    %c0_519 = arith.constant 0 : index
    %661 = vector.load %arg7[%c146_518, %c0_519] : memref<192x32xf32, #tpu.memory_space<vmem>>, vector<8x32xf32>
    %662 = tpu.concatenate %654, %655, %656, %657, %658, %659, %660, %661 in 0 : vector<8x32xf32>, vector<8x32xf32>, vector<8x32xf32>, vector<8x32xf32>, vector<8x32xf32>, vector<8x32xf32>, vector<8x32xf32>, vector<8x32xf32> -> vector<64x32xf32>
    %c35_520 = arith.constant 35 : index
    %c0_521 = arith.constant 0 : index
    %663 = vector.load %arg7[%c35_520, %c0_521] : memref<192x32xf32, #tpu.memory_space<vmem>>, vector<8x32xf32>
    %c51_522 = arith.constant 51 : index
    %c0_523 = arith.constant 0 : index
    %664 = vector.load %arg7[%c51_522, %c0_523] : memref<192x32xf32, #tpu.memory_space<vmem>>, vector<8x32xf32>
    %c67_524 = arith.constant 67 : index
    %c0_525 = arith.constant 0 : index
    %665 = vector.load %arg7[%c67_524, %c0_525] : memref<192x32xf32, #tpu.memory_space<vmem>>, vector<8x32xf32>
    %c83_526 = arith.constant 83 : index
    %c0_527 = arith.constant 0 : index
    %666 = vector.load %arg7[%c83_526, %c0_527] : memref<192x32xf32, #tpu.memory_space<vmem>>, vector<8x32xf32>
    %c99_528 = arith.constant 99 : index
    %c0_529 = arith.constant 0 : index
    %667 = vector.load %arg7[%c99_528, %c0_529] : memref<192x32xf32, #tpu.memory_space<vmem>>, vector<8x32xf32>
    %c115_530 = arith.constant 115 : index
    %c0_531 = arith.constant 0 : index
    %668 = vector.load %arg7[%c115_530, %c0_531] : memref<192x32xf32, #tpu.memory_space<vmem>>, vector<8x32xf32>
    %c131_532 = arith.constant 131 : index
    %c0_533 = arith.constant 0 : index
    %669 = vector.load %arg7[%c131_532, %c0_533] : memref<192x32xf32, #tpu.memory_space<vmem>>, vector<8x32xf32>
    %c147_534 = arith.constant 147 : index
    %c0_535 = arith.constant 0 : index
    %670 = vector.load %arg7[%c147_534, %c0_535] : memref<192x32xf32, #tpu.memory_space<vmem>>, vector<8x32xf32>
    %671 = tpu.concatenate %663, %664, %665, %666, %667, %668, %669, %670 in 0 : vector<8x32xf32>, vector<8x32xf32>, vector<8x32xf32>, vector<8x32xf32>, vector<8x32xf32>, vector<8x32xf32>, vector<8x32xf32>, vector<8x32xf32> -> vector<64x32xf32>
    %c36_536 = arith.constant 36 : index
    %c0_537 = arith.constant 0 : index
    %672 = vector.load %arg7[%c36_536, %c0_537] : memref<192x32xf32, #tpu.memory_space<vmem>>, vector<8x32xf32>
    %c52_538 = arith.constant 52 : index
    %c0_539 = arith.constant 0 : index
    %673 = vector.load %arg7[%c52_538, %c0_539] : memref<192x32xf32, #tpu.memory_space<vmem>>, vector<8x32xf32>
    %c68_540 = arith.constant 68 : index
    %c0_541 = arith.constant 0 : index
    %674 = vector.load %arg7[%c68_540, %c0_541] : memref<192x32xf32, #tpu.memory_space<vmem>>, vector<8x32xf32>
    %c84_542 = arith.constant 84 : index
    %c0_543 = arith.constant 0 : index
    %675 = vector.load %arg7[%c84_542, %c0_543] : memref<192x32xf32, #tpu.memory_space<vmem>>, vector<8x32xf32>
    %c100_544 = arith.constant 100 : index
    %c0_545 = arith.constant 0 : index
    %676 = vector.load %arg7[%c100_544, %c0_545] : memref<192x32xf32, #tpu.memory_space<vmem>>, vector<8x32xf32>
    %c116_546 = arith.constant 116 : index
    %c0_547 = arith.constant 0 : index
    %677 = vector.load %arg7[%c116_546, %c0_547] : memref<192x32xf32, #tpu.memory_space<vmem>>, vector<8x32xf32>
    %c132_548 = arith.constant 132 : index
    %c0_549 = arith.constant 0 : index
    %678 = vector.load %arg7[%c132_548, %c0_549] : memref<192x32xf32, #tpu.memory_space<vmem>>, vector<8x32xf32>
    %c148_550 = arith.constant 148 : index
    %c0_551 = arith.constant 0 : index
    %679 = vector.load %arg7[%c148_550, %c0_551] : memref<192x32xf32, #tpu.memory_space<vmem>>, vector<8x32xf32>
    %680 = tpu.concatenate %672, %673, %674, %675, %676, %677, %678, %679 in 0 : vector<8x32xf32>, vector<8x32xf32>, vector<8x32xf32>, vector<8x32xf32>, vector<8x32xf32>, vector<8x32xf32>, vector<8x32xf32>, vector<8x32xf32> -> vector<64x32xf32>
    %c48_552 = arith.constant 48 : index
    %c0_553 = arith.constant 0 : index
    %681 = vector.load %arg7[%c48_552, %c0_553] : memref<192x32xf32, #tpu.memory_space<vmem>>, vector<8x32xf32>
    %c64_554 = arith.constant 64 : index
    %c0_555 = arith.constant 0 : index
    %682 = vector.load %arg7[%c64_554, %c0_555] : memref<192x32xf32, #tpu.memory_space<vmem>>, vector<8x32xf32>
    %c80_556 = arith.constant 80 : index
    %c0_557 = arith.constant 0 : index
    %683 = vector.load %arg7[%c80_556, %c0_557] : memref<192x32xf32, #tpu.memory_space<vmem>>, vector<8x32xf32>
    %c96_558 = arith.constant 96 : index
    %c0_559 = arith.constant 0 : index
    %684 = vector.load %arg7[%c96_558, %c0_559] : memref<192x32xf32, #tpu.memory_space<vmem>>, vector<8x32xf32>
    %c112_560 = arith.constant 112 : index
    %c0_561 = arith.constant 0 : index
    %685 = vector.load %arg7[%c112_560, %c0_561] : memref<192x32xf32, #tpu.memory_space<vmem>>, vector<8x32xf32>
    %c128_562 = arith.constant 128 : index
    %c0_563 = arith.constant 0 : index
    %686 = vector.load %arg7[%c128_562, %c0_563] : memref<192x32xf32, #tpu.memory_space<vmem>>, vector<8x32xf32>
    %c144_564 = arith.constant 144 : index
    %c0_565 = arith.constant 0 : index
    %687 = vector.load %arg7[%c144_564, %c0_565] : memref<192x32xf32, #tpu.memory_space<vmem>>, vector<8x32xf32>
    %c160_566 = arith.constant 160 : index
    %c0_567 = arith.constant 0 : index
    %688 = vector.load %arg7[%c160_566, %c0_567] : memref<192x32xf32, #tpu.memory_space<vmem>>, vector<8x32xf32>
    %689 = tpu.concatenate %681, %682, %683, %684, %685, %686, %687, %688 in 0 : vector<8x32xf32>, vector<8x32xf32>, vector<8x32xf32>, vector<8x32xf32>, vector<8x32xf32>, vector<8x32xf32>, vector<8x32xf32>, vector<8x32xf32> -> vector<64x32xf32>
    %c49_568 = arith.constant 49 : index
    %c0_569 = arith.constant 0 : index
    %690 = vector.load %arg7[%c49_568, %c0_569] : memref<192x32xf32, #tpu.memory_space<vmem>>, vector<8x32xf32>
    %c65_570 = arith.constant 65 : index
    %c0_571 = arith.constant 0 : index
    %691 = vector.load %arg7[%c65_570, %c0_571] : memref<192x32xf32, #tpu.memory_space<vmem>>, vector<8x32xf32>
    %c81_572 = arith.constant 81 : index
    %c0_573 = arith.constant 0 : index
    %692 = vector.load %arg7[%c81_572, %c0_573] : memref<192x32xf32, #tpu.memory_space<vmem>>, vector<8x32xf32>
    %c97_574 = arith.constant 97 : index
    %c0_575 = arith.constant 0 : index
    %693 = vector.load %arg7[%c97_574, %c0_575] : memref<192x32xf32, #tpu.memory_space<vmem>>, vector<8x32xf32>
    %c113_576 = arith.constant 113 : index
    %c0_577 = arith.constant 0 : index
    %694 = vector.load %arg7[%c113_576, %c0_577] : memref<192x32xf32, #tpu.memory_space<vmem>>, vector<8x32xf32>
    %c129_578 = arith.constant 129 : index
    %c0_579 = arith.constant 0 : index
    %695 = vector.load %arg7[%c129_578, %c0_579] : memref<192x32xf32, #tpu.memory_space<vmem>>, vector<8x32xf32>
    %c145_580 = arith.constant 145 : index
    %c0_581 = arith.constant 0 : index
    %696 = vector.load %arg7[%c145_580, %c0_581] : memref<192x32xf32, #tpu.memory_space<vmem>>, vector<8x32xf32>
    %c161_582 = arith.constant 161 : index
    %c0_583 = arith.constant 0 : index
    %697 = vector.load %arg7[%c161_582, %c0_583] : memref<192x32xf32, #tpu.memory_space<vmem>>, vector<8x32xf32>
    %698 = tpu.concatenate %690, %691, %692, %693, %694, %695, %696, %697 in 0 : vector<8x32xf32>, vector<8x32xf32>, vector<8x32xf32>, vector<8x32xf32>, vector<8x32xf32>, vector<8x32xf32>, vector<8x32xf32>, vector<8x32xf32> -> vector<64x32xf32>
    %c50_584 = arith.constant 50 : index
    %c0_585 = arith.constant 0 : index
    %699 = vector.load %arg7[%c50_584, %c0_585] : memref<192x32xf32, #tpu.memory_space<vmem>>, vector<8x32xf32>
    %c66_586 = arith.constant 66 : index
    %c0_587 = arith.constant 0 : index
    %700 = vector.load %arg7[%c66_586, %c0_587] : memref<192x32xf32, #tpu.memory_space<vmem>>, vector<8x32xf32>
    %c82_588 = arith.constant 82 : index
    %c0_589 = arith.constant 0 : index
    %701 = vector.load %arg7[%c82_588, %c0_589] : memref<192x32xf32, #tpu.memory_space<vmem>>, vector<8x32xf32>
    %c98_590 = arith.constant 98 : index
    %c0_591 = arith.constant 0 : index
    %702 = vector.load %arg7[%c98_590, %c0_591] : memref<192x32xf32, #tpu.memory_space<vmem>>, vector<8x32xf32>
    %c114_592 = arith.constant 114 : index
    %c0_593 = arith.constant 0 : index
    %703 = vector.load %arg7[%c114_592, %c0_593] : memref<192x32xf32, #tpu.memory_space<vmem>>, vector<8x32xf32>
    %c130_594 = arith.constant 130 : index
    %c0_595 = arith.constant 0 : index
    %704 = vector.load %arg7[%c130_594, %c0_595] : memref<192x32xf32, #tpu.memory_space<vmem>>, vector<8x32xf32>
    %c146_596 = arith.constant 146 : index
    %c0_597 = arith.constant 0 : index
    %705 = vector.load %arg7[%c146_596, %c0_597] : memref<192x32xf32, #tpu.memory_space<vmem>>, vector<8x32xf32>
    %c162_598 = arith.constant 162 : index
    %c0_599 = arith.constant 0 : index
    %706 = vector.load %arg7[%c162_598, %c0_599] : memref<192x32xf32, #tpu.memory_space<vmem>>, vector<8x32xf32>
    %707 = tpu.concatenate %699, %700, %701, %702, %703, %704, %705, %706 in 0 : vector<8x32xf32>, vector<8x32xf32>, vector<8x32xf32>, vector<8x32xf32>, vector<8x32xf32>, vector<8x32xf32>, vector<8x32xf32>, vector<8x32xf32> -> vector<64x32xf32>
    %c51_600 = arith.constant 51 : index
    %c0_601 = arith.constant 0 : index
    %708 = vector.load %arg7[%c51_600, %c0_601] : memref<192x32xf32, #tpu.memory_space<vmem>>, vector<8x32xf32>
    %c67_602 = arith.constant 67 : index
    %c0_603 = arith.constant 0 : index
    %709 = vector.load %arg7[%c67_602, %c0_603] : memref<192x32xf32, #tpu.memory_space<vmem>>, vector<8x32xf32>
    %c83_604 = arith.constant 83 : index
    %c0_605 = arith.constant 0 : index
    %710 = vector.load %arg7[%c83_604, %c0_605] : memref<192x32xf32, #tpu.memory_space<vmem>>, vector<8x32xf32>
    %c99_606 = arith.constant 99 : index
    %c0_607 = arith.constant 0 : index
    %711 = vector.load %arg7[%c99_606, %c0_607] : memref<192x32xf32, #tpu.memory_space<vmem>>, vector<8x32xf32>
    %c115_608 = arith.constant 115 : index
    %c0_609 = arith.constant 0 : index
    %712 = vector.load %arg7[%c115_608, %c0_609] : memref<192x32xf32, #tpu.memory_space<vmem>>, vector<8x32xf32>
    %c131_610 = arith.constant 131 : index
    %c0_611 = arith.constant 0 : index
    %713 = vector.load %arg7[%c131_610, %c0_611] : memref<192x32xf32, #tpu.memory_space<vmem>>, vector<8x32xf32>
    %c147_612 = arith.constant 147 : index
    %c0_613 = arith.constant 0 : index
    %714 = vector.load %arg7[%c147_612, %c0_613] : memref<192x32xf32, #tpu.memory_space<vmem>>, vector<8x32xf32>
    %c163_614 = arith.constant 163 : index
    %c0_615 = arith.constant 0 : index
    %715 = vector.load %arg7[%c163_614, %c0_615] : memref<192x32xf32, #tpu.memory_space<vmem>>, vector<8x32xf32>
    %716 = tpu.concatenate %708, %709, %710, %711, %712, %713, %714, %715 in 0 : vector<8x32xf32>, vector<8x32xf32>, vector<8x32xf32>, vector<8x32xf32>, vector<8x32xf32>, vector<8x32xf32>, vector<8x32xf32>, vector<8x32xf32> -> vector<64x32xf32>
    %c52_616 = arith.constant 52 : index
    %c0_617 = arith.constant 0 : index
    %717 = vector.load %arg7[%c52_616, %c0_617] : memref<192x32xf32, #tpu.memory_space<vmem>>, vector<8x32xf32>
    %c68_618 = arith.constant 68 : index
    %c0_619 = arith.constant 0 : index
    %718 = vector.load %arg7[%c68_618, %c0_619] : memref<192x32xf32, #tpu.memory_space<vmem>>, vector<8x32xf32>
    %c84_620 = arith.constant 84 : index
    %c0_621 = arith.constant 0 : index
    %719 = vector.load %arg7[%c84_620, %c0_621] : memref<192x32xf32, #tpu.memory_space<vmem>>, vector<8x32xf32>
    %c100_622 = arith.constant 100 : index
    %c0_623 = arith.constant 0 : index
    %720 = vector.load %arg7[%c100_622, %c0_623] : memref<192x32xf32, #tpu.memory_space<vmem>>, vector<8x32xf32>
    %c116_624 = arith.constant 116 : index
    %c0_625 = arith.constant 0 : index
    %721 = vector.load %arg7[%c116_624, %c0_625] : memref<192x32xf32, #tpu.memory_space<vmem>>, vector<8x32xf32>
    %c132_626 = arith.constant 132 : index
    %c0_627 = arith.constant 0 : index
    %722 = vector.load %arg7[%c132_626, %c0_627] : memref<192x32xf32, #tpu.memory_space<vmem>>, vector<8x32xf32>
    %c148_628 = arith.constant 148 : index
    %c0_629 = arith.constant 0 : index
    %723 = vector.load %arg7[%c148_628, %c0_629] : memref<192x32xf32, #tpu.memory_space<vmem>>, vector<8x32xf32>
    %c164_630 = arith.constant 164 : index
    %c0_631 = arith.constant 0 : index
    %724 = vector.load %arg7[%c164_630, %c0_631] : memref<192x32xf32, #tpu.memory_space<vmem>>, vector<8x32xf32>
    %725 = tpu.concatenate %717, %718, %719, %720, %721, %722, %723, %724 in 0 : vector<8x32xf32>, vector<8x32xf32>, vector<8x32xf32>, vector<8x32xf32>, vector<8x32xf32>, vector<8x32xf32>, vector<8x32xf32>, vector<8x32xf32> -> vector<64x32xf32>
    %c64_632 = arith.constant 64 : index
    %c0_633 = arith.constant 0 : index
    %726 = vector.load %arg7[%c64_632, %c0_633] : memref<192x32xf32, #tpu.memory_space<vmem>>, vector<8x32xf32>
    %c80_634 = arith.constant 80 : index
    %c0_635 = arith.constant 0 : index
    %727 = vector.load %arg7[%c80_634, %c0_635] : memref<192x32xf32, #tpu.memory_space<vmem>>, vector<8x32xf32>
    %c96_636 = arith.constant 96 : index
    %c0_637 = arith.constant 0 : index
    %728 = vector.load %arg7[%c96_636, %c0_637] : memref<192x32xf32, #tpu.memory_space<vmem>>, vector<8x32xf32>
    %c112_638 = arith.constant 112 : index
    %c0_639 = arith.constant 0 : index
    %729 = vector.load %arg7[%c112_638, %c0_639] : memref<192x32xf32, #tpu.memory_space<vmem>>, vector<8x32xf32>
    %c128_640 = arith.constant 128 : index
    %c0_641 = arith.constant 0 : index
    %730 = vector.load %arg7[%c128_640, %c0_641] : memref<192x32xf32, #tpu.memory_space<vmem>>, vector<8x32xf32>
    %c144_642 = arith.constant 144 : index
    %c0_643 = arith.constant 0 : index
    %731 = vector.load %arg7[%c144_642, %c0_643] : memref<192x32xf32, #tpu.memory_space<vmem>>, vector<8x32xf32>
    %c160_644 = arith.constant 160 : index
    %c0_645 = arith.constant 0 : index
    %732 = vector.load %arg7[%c160_644, %c0_645] : memref<192x32xf32, #tpu.memory_space<vmem>>, vector<8x32xf32>
    %c176_646 = arith.constant 176 : index
    %c0_647 = arith.constant 0 : index
    %733 = vector.load %arg7[%c176_646, %c0_647] : memref<192x32xf32, #tpu.memory_space<vmem>>, vector<8x32xf32>
    %734 = tpu.concatenate %726, %727, %728, %729, %730, %731, %732, %733 in 0 : vector<8x32xf32>, vector<8x32xf32>, vector<8x32xf32>, vector<8x32xf32>, vector<8x32xf32>, vector<8x32xf32>, vector<8x32xf32>, vector<8x32xf32> -> vector<64x32xf32>
    %c65_648 = arith.constant 65 : index
    %c0_649 = arith.constant 0 : index
    %735 = vector.load %arg7[%c65_648, %c0_649] : memref<192x32xf32, #tpu.memory_space<vmem>>, vector<8x32xf32>
    %c81_650 = arith.constant 81 : index
    %c0_651 = arith.constant 0 : index
    %736 = vector.load %arg7[%c81_650, %c0_651] : memref<192x32xf32, #tpu.memory_space<vmem>>, vector<8x32xf32>
    %c97_652 = arith.constant 97 : index
    %c0_653 = arith.constant 0 : index
    %737 = vector.load %arg7[%c97_652, %c0_653] : memref<192x32xf32, #tpu.memory_space<vmem>>, vector<8x32xf32>
    %c113_654 = arith.constant 113 : index
    %c0_655 = arith.constant 0 : index
    %738 = vector.load %arg7[%c113_654, %c0_655] : memref<192x32xf32, #tpu.memory_space<vmem>>, vector<8x32xf32>
    %c129_656 = arith.constant 129 : index
    %c0_657 = arith.constant 0 : index
    %739 = vector.load %arg7[%c129_656, %c0_657] : memref<192x32xf32, #tpu.memory_space<vmem>>, vector<8x32xf32>
    %c145_658 = arith.constant 145 : index
    %c0_659 = arith.constant 0 : index
    %740 = vector.load %arg7[%c145_658, %c0_659] : memref<192x32xf32, #tpu.memory_space<vmem>>, vector<8x32xf32>
    %c161_660 = arith.constant 161 : index
    %c0_661 = arith.constant 0 : index
    %741 = vector.load %arg7[%c161_660, %c0_661] : memref<192x32xf32, #tpu.memory_space<vmem>>, vector<8x32xf32>
    %c177_662 = arith.constant 177 : index
    %c0_663 = arith.constant 0 : index
    %742 = vector.load %arg7[%c177_662, %c0_663] : memref<192x32xf32, #tpu.memory_space<vmem>>, vector<8x32xf32>
    %743 = tpu.concatenate %735, %736, %737, %738, %739, %740, %741, %742 in 0 : vector<8x32xf32>, vector<8x32xf32>, vector<8x32xf32>, vector<8x32xf32>, vector<8x32xf32>, vector<8x32xf32>, vector<8x32xf32>, vector<8x32xf32> -> vector<64x32xf32>
    %c66_664 = arith.constant 66 : index
    %c0_665 = arith.constant 0 : index
    %744 = vector.load %arg7[%c66_664, %c0_665] : memref<192x32xf32, #tpu.memory_space<vmem>>, vector<8x32xf32>
    %c82_666 = arith.constant 82 : index
    %c0_667 = arith.constant 0 : index
    %745 = vector.load %arg7[%c82_666, %c0_667] : memref<192x32xf32, #tpu.memory_space<vmem>>, vector<8x32xf32>
    %c98_668 = arith.constant 98 : index
    %c0_669 = arith.constant 0 : index
    %746 = vector.load %arg7[%c98_668, %c0_669] : memref<192x32xf32, #tpu.memory_space<vmem>>, vector<8x32xf32>
    %c114_670 = arith.constant 114 : index
    %c0_671 = arith.constant 0 : index
    %747 = vector.load %arg7[%c114_670, %c0_671] : memref<192x32xf32, #tpu.memory_space<vmem>>, vector<8x32xf32>
    %c130_672 = arith.constant 130 : index
    %c0_673 = arith.constant 0 : index
    %748 = vector.load %arg7[%c130_672, %c0_673] : memref<192x32xf32, #tpu.memory_space<vmem>>, vector<8x32xf32>
    %c146_674 = arith.constant 146 : index
    %c0_675 = arith.constant 0 : index
    %749 = vector.load %arg7[%c146_674, %c0_675] : memref<192x32xf32, #tpu.memory_space<vmem>>, vector<8x32xf32>
    %c162_676 = arith.constant 162 : index
    %c0_677 = arith.constant 0 : index
    %750 = vector.load %arg7[%c162_676, %c0_677] : memref<192x32xf32, #tpu.memory_space<vmem>>, vector<8x32xf32>
    %c178_678 = arith.constant 178 : index
    %c0_679 = arith.constant 0 : index
    %751 = vector.load %arg7[%c178_678, %c0_679] : memref<192x32xf32, #tpu.memory_space<vmem>>, vector<8x32xf32>
    %752 = tpu.concatenate %744, %745, %746, %747, %748, %749, %750, %751 in 0 : vector<8x32xf32>, vector<8x32xf32>, vector<8x32xf32>, vector<8x32xf32>, vector<8x32xf32>, vector<8x32xf32>, vector<8x32xf32>, vector<8x32xf32> -> vector<64x32xf32>
    %c67_680 = arith.constant 67 : index
    %c0_681 = arith.constant 0 : index
    %753 = vector.load %arg7[%c67_680, %c0_681] : memref<192x32xf32, #tpu.memory_space<vmem>>, vector<8x32xf32>
    %c83_682 = arith.constant 83 : index
    %c0_683 = arith.constant 0 : index
    %754 = vector.load %arg7[%c83_682, %c0_683] : memref<192x32xf32, #tpu.memory_space<vmem>>, vector<8x32xf32>
    %c99_684 = arith.constant 99 : index
    %c0_685 = arith.constant 0 : index
    %755 = vector.load %arg7[%c99_684, %c0_685] : memref<192x32xf32, #tpu.memory_space<vmem>>, vector<8x32xf32>
    %c115_686 = arith.constant 115 : index
    %c0_687 = arith.constant 0 : index
    %756 = vector.load %arg7[%c115_686, %c0_687] : memref<192x32xf32, #tpu.memory_space<vmem>>, vector<8x32xf32>
    %c131_688 = arith.constant 131 : index
    %c0_689 = arith.constant 0 : index
    %757 = vector.load %arg7[%c131_688, %c0_689] : memref<192x32xf32, #tpu.memory_space<vmem>>, vector<8x32xf32>
    %c147_690 = arith.constant 147 : index
    %c0_691 = arith.constant 0 : index
    %758 = vector.load %arg7[%c147_690, %c0_691] : memref<192x32xf32, #tpu.memory_space<vmem>>, vector<8x32xf32>
    %c163_692 = arith.constant 163 : index
    %c0_693 = arith.constant 0 : index
    %759 = vector.load %arg7[%c163_692, %c0_693] : memref<192x32xf32, #tpu.memory_space<vmem>>, vector<8x32xf32>
    %c179_694 = arith.constant 179 : index
    %c0_695 = arith.constant 0 : index
    %760 = vector.load %arg7[%c179_694, %c0_695] : memref<192x32xf32, #tpu.memory_space<vmem>>, vector<8x32xf32>
    %761 = tpu.concatenate %753, %754, %755, %756, %757, %758, %759, %760 in 0 : vector<8x32xf32>, vector<8x32xf32>, vector<8x32xf32>, vector<8x32xf32>, vector<8x32xf32>, vector<8x32xf32>, vector<8x32xf32>, vector<8x32xf32> -> vector<64x32xf32>
    %c68_696 = arith.constant 68 : index
    %c0_697 = arith.constant 0 : index
    %762 = vector.load %arg7[%c68_696, %c0_697] : memref<192x32xf32, #tpu.memory_space<vmem>>, vector<8x32xf32>
    %c84_698 = arith.constant 84 : index
    %c0_699 = arith.constant 0 : index
    %763 = vector.load %arg7[%c84_698, %c0_699] : memref<192x32xf32, #tpu.memory_space<vmem>>, vector<8x32xf32>
    %c100_700 = arith.constant 100 : index
    %c0_701 = arith.constant 0 : index
    %764 = vector.load %arg7[%c100_700, %c0_701] : memref<192x32xf32, #tpu.memory_space<vmem>>, vector<8x32xf32>
    %c116_702 = arith.constant 116 : index
    %c0_703 = arith.constant 0 : index
    %765 = vector.load %arg7[%c116_702, %c0_703] : memref<192x32xf32, #tpu.memory_space<vmem>>, vector<8x32xf32>
    %c132_704 = arith.constant 132 : index
    %c0_705 = arith.constant 0 : index
    %766 = vector.load %arg7[%c132_704, %c0_705] : memref<192x32xf32, #tpu.memory_space<vmem>>, vector<8x32xf32>
    %c148_706 = arith.constant 148 : index
    %c0_707 = arith.constant 0 : index
    %767 = vector.load %arg7[%c148_706, %c0_707] : memref<192x32xf32, #tpu.memory_space<vmem>>, vector<8x32xf32>
    %c164_708 = arith.constant 164 : index
    %c0_709 = arith.constant 0 : index
    %768 = vector.load %arg7[%c164_708, %c0_709] : memref<192x32xf32, #tpu.memory_space<vmem>>, vector<8x32xf32>
    %c180_710 = arith.constant 180 : index
    %c0_711 = arith.constant 0 : index
    %769 = vector.load %arg7[%c180_710, %c0_711] : memref<192x32xf32, #tpu.memory_space<vmem>>, vector<8x32xf32>
    %770 = tpu.concatenate %762, %763, %764, %765, %766, %767, %768, %769 in 0 : vector<8x32xf32>, vector<8x32xf32>, vector<8x32xf32>, vector<8x32xf32>, vector<8x32xf32>, vector<8x32xf32>, vector<8x32xf32>, vector<8x32xf32> -> vector<64x32xf32>
    %771 = tpu.concatenate %554, %563, %572, %581, %590, %599, %608, %617, %626, %635, %644, %653, %662, %671, %680, %689 in 1 : vector<64x32xf32>, vector<64x32xf32>, vector<64x32xf32>, vector<64x32xf32>, vector<64x32xf32>, vector<64x32xf32>, vector<64x32xf32>, vector<64x32xf32>, vector<64x32xf32>, vector<64x32xf32>, vector<64x32xf32>, vector<64x32xf32>, vector<64x32xf32>, vector<64x32xf32>, vector<64x32xf32>, vector<64x32xf32> -> vector<64x512xf32>
    %772 = tpu.concatenate %698, %707, %716, %725, %734, %743, %752, %761, %770 in 1 : vector<64x32xf32>, vector<64x32xf32>, vector<64x32xf32>, vector<64x32xf32>, vector<64x32xf32>, vector<64x32xf32>, vector<64x32xf32>, vector<64x32xf32>, vector<64x32xf32> -> vector<64x288xf32>
    %773 = tpu.concatenate %771, %772 in 1 : vector<64x512xf32>, vector<64x288xf32> -> vector<64x800xf32>
    %c0_712 = arith.constant 0 : index
    %c0_713 = arith.constant 0 : index
    %774 = vector.load %arg4[%c0_712, %c0_713] : memref<800x128xf32, #tpu.memory_space<vmem>>, vector<800x128xf32>
    %cst_714 = arith.constant dense<0.000000e+00> : vector<64x128xf32>
    %775 = tpu.matmul %773, %774, %cst_714 {dimension_numbers = #tpu.dot_dimension_numbers<[1], [0], [0], [1], [0, 0, 1, 1], [], []>} : vector<64x800xf32>, vector<800x128xf32>, vector<64x128xf32> -> vector<64x128xf32>
    %c0_715 = arith.constant 0 : index
    %c0_716 = arith.constant 0 : index
    %776 = vector.load %arg5[%c0_715, %c0_716] : memref<1x128xf32, #tpu.memory_space<vmem>>, vector<1x128xf32>
    %777 = vector.broadcast %776 : vector<1x128xf32> to vector<64x128xf32>
    %778 = arith.addf %775, %777 : vector<64x128xf32>
    %cst_717 = arith.constant 0.000000e+00 : f32
    %779 = vector.broadcast %cst_717 : f32 to vector<64x128xf32>
    %780 = arith.maximumf %778, %779 : vector<64x128xf32>
    %c0_718 = arith.constant 0 : index
    %c0_719 = arith.constant 0 : index
    %c0_720 = arith.constant 0 : index
    %781 = vector.load %arg6[%c0_718, %c0_719, %c0_720] : memref<1x64x128xf32, #tpu.memory_space<vmem>>, vector<1x64x128xf32>
    %782 = vector.shape_cast %781 : vector<1x64x128xf32> to vector<64x128xf32>
    %783 = vector.shape_cast %780 : vector<64x128xf32> to vector<1x64x128xf32>
    tpu.vector_store %arg6[%c0_718, %c0_719, %c0_720], %783 {strides = array<i32>} : memref<1x64x128xf32, #tpu.memory_space<vmem>>, vector<1x64x128xf32>,
    return
  }
  func.func @transform_0(%arg0: i32) -> (i32, i32, i32) {
    %c0_i32 = arith.constant 0 : i32
    %c0_i32_0 = arith.constant 0 : i32
    %c0_i32_1 = arith.constant 0 : i32
    return %arg0, %c0_i32, %c0_i32_0 : i32, i32, i32
  }
  func.func @transform_1(%arg0: i32) -> (i32, i32) {
    %c0_i32 = arith.constant 0 : i32
    %c0_i32_0 = arith.constant 0 : i32
    %c0_i32_1 = arith.constant 0 : i32
    return %c0_i32, %c0_i32_0 : i32, i32
  }
  func.func @transform_2(%arg0: i32) -> (i32, i32) {
    %c0_i32 = arith.constant 0 : i32
    %c0_i32_0 = arith.constant 0 : i32
    %c0_i32_1 = arith.constant 0 : i32
    return %c0_i32, %c0_i32_0 : i32, i32
  }
  func.func @transform_3(%arg0: i32) -> (i32, i32) {
    %c0_i32 = arith.constant 0 : i32
    %c0_i32_0 = arith.constant 0 : i32
    %c0_i32_1 = arith.constant 0 : i32
    return %c0_i32, %c0_i32_0 : i32, i32
  }
  func.func @transform_4(%arg0: i32) -> (i32, i32) {
    %c0_i32 = arith.constant 0 : i32
    %c0_i32_0 = arith.constant 0 : i32
    %c0_i32_1 = arith.constant 0 : i32
    return %c0_i32, %c0_i32_0 : i32, i32
  }
  func.func @transform_5(%arg0: i32) -> (i32, i32, i32) {
    %c0_i32 = arith.constant 0 : i32
    %c0_i32_0 = arith.constant 0 : i32
    %c0_i32_1 = arith.constant 0 : i32
    return %arg0, %c0_i32, %c0_i32_0 : i32, i32, i32
  }
}

</mosaic_0001>

<bundles_post_ra>
// kernel: _forward.1
= control target key start
LH: loop header
LB: loop body
LE: loop exit
PB: predicated region body
PF: predicated region fallthrough
CT: control target
= control target key end

     0   :  { %s7612_s18 = smov 0   ;;  %s11969_s0 = inlined_call_operand.vmem [shape: f32[2,264,1], index: 0, kind: input, shape index: {}]   ;;  %s11970_s1 = inlined_call_operand.vmem [shape: f32[25,32], index: 1, kind: input, shape index: {}]   ;;  %s11971_s2 = inlined_call_operand.vmem [shape: f32[1,32], index: 2, kind: input, shape index: {}]   ;;  %s11972_s3 = inlined_call_operand.vmem [shape: f32[800,128], index: 3, kind: input, shape index: {}]   ;;  %s11973_s4 = inlined_call_operand.vmem [shape: f32[1,128], index: 4, kind: input, shape index: {}]   ;;  %s11974_s5 = inlined_call_operand.vmem [shape: f32[2,64,128], index: 5, kind: output, shape index: {}]  }
   0x1 LB: > { %s6755_s19 = sadd.s32 4294967295, %s7576_s18   ;;  %p6759_p0 = scmp.ge.s32.totalorder %s7576_s18, 1  ;;  %s7576_s18 = sphi %s7612_s18, %s15_s18  }
   0x2   : > { %p187_p1 = scmp.lt.s32.totalorder %s7576_s18, 3 }
   0x4   : > { %p188_p2 = pnand %p6759_p0, %p187_p1 }
   0x6   : > { %191 = sbr.rel (%p188_p2) target bundleno = 1732 (0x6c4), region = 40 }
   0xd   : > { %p215_p3 = scmp.lt.s32.totalorder %s6755_s19, 1  ;;  %v7578_v0 = vmov 0   ;;  %vm1973_vm0 = vcmask 261120   ;;  %s7579_s27 = smov 64   ;;  %vm5898_vm1 = vcmask 523264   ;;  %vm5907_vm2 = vcmask 785408  }
   0xe   : > { %7187 = vset.pattern.permute.xlu1 %v7578_v0  ;;  %7186 = vset.pattern.permute.xlu0 %v7578_v0  ;;  %s7581_s29 = smov 96  }
   0xf   : > { %s12831_s19 = smov (!%p215_p3, %s6755_s19), 1 }
  0x10   : > { %s7173_s20 = smul.u32 264, %s12831_s19 }
  0x12   : > { %s7626_s23 = scalar_lea.vmem %s11969_s0, %s7173_s20  ;;  %s6852_s20 = sshll.u32 %s12831_s19, 6 }
  0x13   : > { %v7629_v1 = vld [vmem:[%s7626_s23 + $0x10] sm:$0xff]  ;;  %v225_v2 = vld [vmem:[%s7626_s23] sm:$0xff]  ;;  %v7634_v3 = vld [vmem:[%s7626_s23 + $0x18] sm:$0xff]  ;;  %s11954_s24 = scalar_lea.vmem %s11974_s5, %s6852_s20 }
  0x14   : > { %246 = vperm.xlu1 %7187, %v7629_v1   ;;  %236 = vperm.xlu0 %7186, %v225_v2   ;;  %v226_v4 = vld [vmem:[%s7626_s23 + $0x8] sm:$0xff]  ;;  %v7642_v6 = vld [vmem:[%s7626_s23 + $0x20] sm:$0xff]  ;;  %v7647_v7 = vld [vmem:[%s7626_s23 + $0x38] sm:$0xff] }
  0x15   : > { %v7639_v5 = vld [vmem:[%s7626_s23 + $0x28] sm:$0xff]  ;;  %v7650_v8 = vld [vmem:[%s7626_s23 + $0x30] sm:$0xff]  ;;  %v7657_v11 = vld [vmem:[%s7626_s23 + $0x19] sm:$0xff] }
  0x16   : > { %v295_v9 = vld [vmem:[%s7626_s23 + $0x9] sm:$0xff]  ;;  %v294_v10 = vld [vmem:[%s7626_s23 + $0x1] sm:$0xff]  ;;  %v7660_v12 = vld [vmem:[%s7626_s23 + $0x11] sm:$0xff] }
  0x17   : > { %v7665_v13 = vld [vmem:[%s7626_s23 + $0x29] sm:$0xff]  ;;  %v7668_v14 = vld [vmem:[%s7626_s23 + $0x21] sm:$0xff]  ;;  %v7673_v15 = vld [vmem:[%s7626_s23 + $0x39] sm:$0xff] }
  0x18   : > { %251 = vperm.xlu1 %7187, %v7634_v3   ;;  %241 = vperm.xlu0 %7186, %v226_v4   ;;  %v7676_v16 = vld [vmem:[%s7626_s23 + $0x31] sm:$0xff]  ;;  %v363_v18 = vld [vmem:[%s7626_s23 + $0x2] sm:$0xff]  ;;  %v7683_v19 = vld [vmem:[%s7626_s23 + $0x1a] sm:$0xff] }
  0x19   : > { %v364_v17 = vld [vmem:[%s7626_s23 + $0xa] sm:$0xff]  ;;  %v7686_v20 = vld [vmem:[%s7626_s23 + $0x12] sm:$0xff]  ;;  %v7694_v22 = vld [vmem:[%s7626_s23 + $0x22] sm:$0xff] }
  0x1a   : > { %v7691_v21 = vld [vmem:[%s7626_s23 + $0x2a] sm:$0xff]  ;;  %v7699_v23 = vld [vmem:[%s7626_s23 + $0x3a] sm:$0xff]  ;;  %v7702_v24 = vld [vmem:[%s7626_s23 + $0x32] sm:$0xff] }
  0x1b   : > { %v433_v25 = vld [vmem:[%s7626_s23 + $0xb] sm:$0xff]  ;;  %v432_v26 = vld [vmem:[%s7626_s23 + $0x3] sm:$0xff]  ;;  %v435_v27 = vld [vmem:[%s7626_s23 + $0x1b] sm:$0xff] }
  0x1c   : > { %261 = vperm.xlu1 %7187, %v7639_v5   ;;  %256 = vperm.xlu0 %7186, %v7642_v6   ;;  %v434_v28 = vld [vmem:[%s7626_s23 + $0x13] sm:$0xff]  ;;  %v7711_v29 = vld [vmem:[%s7626_s23 + $0x2b] sm:$0xff]  ;;  %v7714_v30 = vld [vmem:[%s7626_s23 + $0x23] sm:$0xff] }
  0x1d   : > { %v7719_v31 = vld [vmem:[%s7626_s23 + $0x3b] sm:$0xff]  ;;  %v7722_v32 = vld [vmem:[%s7626_s23 + $0x33] sm:$0xff]  ;;  %v501_v34 = vld [vmem:[%s7626_s23 + $0x4] sm:$0xff] }
  0x1e   : > { %v502_v33 = vld [vmem:[%s7626_s23 + $0xc] sm:$0xff]  ;;  %v504_v35 = vld [vmem:[%s7626_s23 + $0x1c] sm:$0xff]  ;;  %v503_v36 = vld [vmem:[%s7626_s23 + $0x14] sm:$0xff] }
  0x1f   : > { %v7731_v37 = vld [vmem:[%s7626_s23 + $0x2c] sm:$0xff]  ;;  %v7734_v38 = vld [vmem:[%s7626_s23 + $0x24] sm:$0xff]  ;;  %v7739_v39 = vld [vmem:[%s7626_s23 + $0x3c] sm:$0xff] }
  0x20   : > { %271 = vperm.xlu1 %7187, %v7647_v7   ;;  %266 = vperm.xlu0 %7186, %v7650_v8   ;;  %v7742_v40 = vld [vmem:[%s7626_s23 + $0x34] sm:$0xff]  ;;  %v7753_v41 = vld [vmem:[%s7626_s23 + $0x48] sm:$0xff]  ;;  %v7756_v42 = vld [vmem:[%s7626_s23 + $0x40] sm:$0xff] }
  0x21   : > { %v7767_v43 = vld [vmem:[%s7626_s23 + $0x49] sm:$0xff]  ;;  %v7770_v44 = vld [vmem:[%s7626_s23 + $0x41] sm:$0xff] }
  0x22   : > { %v7781_v45 = vld [vmem:[%s7626_s23 + $0x4a] sm:$0xff]  ;;  %v7784_v46 = vld [vmem:[%s7626_s23 + $0x42] sm:$0xff] }
  0x23   : > { %v7805_v53 = vld [vmem:[%s7626_s23 + $0x4b] sm:$0xff]  ;;  %v7808_v54 = vld [vmem:[%s7626_s23 + $0x43] sm:$0xff] }
  0x24   : > { %310 = vperm.xlu1 %7187, %v295_v9   ;;  %305 = vperm.xlu0 %7186, %v294_v10   ;;  %v7833_v63 = vld [vmem:[%s7626_s23 + $0x4c] sm:$0xff]  ;;  %v7836_v0 = vld [vmem:[%s7626_s23 + $0x44] sm:$0xff] }
  0x28   : > { %320 = vperm.xlu1 %7187, %v7657_v11   ;;  %315 = vperm.xlu0 %7186, %v7660_v12  }
  0x2c   : > { %330 = vperm.xlu1 %7187, %v7665_v13   ;;  %325 = vperm.xlu0 %7186, %v7668_v14  }
  0x30   : > { %340 = vperm.xlu1 %7187, %v7673_v15   ;;  %335 = vperm.xlu0 %7186, %v7676_v16  }
  0x34   : > { %379 = vperm.xlu1 %7187, %v364_v17   ;;  %374 = vperm.xlu0 %7186, %v363_v18   ;;  %v7863_v17 = vld [vmem:[%s7626_s23 + $0x58] sm:$0xff] }
  0x38   : > { %389 = vperm.xlu1 %7187, %v7683_v19   ;;  %384 = vperm.xlu0 %7186, %v7686_v20  }
  0x3c   : > { %399 = vperm.xlu1 %7187, %v7691_v21   ;;  %394 = vperm.xlu0 %7186, %v7694_v22  }
  0x40   : > { %409 = vperm.xlu1 %7187, %v7699_v23   ;;  %404 = vperm.xlu0 %7186, %v7702_v24  }
  0x44   : > { %448 = vperm.xlu1 %7187, %v433_v25   ;;  %443 = vperm.xlu0 %7186, %v432_v26  }
  0x48   : > { %458 = vperm.xlu1 %7187, %v435_v27   ;;  %453 = vperm.xlu0 %7186, %v434_v28  }
  0x4c   : > { %468 = vperm.xlu1 %7187, %v7711_v29   ;;  %463 = vperm.xlu0 %7186, %v7714_v30  }
  0x50   : > { %478 = vperm.xlu1 %7187, %v7719_v31   ;;  %473 = vperm.xlu0 %7186, %v7722_v32  }
  0x54   : > { %517 = vperm.xlu1 %7187, %v502_v33   ;;  %512 = vperm.xlu0 %7186, %v501_v34   ;;  %v7893_v33 = vld [vmem:[%s7626_s23 + $0x59] sm:$0xff] }
  0x58   : > { %527 = vperm.xlu1 %7187, %v504_v35   ;;  %522 = vperm.xlu0 %7186, %v503_v36  }
  0x5c   : > { %537 = vperm.xlu1 %7187, %v7731_v37   ;;  %532 = vperm.xlu0 %7186, %v7734_v38  }
  0x60   : > { %547 = vperm.xlu1 %7187, %v7739_v39   ;;  %542 = vperm.xlu0 %7186, %v7742_v40  }
  0x64   : > { %586 = vperm.xlu1 %7187, %v7634_v3   ;;  %581 = vperm.xlu0 %7186, %v7629_v1  }
  0x68   : > { %596 = vperm.xlu1 %7187, %v7639_v5   ;;  %591 = vperm.xlu0 %7186, %v7642_v6  }
  0x6c   : > { %606 = vperm.xlu1 %7187, %v7647_v7   ;;  %601 = vperm.xlu0 %7186, %v7650_v8  }
  0x70   : > { %616 = vperm.xlu1 %7187, %v7753_v41   ;;  %611 = vperm.xlu0 %7186, %v7756_v42  }
  0x74   : > { %655 = vperm.xlu1 %7187, %v7657_v11   ;;  %650 = vperm.xlu0 %7186, %v7660_v12  }
  0x78   : > { %665 = vperm.xlu1 %7187, %v7665_v13   ;;  %660 = vperm.xlu0 %7186, %v7668_v14  }
  0x7c   : > { %675 = vperm.xlu1 %7187, %v7673_v15   ;;  %670 = vperm.xlu0 %7186, %v7676_v16  }
  0x80   : > { %685 = vperm.xlu1 %7187, %v7767_v43   ;;  %680 = vperm.xlu0 %7186, %v7770_v44  }
  0x84   : > { %724 = vperm.xlu1 %7187, %v7683_v19   ;;  %719 = vperm.xlu0 %7186, %v7686_v20  }
  0x88   : > { %734 = vperm.xlu1 %7187, %v7691_v21   ;;  %729 = vperm.xlu0 %7186, %v7694_v22  }
  0x8c   : > { %744 = vperm.xlu1 %7187, %v7699_v23   ;;  %739 = vperm.xlu0 %7186, %v7702_v24  }
  0x90   : > { %754 = vperm.xlu1 %7187, %v7781_v45   ;;  %749 = vperm.xlu0 %7186, %v7784_v46  }
  0x93   : > { %v7788_v47 = vpop.permute.xlu1 %246  ;;  %v7790_v48 = vpop.permute.xlu0 %236 }
  0x94   : > { %793 = vperm.xlu1 %7187, %v435_v27   ;;  %788 = vperm.xlu0 %7186, %v434_v28  }
  0x97   : > { %v7792_v49 = vpop.permute.xlu1 %251  ;;  %v7794_v50 = vpop.permute.xlu0 %241 }
  0x98   : > { %803 = vperm.xlu1 %7187, %v7711_v29   ;;  %798 = vperm.xlu0 %7186, %v7714_v30  }
  0x9b   : > { %v7798_v51 = vpop.permute.xlu1 %261  ;;  %v7800_v52 = vpop.permute.xlu0 %256 }
  0x9c   : > { %813 = vperm.xlu1 %7187, %v7719_v31   ;;  %808 = vperm.xlu0 %7186, %v7722_v32  }
  0x9f   : > { %v7810_v55 = vpop.permute.xlu1 %271  ;;  %v7812_v56 = vpop.permute.xlu0 %266 }
  0xa0   : > { %823 = vperm.xlu1 %7187, %v7805_v53   ;;  %818 = vperm.xlu0 %7186, %v7808_v54  }
  0xa3   : > { %v7816_v57 = vpop.permute.xlu1 %310  ;;  %v7818_v58 = vpop.permute.xlu0 %305 }
  0xa4   : > { %862 = vperm.xlu1 %7187, %v504_v35   ;;  %857 = vperm.xlu0 %7186, %v503_v36  }
  0xa7   : > { %v7820_v59 = vpop.permute.xlu1 %320  ;;  %v7822_v60 = vpop.permute.xlu0 %315 }
  0xa8   : > { %872 = vperm.xlu1 %7187, %v7731_v37   ;;  %867 = vperm.xlu0 %7186, %v7734_v38  }
  0xab   : > { %v7826_v61 = vpop.permute.xlu1 %330  ;;  %v7828_v62 = vpop.permute.xlu0 %325 }
  0xac   : > { %882 = vperm.xlu1 %7187, %v7739_v39   ;;  %877 = vperm.xlu0 %7186, %v7742_v40  }
  0xaf   : > { %v7838_v1 = vpop.permute.xlu1 %340  ;;  %v7840_v2 = vpop.permute.xlu0 %335 }
  0xb0   : > { %892 = vperm.xlu1 %7187, %v7833_v63   ;;  %887 = vperm.xlu0 %7186, %v7836_v0  }
  0xb3   : > { %v7844_v3 = vpop.permute.xlu1 %379  ;;  %v7846_v4 = vpop.permute.xlu0 %374 }
  0xb4   : > { %931 = vperm.xlu1 %7187, %v7639_v5   ;;  %926 = vperm.xlu0 %7186, %v7642_v6   ;;  %v7866_v5 = vld [vmem:[%s7626_s23 + $0x50] sm:$0xff] }
  0xb7   : > { %v7850_v9 = vpop.permute.xlu1 %389  ;;  %v7852_v10 = vpop.permute.xlu0 %384 }
  0xb8   : > { %941 = vperm.xlu1 %7187, %v7647_v7   ;;  %936 = vperm.xlu0 %7186, %v7650_v8  }
  0xbb   : > { %v7856_v11 = vpop.permute.xlu1 %399  ;;  %v7858_v12 = vpop.permute.xlu0 %394 }
  0xbc   : > { %951 = vperm.xlu1 %7187, %v7753_v41   ;;  %946 = vperm.xlu0 %7186, %v7756_v42  }
  0xbf   : > { %v7868_v6 = vpop.permute.xlu1 %409  ;;  %v7870_v18 = vpop.permute.xlu0 %404 }
  0xc0   : > { %961 = vperm.xlu1 %7187, %v7863_v17   ;;  %956 = vperm.xlu0 %7186, %v7866_v5  }
  0xc3   : > { %v7874_v19 = vpop.permute.xlu1 %448  ;;  %v7876_v20 = vpop.permute.xlu0 %443 }
  0xc4   : > { %1000 = vperm.xlu1 %7187, %v7665_v13   ;;  %995 = vperm.xlu0 %7186, %v7668_v14   ;;  %v7896_v13 = vld [vmem:[%s7626_s23 + $0x51] sm:$0xff] }
  0xc7   : > { %v7880_v25 = vpop.permute.xlu1 %458  ;;  %v7882_v26 = vpop.permute.xlu0 %453 }
  0xc8   : > { %1010 = vperm.xlu1 %7187, %v7673_v15   ;;  %1005 = vperm.xlu0 %7186, %v7676_v16  }
  0xcb   : > { %v7886_v27 = vpop.permute.xlu1 %468  ;;  %v7888_v28 = vpop.permute.xlu0 %463 }
  0xcc   : > { %12008 = vst [vmem:[#allocation3_spill] sm:$0xff] %v7886_v27  ;;  %12009 = vst [vmem:[#allocation4_spill] sm:$0xff] %v7888_v28  ;;  %1020 = vperm.xlu1 %7187, %v7767_v43   ;;  %1015 = vperm.xlu0 %7186, %v7770_v44  }
  0xcf   : > { %v7898_v14 = vpop.permute.xlu1 %478  ;;  %v7900_v34 = vpop.permute.xlu0 %473 }
  0xd0   : > { %12010 = vst [vmem:[#allocation5_spill] sm:$0xff] %v7898_v14  ;;  %12011 = vst [vmem:[#allocation6_spill] sm:$0xff] %v7900_v34  ;;  %1030 = vperm.xlu1 %7187, %v7893_v33   ;;  %1025 = vperm.xlu0 %7186, %v7896_v13  }
  0xd3   : > { %v7904_v35 = vpop.permute.xlu1 %517  ;;  %v7906_v36 = vpop.permute.xlu0 %512 }
  0xd4   : > { %12012 = vst [vmem:[#allocation7_spill] sm:$0xff] %v7904_v35  ;;  %12013 = vst [vmem:[#allocation8_spill] sm:$0xff] %v7906_v36  ;;  %1069 = vperm.xlu1 %7187, %v7691_v21   ;;  %1064 = vperm.xlu0 %7186, %v7694_v22   ;;  %v7923_v36 = vld [vmem:[%s7626_s23 + $0x5a] sm:$0xff]  ;;  %v7926_v21 = vld [vmem:[%s7626_s23 + $0x52] sm:$0xff] }
  0xd7   : > { %v7910_v28 = vpop.permute.xlu1 %527  ;;  %v7912_v27 = vpop.permute.xlu0 %522 }
  0xd8   : > { %12014 = vst [vmem:[#allocation9_spill] sm:$0xff] %v7910_v28  ;;  %12015 = vst [vmem:[#allocation10_spill] sm:$0xff] %v7912_v27  ;;  %1079 = vperm.xlu1 %7187, %v7699_v23   ;;  %1074 = vperm.xlu0 %7186, %v7702_v24  }
  0xdb   : > { %v7916_v34 = vpop.permute.xlu1 %537  ;;  %v7918_v14 = vpop.permute.xlu0 %532 }
  0xdc   : > { %12016 = vst [vmem:[#allocation11_spill] sm:$0xff] %v7916_v34  ;;  %12017 = vst [vmem:[#allocation12_spill] sm:$0xff] %v7918_v14  ;;  %1089 = vperm.xlu1 %7187, %v7781_v45   ;;  %1084 = vperm.xlu0 %7186, %v7784_v46  }
  0xdf   : > { %v7928_v22 = vpop.permute.xlu1 %547  ;;  %v7930_v27 = vpop.permute.xlu0 %542 }
  0xe0   : > { %12018 = vst [vmem:[#allocation13_spill] sm:$0xff] %v7928_v22  ;;  %12019 = vst [vmem:[#allocation14_spill] sm:$0xff] %v7930_v27  ;;  %1099 = vperm.xlu1 %7187, %v7923_v36   ;;  %1094 = vperm.xlu0 %7186, %v7926_v21  }
  0xe3   : > { %v7934_v34 = vpop.permute.xlu1 %586  ;;  %v7936_v14 = vpop.permute.xlu0 %581 }
  0xe4   : > { %12020 = vst [vmem:[#allocation15_spill] sm:$0xff] %v7934_v34  ;;  %12021 = vst [vmem:[#allocation16_spill] sm:$0xff] %v7936_v14  ;;  %1138 = vperm.xlu1 %7187, %v7711_v29   ;;  %1133 = vperm.xlu0 %7186, %v7714_v30   ;;  %v7953_v14 = vld [vmem:[%s7626_s23 + $0x5b] sm:$0xff]  ;;  %v7956_v29 = vld [vmem:[%s7626_s23 + $0x53] sm:$0xff] }
  0xe7   : > { %v7940_v28 = vpop.permute.xlu1 %596  ;;  %v7942_v35 = vpop.permute.xlu0 %591 }
  0xe8   : > { %12022 = vst [vmem:[#allocation17_spill] sm:$0xff] %v7940_v28  ;;  %12023 = vst [vmem:[#allocation18_spill] sm:$0xff] %v7942_v35  ;;  %1148 = vperm.xlu1 %7187, %v7719_v31   ;;  %1143 = vperm.xlu0 %7186, %v7722_v32  }
  0xeb   : > { %v7946_v27 = vpop.permute.xlu1 %606  ;;  %v7948_v22 = vpop.permute.xlu0 %601 }
  0xec   : > { %12024 = vst [vmem:[#allocation19_spill] sm:$0xff] %v7946_v27  ;;  %12025 = vst [vmem:[#allocation20_spill] sm:$0xff] %v7948_v22  ;;  %1158 = vperm.xlu1 %7187, %v7805_v53   ;;  %1153 = vperm.xlu0 %7186, %v7808_v54  }
  0xef   : > { %v7958_v30 = vpop.permute.xlu1 %616  ;;  %v7960_v35 = vpop.permute.xlu0 %611 }
  0xf0   : > { %12026 = vst [vmem:[#allocation21_spill] sm:$0xff] %v7958_v30  ;;  %12027 = vst [vmem:[#allocation22_spill] sm:$0xff] %v7960_v35  ;;  %1168 = vperm.xlu1 %7187, %v7953_v14   ;;  %1163 = vperm.xlu0 %7186, %v7956_v29  }
  0xf3   : > { %v7964_v27 = vpop.permute.xlu1 %655  ;;  %v7966_v22 = vpop.permute.xlu0 %650 }
  0xf4   : > { %12028 = vst [vmem:[#allocation23_spill] sm:$0xff] %v7964_v27  ;;  %12029 = vst [vmem:[#allocation24_spill] sm:$0xff] %v7966_v22  ;;  %1207 = vperm.xlu1 %7187, %v7731_v37   ;;  %1202 = vperm.xlu0 %7186, %v7734_v38   ;;  %v7983_v22 = vld [vmem:[%s7626_s23 + $0x5c] sm:$0xff]  ;;  %v7986_v37 = vld [vmem:[%s7626_s23 + $0x54] sm:$0xff] }
  0xf7   : > { %v7970_v28 = vpop.permute.xlu1 %665  ;;  %v7972_v34 = vpop.permute.xlu0 %660 }
  0xf8   : > { %12030 = vst [vmem:[#allocation25_spill] sm:$0xff] %v7970_v28  ;;  %12031 = vst [vmem:[#allocation26_spill] sm:$0xff] %v7972_v34  ;;  %1217 = vperm.xlu1 %7187, %v7739_v39   ;;  %1212 = vperm.xlu0 %7186, %v7742_v40  }
  0xfb   : > { %v7976_v35 = vpop.permute.xlu1 %675  ;;  %v7978_v30 = vpop.permute.xlu0 %670 }
  0xfc   : > { %12032 = vst [vmem:[#allocation27_spill] sm:$0xff] %v7976_v35  ;;  %12033 = vst [vmem:[#allocation28_spill] sm:$0xff] %v7978_v30  ;;  %1227 = vperm.xlu1 %7187, %v7833_v63   ;;  %1222 = vperm.xlu0 %7186, %v7836_v0  }
  0xff   : > { %v7988_v38 = vpop.permute.xlu1 %685  ;;  %v7990_v34 = vpop.permute.xlu0 %680 }
 0x100   : > { %12034 = vst [vmem:[#allocation29_spill] sm:$0xff] %v7988_v38  ;;  %12035 = vst [vmem:[#allocation30_spill] sm:$0xff] %v7990_v34  ;;  %1237 = vperm.xlu1 %7187, %v7983_v22   ;;  %1232 = vperm.xlu0 %7186, %v7986_v37  }
 0x103   : > { %v7994_v35 = vpop.permute.xlu1 %724  ;;  %v7996_v30 = vpop.permute.xlu0 %719 }
 0x104   : > { %12036 = vst [vmem:[#allocation31_spill] sm:$0xff] %v7996_v30  ;;  %1276 = vperm.xlu1 %7187, %v7647_v7   ;;  %1271 = vperm.xlu0 %7186, %v7650_v8   ;;  %v8013_v30 = vld [vmem:[%s7626_s23 + $0x68] sm:$0xff]  ;;  %v8016_v7 = vld [vmem:[%s7626_s23 + $0x60] sm:$0xff] }
 0x107   : > { %v8000_v28 = vpop.permute.xlu1 %734  ;;  %v8002_v27 = vpop.permute.xlu0 %729 }
 0x108   : > { %12037 = vst [vmem:[#allocation32_spill] sm:$0xff] %v8002_v27  ;;  %1286 = vperm.xlu1 %7187, %v7753_v41   ;;  %1281 = vperm.xlu0 %7186, %v7756_v42  }
 0x10b   : > { %v8006_v34 = vpop.permute.xlu1 %744  ;;  %v8008_v38 = vpop.permute.xlu0 %739 }
 0x10c   : > { %12038 = vst [vmem:[#allocation33_spill] sm:$0xff] %v8006_v34  ;;  %12039 = vst [vmem:[#allocation34_spill] sm:$0xff] %v8008_v38  ;;  %1296 = vperm.xlu1 %7187, %v7863_v17   ;;  %1291 = vperm.xlu0 %7186, %v7866_v5  }
 0x10f   : > { %v8018_v8 = vpop.permute.xlu1 %754  ;;  %v8020_v27 = vpop.permute.xlu0 %749 }
 0x110   : > { %12040 = vst [vmem:[#allocation35_spill] sm:$0xff] %v8018_v8  ;;  %12041 = vst [vmem:[#allocation36_spill] sm:$0xff] %v8020_v27  ;;  %1306 = vperm.xlu1 %7187, %v8013_v30   ;;  %1301 = vperm.xlu0 %7186, %v8016_v7  }
 0x113   : > { %v8024_v41 = vpop.permute.xlu1 %793  ;;  %v8026_v42 = vpop.permute.xlu0 %788 }
 0x114   : > { %12042 = vst [vmem:[#allocation37_spill] sm:$0xff] %v8024_v41  ;;  %12043 = vst [vmem:[#allocation38_spill] sm:$0xff] %v8026_v42  ;;  %1345 = vperm.xlu1 %7187, %v7673_v15   ;;  %1340 = vperm.xlu0 %7186, %v7676_v16   ;;  %v8043_v42 = vld [vmem:[%s7626_s23 + $0x69] sm:$0xff]  ;;  %v8046_v15 = vld [vmem:[%s7626_s23 + $0x61] sm:$0xff] }
 0x117   : > { %v8030_v38 = vpop.permute.xlu1 %803  ;;  %v8032_v34 = vpop.permute.xlu0 %798 }
 0x118   : > { %12044 = vst [vmem:[#allocation39_spill] sm:$0xff] %v8030_v38  ;;  %12045 = vst [vmem:[#allocation40_spill] sm:$0xff] %v8032_v34  ;;  %1355 = vperm.xlu1 %7187, %v7767_v43   ;;  %1350 = vperm.xlu0 %7186, %v7770_v44  }
 0x11b   : > { %v8036_v27 = vpop.permute.xlu1 %813  ;;  %v8038_v8 = vpop.permute.xlu0 %808 }
 0x11c   : > { %12046 = vst [vmem:[#allocation41_spill] sm:$0xff] %v8036_v27  ;;  %12047 = vst [vmem:[#allocation42_spill] sm:$0xff] %v8038_v8  ;;  %1365 = vperm.xlu1 %7187, %v7893_v33   ;;  %1360 = vperm.xlu0 %7186, %v7896_v13  }
 0x11f   : > { %v8048_v16 = vpop.permute.xlu1 %823  ;;  %v8050_v34 = vpop.permute.xlu0 %818 }
 0x120   : > { %12048 = vst [vmem:[#allocation43_spill] sm:$0xff] %v8048_v16  ;;  %12049 = vst [vmem:[#allocation44_spill] sm:$0xff] %v8050_v34  ;;  %1375 = vperm.xlu1 %7187, %v8043_v42   ;;  %1370 = vperm.xlu0 %7186, %v8046_v15  }
 0x123   : > { %v8054_v43 = vpop.permute.xlu1 %862  ;;  %v8056_v44 = vpop.permute.xlu0 %857 }
 0x124   : > { %12050 = vst [vmem:[#allocation45_spill] sm:$0xff] %v8054_v43  ;;  %12051 = vst [vmem:[#allocation46_spill] sm:$0xff] %v8056_v44  ;;  %1414 = vperm.xlu1 %7187, %v7699_v23   ;;  %1409 = vperm.xlu0 %7186, %v7702_v24   ;;  %v8073_v44 = vld [vmem:[%s7626_s23 + $0x6a] sm:$0xff]  ;;  %v8076_v23 = vld [vmem:[%s7626_s23 + $0x62] sm:$0xff] }
 0x127   : > { %v8060_v8 = vpop.permute.xlu1 %872  ;;  %v8062_v27 = vpop.permute.xlu0 %867 }
 0x128   : > { %12052 = vst [vmem:[#allocation47_spill] sm:$0xff] %v8060_v8  ;;  %12053 = vst [vmem:[#allocation48_spill] sm:$0xff] %v8062_v27  ;;  %1424 = vperm.xlu1 %7187, %v7781_v45   ;;  %1419 = vperm.xlu0 %7186, %v7784_v46  }
 0x12b   : > { %v8066_v34 = vpop.permute.xlu1 %882  ;;  %v8068_v16 = vpop.permute.xlu0 %877 }
 0x12c   : > { %12054 = vst [vmem:[#allocation49_spill] sm:$0xff] %v8066_v34  ;;  %12055 = vst [vmem:[#allocation50_spill] sm:$0xff] %v8068_v16  ;;  %1434 = vperm.xlu1 %7187, %v7923_v36   ;;  %1429 = vperm.xlu0 %7186, %v7926_v21  }
 0x12f   : > { %v8078_v24 = vpop.permute.xlu1 %892  ;;  %v8080_v27 = vpop.permute.xlu0 %887 }
 0x130   : > { %12056 = vst [vmem:[#allocation51_spill] sm:$0xff] %v8078_v24  ;;  %12057 = vst [vmem:[#allocation52_spill] sm:$0xff] %v8080_v27  ;;  %1444 = vperm.xlu1 %7187, %v8073_v44   ;;  %1439 = vperm.xlu0 %7186, %v8076_v23  }
 0x133   : > { %v8084_v45 = vpop.permute.xlu1 %931  ;;  %v8086_v46 = vpop.permute.xlu0 %926 }
 0x134   : > { %12058 = vst [vmem:[#allocation53_spill] sm:$0xff] %v8084_v45  ;;  %12059 = vst [vmem:[#allocation54_spill] sm:$0xff] %v8086_v46  ;;  %1483 = vperm.xlu1 %7187, %v7719_v31   ;;  %1478 = vperm.xlu0 %7186, %v7722_v32   ;;  %v8103_v46 = vld [vmem:[%s7626_s23 + $0x6b] sm:$0xff]  ;;  %v8106_v31 = vld [vmem:[%s7626_s23 + $0x63] sm:$0xff] }
 0x137   : > { %v8090_v16 = vpop.permute.xlu1 %941  ;;  %v8092_v34 = vpop.permute.xlu0 %936 }
 0x138   : > { %12060 = vst [vmem:[#allocation55_spill] sm:$0xff] %v8090_v16  ;;  %12061 = vst [vmem:[#allocation56_spill] sm:$0xff] %v8092_v34  ;;  %1493 = vperm.xlu1 %7187, %v7805_v53   ;;  %1488 = vperm.xlu0 %7186, %v7808_v54  }
 0x13b   : > { %v8096_v27 = vpop.permute.xlu1 %951  ;;  %v8098_v24 = vpop.permute.xlu0 %946 }
 0x13c   : > { %12062 = vst [vmem:[#allocation57_spill] sm:$0xff] %v8096_v27  ;;  %12063 = vst [vmem:[#allocation58_spill] sm:$0xff] %v8098_v24  ;;  %1503 = vperm.xlu1 %7187, %v7953_v14   ;;  %1498 = vperm.xlu0 %7186, %v7956_v29  }
 0x13f   : > { %v8108_v32 = vpop.permute.xlu1 %961  ;;  %v8110_v34 = vpop.permute.xlu0 %956 }
 0x140   : > { %12064 = vst [vmem:[#allocation59_spill] sm:$0xff] %v8108_v32  ;;  %12065 = vst [vmem:[#allocation60_spill] sm:$0xff] %v8110_v34  ;;  %1513 = vperm.xlu1 %7187, %v8103_v46   ;;  %1508 = vperm.xlu0 %7186, %v8106_v31  }
 0x143   : > { %v8114_v53 = vpop.permute.xlu1 %1000  ;;  %v8116_v54 = vpop.permute.xlu0 %995 }
 0x144   : > { %12066 = vst [vmem:[#allocation61_spill] sm:$0xff] %v8114_v53  ;;  %12067 = vst [vmem:[#allocation62_spill] sm:$0xff] %v8116_v54  ;;  %1552 = vperm.xlu1 %7187, %v7739_v39   ;;  %1547 = vperm.xlu0 %7186, %v7742_v40   ;;  %v8133_v39 = vld [vmem:[%s7626_s23 + $0x6c] sm:$0xff]  ;;  %v8136_v40 = vld [vmem:[%s7626_s23 + $0x64] sm:$0xff] }
 0x145   : > { %12072 = vst [vmem:[#allocation67_spill] sm:$0xff] %v8136_v40 }
 0x147   : > { %v8120_v24 = vpop.permute.xlu1 %1010  ;;  %v8122_v32 = vpop.permute.xlu0 %1005 }
 0x148   : > { %12068 = vst [vmem:[#allocation63_spill] sm:$0xff] %v8120_v24  ;;  %12069 = vst [vmem:[#allocation64_spill] sm:$0xff] %v8122_v32  ;;  %1562 = vperm.xlu1 %7187, %v7833_v63   ;;  %1557 = vperm.xlu0 %7186, %v7836_v0   ;;  %v8145_v63 = vld [vmem:[%s7626_s23 + $0x48] sm:$0xff]  ;;  %v8148_v0 = vld [vmem:[%s7626_s23 + $0x40] sm:$0xff] }
 0x14b   : > { %v8126_v34 = vpop.permute.xlu1 %1020  ;;  %v8128_v27 = vpop.permute.xlu0 %1015 }
 0x14c   : > { %12070 = vst [vmem:[#allocation65_spill] sm:$0xff] %v8126_v34  ;;  %12071 = vst [vmem:[#allocation66_spill] sm:$0xff] %v8128_v27  ;;  %1572 = vperm.xlu1 %7187, %v7983_v22   ;;  %1567 = vperm.xlu0 %7186, %v7986_v37  }
 0x14f   : > { %v8138_v54 = vpop.permute.xlu1 %1030  ;;  %v8140_v24 = vpop.permute.xlu0 %1025 }
 0x150   : > { %12073 = vst [vmem:[#allocation68_spill] sm:$0xff] %v8138_v54  ;;  %12074 = vst [vmem:[#allocation69_spill] sm:$0xff] %v8140_v24  ;;  %1582 = vperm.xlu1 %7187, %v8133_v39   ;;  %1577 = vperm.xlu0 %7186, %v8136_v40  }
 0x153   : > { %v8150_v27 = vpop.permute.xlu1 %1069  ;;  %v8152_v34 = vpop.permute.xlu0 %1064 }
 0x154   : > { %12075 = vst [vmem:[#allocation70_spill] sm:$0xff] %v8150_v27  ;;  %12076 = vst [vmem:[#allocation71_spill] sm:$0xff] %v8152_v34  ;;  %1621 = vperm.xlu1 %7187, %v8145_v63   ;;  %1616 = vperm.xlu0 %7186, %v8148_v0   ;;  %v8169_v34 = vld [vmem:[%s7626_s23 + $0x78] sm:$0xff]  ;;  %v8172_v27 = vld [vmem:[%s7626_s23 + $0x70] sm:$0xff] }
 0x155   : > { %12081 = vst [vmem:[#allocation76_spill] sm:$0xff] %v8169_v34  ;;  %12082 = vst [vmem:[#allocation77_spill] sm:$0xff] %v8172_v27 }
 0x157   : > { %v8156_v24 = vpop.permute.xlu1 %1079  ;;  %v8158_v54 = vpop.permute.xlu0 %1074 }
 0x158   : > { %12077 = vst [vmem:[#allocation72_spill] sm:$0xff] %v8156_v24  ;;  %12078 = vst [vmem:[#allocation73_spill] sm:$0xff] %v8158_v54  ;;  %1631 = vperm.xlu1 %7187, %v7863_v17   ;;  %1626 = vperm.xlu0 %7186, %v7866_v5   ;;  %v8181_v17 = vld [vmem:[%s7626_s23 + $0x49] sm:$0xff]  ;;  %v8184_v5 = vld [vmem:[%s7626_s23 + $0x41] sm:$0xff] }
 0x15b   : > { %v8162_v32 = vpop.permute.xlu1 %1089  ;;  %v8164_v53 = vpop.permute.xlu0 %1084 }
 0x15c   : > { %12079 = vst [vmem:[#allocation74_spill] sm:$0xff] %v8162_v32  ;;  %12080 = vst [vmem:[#allocation75_spill] sm:$0xff] %v8164_v53  ;;  %1641 = vperm.xlu1 %7187, %v8013_v30   ;;  %1636 = vperm.xlu0 %7186, %v8016_v7  }
 0x15f   : > { %v8174_v16 = vpop.permute.xlu1 %1099  ;;  %v8176_v24 = vpop.permute.xlu0 %1094 }
 0x160   : > { %12083 = vst [vmem:[#allocation78_spill] sm:$0xff] %v8174_v16  ;;  %12084 = vst [vmem:[#allocation79_spill] sm:$0xff] %v8176_v24  ;;  %1651 = vperm.xlu1 %7187, %v8169_v34   ;;  %1646 = vperm.xlu0 %7186, %v8172_v27  }
 0x163   : > { %v8186_v53 = vpop.permute.xlu1 %1138  ;;  %v8188_v32 = vpop.permute.xlu0 %1133 }
 0x164   : > { %12085 = vst [vmem:[#allocation80_spill] sm:$0xff] %v8186_v53  ;;  %12086 = vst [vmem:[#allocation81_spill] sm:$0xff] %v8188_v32  ;;  %1690 = vperm.xlu1 %7187, %v8181_v17   ;;  %1685 = vperm.xlu0 %7186, %v8184_v5   ;;  %v8205_v32 = vld [vmem:[%s7626_s23 + $0x79] sm:$0xff]  ;;  %v8208_v53 = vld [vmem:[%s7626_s23 + $0x71] sm:$0xff] }
 0x167   : > { %v8192_v24 = vpop.permute.xlu1 %1148  ;;  %v8194_v16 = vpop.permute.xlu0 %1143 }
 0x168   : > { %12087 = vst [vmem:[#allocation82_spill] sm:$0xff] %v8192_v24  ;;  %12088 = vst [vmem:[#allocation83_spill] sm:$0xff] %v8194_v16  ;;  %1700 = vperm.xlu1 %7187, %v7893_v33   ;;  %1695 = vperm.xlu0 %7186, %v7896_v13   ;;  %v8217_v33 = vld [vmem:[%s7626_s23 + $0x4a] sm:$0xff]  ;;  %v8220_v13 = vld [vmem:[%s7626_s23 + $0x42] sm:$0xff] }
 0x16b   : > { %v8198_v54 = vpop.permute.xlu1 %1158  ;;  %v8200_v45 = vpop.permute.xlu0 %1153 }
 0x16c   : > { %12089 = vst [vmem:[#allocation84_spill] sm:$0xff] %v8198_v54  ;;  %12090 = vst [vmem:[#allocation85_spill] sm:$0xff] %v8200_v45  ;;  %1710 = vperm.xlu1 %7187, %v8043_v42   ;;  %1705 = vperm.xlu0 %7186, %v8046_v15  }
 0x16f   : > { %v8210_v8 = vpop.permute.xlu1 %1168  ;;  %v8212_v24 = vpop.permute.xlu0 %1163 }
 0x170   : > { %12091 = vst [vmem:[#allocation86_spill] sm:$0xff] %v8210_v8  ;;  %12092 = vst [vmem:[#allocation87_spill] sm:$0xff] %v8212_v24  ;;  %1720 = vperm.xlu1 %7187, %v8205_v32   ;;  %1715 = vperm.xlu0 %7186, %v8208_v53  }
 0x173   : > { %v8222_v45 = vpop.permute.xlu1 %1207  ;;  %v8224_v54 = vpop.permute.xlu0 %1202 }
 0x174   : > { %12093 = vst [vmem:[#allocation88_spill] sm:$0xff] %v8222_v45  ;;  %12094 = vst [vmem:[#allocation89_spill] sm:$0xff] %v8224_v54  ;;  %1759 = vperm.xlu1 %7187, %v8217_v33   ;;  %1754 = vperm.xlu0 %7186, %v8220_v13   ;;  %v8241_v54 = vld [vmem:[%s7626_s23 + $0x7a] sm:$0xff]  ;;  %v8244_v45 = vld [vmem:[%s7626_s23 + $0x72] sm:$0xff] }
 0x177   : > { %v8228_v24 = vpop.permute.xlu1 %1217  ;;  %v8230_v8 = vpop.permute.xlu0 %1212 }
 0x178   : > { %12095 = vst [vmem:[#allocation90_spill] sm:$0xff] %v8228_v24  ;;  %12096 = vst [vmem:[#allocation91_spill] sm:$0xff] %v8230_v8  ;;  %1769 = vperm.xlu1 %7187, %v7923_v36   ;;  %1764 = vperm.xlu0 %7186, %v7926_v21   ;;  %v8253_v36 = vld [vmem:[%s7626_s23 + $0x4b] sm:$0xff]  ;;  %v8256_v21 = vld [vmem:[%s7626_s23 + $0x43] sm:$0xff] }
 0x179   : > { %12101 = vst [vmem:[#allocation96_spill] sm:$0xff] %v8256_v21 }
 0x17b   : > { %v8234_v16 = vpop.permute.xlu1 %1227  ;;  %v8236_v43 = vpop.permute.xlu0 %1222 }
 0x17c   : > { %12097 = vst [vmem:[#allocation92_spill] sm:$0xff] %v8234_v16  ;;  %12098 = vst [vmem:[#allocation93_spill] sm:$0xff] %v8236_v43  ;;  %1779 = vperm.xlu1 %7187, %v8073_v44   ;;  %1774 = vperm.xlu0 %7186, %v8076_v23  }
 0x17f   : > { %v8246_v38 = vpop.permute.xlu1 %1237  ;;  %v8248_v24 = vpop.permute.xlu0 %1232 }
 0x180   : > { %12099 = vst [vmem:[#allocation94_spill] sm:$0xff] %v8246_v38  ;;  %12100 = vst [vmem:[#allocation95_spill] sm:$0xff] %v8248_v24  ;;  %1789 = vperm.xlu1 %7187, %v8241_v54   ;;  %1784 = vperm.xlu0 %7186, %v8244_v45  }
 0x183   : > { %v8258_v43 = vpop.permute.xlu1 %1276  ;;  %v8260_v16 = vpop.permute.xlu0 %1271 }
 0x184   : > { %12102 = vst [vmem:[#allocation97_spill] sm:$0xff] %v8258_v43  ;;  %12103 = vst [vmem:[#allocation98_spill] sm:$0xff] %v8260_v16  ;;  %1828 = vperm.xlu1 %7187, %v8253_v36   ;;  %1823 = vperm.xlu0 %7186, %v8256_v21   ;;  %v8277_v16 = vld [vmem:[%s7626_s23 + $0x7b] sm:$0xff]  ;;  %v8280_v43 = vld [vmem:[%s7626_s23 + $0x73] sm:$0xff] }
 0x185   : > { %12108 = vst [vmem:[#allocation103_spill] sm:$0xff] %v8280_v43 }
 0x187   : > { %v8264_v24 = vpop.permute.xlu1 %1286  ;;  %v8266_v38 = vpop.permute.xlu0 %1281 }
 0x188   : > { %12104 = vst [vmem:[#allocation99_spill] sm:$0xff] %v8264_v24  ;;  %12105 = vst [vmem:[#allocation100_spill] sm:$0xff] %v8266_v38  ;;  %1838 = vperm.xlu1 %7187, %v7953_v14   ;;  %1833 = vperm.xlu0 %7186, %v7956_v29   ;;  %v8289_v14 = vld [vmem:[%s7626_s23 + $0x4c] sm:$0xff]  ;;  %v8292_v29 = vld [vmem:[%s7626_s23 + $0x44] sm:$0xff] }
 0x18b   : > { %v8270_v8 = vpop.permute.xlu1 %1296  ;;  %v8272_v41 = vpop.permute.xlu0 %1291 }
 0x18c   : > { %12106 = vst [vmem:[#allocation101_spill] sm:$0xff] %v8270_v8  ;;  %12107 = vst [vmem:[#allocation102_spill] sm:$0xff] %v8272_v41  ;;  %1848 = vperm.xlu1 %7187, %v8103_v46   ;;  %1843 = vperm.xlu0 %7186, %v8106_v31  }
 0x18f   : > { %v8282_v21 = vpop.permute.xlu1 %1306  ;;  %v8284_v24 = vpop.permute.xlu0 %1301 }
 0x190   : > { %12109 = vst [vmem:[#allocation104_spill] sm:$0xff] %v8282_v21  ;;  %12110 = vst [vmem:[#allocation105_spill] sm:$0xff] %v8284_v24  ;;  %1858 = vperm.xlu1 %7187, %v8277_v16   ;;  %1853 = vperm.xlu0 %7186, %v8280_v43  }
 0x193   : > { %v8294_v41 = vpop.permute.xlu1 %1345  ;;  %v8296_v8 = vpop.permute.xlu0 %1340 }
 0x194   : > { %12111 = vst [vmem:[#allocation106_spill] sm:$0xff] %v8294_v41  ;;  %12112 = vst [vmem:[#allocation107_spill] sm:$0xff] %v8296_v8  ;;  %1897 = vperm.xlu1 %7187, %v8289_v14   ;;  %1892 = vperm.xlu0 %7186, %v8292_v29   ;;  %v8313_v8 = vld [vmem:[%s7626_s23 + $0x7c] sm:$0xff]  ;;  %v8316_v41 = vld [vmem:[%s7626_s23 + $0x74] sm:$0xff] }
 0x197   : > { %v8300_v21 = vpop.permute.xlu1 %1355  ;;  %v8302_v24 = vpop.permute.xlu0 %1350 }
 0x198   : > { %12113 = vst [vmem:[#allocation108_spill] sm:$0xff] %v8300_v21  ;;  %12114 = vst [vmem:[#allocation109_spill] sm:$0xff] %v8302_v24  ;;  %1907 = vperm.xlu1 %7187, %v7983_v22   ;;  %1902 = vperm.xlu0 %7186, %v7986_v37  }
 0x19b   : > { %v8306_v38 = vpop.permute.xlu1 %1365  ;;  %v8308_v43 = vpop.permute.xlu0 %1360 }
 0x19c   : > { %12115 = vst [vmem:[#allocation110_spill] sm:$0xff] %v8306_v38  ;;  %12116 = vst [vmem:[#allocation111_spill] sm:$0xff] %v8308_v43  ;;  %1917 = vperm.xlu1 %7187, %v8133_v39   ;;  %1912 = vperm.xlu0 %7186, %v8136_v40   ;;  %v8331_v43 = vld [vmem:[%s7626_s23 + $0x58] sm:$0xff]  ;;  %v8334_v38 = vld [vmem:[%s7626_s23 + $0x50] sm:$0xff] }
 0x19d   : > { %12121 = vst [vmem:[#allocation116_spill] sm:$0xff] %v8331_v43  ;;  %12122 = vst [vmem:[#allocation117_spill] sm:$0xff] %v8334_v38 }
 0x19f   : > { %v8318_v21 = vpop.permute.xlu1 %1375  ;;  %v8320_v24 = vpop.permute.xlu0 %1370 }
 0x1a0   : > { %12117 = vst [vmem:[#allocation112_spill] sm:$0xff] %v8318_v21  ;;  %12118 = vst [vmem:[#allocation113_spill] sm:$0xff] %v8320_v24  ;;  %1927 = vperm.xlu1 %7187, %v8313_v8   ;;  %1922 = vperm.xlu0 %7186, %v8316_v41   ;;  %v6765_v24 = vld [vmem:[%s11970_s1 + $0x2] ss:$0 sm:$0xff] }
 0x1a3   : > { %v8324_v22 = vpop.permute.xlu1 %1414  ;;  %v8326_v37 = vpop.permute.xlu0 %1409 }
 0x1a4   : > { %12119 = vst [vmem:[#allocation114_spill] sm:$0xff] %v8324_v22  ;;  %12120 = vst [vmem:[#allocation115_spill] sm:$0xff] %v8326_v37  ;;  %1998 = vperm.xlu1 %7187, %v8145_v63   ;;  %1993 = vperm.xlu0 %7186, %v8148_v0  }
 0x1a7   : > { %v8336_v40 = vpop.permute.xlu1 %1424  ;;  %v8338_v21 = vpop.permute.xlu0 %1419 }
 0x1a8   : > { %12123 = vst [vmem:[#allocation118_spill] sm:$0xff] %v8336_v40  ;;  %12124 = vst [vmem:[#allocation119_spill] sm:$0xff] %v8338_v21  ;;  %2008 = vperm.xlu1 %7187, %v8331_v43   ;;  %2003 = vperm.xlu0 %7186, %v8334_v38   ;;  %v6763_v21 = vld [vmem:[%s11970_s1] ss:$0 sm:$0xff] }
 0x1ab   : > { %v8342_v22 = vpop.permute.xlu1 %1434  ;;  %v8344_v37 = vpop.permute.xlu0 %1429 }
 0x1ac   : > { %12125 = vst [vmem:[#allocation120_spill] sm:$0xff] %v8342_v22  ;;  %12126 = vst [vmem:[#allocation121_spill] sm:$0xff] %v8344_v37  ;;  %2018 = vperm.xlu1 %7187, %v8013_v30   ;;  %2013 = vperm.xlu0 %7186, %v8016_v7   ;;  %v6764_v37 = vld [vmem:[%s11970_s1 + $0x1] ss:$0 sm:$0xff]  ;;  %v8367_v7 = vld [vmem:[%s7626_s23 + $0x59] sm:$0xff] }
 0x1ad   : > { %12131 = vst [vmem:[#allocation126_spill] sm:$0xff] %v8367_v7  ;;  %v347_v40 = vmul.f32 %v6764_v37, %v7818_v58  ;;  %v284_v58 = vmul.f32 %v6763_v21, %v7812_v56 }
 0x1af   : > { %v8348_v63 = vpop.permute.xlu1 %1444  ;;  %v8350_v0 = vpop.permute.xlu0 %1439 }
 0x1b0   : > { %12127 = vst [vmem:[#allocation122_spill] sm:$0xff] %v8348_v63  ;;  %12128 = vst [vmem:[#allocation123_spill] sm:$0xff] %v8350_v0  ;;  %2028 = vperm.xlu1 %7187, %v8169_v34   ;;  %2023 = vperm.xlu0 %7186, %v8172_v27   ;;  %v8370_v0 = vld [vmem:[%s7626_s23 + $0x51] sm:$0xff]  ;;  %v280_v63 = vmul.f32 %v6763_v21, %v7788_v47  ;;  %v278_v27 = vmul.f32 %v6763_v21, %v7790_v48 }
 0x1b1   : > { %12132 = vst [vmem:[#allocation127_spill] sm:$0xff] %v8370_v0  ;;  %v348_v34 = vmul.f32 %v6764_v37, %v7816_v57  ;;  %v283_v48 = vmul.f32 %v6763_v21, %v7798_v51  ;;  %v282_v57 = vmul.f32 %v6763_v21, %v7800_v52  ;;  %v353_v51 = vmul.f32 %v6764_v37, %v7840_v2 }
 0x1b2   : > { %v417_v52 = vmul.f32 %v6765_v24, %v7844_v3  ;;  %v421_v2 = vmul.f32 %v6765_v24, %v7856_v11 }
 0x1b3   : > { %v8360_v22 = vpop.permute.xlu1 %1483  ;;  %v8362_v30 = vpop.permute.xlu0 %1478 }
 0x1b4   : > { %12129 = vst [vmem:[#allocation124_spill] sm:$0xff] %v8360_v22  ;;  %12130 = vst [vmem:[#allocation125_spill] sm:$0xff] %v8362_v30  ;;  %2067 = vperm.xlu1 %7187, %v8181_v17   ;;  %2062 = vperm.xlu0 %7186, %v8184_v5   ;;  %v281_v22 = vmul.f32 %v6763_v21, %v7792_v49  ;;  %v279_v30 = vmul.f32 %v6763_v21, %v7794_v50 }
 0x1b5   : > { %v350_v17 = vmul.f32 %v6764_v37, %v7820_v59  ;;  %v349_v5 = vmul.f32 %v6764_v37, %v7822_v60  ;;  %v352_v49 = vmul.f32 %v6764_v37, %v7826_v61  ;;  %v285_v50 = vmul.f32 %v6763_v21, %v7810_v55  ;;  %v6766_v55 = vld [vmem:[%s11970_s1 + $0x3] ss:$0 sm:$0xff] }
 0x1b6   : > { %v351_v59 = vmul.f32 %v6764_v37, %v7828_v62  ;;  %v354_v60 = vmul.f32 %v6764_v37, %v7838_v1  ;;  %v486_v37 = vmul.f32 %v6766_v55, %v7874_v19  ;;  %v485_v11 = vmul.f32 %v6766_v55, %v7876_v20 }
 0x1b7   : > { %v8383_v38 = vpop.permute.xlu1 %1493  ;;  %v8385_v47 = vpop.permute.xlu0 %1488  ;;  %v358_v43 = vadd.f32 %v350_v17, %v281_v22  ;;  %v357_v61 = vadd.f32 %v349_v5, %v280_v63  ;;  %v360_v1 = vadd.f32 %v352_v49, %v283_v48  ;;  %v422_v22 = vmul.f32 %v6765_v24, %v7870_v18  ;;  %v6767_v18 = vld [vmem:[%s11970_s1 + $0x4] ss:$0 sm:$0xff]  ;;  %v12137_v5 = vld [vmem:[#allocation5_spill] sm:$0xff]  ;;  %v12138_v48 = vld [vmem:[#allocation6_spill] sm:$0xff] }
 0x1b8   : > { %12133 = vst [vmem:[#allocation128_spill] sm:$0xff] %v8383_v38  ;;  %12134 = vst [vmem:[#allocation129_spill] sm:$0xff] %v8385_v47  ;;  %2077 = vperm.xlu1 %7187, %v8367_v7   ;;  %2072 = vperm.xlu0 %7186, %v8370_v0   ;;  %v356_v38 = vadd.f32 %v348_v34, %v279_v30  ;;  %v355_v47 = vadd.f32 %v347_v40, %v278_v27 }
 0x1b9   : > { %v416_v7 = vmul.f32 %v6765_v24, %v7846_v4  ;;  %v419_v0 = vmul.f32 %v6765_v24, %v7850_v9  ;;  %v418_v27 = vmul.f32 %v6765_v24, %v7852_v10  ;;  %v359_v3 = vadd.f32 %v351_v59, %v282_v57 }
 0x1ba   : > { %v362_v4 = vadd.f32 %v354_v60, %v285_v50  ;;  %v420_v9 = vmul.f32 %v6765_v24, %v7858_v12  ;;  %v423_v34 = vmul.f32 %v6765_v24, %v7868_v6  ;;  %v361_v40 = vadd.f32 %v353_v51, %v284_v58  ;;  %v12139_v50 = vld [vmem:[#allocation7_spill] sm:$0xff]  ;;  %v12140_v58 = vld [vmem:[#allocation8_spill] sm:$0xff] }
 0x1bb   : > { %v8403_v56 = vpop.permute.xlu1 %1503  ;;  %v8405_v62 = vpop.permute.xlu0 %1498  ;;  %v425_v21 = vadd.f32 %v417_v52, %v356_v38  ;;  %v424_v63 = vadd.f32 %v416_v7, %v355_v47  ;;  %v427_v10 = vadd.f32 %v419_v0, %v358_v43  ;;  %v426_v17 = vadd.f32 %v418_v27, %v357_v61  ;;  %v12135_v38 = vld [vmem:[#allocation3_spill] sm:$0xff]  ;;  %v12136_v43 = vld [vmem:[#allocation4_spill] sm:$0xff]  ;;  %v12141_v52 = vld [vmem:[#allocation9_spill] sm:$0xff] }
 0x1bc   : > { %2087 = vperm.xlu1 %7187, %v8043_v42   ;;  %2082 = vperm.xlu0 %7186, %v8046_v15   ;;  %v488_v42 = vmul.f32 %v6766_v55, %v7880_v25  ;;  %v429_v12 = vadd.f32 %v421_v2, %v360_v1  ;;  %v487_v6 = vmul.f32 %v6766_v55, %v7882_v26  ;;  %v12142_v1 = vld [vmem:[#allocation10_spill] sm:$0xff] }
 0x1bd   : > { %v428_v19 = vadd.f32 %v420_v9, %v359_v3  ;;  %v431_v20 = vadd.f32 %v423_v34, %v362_v4  ;;  %v490_v25 = vmul.f32 %v6766_v55, %v12135_v38  ;;  %v489_v24 = vmul.f32 %v6766_v55, %v12136_v43  ;;  %v12143_v4 = vld [vmem:[#allocation11_spill] sm:$0xff]  ;;  %v12144_v34 = vld [vmem:[#allocation12_spill] sm:$0xff] }
 0x1be   : > { %v430_v0 = vadd.f32 %v422_v22, %v361_v40  ;;  %v494_v7 = vadd.f32 %v486_v37, %v425_v21  ;;  %v492_v47 = vmul.f32 %v6766_v55, %v12137_v5  ;;  %v491_v26 = vmul.f32 %v6766_v55, %v12138_v48  ;;  %v6768_v55 = vld [vmem:[%s11970_s1 + $0x5] ss:$0 sm:$0xff]  ;;  %v8447_v21 = vld [vmem:[%s7626_s23 + $0x5a] sm:$0xff]  ;;  %v8450_v22 = vld [vmem:[%s7626_s23 + $0x52] sm:$0xff] }
 0x1bf   : > { %v8417_v30 = vpop.permute.xlu1 %1513  ;;  %v8419_v15 = vpop.permute.xlu0 %1508  ;;  %v493_v57 = vadd.f32 %v485_v11, %v424_v63  ;;  %v496_v49 = vadd.f32 %v488_v42, %v427_v10  ;;  %v495_v51 = vadd.f32 %v487_v6, %v426_v17  ;;  %v557_v61 = vmul.f32 %v6767_v18, %v12141_v52  ;;  %12145 = vst [vmem:[#allocation3_spill] sm:$0xff] %v8447_v21  ;;  %v12147_v10 = vld [vmem:[#allocation13_spill] sm:$0xff]  ;;  %v12148_v42 = vld [vmem:[#allocation14_spill] sm:$0xff]  ;;  %v12149_v38 = vld [vmem:[#allocation15_spill] sm:$0xff] }
 0x1c0   : > { %2097 = vperm.xlu1 %7187, %v8205_v32   ;;  %2092 = vperm.xlu0 %7186, %v8208_v53   ;;  %v555_v32 = vmul.f32 %v6767_v18, %v12139_v50  ;;  %v554_v53 = vmul.f32 %v6767_v18, %v12140_v58  ;;  %v556_v27 = vmul.f32 %v6767_v18, %v12142_v1  ;;  %v12151_v48 = vld [vmem:[#allocation17_spill] sm:$0xff] }
 0x1c1   : > { %v498_v2 = vadd.f32 %v490_v25, %v429_v12  ;;  %v497_v3 = vadd.f32 %v489_v24, %v428_v19  ;;  %v559_v9 = vmul.f32 %v6767_v18, %v12143_v4  ;;  %v558_v40 = vmul.f32 %v6767_v18, %v12144_v34  ;;  %12146 = vst [vmem:[#allocation4_spill] sm:$0xff] %v8450_v22  ;;  %v12150_v12 = vld [vmem:[#allocation16_spill] sm:$0xff]  ;;  %v12157_v34 = vld [vmem:[#allocation23_spill] sm:$0xff] }
 0x1c2   : > { %v500_v37 = vadd.f32 %v492_v47, %v431_v20  ;;  %v499_v63 = vadd.f32 %v491_v26, %v430_v0  ;;  %v561_v11 = vmul.f32 %v6767_v18, %v12147_v10  ;;  %v560_v17 = vmul.f32 %v6767_v18, %v12148_v42  ;;  %v6769_v20 = vld [vmem:[%s11970_s1 + $0x6] ss:$0 sm:$0xff] }
 0x1c3   : > { %v8433_v59 = vpop.permute.xlu1 %1552  ;;  %v8435_v60 = vpop.permute.xlu0 %1547  ;;  %v563_v6 = vadd.f32 %v555_v32, %v494_v7  ;;  %v623_v19 = vmul.f32 %v6768_v55, %v12150_v12  ;;  %v565_v24 = vadd.f32 %v557_v61, %v496_v49  ;;  %v564_v5 = vadd.f32 %v556_v27, %v495_v51  ;;  %v12152_v7 = vld [vmem:[#allocation18_spill] sm:$0xff]  ;;  %v12153_v26 = vld [vmem:[#allocation19_spill] sm:$0xff]  ;;  %v12154_v49 = vld [vmem:[#allocation20_spill] sm:$0xff] }
 0x1c4   : > { %2136 = vperm.xlu1 %7187, %v8217_v33   ;;  %2131 = vperm.xlu0 %7186, %v8220_v13   ;;  %v562_v33 = vadd.f32 %v554_v53, %v493_v57  ;;  %v624_v13 = vmul.f32 %v6768_v55, %v12149_v38  ;;  %v626_v50 = vmul.f32 %v6768_v55, %v12151_v48  ;;  %v12155_v51 = vld [vmem:[#allocation21_spill] sm:$0xff]  ;;  %v12156_v27 = vld [vmem:[#allocation22_spill] sm:$0xff] }
 0x1c5   : > { %v567_v18 = vadd.f32 %v559_v9, %v498_v2  ;;  %v566_v0 = vadd.f32 %v558_v40, %v497_v3  ;;  %v625_v47 = vmul.f32 %v6768_v55, %v12152_v7  ;;  %v628_v57 = vmul.f32 %v6768_v55, %v12153_v26  ;;  %v12158_v9 = vld [vmem:[#allocation24_spill] sm:$0xff]  ;;  %v12159_v38 = vld [vmem:[#allocation25_spill] sm:$0xff] }
 0x1c6   : > { %v569_v32 = vadd.f32 %v561_v11, %v500_v37  ;;  %v568_v58 = vadd.f32 %v560_v17, %v499_v63  ;;  %v627_v53 = vmul.f32 %v6768_v55, %v12154_v49  ;;  %v630_v52 = vmul.f32 %v6768_v55, %v12155_v51  ;;  %v6770_v63 = vld [vmem:[%s11970_s1 + $0x7] ss:$0 sm:$0xff]  ;;  %v12160_v17 = vld [vmem:[#allocation26_spill] sm:$0xff] }
 0x1c7   : > { %v8456_v25 = vpop.permute.xlu1 %1562  ;;  %v8458_v43 = vpop.permute.xlu0 %1557  ;;  %v632_v61 = vadd.f32 %v624_v13, %v563_v6  ;;  %v631_v1 = vadd.f32 %v623_v19, %v562_v33  ;;  %v629_v4 = vmul.f32 %v6768_v55, %v12156_v27  ;;  %v693_v10 = vmul.f32 %v6769_v20, %v12157_v34  ;;  %v12161_v33 = vld [vmem:[#allocation27_spill] sm:$0xff]  ;;  %v12164_v51 = vld [vmem:[#allocation30_spill] sm:$0xff] }
 0x1c8   : > { %2146 = vperm.xlu1 %7187, %v8447_v21   ;;  %2141 = vperm.xlu0 %7186, %v8450_v22   ;;  %v634_v3 = vadd.f32 %v626_v50, %v565_v24  ;;  %v692_v40 = vmul.f32 %v6769_v20, %v12158_v9  ;;  %v695_v37 = vmul.f32 %v6769_v20, %v12159_v38  ;;  %v12162_v24 = vld [vmem:[#allocation28_spill] sm:$0xff]  ;;  %v12163_v50 = vld [vmem:[#allocation29_spill] sm:$0xff]  ;;  %v12230_v21 = vld [vmem:[#allocation91_spill] sm:$0xff] }
 0x1c9   : > { %v633_v55 = vadd.f32 %v625_v47, %v564_v5  ;;  %v636_v11 = vadd.f32 %v628_v57, %v567_v18  ;;  %v694_v6 = vmul.f32 %v6769_v20, %v12160_v17  ;;  %v697_v13 = vmul.f32 %v6769_v20, %v12161_v33  ;;  %v12165_v47 = vld [vmem:[#allocation31_spill] sm:$0xff]  ;;  %v12170_v38 = vld [vmem:[#allocation36_spill] sm:$0xff]  ;;  %v12171_v17 = vld [vmem:[#allocation37_spill] sm:$0xff] }
 0x1ca   : > { %v635_v12 = vadd.f32 %v627_v53, %v566_v0  ;;  %v638_v19 = vadd.f32 %v630_v52, %v569_v32  ;;  %v696_v48 = vmul.f32 %v6769_v20, %v12162_v24  ;;  %v699_v7 = vmul.f32 %v6769_v20, %v12163_v50  ;;  %v12166_v53 = vld [vmem:[#allocation32_spill] sm:$0xff]  ;;  %v12172_v33 = vld [vmem:[#allocation38_spill] sm:$0xff] }
 0x1cb   : > { %v8472_v42 = vpop.permute.xlu1 %1572  ;;  %v8474_v2 = vpop.permute.xlu0 %1567  ;;  %v637_v26 = vadd.f32 %v629_v4, %v568_v58  ;;  %v701_v49 = vadd.f32 %v693_v10, %v632_v61  ;;  %v698_v27 = vmul.f32 %v6769_v20, %v12164_v51  ;;  %v700_v5 = vadd.f32 %v692_v40, %v631_v1  ;;  %v12167_v1 = vld [vmem:[#allocation33_spill] sm:$0xff]  ;;  %v12168_v10 = vld [vmem:[#allocation34_spill] sm:$0xff] }
 0x1cc   : > { %2156 = vperm.xlu1 %7187, %v8073_v44   ;;  %2151 = vperm.xlu0 %7186, %v8076_v23   ;;  %v762_v44 = vmul.f32 %v6770_v63, %v7994_v35  ;;  %v703_v18 = vadd.f32 %v695_v37, %v634_v3  ;;  %v761_v57 = vmul.f32 %v6770_v63, %v12165_v47  ;;  %v6771_v35 = vld [vmem:[%s11970_s1 + $0x8] ss:$0 sm:$0xff]  ;;  %v8522_v51 = vld [vmem:[%s7626_s23 + $0x53] sm:$0xff] }
 0x1cd   : > { %v702_v0 = vadd.f32 %v694_v6, %v633_v55  ;;  %v705_v32 = vadd.f32 %v697_v13, %v636_v11  ;;  %v764_v58 = vmul.f32 %v6770_v63, %v8000_v28  ;;  %v763_v20 = vmul.f32 %v6770_v63, %v12166_v53  ;;  %12177 = vst [vmem:[#allocation6_spill] sm:$0xff] %v8522_v51  ;;  %v12179_v47 = vld [vmem:[#allocation42_spill] sm:$0xff] }
 0x1ce   : > { %v704_v52 = vadd.f32 %v696_v48, %v635_v12  ;;  %v707_v61 = vadd.f32 %v699_v7, %v638_v19  ;;  %v766_v4 = vmul.f32 %v6770_v63, %v12167_v1  ;;  %v765_v3 = vmul.f32 %v6770_v63, %v12168_v10  ;;  %v12173_v12 = vld [vmem:[#allocation96_spill] sm:$0xff]  ;;  %v12174_v48 = vld [vmem:[#allocation39_spill] sm:$0xff] }
 0x1cf   : > { %v8489_v34 = vpop.permute.xlu1 %1582  ;;  %v8491_v23 = vpop.permute.xlu0 %1577  ;;  %v706_v9 = vadd.f32 %v698_v27, %v637_v26  ;;  %v767_v28 = vmul.f32 %v6770_v63, %v12170_v38  ;;  %v769_v11 = vadd.f32 %v761_v57, %v700_v5  ;;  %v831_v6 = vmul.f32 %v6771_v35, %v12171_v17  ;;  %v12175_v7 = vld [vmem:[#allocation40_spill] sm:$0xff]  ;;  %v12178_v5 = vld [vmem:[#allocation41_spill] sm:$0xff] }
 0x1d0   : > { %2166 = vperm.xlu1 %7187, %v8241_v54   ;;  %2161 = vperm.xlu0 %7186, %v8244_v45   ;;  %v770_v54 = vadd.f32 %v762_v44, %v701_v49  ;;  %v12169_v45 = vld [vmem:[#allocation35_spill] sm:$0xff]  ;;  %v830_v13 = vmul.f32 %v6771_v35, %v12172_v33  ;;  %v772_v19 = vadd.f32 %v764_v58, %v703_v18  ;;  %v12182_v33 = vld [vmem:[#allocation45_spill] sm:$0xff] }
 0x1d1   : > { %v768_v40 = vmul.f32 %v6770_v63, %v12169_v45  ;;  %v771_v24 = vadd.f32 %v763_v20, %v702_v0  ;;  %v833_v50 = vmul.f32 %v6771_v35, %v12174_v48  ;;  %v832_v26 = vmul.f32 %v6771_v35, %v12175_v7  ;;  %v6772_v63 = vld [vmem:[%s11970_s1 + $0x9] ss:$0 sm:$0xff]  ;;  %v8519_v49 = vld [vmem:[%s7626_s23 + $0x5b] sm:$0xff] }
 0x1d2   : > { %12176 = vst [vmem:[#allocation5_spill] sm:$0xff] %v8519_v49  ;;  %v774_v27 = vadd.f32 %v766_v4, %v705_v32  ;;  %v773_v44 = vadd.f32 %v765_v3, %v704_v52  ;;  %v834_v57 = vmul.f32 %v6771_v35, %v12179_v47  ;;  %v775_v0 = vadd.f32 %v767_v28, %v706_v9  ;;  %v12180_v58 = vld [vmem:[#allocation43_spill] sm:$0xff]  ;;  %v12181_v20 = vld [vmem:[#allocation44_spill] sm:$0xff] }
 0x1d3   : > { %v8505_v37 = vpop.permute.xlu1 %1621  ;;  %v8507_v55 = vpop.permute.xlu0 %1616  ;;  %v776_v18 = vadd.f32 %v768_v40, %v707_v61  ;;  %v837_v53 = vmul.f32 %v6771_v35, %v12180_v58  ;;  %v836_v1 = vmul.f32 %v6771_v35, %v12181_v20  ;;  %v839_v38 = vadd.f32 %v831_v6, %v770_v54  ;;  %v12183_v61 = vld [vmem:[#allocation46_spill] sm:$0xff]  ;;  %v12184_v3 = vld [vmem:[#allocation47_spill] sm:$0xff]  ;;  %v12185_v54 = vld [vmem:[#allocation48_spill] sm:$0xff] }
 0x1d4   : > { %2205 = vperm.xlu1 %7187, %v8253_v36   ;;  %2200 = vperm.xlu0 %7186, %v12173_v12   ;;  %v835_v36 = vmul.f32 %v6771_v35, %v12178_v5  ;;  %v838_v17 = vadd.f32 %v830_v13, %v769_v11  ;;  %v900_v12 = vmul.f32 %v6772_v63, %v12182_v33  ;;  %v6773_v35 = vld [vmem:[%s11970_s1 + $0xa] ss:$0 sm:$0xff]  ;;  %v12186_v6 = vld [vmem:[#allocation49_spill] sm:$0xff]  ;;  %v12187_v5 = vld [vmem:[#allocation50_spill] sm:$0xff] }
 0x1d5   : > { %v841_v32 = vadd.f32 %v833_v50, %v772_v19  ;;  %v840_v52 = vadd.f32 %v832_v26, %v771_v24  ;;  %v899_v4 = vmul.f32 %v6772_v63, %v12183_v61  ;;  %v902_v9 = vmul.f32 %v6772_v63, %v12184_v3  ;;  %v12188_v19 = vld [vmem:[#allocation51_spill] sm:$0xff]  ;;  %v12189_v20 = vld [vmem:[#allocation52_spill] sm:$0xff]  ;;  %v12190_v61 = vld [vmem:[#allocation53_spill] sm:$0xff] }
 0x1d6   : > { %v843_v40 = vadd.f32 %v835_v36, %v774_v27  ;;  %v842_v28 = vadd.f32 %v834_v57, %v773_v44  ;;  %v901_v11 = vmul.f32 %v6772_v63, %v12185_v54  ;;  %v904_v13 = vmul.f32 %v6772_v63, %v12186_v6  ;;  %v12191_v57 = vld [vmem:[#allocation54_spill] sm:$0xff]  ;;  %v12193_v54 = vld [vmem:[#allocation56_spill] sm:$0xff] }
 0x1d7   : > { %v8528_v10 = vpop.permute.xlu1 %1631  ;;  %v8530_v45 = vpop.permute.xlu0 %1626  ;;  %v845_v48 = vadd.f32 %v837_v53, %v776_v18  ;;  %v844_v7 = vadd.f32 %v836_v1, %v775_v0  ;;  %v903_v47 = vmul.f32 %v6772_v63, %v12187_v5  ;;  %v906_v24 = vmul.f32 %v6772_v63, %v12188_v19  ;;  %v12192_v0 = vld [vmem:[#allocation55_spill] sm:$0xff]  ;;  %v12194_v5 = vld [vmem:[#allocation57_spill] sm:$0xff]  ;;  %v12195_v19 = vld [vmem:[#allocation58_spill] sm:$0xff] }
 0x1d8   : > { %2215 = vperm.xlu1 %7187, %v8519_v49   ;;  %2210 = vperm.xlu0 %7186, %v8522_v51   ;;  %v908_v58 = vadd.f32 %v900_v12, %v839_v38  ;;  %v905_v33 = vmul.f32 %v6772_v63, %v12189_v20  ;;  %v969_v27 = vmul.f32 %v6773_v35, %v12190_v61  ;;  %v6774_v63 = vld [vmem:[%s11970_s1 + $0xb] ss:$0 sm:$0xff]  ;;  %v12198_v20 = vld [vmem:[#allocation103_spill] sm:$0xff]  ;;  %v12219_v49 = vld [vmem:[#allocation82_spill] sm:$0xff] }
 0x1d9   : > { %v907_v44 = vadd.f32 %v899_v4, %v838_v17  ;;  %v910_v36 = vadd.f32 %v902_v9, %v841_v32  ;;  %v968_v18 = vmul.f32 %v6773_v35, %v12191_v57  ;;  %v971_v53 = vmul.f32 %v6773_v35, %v12192_v0  ;;  %v12196_v17 = vld [vmem:[#allocation59_spill] sm:$0xff] }
 0x1da   : > { %v909_v1 = vadd.f32 %v901_v11, %v840_v52  ;;  %v912_v3 = vadd.f32 %v904_v13, %v843_v40  ;;  %v970_v6 = vmul.f32 %v6773_v35, %v12193_v54  ;;  %v973_v38 = vmul.f32 %v6773_v35, %v12194_v5  ;;  %v12197_v11 = vld [vmem:[#allocation60_spill] sm:$0xff]  ;;  %v12201_v5 = vld [vmem:[#allocation63_spill] sm:$0xff] }
 0x1db   : > { %v8544_v50 = vpop.permute.xlu1 %1641  ;;  %v8546_v26 = vpop.permute.xlu0 %1636  ;;  %v911_v12 = vadd.f32 %v903_v47, %v842_v28  ;;  %v975_v32 = vmul.f32 %v6773_v35, %v12196_v17  ;;  %v913_v52 = vadd.f32 %v905_v33, %v844_v7  ;;  %v977_v40 = vadd.f32 %v969_v27, %v908_v58  ;;  %v12199_v28 = vld [vmem:[#allocation61_spill] sm:$0xff]  ;;  %v12200_v47 = vld [vmem:[#allocation62_spill] sm:$0xff]  ;;  %v12202_v17 = vld [vmem:[#allocation64_spill] sm:$0xff] }
 0x1dc   : > { %2225 = vperm.xlu1 %7187, %v8103_v46   ;;  %2220 = vperm.xlu0 %7186, %v8106_v31   ;;  %v914_v46 = vadd.f32 %v906_v24, %v845_v48  ;;  %v972_v31 = vmul.f32 %v6773_v35, %v12195_v19  ;;  %v974_v13 = vmul.f32 %v6773_v35, %v12197_v11  ;;  %v6775_v35 = vld [vmem:[%s11970_s1 + $0xc] ss:$0 sm:$0xff]  ;;  %v12203_v58 = vld [vmem:[#allocation65_spill] sm:$0xff]  ;;  %v12204_v27 = vld [vmem:[#allocation66_spill] sm:$0xff] }
 0x1dd   : > { %v976_v61 = vadd.f32 %v968_v18, %v907_v44  ;;  %v979_v57 = vadd.f32 %v971_v53, %v910_v36  ;;  %v1038_v48 = vmul.f32 %v6774_v63, %v12199_v28  ;;  %v1037_v24 = vmul.f32 %v6774_v63, %v12200_v47  ;;  %v12208_v11 = vld [vmem:[#allocation71_spill] sm:$0xff]  ;;  %v8591_v47 = vld [vmem:[%s7626_s23 + $0x54] sm:$0xff] }
 0x1de   : > { %v978_v0 = vadd.f32 %v970_v6, %v909_v1  ;;  %v981_v54 = vadd.f32 %v973_v38, %v912_v3  ;;  %v1040_v19 = vmul.f32 %v6774_v63, %v12201_v5  ;;  %v1039_v51 = vmul.f32 %v6774_v63, %v12202_v17  ;;  %v12205_v1 = vld [vmem:[#allocation68_spill] sm:$0xff]  ;;  %v12206_v6 = vld [vmem:[#allocation69_spill] sm:$0xff]  ;;  %v8588_v28 = vld [vmem:[%s7626_s23 + $0x5c] sm:$0xff]  ;;  %12210 = vst [vmem:[#allocation8_spill] sm:$0xff] %v8591_v47 }
 0x1df   : > { %v8561_v4 = vpop.permute.xlu1 %1651  ;;  %v8563_v9 = vpop.permute.xlu0 %1646  ;;  %v983_v7 = vadd.f32 %v975_v32, %v914_v46  ;;  %v1042_v33 = vmul.f32 %v6774_v63, %v12203_v58  ;;  %v1041_v44 = vmul.f32 %v6774_v63, %v12204_v27  ;;  %v982_v53 = vadd.f32 %v974_v13, %v913_v52  ;;  %v12207_v46 = vld [vmem:[#allocation70_spill] sm:$0xff]  ;;  %12209 = vst [vmem:[#allocation7_spill] sm:$0xff] %v8588_v28  ;;  %v12211_v13 = vld [vmem:[#allocation72_spill] sm:$0xff]  ;;  %v12212_v58 = vld [vmem:[#allocation73_spill] sm:$0xff] }
 0x1e0   : > { %2235 = vperm.xlu1 %7187, %v8277_v16   ;;  %2230 = vperm.xlu0 %7186, %v12198_v20   ;;  %v980_v16 = vadd.f32 %v972_v31, %v911_v12  ;;  %v1044_v3 = vmul.f32 %v6774_v63, %v12205_v1  ;;  %v1043_v38 = vmul.f32 %v6774_v63, %v12206_v6 }
 0x1e1   : > { %v1046_v12 = vadd.f32 %v1038_v48, %v977_v40  ;;  %v1045_v31 = vadd.f32 %v1037_v24, %v976_v61  ;;  %v1107_v32 = vmul.f32 %v6775_v35, %v12207_v46  ;;  %v1106_v20 = vmul.f32 %v6775_v35, %v12208_v11  ;;  %v12213_v61 = vld [vmem:[#allocation74_spill] sm:$0xff]  ;;  %v12214_v24 = vld [vmem:[#allocation75_spill] sm:$0xff] }
 0x1e2   : > { %v1048_v5 = vadd.f32 %v1040_v19, %v979_v57  ;;  %v1047_v52 = vadd.f32 %v1039_v51, %v978_v0  ;;  %v1109_v17 = vmul.f32 %v6775_v35, %v12211_v13  ;;  %v1108_v63 = vmul.f32 %v6775_v35, %v12212_v58  ;;  %v12215_v0 = vld [vmem:[#allocation78_spill] sm:$0xff] }
 0x1e3   : > { %v8577_v36 = vpop.permute.xlu1 %1690  ;;  %v8579_v18 = vpop.permute.xlu0 %1685  ;;  %v1049_v40 = vadd.f32 %v1041_v44, %v980_v16  ;;  %v1111_v48 = vmul.f32 %v6775_v35, %v12213_v61  ;;  %v1110_v27 = vmul.f32 %v6775_v35, %v12214_v24  ;;  %v1052_v57 = vadd.f32 %v1044_v3, %v983_v7  ;;  %v12218_v61 = vld [vmem:[#allocation81_spill] sm:$0xff]  ;;  %v6777_v7 = vld [vmem:[%s11970_s1 + $0xe] ss:$0 sm:$0xff] }
 0x1e4   : > { %2274 = vperm.xlu1 %7187, %v8289_v14   ;;  %2269 = vperm.xlu0 %7186, %v8292_v29   ;;  %v6776_v14 = vld [vmem:[%s11970_s1 + $0xd] ss:$0 sm:$0xff]  ;;  %v1050_v29 = vadd.f32 %v1042_v33, %v981_v54  ;;  %v1051_v51 = vadd.f32 %v1043_v38, %v982_v53  ;;  %v1113_v19 = vmul.f32 %v6775_v35, %v12215_v0  ;;  %v12216_v54 = vld [vmem:[#allocation79_spill] sm:$0xff] }
 0x1e5   : > { %v1115_v46 = vadd.f32 %v1107_v32, %v1046_v12  ;;  %v1114_v11 = vadd.f32 %v1106_v20, %v1045_v31  ;;  %v1112_v16 = vmul.f32 %v6775_v35, %v12216_v54  ;;  %v12217_v33 = vld [vmem:[#allocation80_spill] sm:$0xff]  ;;  %v1117_v13 = vadd.f32 %v1109_v17, %v1048_v5  ;;  %v12220_v38 = vld [vmem:[#allocation83_spill] sm:$0xff]  ;;  %v12223_v5 = vld [vmem:[#allocation85_spill] sm:$0xff] }
 0x1e6   : > { %v1176_v44 = vmul.f32 %v6776_v14, %v12217_v33  ;;  %v1116_v58 = vadd.f32 %v1108_v63, %v1047_v52  ;;  %v1175_v24 = vmul.f32 %v6776_v14, %v12218_v61  ;;  %v1178_v22 = vmul.f32 %v6776_v14, %v12219_v49  ;;  %v12221_v12 = vld [vmem:[#allocation84_spill] sm:$0xff]  ;;  %v12224_v17 = vld [vmem:[#allocation86_spill] sm:$0xff]  ;;  %v12225_v49 = vld [vmem:[#allocation67_spill] sm:$0xff] }
 0x1e7   : > { %v8600_v1 = vpop.permute.xlu1 %1700  ;;  %v8602_v6 = vpop.permute.xlu0 %1695  ;;  %v1119_v53 = vadd.f32 %v1111_v48, %v1050_v29  ;;  %v1118_v3 = vadd.f32 %v1110_v27, %v1049_v40  ;;  %v1177_v0 = vmul.f32 %v6776_v14, %v12220_v38  ;;  %v1180_v31 = vmul.f32 %v6776_v14, %v12221_v12  ;;  %v12226_v40 = vld [vmem:[#allocation87_spill] sm:$0xff]  ;;  %v12227_v27 = vld [vmem:[#allocation88_spill] sm:$0xff]  ;;  %v12228_v12 = vld [vmem:[#allocation89_spill] sm:$0xff] }
 0x1e8   : > { %2284 = vperm.xlu1 %7187, %v8588_v28   ;;  %2279 = vperm.xlu0 %7186, %v8591_v47   ;;  %v1121_v20 = vadd.f32 %v1113_v19, %v1052_v57  ;;  %v1179_v52 = vmul.f32 %v6776_v14, %v12223_v5  ;;  %v1182_v63 = vmul.f32 %v6776_v14, %v12224_v17  ;;  %v12229_v28 = vld [vmem:[#allocation90_spill] sm:$0xff] }
 0x1e9   : > { %v1120_v54 = vadd.f32 %v1112_v16, %v1051_v51  ;;  %v1184_v29 = vadd.f32 %v1176_v44, %v1115_v46  ;;  %v1181_v48 = vmul.f32 %v6776_v14, %v12226_v40  ;;  %v1245_v33 = vmul.f32 %v6777_v7, %v12227_v27  ;;  %v6778_v51 = vld [vmem:[%s11970_s1 + $0xf] ss:$0 sm:$0xff]  ;;  %v12234_v16 = vld [vmem:[#allocation93_spill] sm:$0xff]  ;;  %v12238_v40 = vld [vmem:[#allocation98_spill] sm:$0xff] }
 0x1ea   : > { %v1183_v61 = vadd.f32 %v1175_v24, %v1114_v11  ;;  %v1186_v38 = vadd.f32 %v1178_v22, %v1117_v13  ;;  %v1244_v47 = vmul.f32 %v6777_v7, %v12228_v12  ;;  %v1247_v57 = vmul.f32 %v6777_v7, %v12229_v28  ;;  %v12235_v13 = vld [vmem:[#allocation94_spill] sm:$0xff]  ;;  %v12236_v24 = vld [vmem:[#allocation95_spill] sm:$0xff]  ;;  %v12244_v12 = vld [vmem:[#allocation116_spill] sm:$0xff] }
 0x1eb   : > { %v8616_v32 = vpop.permute.xlu1 %1710  ;;  %v8618_v35 = vpop.permute.xlu0 %1705  ;;  %v1185_v19 = vadd.f32 %v1177_v0, %v1116_v58  ;;  %v1188_v5 = vadd.f32 %v1180_v31, %v1119_v53  ;;  %v1246_v17 = vmul.f32 %v6777_v7, %v12230_v21  ;;  %v1187_v11 = vadd.f32 %v1179_v52, %v1118_v3  ;;  %v12239_v52 = vld [vmem:[#allocation99_spill] sm:$0xff] }
 0x1ec   : > { %12222 = vst [vmem:[#allocation9_spill] sm:$0xff] %v8618_v35  ;;  %2294 = vperm.xlu1 %7187, %v8133_v39   ;;  %2289 = vperm.xlu0 %7186, %v12225_v49   ;;  %v12231_v35 = vld [vmem:[#allocation92_spill] sm:$0xff]  ;;  %v1190_v22 = vadd.f32 %v1182_v63, %v1121_v20  ;;  %v1248_v44 = vmul.f32 %v6777_v7, %v12234_v16  ;;  %v12247_v16 = vld [vmem:[#allocation105_spill] sm:$0xff] }
 0x1ed   : > { %v1249_v39 = vmul.f32 %v6777_v7, %v12231_v35  ;;  %v1189_v28 = vadd.f32 %v1181_v48, %v1120_v54  ;;  %v1253_v21 = vadd.f32 %v1245_v33, %v1184_v29  ;;  %v1251_v58 = vmul.f32 %v6777_v7, %v12235_v13  ;;  %v12237_v35 = vld [vmem:[#allocation97_spill] sm:$0xff]  ;;  %v12240_v63 = vld [vmem:[#allocation100_spill] sm:$0xff] }
 0x1ee   : > { %v1250_v53 = vmul.f32 %v6777_v7, %v12236_v24  ;;  %v1252_v0 = vadd.f32 %v1244_v47, %v1183_v61  ;;  %v1255_v31 = vadd.f32 %v1247_v57, %v1186_v38  ;;  %v1314_v49 = vmul.f32 %v6778_v51, %v12237_v35  ;;  %v6779_v54 = vld [vmem:[%s11970_s1 + $0x10] ss:$0 sm:$0xff]  ;;  %v12243_v61 = vld [vmem:[#allocation102_spill] sm:$0xff]  ;;  %v8660_v24 = vld [vmem:[%s7626_s23 + $0x68] sm:$0xff] }
 0x1ef   : > { %v8633_v46 = vpop.permute.xlu1 %1720  ;;  %v8635_v14 = vpop.permute.xlu0 %1715  ;;  %v1313_v27 = vmul.f32 %v6778_v51, %v12238_v40  ;;  %v1254_v3 = vadd.f32 %v1246_v17, %v1185_v19  ;;  %v1257_v20 = vadd.f32 %v1249_v39, %v1188_v5  ;;  %v1256_v7 = vadd.f32 %v1248_v44, %v1187_v11  ;;  %v12242_v48 = vld [vmem:[#allocation101_spill] sm:$0xff]  ;;  %v12246_v17 = vld [vmem:[#allocation104_spill] sm:$0xff]  ;;  %12248 = vst [vmem:[#allocation13_spill] sm:$0xff] %v8660_v24  ;;  %v8663_v35 = vld [vmem:[%s7626_s23 + $0x60] sm:$0xff] }
 0x1f0   : > { %12232 = vst [vmem:[#allocation10_spill] sm:$0xff] %v8633_v46  ;;  %12233 = vst [vmem:[#allocation11_spill] sm:$0xff] %v8635_v14  ;;  %2304 = vperm.xlu1 %7187, %v8313_v8   ;;  %2299 = vperm.xlu0 %7186, %v8316_v41   ;;  %v1316_v8 = vmul.f32 %v6778_v51, %v12239_v52  ;;  %v1315_v41 = vmul.f32 %v6778_v51, %v12240_v63  ;;  %v12245_v57 = vld [vmem:[#allocation117_spill] sm:$0xff]  ;;  %v12250_v44 = vld [vmem:[#allocation106_spill] sm:$0xff] }
 0x1f1   : > { %v1318_v33 = vmul.f32 %v6778_v51, %v12242_v48  ;;  %v1317_v38 = vmul.f32 %v6778_v51, %v12243_v61  ;;  %v1259_v19 = vadd.f32 %v1251_v58, %v1190_v22  ;;  %v1258_v5 = vadd.f32 %v1250_v53, %v1189_v28  ;;  %12249 = vst [vmem:[#allocation14_spill] sm:$0xff] %v8663_v35  ;;  %v12251_v63 = vld [vmem:[#allocation107_spill] sm:$0xff]  ;;  %v12252_v14 = vld [vmem:[#allocation108_spill] sm:$0xff]  ;;  %v12253_v22 = vld [vmem:[#allocation109_spill] sm:$0xff] }
 0x1f2   : > { %v1320_v39 = vmul.f32 %v6778_v51, %v12246_v17  ;;  %v1319_v13 = vmul.f32 %v6778_v51, %v12247_v16  ;;  %v1322_v40 = vadd.f32 %v1314_v49, %v1253_v21  ;;  %v1321_v11 = vadd.f32 %v1313_v27, %v1252_v0  ;;  %v6780_v51 = vld [vmem:[%s11970_s1 + $0x11] ss:$0 sm:$0xff]  ;;  %v12256_v49 = vld [vmem:[#allocation110_spill] sm:$0xff] }
 0x1f3   : > { %v8649_v29 = vpop.permute.xlu1 %1759  ;;  %v8651_v47 = vpop.permute.xlu0 %1754  ;;  %v1383_v52 = vmul.f32 %v6779_v54, %v12250_v44  ;;  %v1382_v48 = vmul.f32 %v6779_v54, %v12251_v63  ;;  %v1324_v61 = vadd.f32 %v1316_v8, %v1255_v31  ;;  %v1384_v28 = vmul.f32 %v6779_v54, %v12253_v22  ;;  %v12259_v63 = vld [vmem:[#allocation113_spill] sm:$0xff]  ;;  %v12260_v46 = vld [vmem:[#allocation114_spill] sm:$0xff] }
 0x1f4   : > { %12241 = vst [vmem:[#allocation12_spill] sm:$0xff] %v8651_v47  ;;  %2343 = vperm.xlu1 %7187, %v12244_v12   ;;  %2338 = vperm.xlu0 %7186, %v12245_v57   ;;  %v1323_v12 = vadd.f32 %v1315_v41, %v1254_v3  ;;  %v1385_v57 = vmul.f32 %v6779_v54, %v12252_v14  ;;  %v12257_v3 = vld [vmem:[#allocation111_spill] sm:$0xff]  ;;  %v12258_v41 = vld [vmem:[#allocation112_spill] sm:$0xff] }
 0x1f5   : > { %v1326_v21 = vadd.f32 %v1318_v33, %v1257_v20  ;;  %v1325_v0 = vadd.f32 %v1317_v38, %v1256_v7  ;;  %v1387_v27 = vmul.f32 %v6779_v54, %v12256_v49  ;;  %v1328_v31 = vadd.f32 %v1320_v39, %v1259_v19  ;;  %v12261_v33 = vld [vmem:[#allocation115_spill] sm:$0xff]  ;;  %v12262_v49 = vld [vmem:[#allocation118_spill] sm:$0xff]  ;;  %v6781_v19 = vld [vmem:[%s11970_s1 + $0x12] ss:$0 sm:$0xff] }
 0x1f6   : > { %v1327_v14 = vadd.f32 %v1319_v13, %v1258_v5  ;;  %v1386_v8 = vmul.f32 %v6779_v54, %v12257_v3  ;;  %v1389_v17 = vmul.f32 %v6779_v54, %v12258_v41  ;;  %v1391_v16 = vadd.f32 %v1383_v52, %v1322_v40  ;;  %v12267_v52 = vld [vmem:[#allocation76_spill] sm:$0xff]  ;;  %v12270_v3 = vld [vmem:[#allocation122_spill] sm:$0xff] }
 0x1f7   : > { %v8672_v58 = vpop.permute.xlu1 %1769  ;;  %v8674_v53 = vpop.permute.xlu0 %1764  ;;  %v1390_v44 = vadd.f32 %v1382_v48, %v1321_v11  ;;  %v1388_v22 = vmul.f32 %v6779_v54, %v12259_v63  ;;  %v1393_v20 = vadd.f32 %v1385_v57, %v1324_v61  ;;  %v1392_v7 = vadd.f32 %v1384_v28, %v1323_v12  ;;  %v12265_v54 = vld [vmem:[#allocation119_spill] sm:$0xff]  ;;  %v12268_v48 = vld [vmem:[#allocation77_spill] sm:$0xff]  ;;  %v8699_v63 = vld [vmem:[%s7626_s23 + $0x88] sm:$0xff] }
 0x1f8   : > { %12254 = vst [vmem:[#allocation15_spill] sm:$0xff] %v8672_v58  ;;  %12255 = vst [vmem:[#allocation16_spill] sm:$0xff] %v8674_v53  ;;  %2353 = vperm.xlu1 %7187, %v8660_v24   ;;  %2348 = vperm.xlu0 %7186, %v8663_v35   ;;  %v1452_v53 = vmul.f32 %v6780_v51, %v12260_v46  ;;  %v1451_v38 = vmul.f32 %v6780_v51, %v12261_v33  ;;  %v12266_v46 = vld [vmem:[#allocation120_spill] sm:$0xff]  ;;  %v12269_v57 = vld [vmem:[#allocation121_spill] sm:$0xff] }
 0x1f9   : > { %v1454_v35 = vmul.f32 %v6780_v51, %v12262_v49  ;;  %v1395_v13 = vadd.f32 %v1387_v27, %v1326_v21  ;;  %v1453_v40 = vmul.f32 %v6780_v51, %v12265_v54  ;;  %v1456_v11 = vmul.f32 %v6780_v51, %v12266_v46  ;;  %v8702_v33 = vld [vmem:[%s7626_s23 + $0x80] sm:$0xff]  ;;  %v12272_v24 = vld [vmem:[#allocation124_spill] sm:$0xff]  ;;  %v12275_v58 = vld [vmem:[#allocation129_spill] sm:$0xff] }
 0x1fa   : > { %v1394_v61 = vadd.f32 %v1386_v8, %v1325_v0  ;;  %v1397_v12 = vadd.f32 %v1389_v17, %v1328_v31  ;;  %v1455_v28 = vmul.f32 %v6780_v51, %v12269_v57  ;;  %v1458_v41 = vmul.f32 %v6780_v51, %v12270_v3  ;;  %v12271_v27 = vld [vmem:[#allocation123_spill] sm:$0xff]  ;;  %v12274_v0 = vld [vmem:[#allocation128_spill] sm:$0xff] }
 0x1fb   : > { %v8688_v5 = vpop.permute.xlu1 %1779  ;;  %v8690_v39 = vpop.permute.xlu0 %1774  ;;  %v1396_v49 = vadd.f32 %v1388_v22, %v1327_v14  ;;  %v1460_v21 = vadd.f32 %v1452_v53, %v1391_v16  ;;  %v1457_v54 = vmul.f32 %v6780_v51, %v12271_v27  ;;  %v1521_v46 = vmul.f32 %v6781_v19, %v12272_v24  ;;  %v6782_v51 = vld [vmem:[%s11970_s1 + $0x13] ss:$0 sm:$0xff] }
 0x1fc   : > { %12263 = vst [vmem:[#allocation17_spill] sm:$0xff] %v8688_v5  ;;  %12264 = vst [vmem:[#allocation18_spill] sm:$0xff] %v8690_v39  ;;  %2363 = vperm.xlu1 %7187, %v12267_v52   ;;  %2358 = vperm.xlu0 %7186, %v12268_v48   ;;  %v1459_v39 = vadd.f32 %v1451_v38, %v1390_v44  ;;  %v1462_v52 = vadd.f32 %v1454_v35, %v1393_v20  ;;  %v12273_v5 = vld [vmem:[#allocation125_spill] sm:$0xff] }
 0x1fd   : > { %v1520_v48 = vmul.f32 %v6781_v19, %v12273_v5  ;;  %v1523_v31 = vmul.f32 %v6781_v19, %v12274_v0  ;;  %v1461_v57 = vadd.f32 %v1453_v40, %v1392_v7  ;;  %v1464_v3 = vadd.f32 %v1456_v11, %v1395_v13 }
 0x1fe   : > { %v1522_v47 = vmul.f32 %v6781_v19, %v12275_v58  ;;  %v1463_v24 = vadd.f32 %v1455_v28, %v1394_v61  ;;  %v1466_v35 = vadd.f32 %v1458_v41, %v1397_v12  ;;  %v1525_v53 = vmul.f32 %v6781_v19, %v8403_v56  ;;  %v8738_v12 = vld [vmem:[%s7626_s23 + $0x69] sm:$0xff] }
 0x1ff   : > { %v8708_v8 = vpop.permute.xlu1 %1789  ;;  %v8710_v17 = vpop.permute.xlu0 %1784  ;;  %v1524_v14 = vmul.f32 %v6781_v19, %v8405_v62  ;;  %v1465_v16 = vadd.f32 %v1457_v54, %v1396_v49  ;;  %v1529_v44 = vadd.f32 %v1521_v46, %v1460_v21  ;;  %v1527_v22 = vmul.f32 %v6781_v19, %v8417_v30  ;;  %v6783_v30 = vld [vmem:[%s11970_s1 + $0x14] ss:$0 sm:$0xff] }
 0x200   : > { %2373 = vperm.xlu1 %7187, %v8699_v63   ;;  %2368 = vperm.xlu0 %7186, %v8702_v33   ;;  %v1526_v58 = vmul.f32 %v6781_v19, %v8419_v15  ;;  %v1528_v20 = vadd.f32 %v1520_v48, %v1459_v39  ;;  %v1531_v7 = vadd.f32 %v1523_v31, %v1462_v52  ;;  %v12276_v15 = vld [vmem:[#allocation126_spill] sm:$0xff]  ;;  %v12277_v19 = vld [vmem:[#allocation127_spill] sm:$0xff] }
 0x201   : > { %v1590_v38 = vmul.f32 %v6782_v51, %v8433_v59  ;;  %v1589_v5 = vmul.f32 %v6782_v51, %v8435_v60  ;;  %v1530_v56 = vadd.f32 %v1522_v47, %v1461_v57  ;;  %v1592_v62 = vmul.f32 %v6782_v51, %v8456_v25  ;;  %v8741_v47 = vld [vmem:[%s7626_s23 + $0x61] sm:$0xff] }
 0x202   : > { %v1591_v11 = vmul.f32 %v6782_v51, %v8458_v43  ;;  %v1533_v59 = vadd.f32 %v1525_v53, %v1464_v3  ;;  %v1532_v39 = vadd.f32 %v1524_v14, %v1463_v24  ;;  %v1594_v60 = vmul.f32 %v6782_v51, %v8472_v42 }
 0x203   : > { %v8724_v13 = vpop.permute.xlu1 %1828  ;;  %v8726_v40 = vpop.permute.xlu0 %1823  ;;  %v1593_v61 = vmul.f32 %v6782_v51, %v8474_v2  ;;  %v1535_v25 = vadd.f32 %v1527_v22, %v1466_v35  ;;  %v1534_v43 = vadd.f32 %v1526_v58, %v1465_v16  ;;  %v1596_v28 = vmul.f32 %v6782_v51, %v8489_v34  ;;  %v6784_v34 = vld [vmem:[%s11970_s1 + $0x15] ss:$0 sm:$0xff]  ;;  %v7518_v22 = vld [vmem:[%s7626_s23 + $0x79] sm:$0xff] }
 0x204   : > { %2412 = vperm.xlu1 %7187, %v12276_v15   ;;  %2407 = vperm.xlu0 %7186, %v12277_v19   ;;  %v1595_v41 = vmul.f32 %v6782_v51, %v8491_v23  ;;  %v1598_v49 = vadd.f32 %v1590_v38, %v1529_v44  ;;  %v1597_v21 = vadd.f32 %v1589_v5, %v1528_v20  ;;  %v8764_v51 = vld [vmem:[%s11970_s1 + $0x16] ss:$0 sm:$0xff]  ;;  %v8777_v44 = vld [vmem:[%s11970_s1 + $0x17] ss:$0 sm:$0xff]  ;;  %v8785_v38 = vld [vmem:[%s7626_s23 + $0x89] sm:$0xff] }
 0x205   : > { %v1659_v27 = vmul.f32 %v6783_v30, %v8505_v37  ;;  %v1658_v54 = vmul.f32 %v6783_v30, %v8507_v55  ;;  %v1600_v2 = vadd.f32 %v1592_v62, %v1531_v7  ;;  %v1599_v52 = vadd.f32 %v1591_v11, %v1530_v56  ;;  %v12278_v62 = vld [vmem:[#allocation12_spill] sm:$0xff]  ;;  %v12279_v19 = vld [vmem:[#allocation9_spill] sm:$0xff] }
 0x206   : > { %v1661_v48 = vmul.f32 %v6783_v30, %v8528_v10  ;;  %v1602_v23 = vadd.f32 %v1594_v60, %v1533_v59  ;;  %v1601_v37 = vadd.f32 %v1593_v61, %v1532_v39  ;;  %v1660_v55 = vmul.f32 %v6783_v30, %v8530_v45 }
 0x207   : > { %v8747_v46 = vpop.permute.xlu1 %1838  ;;  %v8749_v42 = vpop.permute.xlu0 %1833  ;;  %v1663_v0 = vmul.f32 %v6783_v30, %v8544_v50  ;;  %v1604_v31 = vadd.f32 %v1596_v28, %v1535_v25  ;;  %v1603_v57 = vadd.f32 %v1595_v41, %v1534_v43  ;;  %v1662_v10 = vmul.f32 %v6783_v30, %v8546_v26  ;;  %v12280_v28 = vld [vmem:[#allocation15_spill] sm:$0xff] }
 0x208   : > { %2422 = vperm.xlu1 %7187, %v8738_v12   ;;  %2417 = vperm.xlu0 %7186, %v8741_v47   ;;  %v1665_v3 = vmul.f32 %v6783_v30, %v8561_v4  ;;  %v1667_v24 = vadd.f32 %v1659_v27, %v1598_v49  ;;  %v1666_v35 = vadd.f32 %v1658_v54, %v1597_v21  ;;  %v12281_v49 = vld [vmem:[#allocation16_spill] sm:$0xff]  ;;  %v12282_v54 = vld [vmem:[#allocation10_spill] sm:$0xff] }
 0x209   : > { %v1664_v53 = vmul.f32 %v6783_v30, %v8563_v9  ;;  %v1728_v45 = vmul.f32 %v6784_v34, %v8577_v36  ;;  %v1669_v26 = vadd.f32 %v1661_v48, %v1600_v2  ;;  %v1727_v4 = vmul.f32 %v6784_v34, %v8579_v18  ;;  %v7519_v9 = vld [vmem:[%s7626_s23 + $0x71] sm:$0xff]  ;;  %v8788_v18 = vld [vmem:[%s7626_s23 + $0x81] sm:$0xff] }
 0x20a   : > { %v1730_v16 = vmul.f32 %v6784_v34, %v8600_v1  ;;  %v1668_v36 = vadd.f32 %v1660_v55, %v1599_v52  ;;  %v1671_v58 = vadd.f32 %v1663_v0, %v1602_v23  ;;  %v1729_v20 = vmul.f32 %v6784_v34, %v8602_v6  ;;  %v12283_v2 = vld [vmem:[#allocation11_spill] sm:$0xff] }
 0x20b   : > { %v8768_v50 = vpop.permute.xlu1 %1848  ;;  %v8770_v14 = vpop.permute.xlu0 %1843  ;;  %v1797_v7 = vmul.f32 %v8764_v51, %v8649_v29  ;;  %v1670_v1 = vadd.f32 %v1662_v10, %v1601_v37  ;;  %v1673_v5 = vadd.f32 %v1665_v3, %v1604_v31  ;;  %v1732_v56 = vmul.f32 %v6784_v34, %v8616_v32 }
 0x20c   : > { %2432 = vperm.xlu1 %7187, %v7518_v22   ;;  %2427 = vperm.xlu0 %7186, %v7519_v9   ;;  %v1796_v11 = vmul.f32 %v8764_v51, %v12278_v62  ;;  %v1672_v30 = vadd.f32 %v1664_v53, %v1603_v57  ;;  %v1736_v15 = vadd.f32 %v1728_v45, %v1667_v24  ;;  %v8829_v22 = vld [vmem:[%s7626_s23 + $0x6a] sm:$0xff] }
 0x20d   : > { %v1731_v59 = vmul.f32 %v6784_v34, %v12279_v19  ;;  %v1866_v6 = vmul.f32 %v8777_v44, %v8724_v13  ;;  %v1735_v60 = vadd.f32 %v1727_v4, %v1666_v35  ;;  %v1738_v61 = vadd.f32 %v1730_v16, %v1669_v26  ;;  %v8807_v13 = vld [vmem:[%s11970_s1 + $0x18] ss:$0 sm:$0xff]  ;;  %v12285_v35 = vld [vmem:[#allocation4_spill] sm:$0xff]  ;;  %v12286_v26 = vld [vmem:[#allocation17_spill] sm:$0xff] }
 0x20e   : > { %v1865_v25 = vmul.f32 %v8777_v44, %v8726_v40  ;;  %v1737_v32 = vadd.f32 %v1729_v20, %v1668_v36  ;;  %v1805_v43 = vadd.f32 %v1797_v7, %v1736_v15  ;;  %v1799_v41 = vmul.f32 %v8764_v51, %v12280_v28  ;;  %v12287_v4 = vld [vmem:[#allocation18_spill] sm:$0xff]  ;;  %v8826_v16 = vld [vmem:[%s11971_s2] ss:$0 sm:$0xff]  ;;  %v8832_v7 = vld [vmem:[%s7626_s23 + $0x62] sm:$0xff] }
 0x20f   : > { %v1859_v39 = vpop.permute.xlu1 %1858  ;;  %v1854_v29 = vpop.permute.xlu0 %1853  ;;  %v1798_v21 = vmul.f32 %v8764_v51, %v12281_v49  ;;  %v1740_v27 = vadd.f32 %v1732_v56, %v1671_v58  ;;  %v1734_v40 = vmul.f32 %v6784_v34, %v12282_v54  ;;  %v1733_v52 = vmul.f32 %v6784_v34, %v12283_v2  ;;  %v12284_v34 = vld [vmem:[#allocation3_spill] sm:$0xff] }
 0x210   : > { %2442 = vperm.xlu1 %7187, %v8785_v38   ;;  %2437 = vperm.xlu0 %7186, %v8788_v18   ;;  %v1804_v48 = vadd.f32 %v1796_v11, %v1735_v60  ;;  %v1739_v23 = vadd.f32 %v1731_v59, %v1670_v1  ;;  %v1874_v37 = vadd.f32 %v1866_v6, %v1805_v43 }
 0x211   : > { %v1868_v55 = vmul.f32 %v8777_v44, %v8747_v46  ;;  %v1867_v0 = vmul.f32 %v8777_v44, %v8749_v42  ;;  %v1807_v53 = vadd.f32 %v1799_v41, %v1738_v61  ;;  %v1806_v45 = vadd.f32 %v1798_v21, %v1737_v32 }
 0x212   : > { %v1873_v10 = vadd.f32 %v1865_v25, %v1804_v48  ;;  %v1801_v46 = vmul.f32 %v8764_v51, %v12286_v26  ;;  %v1800_v42 = vmul.f32 %v8764_v51, %v12287_v4  ;;  %v1742_v9 = vadd.f32 %v1734_v40, %v1673_v5 }
 0x213   : > { %v1898_v31 = vpop.permute.xlu1 %1897  ;;  %v1893_v57 = vpop.permute.xlu0 %1892  ;;  %v1741_v36 = vadd.f32 %v1733_v52, %v1672_v30  ;;  %v1876_v1 = vadd.f32 %v1868_v55, %v1807_v53  ;;  %v1875_v56 = vadd.f32 %v1867_v0, %v1806_v45  ;;  %v1870_v62 = vmul.f32 %v8777_v44, %v8768_v50  ;;  %v7520_v52 = vld [vmem:[%s7626_s23 + $0x7a] sm:$0xff] }
 0x214   : > { %v1935_v3 = vmul.f32 %v8807_v13, %v1898_v31  ;;  %v1934_v24 = vmul.f32 %v8807_v13, %v1893_v57  ;;  %2481 = vperm.xlu1 %7187, %v12284_v34   ;;  %2476 = vperm.xlu0 %7186, %v12285_v35   ;;  %v1869_v11 = vmul.f32 %v8777_v44, %v8770_v14  ;;  %v8862_v31 = vld [vmem:[%s7626_s23 + $0x82] sm:$0xff] }
 0x215   : > { %v1809_v60 = vadd.f32 %v1801_v46, %v1740_v27  ;;  %v1808_v61 = vadd.f32 %v1800_v42, %v1739_v23  ;;  %v1803_v50 = vmul.f32 %v8764_v51, %v8708_v8  ;;  %v1802_v14 = vmul.f32 %v8764_v51, %v8710_v17 }
 0x216   : > { %v1943_v58 = vadd.f32 %v1935_v3, %v1874_v37  ;;  %v1942_v20 = vadd.f32 %v1934_v24, %v1873_v10  ;;  %v1872_v21 = vmul.f32 %v8777_v44, %v1859_v39  ;;  %v1871_v27 = vmul.f32 %v8777_v44, %v1854_v29  ;;  %v7521_v44 = vld [vmem:[%s7626_s23 + $0x72] sm:$0xff]  ;;  %v8859_v29 = vld [vmem:[%s7626_s23 + $0x8a] sm:$0xff] }
 0x217   : > { %v1908_v15 = vpop.permute.xlu1 %1907  ;;  %v1903_v19 = vpop.permute.xlu0 %1902  ;;  %v1878_v41 = vadd.f32 %v1870_v62, %v1809_v60  ;;  %v1877_v49 = vadd.f32 %v1869_v11, %v1808_v61  ;;  %v1811_v39 = vadd.f32 %v1803_v50, %v1742_v9  ;;  %v1810_v48 = vadd.f32 %v1802_v14, %v1741_v36  ;;  %v8903_v60 = vld [vmem:[%s7626_s23 + $0x8b] sm:$0xff]  ;;  %v8906_v61 = vld [vmem:[%s7626_s23 + $0x83] sm:$0xff] }
 0x218   : > { %v1958_v59 = vadd.f32 %v8826_v16, %v1943_v58  ;;  %v1957_v6 = vadd.f32 %v8826_v16, %v1942_v20  ;;  %v1937_v5 = vmul.f32 %v8807_v13, %v1908_v15  ;;  %v1936_v30 = vmul.f32 %v8807_v13, %v1903_v19  ;;  %2491 = vperm.xlu1 %7187, %v8829_v22   ;;  %v12288_v20 = vld [vmem:[#allocation5_spill] sm:$0xff]  ;;  %v8886_v15 = vld [vmem:[%s7626_s23 + $0x63] sm:$0xff] }
 0x219   : > { %2486 = vperm.xlu0 %7186, %v8832_v7   ;;  %v1880_v57 = vadd.f32 %v1872_v21, %v1811_v39  ;;  %v1879_v10 = vadd.f32 %v1871_v27, %v1810_v48 }
 0x21a   : > { %v1966_v25 = vmax.f32 %v1958_v59, 0.0  ;;  %v1965_v32 = vmax.f32 %v1957_v6, 0.0  ;;  %v1945_v43 = vadd.f32 %v1937_v5, %v1876_v1  ;;  %v1944_v28 = vadd.f32 %v1936_v30, %v1875_v56  ;;  %v12289_v1 = vld [vmem:[#allocation6_spill] sm:$0xff]  ;;  %v8883_v56 = vld [vmem:[%s7626_s23 + $0x6b] sm:$0xff] }
 0x21b   : > { %v1918_v54 = vpop.permute.xlu1 %1917  ;;  %v1913_v8 = vpop.permute.xlu0 %1912  ;;  %v7522_v5 = vld [vmem:[%s7626_s23 + $0x7b] sm:$0xff]  ;;  %v7523_v30 = vld [vmem:[%s7626_s23 + $0x73] sm:$0xff] }
 0x21c   : > { %1975 = vst.msk [vmem:[#allocation2 + $0x8] sm:$0xff] %vm1973_vm0, %v1966_v25  ;;  %1974 = vst.msk [vmem:[#allocation2] sm:$0xff] %vm1973_vm0, %v1965_v32  ;;  %v1960_v17 = vadd.f32 %v8826_v16, %v1945_v43  ;;  %v1959_v51 = vadd.f32 %v8826_v16, %v1944_v28  ;;  %v1939_v40 = vmul.f32 %v8807_v13, %v1918_v54  ;;  %2501 = vperm.xlu1 %7187, %v7520_v52   ;;  %v12290_v43 = vld [vmem:[#allocation7_spill] sm:$0xff]  ;;  %v12291_v28 = vld [vmem:[#allocation8_spill] sm:$0xff] }
 0x21d   : > { %v1938_v2 = vmul.f32 %v8807_v13, %v1913_v8  ;;  %2496 = vperm.xlu0 %7186, %v7521_v44  }
 0x21e   : > { %v1968_v23 = vmax.f32 %v1960_v17, 0.0  ;;  %v1967_v37 = vmax.f32 %v1959_v51, 0.0  ;;  %v1947_v55 = vadd.f32 %v1939_v40, %v1878_v41  ;;  %v8921_v41 = vld [vmem:[%s7626_s23 + $0x6c] sm:$0xff]  ;;  %v7524_v17 = vld [vmem:[%s7626_s23 + $0x7c] sm:$0xff]  ;;  %v7525_v51 = vld [vmem:[%s7626_s23 + $0x74] sm:$0xff] }
 0x21f   : > { %v1946_v0 = vadd.f32 %v1938_v2, %v1877_v49  ;;  %v1928_v3 = vpop.permute.xlu1 %1927  ;;  %v1923_v24 = vpop.permute.xlu0 %1922  ;;  %v8924_v49 = vld [vmem:[%s7626_s23 + $0x64] sm:$0xff]  ;;  %v8939_v40 = vld [vmem:[%s7626_s23 + $0x8c] sm:$0xff] }
 0x220   : > { %1977 = vst.msk [vmem:[#allocation2 + $0x18] sm:$0xff] %vm1973_vm0, %v1968_v23  ;;  %1976 = vst.msk [vmem:[#allocation2 + $0x10] sm:$0xff] %vm1973_vm0, %v1967_v37  ;;  %v1962_v34 = vadd.f32 %v8826_v16, %v1947_v55  ;;  %v1941_v53 = vmul.f32 %v8807_v13, %v1928_v3  ;;  %v1940_v45 = vmul.f32 %v8807_v13, %v1923_v24  ;;  %2511 = vperm.xlu1 %7187, %v8859_v29   ;;  %v8942_v2 = vld [vmem:[%s7626_s23 + $0x84] sm:$0xff]  ;;  %v12292_v23 = vld [vmem:[#allocation13_spill] sm:$0xff] }
 0x221   : > { %v1961_v35 = vadd.f32 %v8826_v16, %v1946_v0  ;;  %2506 = vperm.xlu0 %7186, %v8862_v31   ;;  %v12293_v37 = vld [vmem:[#allocation14_spill] sm:$0xff]  ;;  %v8960_v0 = vld [vmem:[%s7626_s23 + $0x70] sm:$0xff] }
 0x222   : > { %v1970_v26 = vmax.f32 %v1962_v34, 0.0  ;;  %v1949_v4 = vadd.f32 %v1941_v53, %v1880_v57  ;;  %v1948_v42 = vadd.f32 %v1940_v45, %v1879_v10  ;;  %v8957_v55 = vld [vmem:[%s7626_s23 + $0x78] sm:$0xff] }
 0x223   : > { %v1969_v46 = vmax.f32 %v1961_v35, 0.0  ;;  %v8872_v9 = vpop.permute.xlu1 %1998  ;;  %v8874_v36 = vpop.permute.xlu0 %1993  ;;  %v8975_v34 = vld [vmem:[%s7626_s23 + $0x98] sm:$0xff]  ;;  %v8978_v35 = vld [vmem:[%s7626_s23 + $0x90] sm:$0xff] }
 0x224   : > { %1979 = vst.msk [vmem:[#allocation2 + $0x28] sm:$0xff] %vm1973_vm0, %v1970_v26  ;;  %v1964_v58 = vadd.f32 %v8826_v16, %v1949_v4  ;;  %v1963_v13 = vadd.f32 %v8826_v16, %v1948_v42  ;;  %2550 = vperm.xlu1 %7187, %v12288_v20   ;;  %v8993_v4 = vld [vmem:[%s7626_s23 + $0x79] sm:$0xff]  ;;  %v8996_v42 = vld [vmem:[%s7626_s23 + $0x71] sm:$0xff] }
 0x225   : > { %1978 = vst.msk [vmem:[#allocation2 + $0x20] sm:$0xff] %vm1973_vm0, %v1969_v46  ;;  %2545 = vperm.xlu0 %7186, %v12289_v1  }
 0x226   : > { %v1972_v62 = vmax.f32 %v1964_v58, 0.0  ;;  %v1971_v11 = vmax.f32 %v1963_v13, 0.0 }
 0x227   : > { %v8888_v19 = vpop.permute.xlu1 %2008  ;;  %v8890_v59 = vpop.permute.xlu0 %2003 }
 0x228   : > { %1981 = vst.msk [vmem:[#allocation2 + $0x38] sm:$0xff] %vm1973_vm0, %v1972_v62  ;;  %1980 = vst.msk [vmem:[#allocation2 + $0x30] sm:$0xff] %vm1973_vm0, %v1971_v11  ;;  %2560 = vperm.xlu1 %7187, %v8883_v56  }
 0x229   : > { %2555 = vperm.xlu0 %7186, %v8886_v15  }
 0x22b   : > { %v8896_v16 = vpop.permute.xlu1 %2018  ;;  %v8898_v6 = vpop.permute.xlu0 %2013 }
 0x22c   : > { %2570 = vperm.xlu1 %7187, %v7522_v5  }
 0x22d   : > { %2565 = vperm.xlu0 %7186, %v7523_v30  }
 0x22f   : > { %v8908_v50 = vpop.permute.xlu1 %2028  ;;  %v8910_v14 = vpop.permute.xlu0 %2023 }
 0x230   : > { %2580 = vperm.xlu1 %7187, %v8903_v60  }
 0x231   : > { %2575 = vperm.xlu0 %7186, %v8906_v61  }
 0x233   : > { %v8914_v25 = vpop.permute.xlu1 %2067  ;;  %v8916_v32 = vpop.permute.xlu0 %2062 }
 0x234   : > { %2619 = vperm.xlu1 %7187, %v12290_v43   ;;  %v9029_v43 = vld [vmem:[%s7626_s23 + $0x7a] sm:$0xff] }
 0x235   : > { %2614 = vperm.xlu0 %7186, %v12291_v28   ;;  %v9032_v28 = vld [vmem:[%s7626_s23 + $0x72] sm:$0xff] }
 0x237   : > { %v8926_v21 = vpop.permute.xlu1 %2077  ;;  %v8928_v27 = vpop.permute.xlu0 %2072 }
 0x238   : > { %2629 = vperm.xlu1 %7187, %v8921_v41  }
 0x239   : > { %2624 = vperm.xlu0 %7186, %v8924_v49  }
 0x23b   : > { %v8932_v54 = vpop.permute.xlu1 %2087  ;;  %v8934_v8 = vpop.permute.xlu0 %2082 }
 0x23c   : > { %2639 = vperm.xlu1 %7187, %v7524_v17  }
 0x23d   : > { %2634 = vperm.xlu0 %7186, %v7525_v51  }
 0x23f   : > { %v8944_v52 = vpop.permute.xlu1 %2097  ;;  %v8946_v39 = vpop.permute.xlu0 %2092 }
 0x240   : > { %2649 = vperm.xlu1 %7187, %v8939_v40  }
 0x241   : > { %2644 = vperm.xlu0 %7186, %v8942_v2  }
 0x243   : > { %v8950_v48 = vpop.permute.xlu1 %2136  ;;  %v8952_v44 = vpop.permute.xlu0 %2131 }
 0x244   : > { %2688 = vperm.xlu1 %7187, %v12292_v23  }
 0x245   : > { %2683 = vperm.xlu0 %7186, %v12293_v37  }
 0x247   : > { %v8962_v57 = vpop.permute.xlu1 %2146  ;;  %v8964_v10 = vpop.permute.xlu0 %2141 }
 0x248   : > { %2698 = vperm.xlu1 %7187, %v8957_v55  }
 0x249   : > { %2693 = vperm.xlu0 %7186, %v8960_v0  }
 0x24b   : > { %v8968_v3 = vpop.permute.xlu1 %2156  ;;  %v8970_v24 = vpop.permute.xlu0 %2151 }
 0x24c   : > { %2708 = vperm.xlu1 %7187, %v8699_v63  }
 0x24d   : > { %2703 = vperm.xlu0 %7186, %v8702_v33  }
 0x24f   : > { %v8980_v53 = vpop.permute.xlu1 %2166  ;;  %v8982_v45 = vpop.permute.xlu0 %2161 }
 0x250   : > { %2718 = vperm.xlu1 %7187, %v8975_v34  }
 0x251   : > { %2713 = vperm.xlu0 %7186, %v8978_v35  }
 0x253   : > { %v8986_v26 = vpop.permute.xlu1 %2205  ;;  %v8988_v46 = vpop.permute.xlu0 %2200 }
 0x254   : > { %2757 = vperm.xlu1 %7187, %v8738_v12   ;;  %v9011_v12 = vld [vmem:[%s7626_s23 + $0x99] sm:$0xff] }
 0x255   : > { %2752 = vperm.xlu0 %7186, %v8741_v47   ;;  %v9014_v47 = vld [vmem:[%s7626_s23 + $0x91] sm:$0xff] }
 0x257   : > { %v8998_v58 = vpop.permute.xlu1 %2215  ;;  %v9000_v13 = vpop.permute.xlu0 %2210 }
 0x258   : > { %2767 = vperm.xlu1 %7187, %v8993_v4  }
 0x259   : > { %2762 = vperm.xlu0 %7186, %v8996_v42  }
 0x25b   : > { %v9004_v20 = vpop.permute.xlu1 %2225  ;;  %v9006_v1 = vpop.permute.xlu0 %2220 }
 0x25c   : > { %12294 = vst [vmem:[#allocation19_spill] sm:$0xff] %v9004_v20  ;;  %12295 = vst [vmem:[#allocation20_spill] sm:$0xff] %v9006_v1  ;;  %2777 = vperm.xlu1 %7187, %v8785_v38  }
 0x25d   : > { %2772 = vperm.xlu0 %7186, %v8788_v18  }
 0x25f   : > { %v9016_v62 = vpop.permute.xlu1 %2235  ;;  %v9018_v11 = vpop.permute.xlu0 %2230 }
 0x260   : > { %12296 = vst [vmem:[#allocation21_spill] sm:$0xff] %v9016_v62  ;;  %12297 = vst [vmem:[#allocation22_spill] sm:$0xff] %v9018_v11  ;;  %2787 = vperm.xlu1 %7187, %v9011_v12   ;;  %v9101_v11 = vld [vmem:[%s7626_s23 + $0x7c] sm:$0xff]  ;;  %v9104_v62 = vld [vmem:[%s7626_s23 + $0x74] sm:$0xff] }
 0x261   : > { %2782 = vperm.xlu0 %7186, %v9014_v47  }
 0x263   : > { %v9022_v5 = vpop.permute.xlu1 %2274  ;;  %v9024_v30 = vpop.permute.xlu0 %2269 }
 0x264   : > { %12298 = vst [vmem:[#allocation23_spill] sm:$0xff] %v9022_v5  ;;  %12299 = vst [vmem:[#allocation24_spill] sm:$0xff] %v9024_v30  ;;  %2826 = vperm.xlu1 %7187, %v8829_v22   ;;  %v9047_v22 = vld [vmem:[%s7626_s23 + $0x9a] sm:$0xff] }
 0x265   : > { %2821 = vperm.xlu0 %7186, %v8832_v7   ;;  %v9050_v7 = vld [vmem:[%s7626_s23 + $0x92] sm:$0xff]  ;;  %v9065_v30 = vld [vmem:[%s7626_s23 + $0x7b] sm:$0xff] }
 0x266   : > { %v9068_v5 = vld [vmem:[%s7626_s23 + $0x73] sm:$0xff] }
 0x267   : > { %v9034_v17 = vpop.permute.xlu1 %2284  ;;  %v9036_v51 = vpop.permute.xlu0 %2279 }
 0x268   : > { %12300 = vst [vmem:[#allocation25_spill] sm:$0xff] %v9034_v17  ;;  %12301 = vst [vmem:[#allocation26_spill] sm:$0xff] %v9036_v51  ;;  %2836 = vperm.xlu1 %7187, %v9029_v43  }
 0x269   : > { %2831 = vperm.xlu0 %7186, %v9032_v28  }
 0x26b   : > { %v9040_v23 = vpop.permute.xlu1 %2294  ;;  %v9042_v37 = vpop.permute.xlu0 %2289 }
 0x26c   : > { %12302 = vst [vmem:[#allocation27_spill] sm:$0xff] %v9040_v23  ;;  %12303 = vst [vmem:[#allocation28_spill] sm:$0xff] %v9042_v37  ;;  %2846 = vperm.xlu1 %7187, %v8859_v29  }
 0x26d   : > { %2841 = vperm.xlu0 %7186, %v8862_v31  }
 0x26f   : > { %v9052_v17 = vpop.permute.xlu1 %2304  ;;  %v9054_v51 = vpop.permute.xlu0 %2299 }
 0x270   : > { %12304 = vst [vmem:[#allocation29_spill] sm:$0xff] %v9052_v17  ;;  %12305 = vst [vmem:[#allocation30_spill] sm:$0xff] %v9054_v51  ;;  %2856 = vperm.xlu1 %7187, %v9047_v22  }
 0x271   : > { %2851 = vperm.xlu0 %7186, %v9050_v7  }
 0x273   : > { %v9058_v23 = vpop.permute.xlu1 %2343  ;;  %v9060_v37 = vpop.permute.xlu0 %2338 }
 0x274   : > { %12306 = vst [vmem:[#allocation31_spill] sm:$0xff] %v9058_v23  ;;  %12307 = vst [vmem:[#allocation32_spill] sm:$0xff] %v9060_v37  ;;  %2895 = vperm.xlu1 %7187, %v8883_v56   ;;  %v9083_v56 = vld [vmem:[%s7626_s23 + $0x9b] sm:$0xff] }
 0x275   : > { %2890 = vperm.xlu0 %7186, %v8886_v15   ;;  %v9086_v15 = vld [vmem:[%s7626_s23 + $0x93] sm:$0xff] }
 0x277   : > { %v9070_v17 = vpop.permute.xlu1 %2353  ;;  %v9072_v51 = vpop.permute.xlu0 %2348 }
 0x278   : > { %12308 = vst [vmem:[#allocation33_spill] sm:$0xff] %v9070_v17  ;;  %12309 = vst [vmem:[#allocation34_spill] sm:$0xff] %v9072_v51  ;;  %2905 = vperm.xlu1 %7187, %v9065_v30  }
 0x279   : > { %2900 = vperm.xlu0 %7186, %v9068_v5  }
 0x27b   : > { %v9076_v23 = vpop.permute.xlu1 %2363  ;;  %v9078_v37 = vpop.permute.xlu0 %2358 }
 0x27c   : > { %12310 = vst [vmem:[#allocation35_spill] sm:$0xff] %v9076_v23  ;;  %12311 = vst [vmem:[#allocation36_spill] sm:$0xff] %v9078_v37  ;;  %2915 = vperm.xlu1 %7187, %v8903_v60  }
 0x27d   : > { %2910 = vperm.xlu0 %7186, %v8906_v61  }
 0x27f   : > { %v9088_v17 = vpop.permute.xlu1 %2373  ;;  %v9090_v51 = vpop.permute.xlu0 %2368 }
 0x280   : > { %12312 = vst [vmem:[#allocation37_spill] sm:$0xff] %v9088_v17  ;;  %12313 = vst [vmem:[#allocation38_spill] sm:$0xff] %v9090_v51  ;;  %2925 = vperm.xlu1 %7187, %v9083_v56  }
 0x281   : > { %2920 = vperm.xlu0 %7186, %v9086_v15  }
 0x283   : > { %v9094_v23 = vpop.permute.xlu1 %2412  ;;  %v9096_v37 = vpop.permute.xlu0 %2407 }
 0x284   : > { %12314 = vst [vmem:[#allocation96_spill] sm:$0xff] %v9094_v23  ;;  %12315 = vst [vmem:[#allocation39_spill] sm:$0xff] %v9096_v37  ;;  %2964 = vperm.xlu1 %7187, %v8921_v41   ;;  %v9119_v41 = vld [vmem:[%s7626_s23 + $0x9c] sm:$0xff] }
 0x285   : > { %2959 = vperm.xlu0 %7186, %v8924_v49   ;;  %v9122_v49 = vld [vmem:[%s7626_s23 + $0x94] sm:$0xff] }
 0x287   : > { %v9106_v17 = vpop.permute.xlu1 %2422  ;;  %v9108_v51 = vpop.permute.xlu0 %2417 }
 0x288   : > { %12316 = vst [vmem:[#allocation40_spill] sm:$0xff] %v9106_v17  ;;  %12317 = vst [vmem:[#allocation41_spill] sm:$0xff] %v9108_v51  ;;  %2974 = vperm.xlu1 %7187, %v9101_v11  }
 0x289   : > { %2969 = vperm.xlu0 %7186, %v9104_v62  }
 0x28b   : > { %v9112_v1 = vpop.permute.xlu1 %2432  ;;  %v9114_v23 = vpop.permute.xlu0 %2427 }
 0x28c   : > { %12318 = vst [vmem:[#allocation42_spill] sm:$0xff] %v9112_v1  ;;  %12319 = vst [vmem:[#allocation43_spill] sm:$0xff] %v9114_v23  ;;  %2984 = vperm.xlu1 %7187, %v8939_v40  }
 0x28d   : > { %2979 = vperm.xlu0 %7186, %v8942_v2  }
 0x28f   : > { %v9124_v37 = vpop.permute.xlu1 %2442  ;;  %v9126_v51 = vpop.permute.xlu0 %2437 }
 0x290   : > { %12320 = vst [vmem:[#allocation44_spill] sm:$0xff] %v9124_v37  ;;  %12321 = vst [vmem:[#allocation45_spill] sm:$0xff] %v9126_v51  ;;  %2994 = vperm.xlu1 %7187, %v9119_v41  }
 0x291   : > { %2989 = vperm.xlu0 %7186, %v9122_v49  }
 0x293   : > { %v9130_v1 = vpop.permute.xlu1 %2481  ;;  %v9132_v23 = vpop.permute.xlu0 %2476 }
 0x294   : > { %12322 = vst [vmem:[#allocation46_spill] sm:$0xff] %v9132_v23  ;;  %3033 = vperm.xlu1 %7187, %v8957_v55   ;;  %v9149_v23 = vld [vmem:[%s7626_s23 + $0xa8] sm:$0xff]  ;;  %v9152_v55 = vld [vmem:[%s7626_s23 + $0xa0] sm:$0xff] }
 0x295   : > { %3028 = vperm.xlu0 %7186, %v8960_v0  }
 0x297   : > { %v9136_v17 = vpop.permute.xlu1 %2491 }
 0x298   : > { %12323 = vst [vmem:[#allocation47_spill] sm:$0xff] %v9136_v17  ;;  %v9138_v20 = vpop.permute.xlu0 %2486  ;;  %3043 = vperm.xlu1 %7187, %v8699_v63  }
 0x299   : > { %12324 = vst [vmem:[#allocation48_spill] sm:$0xff] %v9138_v20  ;;  %3038 = vperm.xlu0 %7186, %v8702_v33  }
 0x29b   : > { %v9142_v51 = vpop.permute.xlu1 %2501 }
 0x29c   : > { %12325 = vst [vmem:[#allocation49_spill] sm:$0xff] %v9142_v51  ;;  %v9144_v37 = vpop.permute.xlu0 %2496  ;;  %3053 = vperm.xlu1 %7187, %v8975_v34  }
 0x29d   : > { %12326 = vst [vmem:[#allocation50_spill] sm:$0xff] %v9144_v37  ;;  %3048 = vperm.xlu0 %7186, %v8978_v35  }
 0x29f   : > { %v9154_v0 = vpop.permute.xlu1 %2511 }
 0x2a0   : > { %12327 = vst [vmem:[#allocation51_spill] sm:$0xff] %v9154_v0  ;;  %v9156_v20 = vpop.permute.xlu0 %2506  ;;  %3063 = vperm.xlu1 %7187, %v9149_v23  }
 0x2a1   : > { %12328 = vst [vmem:[#allocation52_spill] sm:$0xff] %v9156_v20  ;;  %3058 = vperm.xlu0 %7186, %v9152_v55  }
 0x2a3   : > { %v9160_v63 = vpop.permute.xlu1 %2550 }
 0x2a4   : > { %12329 = vst [vmem:[#allocation53_spill] sm:$0xff] %v9160_v63  ;;  %v9162_v33 = vpop.permute.xlu0 %2545  ;;  %3102 = vperm.xlu1 %7187, %v8993_v4   ;;  %v9182_v4 = vld [vmem:[%s7626_s23 + $0xa1] sm:$0xff] }
 0x2a5   : > { %12330 = vst [vmem:[#allocation54_spill] sm:$0xff] %v9162_v33  ;;  %3097 = vperm.xlu0 %7186, %v8996_v42   ;;  %v9179_v33 = vld [vmem:[%s7626_s23 + $0xa9] sm:$0xff] }
 0x2a7   : > { %v9166_v37 = vpop.permute.xlu1 %2560 }
 0x2a8   : > { %12331 = vst [vmem:[#allocation55_spill] sm:$0xff] %v9166_v37  ;;  %v9168_v51 = vpop.permute.xlu0 %2555  ;;  %3112 = vperm.xlu1 %7187, %v8785_v38  }
 0x2a9   : > { %12332 = vst [vmem:[#allocation56_spill] sm:$0xff] %v9168_v51  ;;  %3107 = vperm.xlu0 %7186, %v8788_v18  }
 0x2ab   : > { %v9172_v20 = vpop.permute.xlu1 %2570 }
 0x2ac   : > { %12333 = vst [vmem:[#allocation57_spill] sm:$0xff] %v9172_v20  ;;  %v9174_v0 = vpop.permute.xlu0 %2565  ;;  %3122 = vperm.xlu1 %7187, %v9011_v12  }
 0x2ad   : > { %12334 = vst [vmem:[#allocation58_spill] sm:$0xff] %v9174_v0  ;;  %3117 = vperm.xlu0 %7186, %v9014_v47  }
 0x2af   : > { %v9184_v42 = vpop.permute.xlu1 %2580 }
 0x2b0   : > { %12335 = vst [vmem:[#allocation59_spill] sm:$0xff] %v9184_v42  ;;  %v9186_v51 = vpop.permute.xlu0 %2575  ;;  %3132 = vperm.xlu1 %7187, %v9179_v33  }
 0x2b1   : > { %12336 = vst [vmem:[#allocation60_spill] sm:$0xff] %v9186_v51  ;;  %3127 = vperm.xlu0 %7186, %v9182_v4  }
 0x2b3   : > { %v9190_v38 = vpop.permute.xlu1 %2619 }
 0x2b4   : > { %12337 = vst [vmem:[#allocation103_spill] sm:$0xff] %v9190_v38  ;;  %v9192_v18 = vpop.permute.xlu0 %2614  ;;  %3171 = vperm.xlu1 %7187, %v9029_v43   ;;  %v9212_v43 = vld [vmem:[%s7626_s23 + $0xa2] sm:$0xff] }
 0x2b5   : > { %12338 = vst [vmem:[#allocation61_spill] sm:$0xff] %v9192_v18  ;;  %3166 = vperm.xlu0 %7186, %v9032_v28   ;;  %v9209_v18 = vld [vmem:[%s7626_s23 + $0xaa] sm:$0xff] }
 0x2b7   : > { %v9196_v0 = vpop.permute.xlu1 %2629 }
 0x2b8   : > { %12339 = vst [vmem:[#allocation62_spill] sm:$0xff] %v9196_v0  ;;  %v9198_v20 = vpop.permute.xlu0 %2624  ;;  %3181 = vperm.xlu1 %7187, %v8859_v29  }
 0x2b9   : > { %12340 = vst [vmem:[#allocation63_spill] sm:$0xff] %v9198_v20  ;;  %3176 = vperm.xlu0 %7186, %v8862_v31  }
 0x2bb   : > { %v9202_v51 = vpop.permute.xlu1 %2639 }
 0x2bc   : > { %12341 = vst [vmem:[#allocation64_spill] sm:$0xff] %v9202_v51  ;;  %v9204_v42 = vpop.permute.xlu0 %2634  ;;  %3191 = vperm.xlu1 %7187, %v9047_v22  }
 0x2bd   : > { %12342 = vst [vmem:[#allocation65_spill] sm:$0xff] %v9204_v42  ;;  %3186 = vperm.xlu0 %7186, %v9050_v7  }
 0x2bf   : > { %v9214_v28 = vpop.permute.xlu1 %2649 }
 0x2c0   : > { %12343 = vst [vmem:[#allocation66_spill] sm:$0xff] %v9214_v28  ;;  %v9216_v20 = vpop.permute.xlu0 %2644  ;;  %3201 = vperm.xlu1 %7187, %v9209_v18  }
 0x2c1   : > { %12344 = vst [vmem:[#allocation68_spill] sm:$0xff] %v9216_v20  ;;  %3196 = vperm.xlu0 %7186, %v9212_v43  }
 0x2c3   : > { %v9220_v29 = vpop.permute.xlu1 %2688 }
 0x2c4   : > { %12345 = vst [vmem:[#allocation69_spill] sm:$0xff] %v9220_v29  ;;  %v9222_v31 = vpop.permute.xlu0 %2683  ;;  %3240 = vperm.xlu1 %7187, %v9065_v30   ;;  %v9242_v30 = vld [vmem:[%s7626_s23 + $0xa3] sm:$0xff] }
 0x2c5   : > { %12346 = vst [vmem:[#allocation70_spill] sm:$0xff] %v9222_v31  ;;  %3235 = vperm.xlu0 %7186, %v9068_v5   ;;  %v9239_v31 = vld [vmem:[%s7626_s23 + $0xab] sm:$0xff] }
 0x2c7   : > { %v9226_v42 = vpop.permute.xlu1 %2698 }
 0x2c8   : > { %12347 = vst [vmem:[#allocation71_spill] sm:$0xff] %v9226_v42  ;;  %v9228_v51 = vpop.permute.xlu0 %2693  ;;  %3250 = vperm.xlu1 %7187, %v8903_v60  }
 0x2c9   : > { %12348 = vst [vmem:[#allocation72_spill] sm:$0xff] %v9228_v51  ;;  %3245 = vperm.xlu0 %7186, %v8906_v61  }
 0x2cb   : > { %v9232_v20 = vpop.permute.xlu1 %2708 }
 0x2cc   : > { %12349 = vst [vmem:[#allocation73_spill] sm:$0xff] %v9232_v20  ;;  %v9234_v28 = vpop.permute.xlu0 %2703  ;;  %3260 = vperm.xlu1 %7187, %v9083_v56  }
 0x2cd   : > { %12350 = vst [vmem:[#allocation74_spill] sm:$0xff] %v9234_v28  ;;  %3255 = vperm.xlu0 %7186, %v9086_v15  }
 0x2cf   : > { %v9244_v5 = vpop.permute.xlu1 %2718 }
 0x2d0   : > { %12351 = vst [vmem:[#allocation75_spill] sm:$0xff] %v9244_v5  ;;  %v9246_v51 = vpop.permute.xlu0 %2713  ;;  %3270 = vperm.xlu1 %7187, %v9239_v31  }
 0x2d1   : > { %12352 = vst [vmem:[#allocation78_spill] sm:$0xff] %v9246_v51  ;;  %3265 = vperm.xlu0 %7186, %v9242_v30  }
 0x2d3   : > { %v9250_v60 = vpop.permute.xlu1 %2757 }
 0x2d4   : > { %12353 = vst [vmem:[#allocation79_spill] sm:$0xff] %v9250_v60  ;;  %v9252_v61 = vpop.permute.xlu0 %2752  ;;  %3309 = vperm.xlu1 %7187, %v9101_v11   ;;  %v9269_v11 = vld [vmem:[%s7626_s23 + $0xac] sm:$0xff] }
 0x2d5   : > { %12354 = vst [vmem:[#allocation80_spill] sm:$0xff] %v9252_v61  ;;  %3304 = vperm.xlu0 %7186, %v9104_v62   ;;  %v9272_v62 = vld [vmem:[%s7626_s23 + $0xa4] sm:$0xff] }
 0x2d6   : > { %12359 = vst [vmem:[#allocation85_spill] sm:$0xff] %v9272_v62 }
 0x2d7   : > { %v9256_v28 = vpop.permute.xlu1 %2767 }
 0x2d8   : > { %12355 = vst [vmem:[#allocation81_spill] sm:$0xff] %v9256_v28  ;;  %v9258_v5 = vpop.permute.xlu0 %2762  ;;  %3319 = vperm.xlu1 %7187, %v8939_v40   ;;  %v9281_v40 = vld [vmem:[%s7626_s23 + $0x88] sm:$0xff] }
 0x2d9   : > { %12356 = vst [vmem:[#allocation82_spill] sm:$0xff] %v9258_v5  ;;  %3314 = vperm.xlu0 %7186, %v8942_v2   ;;  %v9284_v2 = vld [vmem:[%s7626_s23 + $0x80] sm:$0xff] }
 0x2db   : > { %v9262_v51 = vpop.permute.xlu1 %2777 }
 0x2dc   : > { %12357 = vst [vmem:[#allocation83_spill] sm:$0xff] %v9262_v51  ;;  %v9264_v20 = vpop.permute.xlu0 %2772  ;;  %3329 = vperm.xlu1 %7187, %v9119_v41  }
 0x2dd   : > { %12358 = vst [vmem:[#allocation84_spill] sm:$0xff] %v9264_v20  ;;  %3324 = vperm.xlu0 %7186, %v9122_v49  }
 0x2df   : > { %v9274_v61 = vpop.permute.xlu1 %2787 }
 0x2e0   : > { %12360 = vst [vmem:[#allocation86_spill] sm:$0xff] %v9274_v61  ;;  %v9276_v28 = vpop.permute.xlu0 %2782  ;;  %3339 = vperm.xlu1 %7187, %v9269_v11  }
 0x2e1   : > { %12361 = vst [vmem:[#allocation67_spill] sm:$0xff] %v9276_v28  ;;  %3334 = vperm.xlu0 %7186, %v9272_v62  }
 0x2e3   : > { %v9286_v20 = vpop.permute.xlu1 %2826 }
 0x2e4   : > { %12362 = vst [vmem:[#allocation87_spill] sm:$0xff] %v9286_v20  ;;  %v9288_v51 = vpop.permute.xlu0 %2821  ;;  %3378 = vperm.xlu1 %7187, %v9281_v40   ;;  %v9308_v20 = vld [vmem:[%s7626_s23 + $0xb0] sm:$0xff] }
 0x2e5   : > { %12363 = vst [vmem:[#allocation88_spill] sm:$0xff] %v9288_v51  ;;  %3373 = vperm.xlu0 %7186, %v9284_v2   ;;  %v9305_v51 = vld [vmem:[%s7626_s23 + $0xb8] sm:$0xff]  ;;  %12368 = vst [vmem:[#allocation93_spill] sm:$0xff] %v9308_v20 }
 0x2e7   : > { %v9292_v28 = vpop.permute.xlu1 %2836 }
 0x2e8   : > { %12364 = vst [vmem:[#allocation89_spill] sm:$0xff] %v9292_v28  ;;  %v9294_v61 = vpop.permute.xlu0 %2831  ;;  %3388 = vperm.xlu1 %7187, %v8975_v34   ;;  %v9317_v34 = vld [vmem:[%s7626_s23 + $0x89] sm:$0xff] }
 0x2e9   : > { %12365 = vst [vmem:[#allocation90_spill] sm:$0xff] %v9294_v61  ;;  %3383 = vperm.xlu0 %7186, %v8978_v35   ;;  %v9320_v35 = vld [vmem:[%s7626_s23 + $0x81] sm:$0xff] }
 0x2eb   : > { %v9298_v5 = vpop.permute.xlu1 %2846 }
 0x2ec   : > { %12366 = vst [vmem:[#allocation91_spill] sm:$0xff] %v9298_v5  ;;  %v9300_v60 = vpop.permute.xlu0 %2841  ;;  %3398 = vperm.xlu1 %7187, %v9149_v23  }
 0x2ed   : > { %12367 = vst [vmem:[#allocation92_spill] sm:$0xff] %v9300_v60  ;;  %3393 = vperm.xlu0 %7186, %v9152_v55  }
 0x2ef   : > { %v9310_v42 = vpop.permute.xlu1 %2856 }
 0x2f0   : > { %12369 = vst [vmem:[#allocation94_spill] sm:$0xff] %v9310_v42  ;;  %v9312_v28 = vpop.permute.xlu0 %2851  ;;  %3408 = vperm.xlu1 %7187, %v9305_v51  }
 0x2f1   : > { %12370 = vst [vmem:[#allocation95_spill] sm:$0xff] %v9312_v28  ;;  %3403 = vperm.xlu0 %7186, %v9308_v20  }
 0x2f3   : > { %v9322_v60 = vpop.permute.xlu1 %2895 }
 0x2f4   : > { %12371 = vst [vmem:[#allocation97_spill] sm:$0xff] %v9322_v60  ;;  %v9324_v5 = vpop.permute.xlu0 %2890  ;;  %3447 = vperm.xlu1 %7187, %v9317_v34   ;;  %v9344_v60 = vld [vmem:[%s7626_s23 + $0xb1] sm:$0xff] }
 0x2f5   : > { %12372 = vst [vmem:[#allocation98_spill] sm:$0xff] %v9324_v5  ;;  %3442 = vperm.xlu0 %7186, %v9320_v35   ;;  %v9341_v5 = vld [vmem:[%s7626_s23 + $0xb9] sm:$0xff] }
 0x2f7   : > { %v9328_v28 = vpop.permute.xlu1 %2905 }
 0x2f8   : > { %12373 = vst [vmem:[#allocation99_spill] sm:$0xff] %v9328_v28  ;;  %v9330_v42 = vpop.permute.xlu0 %2900  ;;  %3457 = vperm.xlu1 %7187, %v9011_v12   ;;  %v9353_v12 = vld [vmem:[%s7626_s23 + $0x8a] sm:$0xff] }
 0x2f9   : > { %12374 = vst [vmem:[#allocation100_spill] sm:$0xff] %v9330_v42  ;;  %3452 = vperm.xlu0 %7186, %v9014_v47   ;;  %v9356_v47 = vld [vmem:[%s7626_s23 + $0x82] sm:$0xff] }
 0x2fb   : > { %v9334_v61 = vpop.permute.xlu1 %2915 }
 0x2fc   : > { %12375 = vst [vmem:[#allocation101_spill] sm:$0xff] %v9334_v61  ;;  %v9336_v29 = vpop.permute.xlu0 %2910  ;;  %3467 = vperm.xlu1 %7187, %v9179_v33  }
 0x2fd   : > { %12376 = vst [vmem:[#allocation102_spill] sm:$0xff] %v9336_v29  ;;  %3462 = vperm.xlu0 %7186, %v9182_v4  }
 0x2ff   : > { %v9346_v0 = vpop.permute.xlu1 %2925 }
 0x300   : > { %12377 = vst [vmem:[#allocation116_spill] sm:$0xff] %v9346_v0  ;;  %v9348_v28 = vpop.permute.xlu0 %2920  ;;  %3477 = vperm.xlu1 %7187, %v9341_v5  }
 0x301   : > { %12378 = vst [vmem:[#allocation117_spill] sm:$0xff] %v9348_v28  ;;  %3472 = vperm.xlu0 %7186, %v9344_v60  }
 0x303   : > { %v9358_v29 = vpop.permute.xlu1 %2964 }
 0x304   : > { %12379 = vst [vmem:[#allocation104_spill] sm:$0xff] %v9358_v29  ;;  %v9360_v61 = vpop.permute.xlu0 %2959  ;;  %3516 = vperm.xlu1 %7187, %v9353_v12   ;;  %v9380_v29 = vld [vmem:[%s7626_s23 + $0xb2] sm:$0xff] }
 0x305   : > { %12380 = vst [vmem:[#allocation105_spill] sm:$0xff] %v9360_v61  ;;  %3511 = vperm.xlu0 %7186, %v9356_v47   ;;  %v9377_v61 = vld [vmem:[%s7626_s23 + $0xba] sm:$0xff] }
 0x307   : > { %v9364_v28 = vpop.permute.xlu1 %2974 }
 0x308   : > { %12381 = vst [vmem:[#allocation106_spill] sm:$0xff] %v9364_v28  ;;  %v9366_v0 = vpop.permute.xlu0 %2969  ;;  %3526 = vperm.xlu1 %7187, %v9047_v22   ;;  %v9389_v22 = vld [vmem:[%s7626_s23 + $0x8b] sm:$0xff] }
 0x309   : > { %12382 = vst [vmem:[#allocation107_spill] sm:$0xff] %v9366_v0  ;;  %3521 = vperm.xlu0 %7186, %v9050_v7   ;;  %v9392_v7 = vld [vmem:[%s7626_s23 + $0x83] sm:$0xff] }
 0x30b   : > { %v9370_v42 = vpop.permute.xlu1 %2984 }
 0x30c   : > { %12383 = vst [vmem:[#allocation108_spill] sm:$0xff] %v9370_v42  ;;  %v9372_v38 = vpop.permute.xlu0 %2979  ;;  %3536 = vperm.xlu1 %7187, %v9209_v18  }
 0x30d   : > { %12384 = vst [vmem:[#allocation109_spill] sm:$0xff] %v9372_v38  ;;  %3531 = vperm.xlu0 %7186, %v9212_v43  }
 0x30f   : > { %v9382_v37 = vpop.permute.xlu1 %2994 }
 0x310   : > { %12385 = vst [vmem:[#allocation110_spill] sm:$0xff] %v9382_v37  ;;  %v9384_v28 = vpop.permute.xlu0 %2989  ;;  %3546 = vperm.xlu1 %7187, %v9377_v61  }
 0x311   : > { %12386 = vst [vmem:[#allocation111_spill] sm:$0xff] %v9384_v28  ;;  %3541 = vperm.xlu0 %7186, %v9380_v29  }
 0x313   : > { %v9394_v38 = vpop.permute.xlu1 %3033 }
 0x314   : > { %12387 = vst [vmem:[#allocation112_spill] sm:$0xff] %v9394_v38  ;;  %v9396_v42 = vpop.permute.xlu0 %3028  ;;  %3585 = vperm.xlu1 %7187, %v9389_v22   ;;  %v9416_v38 = vld [vmem:[%s7626_s23 + $0xb3] sm:$0xff] }
 0x315   : > { %12388 = vst [vmem:[#allocation113_spill] sm:$0xff] %v9396_v42  ;;  %3580 = vperm.xlu0 %7186, %v9392_v7   ;;  %v9413_v42 = vld [vmem:[%s7626_s23 + $0xbb] sm:$0xff]  ;;  %12393 = vst [vmem:[#allocation120_spill] sm:$0xff] %v9416_v38 }
 0x317   : > { %v9400_v28 = vpop.permute.xlu1 %3043 }
 0x318   : > { %12389 = vst [vmem:[#allocation114_spill] sm:$0xff] %v9400_v28  ;;  %v9402_v37 = vpop.permute.xlu0 %3038  ;;  %3595 = vperm.xlu1 %7187, %v9083_v56   ;;  %v9425_v56 = vld [vmem:[%s7626_s23 + $0x8c] sm:$0xff] }
 0x319   : > { %12390 = vst [vmem:[#allocation115_spill] sm:$0xff] %v9402_v37  ;;  %3590 = vperm.xlu0 %7186, %v9086_v15   ;;  %v9428_v15 = vld [vmem:[%s7626_s23 + $0x84] sm:$0xff] }
 0x31b   : > { %v9406_v0 = vpop.permute.xlu1 %3053 }
 0x31c   : > { %12391 = vst [vmem:[#allocation118_spill] sm:$0xff] %v9406_v0  ;;  %v9408_v63 = vpop.permute.xlu0 %3048  ;;  %3605 = vperm.xlu1 %7187, %v9239_v31  }
 0x31d   : > { %12392 = vst [vmem:[#allocation119_spill] sm:$0xff] %v9408_v63  ;;  %3600 = vperm.xlu0 %7186, %v9242_v30  }
 0x31f   : > { %v9418_v17 = vpop.permute.xlu1 %3063 }
 0x320   : > { %12394 = vst [vmem:[#allocation76_spill] sm:$0xff] %v9418_v17  ;;  %v9420_v28 = vpop.permute.xlu0 %3058  ;;  %3615 = vperm.xlu1 %7187, %v9413_v42  }
 0x321   : > { %12395 = vst [vmem:[#allocation77_spill] sm:$0xff] %v9420_v28  ;;  %3610 = vperm.xlu0 %7186, %v9416_v38  }
 0x323   : > { %v9430_v63 = vpop.permute.xlu1 %3102 }
 0x324   : > { %12396 = vst [vmem:[#allocation121_spill] sm:$0xff] %v9430_v63  ;;  %v9432_v0 = vpop.permute.xlu0 %3097  ;;  %3654 = vperm.xlu1 %7187, %v9425_v56   ;;  %v9452_v63 = vld [vmem:[%s7626_s23 + $0xb4] sm:$0xff] }
 0x325   : > { %12397 = vst [vmem:[#allocation122_spill] sm:$0xff] %v9432_v0  ;;  %3649 = vperm.xlu0 %7186, %v9428_v15   ;;  %v9449_v0 = vld [vmem:[%s7626_s23 + $0xbc] sm:$0xff] }
 0x327   : > { %v9436_v17 = vpop.permute.xlu1 %3112 }
 0x328   : > { %12398 = vst [vmem:[#allocation123_spill] sm:$0xff] %v9436_v17  ;;  %v9438_v28 = vpop.permute.xlu0 %3107  ;;  %3664 = vperm.xlu1 %7187, %v9119_v41  }
 0x329   : > { %12399 = vst [vmem:[#allocation124_spill] sm:$0xff] %v9438_v28  ;;  %3659 = vperm.xlu0 %7186, %v9122_v49  }
 0x32b   : > { %v9442_v37 = vpop.permute.xlu1 %3122 }
 0x32c   : > { %12400 = vst [vmem:[#allocation125_spill] sm:$0xff] %v9442_v37  ;;  %v9444_v38 = vpop.permute.xlu0 %3117  ;;  %3674 = vperm.xlu1 %7187, %v9269_v11   ;;  %v9470_v37 = vld [vmem:[%s7626_s23 + $0x90] sm:$0xff] }
 0x32d   : > { %12401 = vst [vmem:[#allocation128_spill] sm:$0xff] %v9444_v38  ;;  %3669 = vperm.xlu0 %7186, %v9272_v62   ;;  %v9467_v38 = vld [vmem:[%s7626_s23 + $0x98] sm:$0xff] }
 0x32f   : > { %v9454_v17 = vpop.permute.xlu1 %3132 }
 0x330   : > { %v9456_v28 = vpop.permute.xlu0 %3127  ;;  %3684 = vperm.xlu1 %7187, %v9449_v0  }
 0x331   : > { %12402 = vst [vmem:[#allocation129_spill] sm:$0xff] %v9456_v28  ;;  %3679 = vperm.xlu0 %7186, %v9452_v63  }
 0x333   : > { %v9460_v41 = vpop.permute.xlu1 %3171 }
 0x334   : > { %12403 = vst [vmem:[#allocation126_spill] sm:$0xff] %v9460_v41  ;;  %v9462_v49 = vpop.permute.xlu0 %3166  ;;  %3754 = vperm.xlu1 %7187, %v9281_v40  }
 0x335   : > { %12404 = vst [vmem:[#allocation127_spill] sm:$0xff] %v9462_v49  ;;  %3749 = vperm.xlu0 %7186, %v9284_v2  }
 0x337   : > { %v9472_v62 = vpop.permute.xlu1 %3181 }
 0x338   : > { %12405 = vst [vmem:[#allocation12_spill] sm:$0xff] %v9472_v62  ;;  %v9474_v28 = vpop.permute.xlu0 %3176  ;;  %3764 = vperm.xlu1 %7187, %v9467_v38  }
 0x339   : > { %12406 = vst [vmem:[#allocation9_spill] sm:$0xff] %v9474_v28  ;;  %3759 = vperm.xlu0 %7186, %v9470_v37  }
 0x33b   : > { %v9478_v41 = vpop.permute.xlu1 %3191 }
 0x33c   : > { %12407 = vst [vmem:[#allocation15_spill] sm:$0xff] %v9478_v41  ;;  %v9480_v49 = vpop.permute.xlu0 %3186  ;;  %3774 = vperm.xlu1 %7187, %v9149_v23   ;;  %v9500_v23 = vld [vmem:[%s7626_s23 + $0x91] sm:$0xff] }
 0x33d   : > { %12408 = vst [vmem:[#allocation16_spill] sm:$0xff] %v9480_v49  ;;  %3769 = vperm.xlu0 %7186, %v9152_v55   ;;  %v9497_v49 = vld [vmem:[%s7626_s23 + $0x99] sm:$0xff]  ;;  %12414 = vst [vmem:[#allocation18_spill] sm:$0xff] %v9500_v23 }
 0x33e   : > { %12413 = vst [vmem:[#allocation17_spill] sm:$0xff] %v9497_v49 }
 0x33f   : > { %v9484_v40 = vpop.permute.xlu1 %3201 }
 0x340   : > { %12409 = vst [vmem:[#allocation10_spill] sm:$0xff] %v9484_v40  ;;  %v9486_v2 = vpop.permute.xlu0 %3196  ;;  %3784 = vperm.xlu1 %7187, %v9305_v51  }
 0x341   : > { %12410 = vst [vmem:[#allocation11_spill] sm:$0xff] %v9486_v2  ;;  %3779 = vperm.xlu0 %7186, %v9308_v20  }
 0x343   : > { %v9490_v28 = vpop.permute.xlu1 %3240 }
 0x344   : > { %12411 = vst [vmem:[#allocation3_spill] sm:$0xff] %v9490_v28  ;;  %v9492_v62 = vpop.permute.xlu0 %3235  ;;  %3823 = vperm.xlu1 %7187, %v9317_v34   ;;  %v6790_v34 = vld [vmem:[%s11970_s1 + $0x1] ss:$0 sm:$0xff] }
 0x345   : > { %12412 = vst [vmem:[#allocation4_spill] sm:$0xff] %v9492_v62  ;;  %3818 = vperm.xlu0 %7186, %v9320_v35   ;;  %v6789_v62 = vld [vmem:[%s11970_s1] ss:$0 sm:$0xff] }
 0x346   : > { %v2038_v2 = vmul.f32 %v6789_v62, %v8888_v19  ;;  %v2037_v41 = vmul.f32 %v6789_v62, %v8890_v59  ;;  %v2042_v19 = vmul.f32 %v6789_v62, %v8908_v50  ;;  %v2041_v59 = vmul.f32 %v6789_v62, %v8910_v14 }
 0x347   : > { %v9502_v55 = vpop.permute.xlu1 %3250 }
 0x348   : > { %12415 = vst [vmem:[#allocation5_spill] sm:$0xff] %v9502_v55  ;;  %v9504_v40 = vpop.permute.xlu0 %3245  ;;  %3833 = vperm.xlu1 %7187, %v9497_v49   ;;  %v2035_v49 = vmul.f32 %v6789_v62, %v8874_v36  ;;  %v2104_v55 = vmul.f32 %v6790_v34, %v8916_v32  ;;  %v2040_v36 = vmul.f32 %v6789_v62, %v8896_v16 }
 0x349   : > { %12416 = vst [vmem:[#allocation6_spill] sm:$0xff] %v9504_v40  ;;  %3828 = vperm.xlu0 %7186, %v9500_v23   ;;  %v2036_v40 = vmul.f32 %v6789_v62, %v8872_v9  ;;  %v2105_v23 = vmul.f32 %v6790_v34, %v8914_v25  ;;  %v6791_v9 = vld [vmem:[%s11970_s1 + $0x2] ss:$0 sm:$0xff]  ;;  %v2039_v25 = vmul.f32 %v6789_v62, %v8898_v6 }
 0x34a   : > { %v2109_v32 = vmul.f32 %v6790_v34, %v8932_v54  ;;  %v2112_v6 = vadd.f32 %v2104_v55, %v2035_v49  ;;  %v2174_v54 = vmul.f32 %v6791_v9, %v8950_v48  ;;  %v2176_v14 = vmul.f32 %v6791_v9, %v8962_v57 }
 0x34b   : > { %v9514_v35 = vpop.permute.xlu1 %3260  ;;  %v2113_v16 = vadd.f32 %v2105_v23, %v2036_v40  ;;  %v2178_v49 = vmul.f32 %v6791_v9, %v8968_v3  ;;  %v2177_v48 = vmul.f32 %v6791_v9, %v8970_v24  ;;  %v2180_v57 = vmul.f32 %v6791_v9, %v8980_v53  ;;  %v9565_v24 = vld [vmem:[%s7626_s23 + $0x9a] sm:$0xff] }
 0x34c   : > { %12417 = vst [vmem:[#allocation7_spill] sm:$0xff] %v9514_v35  ;;  %v9516_v28 = vpop.permute.xlu0 %3255  ;;  %3843 = vperm.xlu1 %7187, %v9179_v33   ;;  %v2107_v35 = vmul.f32 %v6790_v34, %v8926_v21  ;;  %v2108_v33 = vmul.f32 %v6790_v34, %v8934_v8  ;;  %v2111_v21 = vmul.f32 %v6790_v34, %v8944_v52  ;;  %12420 = vst [vmem:[#allocation14_spill] sm:$0xff] %v9565_v24 }
 0x34d   : > { %12418 = vst [vmem:[#allocation8_spill] sm:$0xff] %v9516_v28  ;;  %3838 = vperm.xlu0 %7186, %v9182_v4   ;;  %v2106_v28 = vmul.f32 %v6790_v34, %v8928_v27  ;;  %v2110_v27 = vmul.f32 %v6790_v34, %v8946_v39  ;;  %v2173_v8 = vmul.f32 %v6791_v9, %v8952_v44  ;;  %v6792_v39 = vld [vmem:[%s11970_s1 + $0x3] ss:$0 sm:$0xff] }
 0x34e   : > { %v2175_v52 = vmul.f32 %v6791_v9, %v8964_v10  ;;  %v2117_v62 = vadd.f32 %v2109_v32, %v2040_v36  ;;  %v2179_v10 = vmul.f32 %v6791_v9, %v8982_v45  ;;  %v2243_v23 = vmul.f32 %v6792_v39, %v8986_v26  ;;  %v12422_v36 = vld [vmem:[#allocation19_spill] sm:$0xff] }
 0x34f   : > { %v9535_v4 = vpop.permute.xlu1 %3270  ;;  %v2114_v50 = vadd.f32 %v2106_v28, %v2037_v41  ;;  %v2118_v40 = vadd.f32 %v2110_v27, %v2041_v59  ;;  %v2182_v41 = vadd.f32 %v2174_v54, %v2113_v16  ;;  %v2242_v3 = vmul.f32 %v6792_v39, %v8988_v46  ;;  %v12425_v59 = vld [vmem:[#allocation22_spill] sm:$0xff] }
 0x350   : > { %12419 = vst [vmem:[#allocation13_spill] sm:$0xff] %v9535_v4  ;;  %v9541_v20 = vpop.permute.xlu0 %3265  ;;  %3853 = vperm.xlu1 %7187, %v9341_v5   ;;  %v2115_v4 = vadd.f32 %v2107_v35, %v2038_v2  ;;  %v2116_v5 = vadd.f32 %v2108_v33, %v2039_v25  ;;  %v2181_v2 = vadd.f32 %v2173_v8, %v2112_v6  ;;  %v9573_v35 = vld [vmem:[%s7626_s23 + $0x92] sm:$0xff]  ;;  %v12423_v25 = vld [vmem:[#allocation20_spill] sm:$0xff]  ;;  %v12426_v6 = vld [vmem:[#allocation23_spill] sm:$0xff] }
 0x351   : > { %3848 = vperm.xlu0 %7186, %v9344_v60   ;;  %v2119_v60 = vadd.f32 %v2111_v21, %v2042_v19  ;;  %v2183_v34 = vadd.f32 %v2175_v52, %v2114_v50  ;;  %v2245_v53 = vmul.f32 %v6792_v39, %v8998_v58  ;;  %v2244_v45 = vmul.f32 %v6792_v39, %v9000_v13  ;;  %v12424_v19 = vld [vmem:[#allocation21_spill] sm:$0xff]  ;;  %v12427_v8 = vld [vmem:[#allocation24_spill] sm:$0xff] }
 0x352   : > { %v2184_v55 = vadd.f32 %v2176_v14, %v2115_v4  ;;  %12421 = vst [vmem:[#allocation130_spill] sm:$0xff] %v9573_v35  ;;  %v2186_v9 = vadd.f32 %v2178_v49, %v2117_v62  ;;  %v2185_v26 = vadd.f32 %v2177_v48, %v2116_v5  ;;  %v2247_v46 = vmul.f32 %v6792_v39, %v12422_v36  ;;  %v12428_v62 = vld [vmem:[#allocation25_spill] sm:$0xff]  ;;  %v12429_v49 = vld [vmem:[#allocation26_spill] sm:$0xff] }
 0x353   : > { %v9554_v44 = vpop.permute.xlu1 %3309  ;;  %v2188_v33 = vadd.f32 %v2180_v57, %v2119_v60  ;;  %v2187_v4 = vadd.f32 %v2179_v10, %v2118_v40  ;;  %v2249_v58 = vmul.f32 %v6792_v39, %v12424_v19  ;;  %v2248_v13 = vmul.f32 %v6792_v39, %v12425_v59  ;;  %v12430_v57 = vld [vmem:[#allocation27_spill] sm:$0xff] }
 0x354   : > { %v9558_v28 = vpop.permute.xlu0 %3304  ;;  %3892 = vperm.xlu1 %7187, %v9353_v12   ;;  %v6793_v12 = vld [vmem:[%s11970_s1 + $0x4] ss:$0 sm:$0xff]  ;;  %v2251_v27 = vadd.f32 %v2243_v23, %v2182_v41  ;;  %v2250_v16 = vadd.f32 %v2242_v3, %v2181_v2  ;;  %v2253_v14 = vadd.f32 %v2245_v53, %v2184_v55  ;;  %v2252_v52 = vadd.f32 %v2244_v45, %v2183_v34  ;;  %v12431_v41 = vld [vmem:[#allocation28_spill] sm:$0xff]  ;;  %v12432_v55 = vld [vmem:[#allocation29_spill] sm:$0xff] }
 0x355   : > { %3887 = vperm.xlu0 %7186, %v9356_v47   ;;  %v2246_v47 = vmul.f32 %v6792_v39, %v12423_v25  ;;  %v2312_v54 = vmul.f32 %v6793_v12, %v12426_v6  ;;  %v2311_v50 = vmul.f32 %v6793_v12, %v12427_v8  ;;  %v2314_v5 = vmul.f32 %v6793_v12, %v12428_v62  ;;  %v6794_v39 = vld [vmem:[%s11970_s1 + $0x5] ss:$0 sm:$0xff]  ;;  %v12433_v53 = vld [vmem:[#allocation30_spill] sm:$0xff] }
 0x356   : > { %v2313_v48 = vmul.f32 %v6793_v12, %v12429_v49  ;;  %v2255_v60 = vadd.f32 %v2247_v46, %v2186_v9  ;;  %v2316_v10 = vmul.f32 %v6793_v12, %v12430_v57  ;;  %v2315_v2 = vmul.f32 %v6793_v12, %v12431_v41  ;;  %v12434_v9 = vld [vmem:[#allocation31_spill] sm:$0xff]  ;;  %v12435_v46 = vld [vmem:[#allocation32_spill] sm:$0xff] }
 0x357   : > { %v9577_v32 = vpop.permute.xlu1 %3319  ;;  %v2254_v40 = vadd.f32 %v2246_v47, %v2185_v26  ;;  %v2257_v3 = vadd.f32 %v2249_v58, %v2188_v33  ;;  %v2256_v36 = vadd.f32 %v2248_v13, %v2187_v4  ;;  %v2318_v34 = vmul.f32 %v6793_v12, %v12432_v55  ;;  %v12436_v33 = vld [vmem:[#allocation33_spill] sm:$0xff]  ;;  %v12437_v58 = vld [vmem:[#allocation34_spill] sm:$0xff] }
 0x358   : > { %v9581_v21 = vpop.permute.xlu0 %3314  ;;  %3902 = vperm.xlu1 %7187, %v9565_v24   ;;  %v2317_v45 = vmul.f32 %v6793_v12, %v12433_v53  ;;  %v2320_v19 = vadd.f32 %v2312_v54, %v2251_v27  ;;  %v2319_v59 = vadd.f32 %v2311_v50, %v2250_v16  ;;  %v2381_v26 = vmul.f32 %v6794_v39, %v12434_v9  ;;  %v6795_v12 = vld [vmem:[%s11970_s1 + $0x6] ss:$0 sm:$0xff]  ;;  %v12439_v54 = vld [vmem:[#allocation36_spill] sm:$0xff] }
 0x359   : > { %3897 = vperm.xlu0 %7186, %v9573_v35   ;;  %v2380_v47 = vmul.f32 %v6794_v39, %v12435_v46  ;;  %v2322_v6 = vadd.f32 %v2314_v5, %v2253_v14  ;;  %v2321_v8 = vadd.f32 %v2313_v48, %v2252_v52  ;;  %v2383_v4 = vmul.f32 %v6794_v39, %v12436_v33  ;;  %v12438_v27 = vld [vmem:[#allocation35_spill] sm:$0xff]  ;;  %v12440_v14 = vld [vmem:[#allocation37_spill] sm:$0xff]  ;;  %v12441_v5 = vld [vmem:[#allocation38_spill] sm:$0xff] }
 0x35a   : > { %v2382_v13 = vmul.f32 %v6794_v39, %v12437_v58  ;;  %v2324_v62 = vadd.f32 %v2316_v10, %v2255_v60  ;;  %v2385_v16 = vmul.f32 %v6794_v39, %v12438_v27  ;;  %v2384_v50 = vmul.f32 %v6794_v39, %v12439_v54  ;;  %v12442_v60 = vld [vmem:[#allocation96_spill] sm:$0xff]  ;;  %v12443_v10 = vld [vmem:[#allocation39_spill] sm:$0xff] }
 0x35b   : > { %v9594_v23 = vpop.permute.xlu1 %3329  ;;  %v2326_v57 = vadd.f32 %v2318_v34, %v2257_v3  ;;  %v2387_v52 = vmul.f32 %v6794_v39, %v12440_v14  ;;  %v2386_v48 = vmul.f32 %v6794_v39, %v12441_v5  ;;  %v2389_v55 = vadd.f32 %v2381_v26, %v2320_v19  ;;  %v12444_v3 = vld [vmem:[#allocation40_spill] sm:$0xff]  ;;  %v12445_v34 = vld [vmem:[#allocation41_spill] sm:$0xff]  ;;  %v6796_v39 = vld [vmem:[%s11970_s1 + $0x7] ss:$0 sm:$0xff] }
 0x35c   : > { %v9598_v25 = vpop.permute.xlu0 %3324  ;;  %3912 = vperm.xlu1 %7187, %v9209_v18   ;;  %v2323_v18 = vadd.f32 %v2315_v2, %v2254_v40  ;;  %v2388_v53 = vadd.f32 %v2380_v47, %v2319_v59  ;;  %v2450_v40 = vmul.f32 %v6795_v12, %v12442_v60  ;;  %v2449_v2 = vmul.f32 %v6795_v12, %v12443_v10  ;;  %v12446_v19 = vld [vmem:[#allocation42_spill] sm:$0xff]  ;;  %v12447_v26 = vld [vmem:[#allocation43_spill] sm:$0xff]  ;;  %v12453_v60 = vld [vmem:[#allocation48_spill] sm:$0xff] }
 0x35d   : > { %3907 = vperm.xlu0 %7186, %v9212_v43   ;;  %v2325_v43 = vadd.f32 %v2317_v45, %v2256_v36  ;;  %v2391_v9 = vadd.f32 %v2383_v4, %v2322_v6  ;;  %v2390_v46 = vadd.f32 %v2382_v13, %v2321_v8  ;;  %v2452_v36 = vmul.f32 %v6795_v12, %v12444_v3  ;;  %v12448_v8 = vld [vmem:[#allocation44_spill] sm:$0xff]  ;;  %v12449_v13 = vld [vmem:[#allocation45_spill] sm:$0xff]  ;;  %v9639_v5 = vld [vmem:[%s7626_s23 + $0x9b] sm:$0xff] }
 0x35e   : > { %v2451_v45 = vmul.f32 %v6795_v12, %v12445_v34  ;;  %v2393_v33 = vadd.f32 %v2385_v16, %v2324_v62  ;;  %v2454_v59 = vmul.f32 %v6795_v12, %v12446_v19  ;;  %v2453_v47 = vmul.f32 %v6795_v12, %v12447_v26  ;;  %12451 = vst [vmem:[#allocation19_spill] sm:$0xff] %v9639_v5 }
 0x35f   : > { %v9611_v49 = vpop.permute.xlu1 %3339  ;;  %v2394_v6 = vadd.f32 %v2386_v48, %v2325_v43  ;;  %v2456_v4 = vmul.f32 %v6795_v12, %v12448_v8  ;;  %v2455_v27 = vmul.f32 %v6795_v12, %v12449_v13  ;;  %v2458_v62 = vadd.f32 %v2450_v40, %v2389_v55  ;;  %v9647_v55 = vld [vmem:[%s7626_s23 + $0x93] sm:$0xff] }
 0x360   : > { %v9615_v41 = vpop.permute.xlu0 %3334  ;;  %3922 = vperm.xlu1 %7187, %v9377_v61   ;;  %v2392_v61 = vadd.f32 %v2384_v50, %v2323_v18  ;;  %v2457_v16 = vadd.f32 %v2449_v2, %v2388_v53  ;;  %v2519_v18 = vmul.f32 %v6796_v39, %v9130_v1  ;;  %v12450_v50 = vld [vmem:[#allocation46_spill] sm:$0xff]  ;;  %v2459_v43 = vadd.f32 %v2451_v45, %v2390_v46  ;;  %v12455_v40 = vld [vmem:[#allocation49_spill] sm:$0xff]  ;;  %v12458_v45 = vld [vmem:[#allocation52_spill] sm:$0xff] }
 0x361   : > { %3917 = vperm.xlu0 %7186, %v9380_v29   ;;  %v2395_v29 = vadd.f32 %v2387_v52, %v2326_v57  ;;  %v2518_v14 = vmul.f32 %v6796_v39, %v12450_v50  ;;  %v2460_v57 = vadd.f32 %v2452_v36, %v2391_v9  ;;  %v12452_v52 = vld [vmem:[#allocation47_spill] sm:$0xff]  ;;  %v2520_v12 = vmul.f32 %v6796_v39, %v12453_v60  ;;  %v12456_v2 = vld [vmem:[#allocation50_spill] sm:$0xff] }
 0x362   : > { %v2521_v48 = vmul.f32 %v6796_v39, %v12452_v52  ;;  %12454 = vst [vmem:[#allocation20_spill] sm:$0xff] %v9647_v55  ;;  %v2462_v53 = vadd.f32 %v2454_v59, %v2393_v33  ;;  %v2461_v1 = vadd.f32 %v2453_v47, %v2392_v61  ;;  %v2523_v10 = vmul.f32 %v6796_v39, %v12455_v40  ;;  %v12457_v36 = vld [vmem:[#allocation51_spill] sm:$0xff]  ;;  %v12459_v33 = vld [vmem:[#allocation53_spill] sm:$0xff]  ;;  %v12460_v59 = vld [vmem:[#allocation54_spill] sm:$0xff] }
 0x363   : > { %v9628_v58 = vpop.permute.xlu1 %3378  ;;  %v2464_v9 = vadd.f32 %v2456_v4, %v2395_v29  ;;  %v2463_v46 = vadd.f32 %v2455_v27, %v2394_v6  ;;  %v2525_v34 = vmul.f32 %v6796_v39, %v12457_v36  ;;  %v2524_v19 = vmul.f32 %v6796_v39, %v12458_v45  ;;  %v12461_v29 = vld [vmem:[#allocation55_spill] sm:$0xff]  ;;  %v12462_v4 = vld [vmem:[#allocation56_spill] sm:$0xff] }
 0x364   : > { %v9632_v54 = vpop.permute.xlu0 %3373  ;;  %3961 = vperm.xlu1 %7187, %v9389_v22   ;;  %v6797_v22 = vld [vmem:[%s11970_s1 + $0x8] ss:$0 sm:$0xff]  ;;  %v2527_v8 = vadd.f32 %v2519_v18, %v2458_v62  ;;  %v2526_v13 = vadd.f32 %v2518_v14, %v2457_v16  ;;  %v2529_v50 = vadd.f32 %v2521_v48, %v2460_v57  ;;  %v2528_v52 = vadd.f32 %v2520_v12, %v2459_v43  ;;  %v12463_v62 = vld [vmem:[#allocation57_spill] sm:$0xff]  ;;  %v12464_v18 = vld [vmem:[#allocation58_spill] sm:$0xff] }
 0x365   : > { %3956 = vperm.xlu0 %7186, %v9392_v7   ;;  %v2522_v7 = vmul.f32 %v6796_v39, %v12456_v2  ;;  %v2588_v61 = vmul.f32 %v6797_v22, %v12459_v33  ;;  %v2587_v47 = vmul.f32 %v6797_v22, %v12460_v59  ;;  %v2590_v6 = vmul.f32 %v6797_v22, %v12461_v29  ;;  %v6798_v39 = vld [vmem:[%s11970_s1 + $0x9] ss:$0 sm:$0xff]  ;;  %v12465_v57 = vld [vmem:[#allocation59_spill] sm:$0xff] }
 0x366   : > { %v2589_v27 = vmul.f32 %v6797_v22, %v12462_v4  ;;  %v2531_v60 = vadd.f32 %v2523_v10, %v2462_v53  ;;  %v2592_v16 = vmul.f32 %v6797_v22, %v12463_v62  ;;  %v2591_v14 = vmul.f32 %v6797_v22, %v12464_v18  ;;  %v12466_v48 = vld [vmem:[#allocation60_spill] sm:$0xff]  ;;  %v12467_v53 = vld [vmem:[#allocation103_spill] sm:$0xff]  ;;  %v12468_v10 = vld [vmem:[#allocation61_spill] sm:$0xff] }
 0x367   : > { %v9651_v3 = vpop.permute.xlu1 %3388  ;;  %v2530_v40 = vadd.f32 %v2522_v7, %v2461_v1  ;;  %v2533_v36 = vadd.f32 %v2525_v34, %v2464_v9  ;;  %v2532_v45 = vadd.f32 %v2524_v19, %v2463_v46  ;;  %v2594_v43 = vmul.f32 %v6797_v22, %v12465_v57  ;;  %v12469_v9 = vld [vmem:[#allocation62_spill] sm:$0xff]  ;;  %v12470_v34 = vld [vmem:[#allocation63_spill] sm:$0xff] }
 0x368   : > { %v9655_v26 = vpop.permute.xlu0 %3383  ;;  %3971 = vperm.xlu1 %7187, %v9639_v5   ;;  %v2593_v12 = vmul.f32 %v6797_v22, %v12466_v48  ;;  %v2596_v59 = vadd.f32 %v2588_v61, %v2527_v8  ;;  %v2595_v29 = vadd.f32 %v2587_v47, %v2526_v13  ;;  %v2657_v1 = vmul.f32 %v6798_v39, %v12467_v53  ;;  %v6799_v22 = vld [vmem:[%s11970_s1 + $0xa] ss:$0 sm:$0xff]  ;;  %v12472_v61 = vld [vmem:[#allocation65_spill] sm:$0xff] }
 0x369   : > { %3966 = vperm.xlu0 %7186, %v9647_v55   ;;  %v2656_v7 = vmul.f32 %v6798_v39, %v12468_v10  ;;  %v2598_v4 = vadd.f32 %v2590_v6, %v2529_v50  ;;  %v2597_v62 = vadd.f32 %v2589_v27, %v2528_v52  ;;  %v2659_v46 = vmul.f32 %v6798_v39, %v12469_v9  ;;  %v12471_v8 = vld [vmem:[#allocation64_spill] sm:$0xff]  ;;  %v12473_v50 = vld [vmem:[#allocation66_spill] sm:$0xff] }
 0x36a   : > { %v2658_v19 = vmul.f32 %v6798_v39, %v12470_v34  ;;  %v2600_v18 = vadd.f32 %v2592_v16, %v2531_v60  ;;  %v2661_v13 = vmul.f32 %v6798_v39, %v12471_v8  ;;  %v2660_v47 = vmul.f32 %v6798_v39, %v12472_v61  ;;  %v12474_v6 = vld [vmem:[#allocation68_spill] sm:$0xff]  ;;  %v12475_v60 = vld [vmem:[#allocation69_spill] sm:$0xff]  ;;  %v12476_v16 = vld [vmem:[#allocation70_spill] sm:$0xff] }
 0x36b   : > { %v9668_v2 = vpop.permute.xlu1 %3398  ;;  %v2602_v48 = vadd.f32 %v2594_v43, %v2533_v36  ;;  %v2663_v52 = vmul.f32 %v6798_v39, %v12473_v50  ;;  %v2662_v27 = vmul.f32 %v6798_v39, %v12474_v6  ;;  %v2665_v10 = vadd.f32 %v2657_v1, %v2596_v59  ;;  %v12477_v34 = vld [vmem:[#allocation120_spill] sm:$0xff]  ;;  %v12478_v36 = vld [vmem:[#allocation71_spill] sm:$0xff]  ;;  %v12480_v59 = vld [vmem:[#allocation73_spill] sm:$0xff] }
 0x36c   : > { %v9672_v33 = vpop.permute.xlu0 %3393  ;;  %3981 = vperm.xlu1 %7187, %v9239_v31   ;;  %v2599_v31 = vadd.f32 %v2591_v14, %v2530_v40  ;;  %v2664_v9 = vadd.f32 %v2656_v7, %v2595_v29  ;;  %v2726_v40 = vmul.f32 %v6799_v22, %v12475_v60  ;;  %v2725_v14 = vmul.f32 %v6799_v22, %v12476_v16  ;;  %v12479_v43 = vld [vmem:[#allocation72_spill] sm:$0xff]  ;;  %v12481_v1 = vld [vmem:[#allocation74_spill] sm:$0xff] }
 0x36d   : > { %3976 = vperm.xlu0 %7186, %v9242_v30   ;;  %v2601_v30 = vadd.f32 %v2593_v12, %v2532_v45  ;;  %v2667_v8 = vadd.f32 %v2659_v46, %v2598_v4  ;;  %v2666_v61 = vadd.f32 %v2658_v19, %v2597_v62  ;;  %v2728_v45 = vmul.f32 %v6799_v22, %v12478_v36  ;;  %v6800_v39 = vld [vmem:[%s11970_s1 + $0xb] ss:$0 sm:$0xff]  ;;  %v12482_v62 = vld [vmem:[#allocation75_spill] sm:$0xff]  ;;  %v12483_v19 = vld [vmem:[#allocation78_spill] sm:$0xff] }
 0x36e   : > { %v2727_v12 = vmul.f32 %v6799_v22, %v12479_v43  ;;  %v2669_v50 = vadd.f32 %v2661_v13, %v2600_v18  ;;  %v2730_v29 = vmul.f32 %v6799_v22, %v12480_v59  ;;  %v2729_v7 = vmul.f32 %v6799_v22, %v12481_v1  ;;  %v12485_v36 = vld [vmem:[#allocation80_spill] sm:$0xff]  ;;  %v9713_v59 = vld [vmem:[%s7626_s23 + $0x9c] sm:$0xff] }
 0x36f   : > { %v9685_v57 = vpop.permute.xlu1 %3408  ;;  %v2671_v60 = vadd.f32 %v2663_v52, %v2602_v48  ;;  %v2670_v4 = vadd.f32 %v2662_v27, %v2601_v30  ;;  %v2732_v46 = vmul.f32 %v6799_v22, %v12482_v62  ;;  %v2731_v16 = vmul.f32 %v6799_v22, %v12483_v19  ;;  %12486 = vst [vmem:[#allocation21_spill] sm:$0xff] %v9713_v59  ;;  %v12487_v52 = vld [vmem:[#allocation81_spill] sm:$0xff]  ;;  %v12488_v1 = vld [vmem:[#allocation82_spill] sm:$0xff]  ;;  %v12491_v19 = vld [vmem:[#allocation84_spill] sm:$0xff] }
 0x370   : > { %v9689_v53 = vpop.permute.xlu0 %3403  ;;  %3991 = vperm.xlu1 %7187, %v9413_v42   ;;  %v2668_v42 = vadd.f32 %v2660_v47, %v2599_v31  ;;  %v2734_v18 = vadd.f32 %v2726_v40, %v2665_v10  ;;  %v2733_v13 = vadd.f32 %v2725_v14, %v2664_v9  ;;  %v12484_v31 = vld [vmem:[#allocation79_spill] sm:$0xff]  ;;  %v2794_v43 = vmul.f32 %v6800_v39, %v12485_v36  ;;  %v9721_v10 = vld [vmem:[%s7626_s23 + $0x94] sm:$0xff] }
 0x371   : > { %3986 = vperm.xlu0 %7186, %v12477_v34   ;;  %v2795_v47 = vmul.f32 %v6800_v39, %v12484_v31  ;;  %v2736_v48 = vadd.f32 %v2728_v45, %v2667_v8  ;;  %v2735_v30 = vadd.f32 %v2727_v12, %v2666_v61  ;;  %v2797_v27 = vmul.f32 %v6800_v39, %v12487_v52  ;;  %v12490_v14 = vld [vmem:[#allocation83_spill] sm:$0xff]  ;;  %v12492_v45 = vld [vmem:[#allocation86_spill] sm:$0xff] }
 0x372   : > { %v2796_v22 = vmul.f32 %v6800_v39, %v12488_v1  ;;  %12489 = vst [vmem:[#allocation22_spill] sm:$0xff] %v9721_v10  ;;  %v2738_v9 = vadd.f32 %v2730_v29, %v2669_v50  ;;  %v2737_v40 = vadd.f32 %v2729_v7, %v2668_v42  ;;  %v2799_v62 = vmul.f32 %v6800_v39, %v12490_v14  ;;  %v12493_v36 = vld [vmem:[#allocation67_spill] sm:$0xff]  ;;  %v12495_v29 = vld [vmem:[#allocation88_spill] sm:$0xff] }
 0x373   : > { %v9702_v6 = vpop.permute.xlu1 %3447  ;;  %v2740_v8 = vadd.f32 %v2732_v46, %v2671_v60  ;;  %v2739_v61 = vadd.f32 %v2731_v16, %v2670_v4  ;;  %v2801_v12 = vmul.f32 %v6800_v39, %v12492_v45  ;;  %v2800_v52 = vmul.f32 %v6800_v39, %v12493_v36  ;;  %v12494_v50 = vld [vmem:[#allocation87_spill] sm:$0xff]  ;;  %v12496_v60 = vld [vmem:[#allocation89_spill] sm:$0xff]  ;;  %v12497_v46 = vld [vmem:[#allocation90_spill] sm:$0xff] }
 0x374   : > { %v9706_v34 = vpop.permute.xlu0 %3442  ;;  %4030 = vperm.xlu1 %7187, %v9425_v56   ;;  %v6801_v56 = vld [vmem:[%s11970_s1 + $0xc] ss:$0 sm:$0xff]  ;;  %v2803_v55 = vadd.f32 %v2795_v47, %v2734_v18  ;;  %v2802_v5 = vadd.f32 %v2794_v43, %v2733_v13  ;;  %v2805_v14 = vadd.f32 %v2797_v27, %v2736_v48  ;;  %v2807_v45 = vadd.f32 %v2799_v62, %v2738_v9  ;;  %v12498_v18 = vld [vmem:[#allocation91_spill] sm:$0xff]  ;;  %v12500_v48 = vld [vmem:[#allocation94_spill] sm:$0xff] }
 0x375   : > { %4025 = vperm.xlu0 %7186, %v9428_v15   ;;  %v2798_v15 = vmul.f32 %v6800_v39, %v12491_v19  ;;  %v2864_v42 = vmul.f32 %v6801_v56, %v12494_v50  ;;  %v2863_v7 = vmul.f32 %v6801_v56, %v12495_v29  ;;  %v2804_v19 = vadd.f32 %v2796_v22, %v2735_v30  ;;  %v6802_v39 = vld [vmem:[%s11970_s1 + $0xd] ss:$0 sm:$0xff]  ;;  %v12501_v27 = vld [vmem:[#allocation95_spill] sm:$0xff]  ;;  %v12502_v9 = vld [vmem:[#allocation97_spill] sm:$0xff] }
 0x376   : > { %v2866_v4 = vmul.f32 %v6801_v56, %v12496_v60  ;;  %v2865_v16 = vmul.f32 %v6801_v56, %v12497_v46  ;;  %v2868_v13 = vmul.f32 %v6801_v56, %v12498_v18  ;;  %v12499_v47 = vld [vmem:[#allocation92_spill] sm:$0xff]  ;;  %v2809_v29 = vadd.f32 %v2801_v12, %v2740_v8  ;;  %v12503_v62 = vld [vmem:[#allocation98_spill] sm:$0xff]  ;;  %v12504_v18 = vld [vmem:[#allocation85_spill] sm:$0xff] }
 0x377   : > { %v9725_v31 = vpop.permute.xlu1 %3457  ;;  %v2806_v36 = vadd.f32 %v2798_v15, %v2737_v40  ;;  %v2867_v43 = vmul.f32 %v6801_v56, %v12499_v47  ;;  %v2870_v30 = vmul.f32 %v6801_v56, %v12500_v48  ;;  %v2869_v22 = vmul.f32 %v6801_v56, %v12501_v27  ;;  %v12505_v8 = vld [vmem:[#allocation99_spill] sm:$0xff]  ;;  %v12506_v12 = vld [vmem:[#allocation100_spill] sm:$0xff] }
 0x378   : > { %v9729_v1 = vpop.permute.xlu0 %3452  ;;  %4040 = vperm.xlu1 %7187, %v9713_v59   ;;  %v2872_v46 = vadd.f32 %v2864_v42, %v2803_v55  ;;  %v2871_v59 = vadd.f32 %v2863_v7, %v2802_v5  ;;  %v2933_v40 = vmul.f32 %v6802_v39, %v12502_v9  ;;  %v2932_v15 = vmul.f32 %v6802_v39, %v12503_v62  ;;  %v6803_v56 = vld [vmem:[%s11970_s1 + $0xe] ss:$0 sm:$0xff]  ;;  %v12507_v55 = vld [vmem:[#allocation101_spill] sm:$0xff]  ;;  %v12508_v42 = vld [vmem:[#allocation102_spill] sm:$0xff] }
 0x379   : > { %4035 = vperm.xlu0 %7186, %v9721_v10   ;;  %v2808_v10 = vadd.f32 %v2800_v52, %v2739_v61  ;;  %v2874_v47 = vadd.f32 %v2866_v4, %v2805_v14  ;;  %v2873_v35 = vadd.f32 %v2865_v16, %v2804_v19  ;;  %v2935_v61 = vmul.f32 %v6802_v39, %v12505_v8  ;;  %v12509_v14 = vld [vmem:[#allocation116_spill] sm:$0xff]  ;;  %v12510_v4 = vld [vmem:[#allocation117_spill] sm:$0xff] }
 0x37a   : > { %v2934_v52 = vmul.f32 %v6802_v39, %v12506_v12  ;;  %v2876_v48 = vadd.f32 %v2868_v13, %v2807_v45  ;;  %v2937_v5 = vmul.f32 %v6802_v39, %v12507_v55  ;;  %v2936_v7 = vmul.f32 %v6802_v39, %v12508_v42  ;;  %v12512_v45 = vld [vmem:[#allocation104_spill] sm:$0xff]  ;;  %v12513_v13 = vld [vmem:[#allocation105_spill] sm:$0xff] }
 0x37b   : > { %v9742_v50 = vpop.permute.xlu1 %3467  ;;  %v2878_v9 = vadd.f32 %v2870_v30, %v2809_v29  ;;  %v2877_v62 = vadd.f32 %v2869_v22, %v2808_v10  ;;  %v2939_v19 = vmul.f32 %v6802_v39, %v12509_v14  ;;  %v2938_v16 = vmul.f32 %v6802_v39, %v12510_v4  ;;  %v12514_v29 = vld [vmem:[#allocation106_spill] sm:$0xff]  ;;  %v12515_v30 = vld [vmem:[#allocation107_spill] sm:$0xff]  ;;  %v6804_v39 = vld [vmem:[%s11970_s1 + $0xf] ss:$0 sm:$0xff] }
 0x37c   : > { %v9746_v60 = vpop.permute.xlu0 %3462  ;;  %4050 = vperm.xlu1 %7187, %v9269_v11   ;;  %v2875_v11 = vadd.f32 %v2867_v43, %v2806_v36  ;;  %v2941_v8 = vadd.f32 %v2933_v40, %v2872_v46  ;;  %v2940_v12 = vadd.f32 %v2932_v15, %v2871_v59  ;;  %v3002_v36 = vmul.f32 %v6803_v56, %v12512_v45  ;;  %v12516_v59 = vld [vmem:[#allocation108_spill] sm:$0xff]  ;;  %v12517_v40 = vld [vmem:[#allocation109_spill] sm:$0xff] }
 0x37d   : > { %4045 = vperm.xlu0 %7186, %v12504_v18   ;;  %v3001_v43 = vmul.f32 %v6803_v56, %v12513_v13  ;;  %v2943_v55 = vadd.f32 %v2935_v61, %v2874_v47  ;;  %v2942_v42 = vadd.f32 %v2934_v52, %v2873_v35  ;;  %v3004_v10 = vmul.f32 %v6803_v56, %v12514_v29  ;;  %v12518_v35 = vld [vmem:[#allocation110_spill] sm:$0xff]  ;;  %v12519_v52 = vld [vmem:[#allocation111_spill] sm:$0xff]  ;;  %v12521_v29 = vld [vmem:[#allocation113_spill] sm:$0xff] }
 0x37e   : > { %v3003_v22 = vmul.f32 %v6803_v56, %v12515_v30  ;;  %v2945_v14 = vadd.f32 %v2937_v5, %v2876_v48  ;;  %v3006_v46 = vmul.f32 %v6803_v56, %v12516_v59  ;;  %v3005_v15 = vmul.f32 %v6803_v56, %v12517_v40  ;;  %v9787_v59 = vld [vmem:[%s7626_s23 + $0xa8] sm:$0xff]  ;;  %v12524_v40 = vld [vmem:[#allocation115_spill] sm:$0xff] }
 0x37f   : > { %v9759_v27 = vpop.permute.xlu1 %3477  ;;  %v2946_v47 = vadd.f32 %v2938_v16, %v2877_v62  ;;  %v3008_v61 = vmul.f32 %v6803_v56, %v12518_v35  ;;  %v3007_v45 = vmul.f32 %v6803_v56, %v12519_v52  ;;  %v3010_v48 = vadd.f32 %v3002_v36, %v2941_v8  ;;  %12522 = vst [vmem:[#allocation24_spill] sm:$0xff] %v9787_v59  ;;  %v9795_v8 = vld [vmem:[%s7626_s23 + $0xa0] sm:$0xff] }
 0x380   : > { %v9763_v18 = vpop.permute.xlu0 %3472  ;;  %4060 = vperm.xlu1 %7187, %v9449_v0   ;;  %v2944_v0 = vadd.f32 %v2936_v7, %v2875_v11  ;;  %v3009_v5 = vadd.f32 %v3001_v43, %v2940_v12  ;;  %v12520_v11 = vld [vmem:[#allocation112_spill] sm:$0xff]  ;;  %v3070_v30 = vmul.f32 %v6804_v39, %v12521_v29  ;;  %v3011_v62 = vadd.f32 %v3003_v22, %v2942_v42  ;;  %v12526_v43 = vld [vmem:[#allocation118_spill] sm:$0xff]  ;;  %v12527_v52 = vld [vmem:[#allocation119_spill] sm:$0xff] }
 0x381   : > { %12511 = vst [vmem:[#allocation23_spill] sm:$0xff] %v9763_v18  ;;  %4055 = vperm.xlu0 %7186, %v9452_v63   ;;  %v2947_v63 = vadd.f32 %v2939_v19, %v2878_v9  ;;  %v3071_v7 = vmul.f32 %v6804_v39, %v12520_v11  ;;  %v3012_v9 = vadd.f32 %v3004_v10, %v2943_v55  ;;  %v12523_v19 = vld [vmem:[#allocation114_spill] sm:$0xff]  ;;  %12525 = vst [vmem:[#allocation25_spill] sm:$0xff] %v9795_v8  ;;  %v12528_v10 = vld [vmem:[#allocation76_spill] sm:$0xff] }
 0x382   : > { %v3073_v16 = vmul.f32 %v6804_v39, %v12523_v19  ;;  %v3072_v56 = vmul.f32 %v6804_v39, %v12524_v40  ;;  %v3014_v12 = vadd.f32 %v3006_v46, %v2945_v14  ;;  %v3013_v36 = vadd.f32 %v3005_v15, %v2944_v0  ;;  %v12529_v29 = vld [vmem:[#allocation77_spill] sm:$0xff]  ;;  %v12531_v46 = vld [vmem:[#allocation122_spill] sm:$0xff] }
 0x383   : > { %v9776_v4 = vpop.permute.xlu1 %3516  ;;  %v3075_v35 = vmul.f32 %v6804_v39, %v12526_v43  ;;  %v3016_v55 = vadd.f32 %v3008_v61, %v2947_v63  ;;  %v3015_v42 = vadd.f32 %v3007_v45, %v2946_v47  ;;  %v3077_v22 = vmul.f32 %v6804_v39, %v12528_v10  ;;  %v12530_v14 = vld [vmem:[#allocation121_spill] sm:$0xff]  ;;  %v12532_v63 = vld [vmem:[#allocation123_spill] sm:$0xff]  ;;  %v12533_v61 = vld [vmem:[#allocation124_spill] sm:$0xff] }
 0x384   : > { %v9780_v13 = vpop.permute.xlu0 %3511  ;;  %4099 = vperm.xlu1 %7187, %v9467_v38   ;;  %v6805_v38 = vld [vmem:[%s11970_s1 + $0x10] ss:$0 sm:$0xff]  ;;  %v3076_v19 = vmul.f32 %v6804_v39, %v12529_v29  ;;  %v3079_v24 = vadd.f32 %v3071_v7, %v3010_v48  ;;  %v3078_v18 = vadd.f32 %v3070_v30, %v3009_v5  ;;  %v3081_v43 = vadd.f32 %v3073_v16, %v3012_v9  ;;  %v12535_v30 = vld [vmem:[#allocation128_spill] sm:$0xff] }
 0x385   : > { %4094 = vperm.xlu0 %7186, %v9470_v37   ;;  %v3074_v37 = vmul.f32 %v6804_v39, %v12527_v52  ;;  %v3140_v0 = vmul.f32 %v6805_v38, %v12530_v14  ;;  %v3139_v15 = vmul.f32 %v6805_v38, %v12531_v46  ;;  %v3080_v52 = vadd.f32 %v3072_v56, %v3011_v62  ;;  %v6806_v39 = vld [vmem:[%s11970_s1 + $0x11] ss:$0 sm:$0xff] }
 0x386   : > { %v3142_v47 = vmul.f32 %v6805_v38, %v12532_v63  ;;  %v3141_v45 = vmul.f32 %v6805_v38, %v12533_v61  ;;  %v3083_v10 = vadd.f32 %v3075_v35, %v3014_v12  ;;  %v12534_v5 = vld [vmem:[#allocation125_spill] sm:$0xff]  ;;  %v3143_v29 = vmul.f32 %v6805_v38, %v12535_v30  ;;  %v12540_v61 = vld [vmem:[#allocation127_spill] sm:$0xff] }
 0x387   : > { %v9799_v11 = vpop.permute.xlu1 %3526  ;;  %v3082_v48 = vadd.f32 %v3074_v37, %v3013_v36  ;;  %v3144_v7 = vmul.f32 %v6805_v38, %v12534_v5  ;;  %v3085_v46 = vadd.f32 %v3077_v22, %v3016_v55  ;;  %v3084_v9 = vadd.f32 %v3076_v19, %v3015_v42  ;;  %v12537_v16 = vld [vmem:[#allocation129_spill] sm:$0xff]  ;;  %v12539_v36 = vld [vmem:[#allocation126_spill] sm:$0xff]  ;;  %v12542_v22 = vld [vmem:[#allocation12_spill] sm:$0xff] }
 0x388   : > { %v9803_v40 = vpop.permute.xlu0 %3521  ;;  %4109 = vperm.xlu1 %7187, %v9787_v59   ;;  %v3146_v62 = vmul.f32 %v6805_v38, %v9454_v17  ;;  %v3145_v56 = vmul.f32 %v6805_v38, %v12537_v16  ;;  %v3148_v12 = vadd.f32 %v3140_v0, %v3079_v24  ;;  %v3147_v35 = vadd.f32 %v3139_v15, %v3078_v18  ;;  %v12541_v30 = vld [vmem:[#allocation93_spill] sm:$0xff]  ;;  %v9835_v24 = vld [vmem:[%s7626_s23 + $0xc0] sm:$0xff] }
 0x389   : > { %4104 = vperm.xlu0 %7186, %v9795_v8   ;;  %v3209_v37 = vmul.f32 %v6806_v39, %v12539_v36  ;;  %v3208_v5 = vmul.f32 %v6806_v39, %v12540_v61  ;;  %v9827_v8 = vld [vmem:[%s7626_s23 + $0xc8] sm:$0xff]  ;;  %v3150_v55 = vadd.f32 %v3142_v47, %v3081_v43  ;;  %v3149_v42 = vadd.f32 %v3141_v45, %v3080_v52  ;;  %v12543_v19 = vld [vmem:[#allocation9_spill] sm:$0xff]  ;;  %v12544_v15 = vld [vmem:[#allocation15_spill] sm:$0xff] }
 0x38a   : > { %v3211_v17 = vmul.f32 %v6806_v39, %v12542_v22  ;;  %v3210_v38 = vmul.f32 %v6806_v39, %v12543_v19  ;;  %v3152_v18 = vadd.f32 %v3144_v7, %v3083_v10  ;;  %v3151_v0 = vadd.f32 %v3143_v29, %v3082_v48  ;;  %v12545_v36 = vld [vmem:[#allocation16_spill] sm:$0xff]  ;;  %v12546_v47 = vld [vmem:[#allocation10_spill] sm:$0xff]  ;;  %v12547_v22 = vld [vmem:[#allocation11_spill] sm:$0xff] }
 0x38b   : > { %v9816_v14 = vpop.permute.xlu1 %3536  ;;  %v3213_v16 = vmul.f32 %v6806_v39, %v12544_v15  ;;  %v3212_v61 = vmul.f32 %v6806_v39, %v12545_v36  ;;  %v3154_v43 = vadd.f32 %v3146_v62, %v3085_v46  ;;  %v3153_v52 = vadd.f32 %v3145_v56, %v3084_v9  ;;  %v12548_v10 = vld [vmem:[#allocation3_spill] sm:$0xff]  ;;  %v12549_v7 = vld [vmem:[#allocation4_spill] sm:$0xff]  ;;  %v12550_v46 = vld [vmem:[#allocation5_spill] sm:$0xff] }
 0x38c   : > { %12536 = vst [vmem:[#allocation26_spill] sm:$0xff] %v9816_v14  ;;  %v9820_v63 = vpop.permute.xlu0 %3531  ;;  %4119 = vperm.xlu1 %7187, %v9305_v51   ;;  %v6807_v51 = vld [vmem:[%s11970_s1 + $0x12] ss:$0 sm:$0xff]  ;;  %v3215_v45 = vmul.f32 %v6806_v39, %v12546_v47  ;;  %v3214_v19 = vmul.f32 %v6806_v39, %v12547_v22  ;;  %v3216_v14 = vadd.f32 %v3208_v5, %v3147_v35  ;;  %v12551_v62 = vld [vmem:[#allocation6_spill] sm:$0xff]  ;;  %v6808_v39 = vld [vmem:[%s11970_s1 + $0x13] ss:$0 sm:$0xff] }
 0x38d   : > { %12538 = vst [vmem:[#allocation27_spill] sm:$0xff] %v9820_v63  ;;  %4114 = vperm.xlu0 %7186, %v12541_v30   ;;  %v3217_v63 = vadd.f32 %v3209_v37, %v3148_v12  ;;  %v3278_v48 = vmul.f32 %v6807_v51, %v12548_v10  ;;  %v3277_v29 = vmul.f32 %v6807_v51, %v12549_v7  ;;  %v12552_v35 = vld [vmem:[#allocation7_spill] sm:$0xff]  ;;  %v12553_v5 = vld [vmem:[#allocation8_spill] sm:$0xff] }
 0x38e   : > { %v3219_v15 = vadd.f32 %v3211_v17, %v3150_v55  ;;  %v3218_v36 = vadd.f32 %v3210_v38, %v3149_v42  ;;  %v3280_v9 = vmul.f32 %v6807_v51, %v12550_v46  ;;  %v3279_v56 = vmul.f32 %v6807_v51, %v12551_v62  ;;  %v12554_v42 = vld [vmem:[#allocation13_spill] sm:$0xff] }
 0x38f   : > { %v9839_v30 = vpop.permute.xlu1 %3546  ;;  %v3221_v47 = vadd.f32 %v3213_v16, %v3152_v18  ;;  %v3220_v12 = vadd.f32 %v3212_v61, %v3151_v0  ;;  %v3282_v37 = vmul.f32 %v6807_v51, %v12552_v35  ;;  %v3281_v22 = vmul.f32 %v6807_v51, %v12553_v5  ;;  %v12555_v62 = vld [vmem:[#allocation17_spill] sm:$0xff]  ;;  %v12556_v35 = vld [vmem:[#allocation18_spill] sm:$0xff] }
 0x390   : > { %v9843_v59 = vpop.permute.xlu0 %3541  ;;  %4129 = vperm.xlu1 %7187, %v9827_v8   ;;  %v3223_v7 = vadd.f32 %v3215_v45, %v3154_v43  ;;  %v3222_v55 = vadd.f32 %v3214_v19, %v3153_v52  ;;  %v3284_v17 = vmul.f32 %v6807_v51, %v12554_v42  ;;  %v3283_v38 = vmul.f32 %v6807_v51, %v9541_v20  ;;  %v9867_v5 = vld [vmem:[%s7626_s23 + $0xa9] sm:$0xff]  ;;  %v6809_v51 = vld [vmem:[%s11970_s1 + $0x14] ss:$0 sm:$0xff] }
 0x391   : > { %4124 = vperm.xlu0 %7186, %v9835_v24   ;;  %v3286_v18 = vadd.f32 %v3278_v48, %v3217_v63  ;;  %v3285_v16 = vadd.f32 %v3277_v29, %v3216_v14  ;;  %v3347_v0 = vmul.f32 %v6808_v39, %v9554_v44  ;;  %v3346_v61 = vmul.f32 %v6808_v39, %v9558_v28  ;;  %v9875_v63 = vld [vmem:[%s7626_s23 + $0xa1] sm:$0xff] }
 0x392   : > { %v3288_v43 = vadd.f32 %v3280_v9, %v3219_v15  ;;  %v3287_v52 = vadd.f32 %v3279_v56, %v3218_v36  ;;  %v3349_v45 = vmul.f32 %v6808_v39, %v9577_v32  ;;  %v3348_v20 = vmul.f32 %v6808_v39, %v9581_v21 }
 0x393   : > { %v9856_v10 = vpop.permute.xlu1 %3585  ;;  %v3290_v14 = vadd.f32 %v3282_v37, %v3221_v47  ;;  %v3289_v44 = vadd.f32 %v3281_v22, %v3220_v12  ;;  %v3351_v28 = vmul.f32 %v6808_v39, %v9594_v23  ;;  %v3350_v19 = vmul.f32 %v6808_v39, %v9598_v25  ;;  %v6810_v25 = vld [vmem:[%s11970_s1 + $0x15] ss:$0 sm:$0xff] }
 0x394   : > { %v9860_v46 = vpop.permute.xlu0 %3580  ;;  %4168 = vperm.xlu1 %7187, %v12555_v62   ;;  %v3292_v29 = vadd.f32 %v3284_v17, %v3223_v7  ;;  %v3291_v15 = vadd.f32 %v3283_v38, %v3222_v55  ;;  %v3353_v32 = vmul.f32 %v6808_v39, %v9611_v49  ;;  %v3352_v21 = vmul.f32 %v6808_v39, %v9615_v41 }
 0x395   : > { %4163 = vperm.xlu0 %7186, %v12556_v35   ;;  %v3355_v9 = vadd.f32 %v3347_v0, %v3286_v18  ;;  %v3354_v56 = vadd.f32 %v3346_v61, %v3285_v16  ;;  %v3416_v47 = vmul.f32 %v6809_v51, %v9628_v58  ;;  %v3415_v23 = vmul.f32 %v6809_v51, %v9632_v54  ;;  %v9899_v54 = vld [vmem:[%s11970_s1 + $0x16] ss:$0 sm:$0xff]  ;;  %v9913_v0 = vld [vmem:[%s11970_s1 + $0x17] ss:$0 sm:$0xff] }
 0x396   : > { %v3357_v49 = vadd.f32 %v3349_v45, %v3288_v43  ;;  %v3356_v12 = vadd.f32 %v3348_v20, %v3287_v52  ;;  %v3418_v41 = vmul.f32 %v6809_v51, %v9651_v3  ;;  %v3417_v39 = vmul.f32 %v6809_v51, %v9655_v26  ;;  %v7527_v61 = vld [vmem:[%s7626_s23 + $0xb1] sm:$0xff]  ;;  %v9923_v45 = vld [vmem:[%s7626_s23 + $0xc1] sm:$0xff] }
 0x397   : > { %v9879_v48 = vpop.permute.xlu1 %3595  ;;  %v3359_v37 = vadd.f32 %v3351_v28, %v3290_v14  ;;  %v3358_v22 = vadd.f32 %v3350_v19, %v3289_v44  ;;  %v3420_v7 = vmul.f32 %v6809_v51, %v9668_v2  ;;  %v3419_v58 = vmul.f32 %v6809_v51, %v9672_v33  ;;  %v7526_v2 = vld [vmem:[%s7626_s23 + $0xb9] sm:$0xff] }
 0x398   : > { %v9883_v36 = vpop.permute.xlu0 %3590  ;;  %4178 = vperm.xlu1 %7187, %v9867_v5   ;;  %v3361_v42 = vadd.f32 %v3353_v32, %v3292_v29  ;;  %v3360_v17 = vadd.f32 %v3352_v21, %v3291_v15  ;;  %v3422_v3 = vmul.f32 %v6809_v51, %v9685_v57  ;;  %v3485_v26 = vmul.f32 %v6810_v25, %v9702_v6  ;;  %v9917_v57 = vld [vmem:[%s7626_s23 + $0xc9] sm:$0xff] }
 0x399   : > { %4173 = vperm.xlu0 %7186, %v9875_v63   ;;  %v3424_v33 = vadd.f32 %v3416_v47, %v3355_v9  ;;  %v3423_v62 = vadd.f32 %v3415_v23, %v3354_v56  ;;  %v3421_v18 = vmul.f32 %v6809_v51, %v9689_v53  ;;  %v3484_v16 = vmul.f32 %v6810_v25, %v9706_v34  ;;  %v12557_v47 = vld [vmem:[#allocation23_spill] sm:$0xff] }
 0x39a   : > { %v3426_v6 = vadd.f32 %v3418_v41, %v3357_v49  ;;  %v3425_v35 = vadd.f32 %v3417_v39, %v3356_v12  ;;  %v3487_v43 = vmul.f32 %v6810_v25, %v9725_v31  ;;  %v3554_v52 = vmul.f32 %v9899_v54, %v9776_v4 }
 0x39b   : > { %v9901_v55 = vpop.permute.xlu1 %3605  ;;  %v3428_v53 = vadd.f32 %v3420_v7, %v3359_v37  ;;  %v3427_v34 = vadd.f32 %v3419_v58, %v3358_v22  ;;  %v3486_v20 = vmul.f32 %v6810_v25, %v9729_v1  ;;  %v3553_v51 = vmul.f32 %v9899_v54, %v9780_v13  ;;  %v12558_v22 = vld [vmem:[#allocation14_spill] sm:$0xff] }
 0x39c   : > { %v9905_v38 = vpop.permute.xlu0 %3600  ;;  %4188 = vperm.xlu1 %7187, %v7526_v2   ;;  %v3430_v44 = vadd.f32 %v3422_v3, %v3361_v42  ;;  %v3493_v28 = vadd.f32 %v3485_v26, %v3424_v33  ;;  %v3489_v19 = vmul.f32 %v6810_v25, %v9742_v50  ;;  %v3623_v31 = vmul.f32 %v9913_v0, %v9856_v10  ;;  %v9943_v50 = vld [vmem:[%s11970_s1 + $0x18] ss:$0 sm:$0xff] }
 0x39d   : > { %4183 = vperm.xlu0 %7186, %v7527_v61   ;;  %v3429_v4 = vadd.f32 %v3421_v18, %v3360_v17  ;;  %v3492_v15 = vadd.f32 %v3484_v16, %v3423_v62  ;;  %v3488_v1 = vmul.f32 %v6810_v25, %v9746_v60  ;;  %v3622_v13 = vmul.f32 %v9913_v0, %v9860_v46  ;;  %v12559_v42 = vld [vmem:[#allocation130_spill] sm:$0xff]  ;;  %v9970_v62 = vld [vmem:[%s7626_s23 + $0xa2] sm:$0xff] }
 0x39e   : > { %v3495_v32 = vadd.f32 %v3487_v43, %v3426_v6  ;;  %v3491_v10 = vmul.f32 %v6810_v25, %v9759_v27  ;;  %v3562_v21 = vadd.f32 %v3554_v52, %v3493_v28  ;;  %v3556_v9 = vmul.f32 %v9899_v54, %v9799_v11  ;;  %v12560_v26 = vld [vmem:[#allocation26_spill] sm:$0xff]  ;;  %v12561_v16 = vld [vmem:[#allocation27_spill] sm:$0xff] }
 0x39f   : > { %v9928_v14 = vpop.permute.xlu1 %3615  ;;  %v3494_v56 = vadd.f32 %v3486_v20, %v3425_v35  ;;  %v3490_v60 = vmul.f32 %v6810_v25, %v12557_v47  ;;  %v3561_v23 = vadd.f32 %v3553_v51, %v3492_v15  ;;  %v3555_v46 = vmul.f32 %v9899_v54, %v9803_v40  ;;  %v9960_v40 = vld [vmem:[%s11971_s2] ss:$0 sm:$0xff] }
 0x3a0   : > { %v9933_v29 = vpop.permute.xlu0 %3610  ;;  %4198 = vperm.xlu1 %7187, %v9917_v57   ;;  %v3497_v12 = vadd.f32 %v3489_v19, %v3428_v53  ;;  %v3631_v41 = vadd.f32 %v3623_v31, %v3562_v21  ;;  %v3625_v39 = vmul.f32 %v9913_v0, %v9879_v48  ;;  %v3496_v11 = vadd.f32 %v3488_v1, %v3427_v34  ;;  %v9965_v48 = vld [vmem:[%s7626_s23 + $0xaa] sm:$0xff] }
 0x3a1   : > { %4193 = vperm.xlu0 %7186, %v9923_v45   ;;  %v3630_v7 = vadd.f32 %v3622_v13, %v3561_v23  ;;  %v3624_v25 = vmul.f32 %v9913_v0, %v9883_v36  ;;  %v3499_v17 = vadd.f32 %v3491_v10, %v3430_v44  ;;  %v3564_v3 = vadd.f32 %v3556_v9, %v3495_v32 }
 0x3a2   : > { %v3558_v2 = vmul.f32 %v9899_v54, %v12560_v26  ;;  %v3498_v36 = vadd.f32 %v3490_v60, %v3429_v4  ;;  %v3563_v18 = vadd.f32 %v3555_v46, %v3494_v56  ;;  %v3557_v61 = vmul.f32 %v9899_v54, %v12561_v16  ;;  %v7528_v60 = vld [vmem:[%s7626_s23 + $0xba] sm:$0xff]  ;;  %v7529_v46 = vld [vmem:[%s7626_s23 + $0xb2] sm:$0xff] }
 0x3a3   : > { %v3655_v49 = vpop.permute.xlu1 %3654  ;;  %v3633_v43 = vadd.f32 %v3625_v39, %v3564_v3  ;;  %v3627_v52 = vmul.f32 %v9913_v0, %v9901_v55  ;;  %v3626_v44 = vmul.f32 %v9913_v0, %v9905_v38  ;;  %v3560_v55 = vmul.f32 %v9899_v54, %v9839_v30 }
 0x3a4   : > { %v3692_v27 = vmul.f32 %v9943_v50, %v3655_v49  ;;  %v3650_v37 = vpop.permute.xlu0 %3649  ;;  %4237 = vperm.xlu1 %7187, %v12558_v22   ;;  %v3632_v51 = vadd.f32 %v3624_v25, %v3563_v18  ;;  %v3566_v31 = vadd.f32 %v3558_v2, %v3497_v12  ;;  %v3565_v1 = vadd.f32 %v3557_v61, %v3496_v11  ;;  %v10001_v49 = vld [vmem:[%s7626_s23 + $0xca] sm:$0xff] }
 0x3a5   : > { %v3691_v58 = vmul.f32 %v9943_v50, %v3650_v37  ;;  %4232 = vperm.xlu0 %7186, %v12559_v42   ;;  %v3559_v13 = vmul.f32 %v9899_v54, %v9843_v59  ;;  %v3629_v9 = vmul.f32 %v9913_v0, %v9928_v14  ;;  %v3628_v54 = vmul.f32 %v9913_v0, %v9933_v29 }
 0x3a6   : > { %v3700_v33 = vadd.f32 %v3692_v27, %v3631_v41  ;;  %v3635_v21 = vadd.f32 %v3627_v52, %v3566_v31  ;;  %v3634_v59 = vadd.f32 %v3626_v44, %v3565_v1  ;;  %v3568_v12 = vadd.f32 %v3560_v55, %v3499_v17  ;;  %v10004_v27 = vld [vmem:[%s7626_s23 + $0xc2] sm:$0xff]  ;;  %v10045_v31 = vld [vmem:[%s7626_s23 + $0xcb] sm:$0xff] }
 0x3a7   : > { %v3699_v6 = vadd.f32 %v3691_v58, %v3630_v7  ;;  %v3665_v35 = vpop.permute.xlu1 %3664  ;;  %v3567_v37 = vadd.f32 %v3559_v13, %v3498_v36  ;;  %v10048_v55 = vld [vmem:[%s7626_s23 + $0xc3] sm:$0xff] }
 0x3a8   : > { %v3715_v53 = vadd.f32 %v9960_v40, %v3700_v33  ;;  %v3694_v34 = vmul.f32 %v9943_v50, %v3665_v35  ;;  %v3660_v20 = vpop.permute.xlu0 %3659  ;;  %4247 = vperm.xlu1 %7187, %v9965_v48   ;;  %v3637_v0 = vadd.f32 %v3629_v9, %v3568_v12  ;;  %v12563_v35 = vld [vmem:[#allocation20_spill] sm:$0xff] }
 0x3a9   : > { %v3714_v28 = vadd.f32 %v9960_v40, %v3699_v6  ;;  %v3693_v19 = vmul.f32 %v9943_v50, %v3660_v20  ;;  %4242 = vperm.xlu0 %7186, %v9970_v62   ;;  %v3636_v42 = vadd.f32 %v3628_v54, %v3567_v37  ;;  %v12562_v6 = vld [vmem:[#allocation19_spill] sm:$0xff]  ;;  %v10081_v54 = vld [vmem:[%s7626_s23 + $0xcc] sm:$0xff] }
 0x3aa   : > { %v3723_v4 = vmax.f32 %v3715_v53, 0.0  ;;  %v3702_v15 = vadd.f32 %v3694_v34, %v3633_v43  ;;  %v10025_v43 = vld [vmem:[%s7626_s23 + $0xab] sm:$0xff]  ;;  %v10028_v53 = vld [vmem:[%s7626_s23 + $0xa3] sm:$0xff] }
 0x3ab   : > { %v3722_v32 = vmax.f32 %v3714_v28, 0.0  ;;  %v3701_v38 = vadd.f32 %v3693_v19, %v3632_v51  ;;  %v3675_v10 = vpop.permute.xlu1 %3674  ;;  %v7530_v28 = vld [vmem:[%s7626_s23 + $0xbb] sm:$0xff]  ;;  %v7531_v19 = vld [vmem:[%s7626_s23 + $0xb3] sm:$0xff] }
 0x3ac   : > { %3731 = vst.msk [vmem:[#allocation2 + $0x48] sm:$0xff] %vm1973_vm0, %v3723_v4  ;;  %v3717_v56 = vadd.f32 %v9960_v40, %v3702_v15  ;;  %v3696_v30 = vmul.f32 %v9943_v50, %v3675_v10  ;;  %v3670_v47 = vpop.permute.xlu0 %3669  ;;  %4257 = vperm.xlu1 %7187, %v7528_v60   ;;  %v10063_v10 = vld [vmem:[%s7626_s23 + $0xac] sm:$0xff]  ;;  %v7532_v60 = vld [vmem:[%s7626_s23 + $0xbc] sm:$0xff] }
 0x3ad   : > { %3730 = vst.msk [vmem:[#allocation2 + $0x40] sm:$0xff] %vm1973_vm0, %v3722_v32  ;;  %v3716_v23 = vadd.f32 %v9960_v40, %v3701_v38  ;;  %v3695_v14 = vmul.f32 %v9943_v50, %v3670_v47  ;;  %4252 = vperm.xlu0 %7186, %v7529_v46   ;;  %v12564_v32 = vld [vmem:[#allocation21_spill] sm:$0xff]  ;;  %v12565_v38 = vld [vmem:[#allocation22_spill] sm:$0xff] }
 0x3ae   : > { %v3725_v41 = vmax.f32 %v3717_v56, 0.0  ;;  %v3704_v39 = vadd.f32 %v3696_v30, %v3635_v21  ;;  %v10066_v21 = vld [vmem:[%s7626_s23 + $0xa4] sm:$0xff]  ;;  %v12567_v37 = vld [vmem:[#allocation25_spill] sm:$0xff] }
 0x3af   : > { %v3724_v22 = vmax.f32 %v3716_v23, 0.0  ;;  %v3703_v11 = vadd.f32 %v3695_v14, %v3634_v59  ;;  %v3685_v7 = vpop.permute.xlu1 %3684  ;;  %v7533_v59 = vld [vmem:[%s7626_s23 + $0xb4] sm:$0xff]  ;;  %v10084_v23 = vld [vmem:[%s7626_s23 + $0xc4] sm:$0xff] }
 0x3b0   : > { %3733 = vst.msk [vmem:[#allocation2 + $0x58] sm:$0xff] %vm1973_vm0, %v3725_v41  ;;  %v3719_v29 = vadd.f32 %v9960_v40, %v3704_v39  ;;  %v3698_v25 = vmul.f32 %v9943_v50, %v3685_v7  ;;  %v3680_v58 = vpop.permute.xlu0 %3679  ;;  %4267 = vperm.xlu1 %7187, %v10001_v49   ;;  %v12566_v39 = vld [vmem:[#allocation24_spill] sm:$0xff] }
 0x3b1   : > { %3732 = vst.msk [vmem:[#allocation2 + $0x50] sm:$0xff] %vm1973_vm0, %v3724_v22  ;;  %v3718_v17 = vadd.f32 %v9960_v40, %v3703_v11  ;;  %v3697_v3 = vmul.f32 %v9943_v50, %v3680_v58  ;;  %4262 = vperm.xlu0 %7186, %v10004_v27   ;;  %v10099_v22 = vld [vmem:[%s7626_s23 + $0xb8] sm:$0xff]  ;;  %v10102_v11 = vld [vmem:[%s7626_s23 + $0xb0] sm:$0xff] }
 0x3b2   : > { %v3727_v26 = vmax.f32 %v3719_v29, 0.0  ;;  %v3706_v2 = vadd.f32 %v3698_v25, %v3637_v0  ;;  %v10117_v58 = vld [vmem:[%s7626_s23 + $0xd8] sm:$0xff] }
 0x3b3   : > { %v3726_v33 = vmax.f32 %v3718_v17, 0.0  ;;  %v3705_v36 = vadd.f32 %v3697_v3, %v3636_v42  ;;  %v10014_v18 = vpop.permute.xlu1 %3754  ;;  %v10120_v42 = vld [vmem:[%s7626_s23 + $0xd0] sm:$0xff] }
 0x3b4   : > { %3735 = vst.msk [vmem:[#allocation2 + $0x68] sm:$0xff] %vm1973_vm0, %v3727_v26  ;;  %v3721_v16 = vadd.f32 %v9960_v40, %v3706_v2  ;;  %v10018_v61 = vpop.permute.xlu0 %3749  ;;  %4306 = vperm.xlu1 %7187, %v12562_v6  }
 0x3b5   : > { %3734 = vst.msk [vmem:[#allocation2 + $0x60] sm:$0xff] %vm1973_vm0, %v3726_v33  ;;  %v3720_v50 = vadd.f32 %v9960_v40, %v3705_v36  ;;  %4301 = vperm.xlu0 %7186, %v12563_v35   ;;  %v10135_v33 = vld [vmem:[%s7626_s23 + $0xb9] sm:$0xff]  ;;  %v10138_v36 = vld [vmem:[%s7626_s23 + $0xb1] sm:$0xff] }
 0x3b6   : > { %v3729_v52 = vmax.f32 %v3721_v16, 0.0 }
 0x3b7   : > { %v3728_v34 = vmax.f32 %v3720_v50, 0.0  ;;  %v10030_v20 = vpop.permute.xlu1 %3764 }
 0x3b8   : > { %3737 = vst.msk [vmem:[#allocation2 + $0x78] sm:$0xff] %vm1973_vm0, %v3729_v52  ;;  %v10033_v51 = vpop.permute.xlu0 %3759  ;;  %4316 = vperm.xlu1 %7187, %v10025_v43  }
 0x3b9   : > { %3736 = vst.msk [vmem:[#allocation2 + $0x70] sm:$0xff] %vm1973_vm0, %v3728_v34  ;;  %4311 = vperm.xlu0 %7186, %v10028_v53  }
 0x3bb   : > { %v10038_v40 = vpop.permute.xlu1 %3774 }
 0x3bc   : > { %v10040_v44 = vpop.permute.xlu0 %3769  ;;  %4326 = vperm.xlu1 %7187, %v7530_v28  }
 0x3bd   : > { %4321 = vperm.xlu0 %7186, %v7531_v19  }
 0x3bf   : > { %v10050_v4 = vpop.permute.xlu1 %3784 }
 0x3c0   : > { %v10052_v15 = vpop.permute.xlu0 %3779  ;;  %4336 = vperm.xlu1 %7187, %v10045_v31  }
 0x3c1   : > { %4331 = vperm.xlu0 %7186, %v10048_v55  }
 0x3c3   : > { %v10056_v1 = vpop.permute.xlu1 %3823 }
 0x3c4   : > { %v10058_v13 = vpop.permute.xlu0 %3818  ;;  %4375 = vperm.xlu1 %7187, %v12564_v32   ;;  %v10171_v32 = vld [vmem:[%s7626_s23 + $0xba] sm:$0xff] }
 0x3c5   : > { %4370 = vperm.xlu0 %7186, %v12565_v38   ;;  %v10174_v38 = vld [vmem:[%s7626_s23 + $0xb2] sm:$0xff] }
 0x3c7   : > { %v10068_v9 = vpop.permute.xlu1 %3833 }
 0x3c8   : > { %v10070_v56 = vpop.permute.xlu0 %3828  ;;  %4385 = vperm.xlu1 %7187, %v10063_v10  }
 0x3c9   : > { %4380 = vperm.xlu0 %7186, %v10066_v21  }
 0x3cb   : > { %v10074_v30 = vpop.permute.xlu1 %3843 }
 0x3cc   : > { %v10076_v47 = vpop.permute.xlu0 %3838  ;;  %4395 = vperm.xlu1 %7187, %v7532_v60  }
 0x3cd   : > { %4390 = vperm.xlu0 %7186, %v7533_v59  }
 0x3cf   : > { %v10086_v14 = vpop.permute.xlu1 %3853 }
 0x3d0   : > { %v10088_v46 = vpop.permute.xlu0 %3848  ;;  %4405 = vperm.xlu1 %7187, %v10081_v54  }
 0x3d1   : > { %4400 = vperm.xlu0 %7186, %v10084_v23  }
 0x3d3   : > { %v10092_v12 = vpop.permute.xlu1 %3892 }
 0x3d4   : > { %v10094_v41 = vpop.permute.xlu0 %3887  ;;  %4444 = vperm.xlu1 %7187, %v12566_v39  }
 0x3d5   : > { %4439 = vperm.xlu0 %7186, %v12567_v37  }
 0x3d7   : > { %v10104_v7 = vpop.permute.xlu1 %3902 }
 0x3d8   : > { %v10106_v0 = vpop.permute.xlu0 %3897  ;;  %4454 = vperm.xlu1 %7187, %v10099_v22  }
 0x3d9   : > { %4449 = vperm.xlu0 %7186, %v10102_v11  }
 0x3db   : > { %v10110_v29 = vpop.permute.xlu1 %3912 }
 0x3dc   : > { %v10112_v25 = vpop.permute.xlu0 %3907  ;;  %4464 = vperm.xlu1 %7187, %v9827_v8  }
 0x3dd   : > { %4459 = vperm.xlu0 %7186, %v9835_v24  }
 0x3df   : > { %v10122_v17 = vpop.permute.xlu1 %3922 }
 0x3e0   : > { %v10124_v3 = vpop.permute.xlu0 %3917  ;;  %4474 = vperm.xlu1 %7187, %v10117_v58  }
 0x3e1   : > { %4469 = vperm.xlu0 %7186, %v10120_v42  }
 0x3e3   : > { %v10128_v26 = vpop.permute.xlu1 %3961 }
 0x3e4   : > { %v10130_v2 = vpop.permute.xlu0 %3956  ;;  %4513 = vperm.xlu1 %7187, %v9867_v5   ;;  %v10153_v5 = vld [vmem:[%s7626_s23 + $0xd9] sm:$0xff] }
 0x3e5   : > { %4508 = vperm.xlu0 %7186, %v9875_v63   ;;  %v10156_v63 = vld [vmem:[%s7626_s23 + $0xd1] sm:$0xff] }
 0x3e7   : > { %v10140_v16 = vpop.permute.xlu1 %3971 }
 0x3e8   : > { %v10142_v6 = vpop.permute.xlu0 %3966  ;;  %4523 = vperm.xlu1 %7187, %v10135_v33  }
 0x3e9   : > { %4518 = vperm.xlu0 %7186, %v10138_v36  }
 0x3eb   : > { %v10146_v50 = vpop.permute.xlu1 %3981 }
 0x3ec   : > { %12568 = vst [vmem:[#allocation28_spill] sm:$0xff] %v10146_v50  ;;  %v10148_v35 = vpop.permute.xlu0 %3976  ;;  %4533 = vperm.xlu1 %7187, %v9917_v57  }
 0x3ed   : > { %12569 = vst [vmem:[#allocation29_spill] sm:$0xff] %v10148_v35  ;;  %4528 = vperm.xlu0 %7186, %v9923_v45  }
 0x3ef   : > { %v10158_v52 = vpop.permute.xlu1 %3991 }
 0x3f0   : > { %12570 = vst [vmem:[#allocation30_spill] sm:$0xff] %v10158_v52  ;;  %v10160_v34 = vpop.permute.xlu0 %3986  ;;  %4543 = vperm.xlu1 %7187, %v10153_v5   ;;  %v10246_v52 = vld [vmem:[%s7626_s23 + $0xb4] sm:$0xff] }
 0x3f1   : > { %12571 = vst [vmem:[#allocation31_spill] sm:$0xff] %v10160_v34  ;;  %4538 = vperm.xlu0 %7186, %v10156_v63   ;;  %v10243_v34 = vld [vmem:[%s7626_s23 + $0xbc] sm:$0xff] }
 0x3f3   : > { %v10164_v28 = vpop.permute.xlu1 %4030 }
 0x3f4   : > { %12572 = vst [vmem:[#allocation32_spill] sm:$0xff] %v10164_v28  ;;  %v10166_v19 = vpop.permute.xlu0 %4025  ;;  %4582 = vperm.xlu1 %7187, %v9965_v48   ;;  %v10189_v48 = vld [vmem:[%s7626_s23 + $0xda] sm:$0xff] }
 0x3f5   : > { %12573 = vst [vmem:[#allocation33_spill] sm:$0xff] %v10166_v19  ;;  %4577 = vperm.xlu0 %7186, %v9970_v62   ;;  %v10192_v62 = vld [vmem:[%s7626_s23 + $0xd2] sm:$0xff]  ;;  %v10207_v19 = vld [vmem:[%s7626_s23 + $0xbb] sm:$0xff] }
 0x3f6   : > { %v10210_v28 = vld [vmem:[%s7626_s23 + $0xb3] sm:$0xff] }
 0x3f7   : > { %v10176_v60 = vpop.permute.xlu1 %4040 }
 0x3f8   : > { %12574 = vst [vmem:[#allocation34_spill] sm:$0xff] %v10176_v60  ;;  %v10178_v59 = vpop.permute.xlu0 %4035  ;;  %4592 = vperm.xlu1 %7187, %v10171_v32  }
 0x3f9   : > { %12575 = vst [vmem:[#allocation35_spill] sm:$0xff] %v10178_v59  ;;  %4587 = vperm.xlu0 %7186, %v10174_v38  }
 0x3fb   : > { %v10182_v39 = vpop.permute.xlu1 %4050 }
 0x3fc   : > { %12576 = vst [vmem:[#allocation36_spill] sm:$0xff] %v10182_v39  ;;  %v10184_v37 = vpop.permute.xlu0 %4045  ;;  %4602 = vperm.xlu1 %7187, %v10001_v49  }
 0x3fd   : > { %12577 = vst [vmem:[#allocation37_spill] sm:$0xff] %v10184_v37  ;;  %4597 = vperm.xlu0 %7186, %v10004_v27  }
 0x3ff   : > { %v10194_v60 = vpop.permute.xlu1 %4060 }
 0x400   : > { %12578 = vst [vmem:[#allocation38_spill] sm:$0xff] %v10194_v60  ;;  %v10196_v59 = vpop.permute.xlu0 %4055  ;;  %4612 = vperm.xlu1 %7187, %v10189_v48  }
 0x401   : > { %12579 = vst [vmem:[#allocation96_spill] sm:$0xff] %v10196_v59  ;;  %4607 = vperm.xlu0 %7186, %v10192_v62  }
 0x403   : > { %v10200_v39 = vpop.permute.xlu1 %4099 }
 0x404   : > { %12580 = vst [vmem:[#allocation39_spill] sm:$0xff] %v10200_v39  ;;  %v10202_v37 = vpop.permute.xlu0 %4094  ;;  %4651 = vperm.xlu1 %7187, %v10025_v43   ;;  %v10225_v43 = vld [vmem:[%s7626_s23 + $0xdb] sm:$0xff] }
 0x405   : > { %12581 = vst [vmem:[#allocation40_spill] sm:$0xff] %v10202_v37  ;;  %4646 = vperm.xlu0 %7186, %v10028_v53   ;;  %v10228_v53 = vld [vmem:[%s7626_s23 + $0xd3] sm:$0xff] }
 0x407   : > { %v10212_v60 = vpop.permute.xlu1 %4109 }
 0x408   : > { %12582 = vst [vmem:[#allocation41_spill] sm:$0xff] %v10212_v60  ;;  %v10214_v59 = vpop.permute.xlu0 %4104  ;;  %4661 = vperm.xlu1 %7187, %v10207_v19  }
 0x409   : > { %12583 = vst [vmem:[#allocation42_spill] sm:$0xff] %v10214_v59  ;;  %4656 = vperm.xlu0 %7186, %v10210_v28  }
 0x40b   : > { %v10218_v39 = vpop.permute.xlu1 %4119 }
 0x40c   : > { %12584 = vst [vmem:[#allocation43_spill] sm:$0xff] %v10218_v39  ;;  %v10220_v37 = vpop.permute.xlu0 %4114  ;;  %4671 = vperm.xlu1 %7187, %v10045_v31  }
 0x40d   : > { %12585 = vst [vmem:[#allocation44_spill] sm:$0xff] %v10220_v37  ;;  %4666 = vperm.xlu0 %7186, %v10048_v55  }
 0x40f   : > { %v10230_v60 = vpop.permute.xlu1 %4129 }
 0x410   : > { %12586 = vst [vmem:[#allocation45_spill] sm:$0xff] %v10230_v60  ;;  %v10232_v59 = vpop.permute.xlu0 %4124  ;;  %4681 = vperm.xlu1 %7187, %v10225_v43  }
 0x411   : > { %12587 = vst [vmem:[#allocation46_spill] sm:$0xff] %v10232_v59  ;;  %4676 = vperm.xlu0 %7186, %v10228_v53  }
 0x413   : > { %v10236_v39 = vpop.permute.xlu1 %4168 }
 0x414   : > { %12588 = vst [vmem:[#allocation47_spill] sm:$0xff] %v10236_v39  ;;  %v10238_v37 = vpop.permute.xlu0 %4163  ;;  %4720 = vperm.xlu1 %7187, %v10063_v10   ;;  %v10261_v10 = vld [vmem:[%s7626_s23 + $0xdc] sm:$0xff] }
 0x415   : > { %12589 = vst [vmem:[#allocation48_spill] sm:$0xff] %v10238_v37  ;;  %4715 = vperm.xlu0 %7186, %v10066_v21   ;;  %v10264_v21 = vld [vmem:[%s7626_s23 + $0xd4] sm:$0xff] }
 0x417   : > { %v10248_v60 = vpop.permute.xlu1 %4178 }
 0x418   : > { %12590 = vst [vmem:[#allocation49_spill] sm:$0xff] %v10248_v60  ;;  %v10250_v59 = vpop.permute.xlu0 %4173  ;;  %4730 = vperm.xlu1 %7187, %v10243_v34  }
 0x419   : > { %12591 = vst [vmem:[#allocation50_spill] sm:$0xff] %v10250_v59  ;;  %4725 = vperm.xlu0 %7186, %v10246_v52  }
 0x41b   : > { %v10254_v35 = vpop.permute.xlu1 %4188 }
 0x41c   : > { %12592 = vst [vmem:[#allocation51_spill] sm:$0xff] %v10254_v35  ;;  %v10256_v39 = vpop.permute.xlu0 %4183  ;;  %4740 = vperm.xlu1 %7187, %v10081_v54  }
 0x41d   : > { %12593 = vst [vmem:[#allocation52_spill] sm:$0xff] %v10256_v39  ;;  %4735 = vperm.xlu0 %7186, %v10084_v23  }
 0x41f   : > { %v10266_v37 = vpop.permute.xlu1 %4198 }
 0x420   : > { %12594 = vst [vmem:[#allocation53_spill] sm:$0xff] %v10266_v37  ;;  %v10268_v59 = vpop.permute.xlu0 %4193  ;;  %4750 = vperm.xlu1 %7187, %v10261_v10  }
 0x421   : > { %12595 = vst [vmem:[#allocation54_spill] sm:$0xff] %v10268_v59  ;;  %4745 = vperm.xlu0 %7186, %v10264_v21  }
 0x423   : > { %v10272_v35 = vpop.permute.xlu1 %4237 }
 0x424   : > { %v10274_v39 = vpop.permute.xlu0 %4232  ;;  %4789 = vperm.xlu1 %7187, %v10099_v22   ;;  %v10294_v22 = vld [vmem:[%s7626_s23 + $0xe0] sm:$0xff] }
 0x425   : > { %12596 = vst [vmem:[#allocation55_spill] sm:$0xff] %v10274_v39  ;;  %4784 = vperm.xlu0 %7186, %v10102_v11   ;;  %v10291_v39 = vld [vmem:[%s7626_s23 + $0xe8] sm:$0xff] }
 0x427   : > { %v10278_v60 = vpop.permute.xlu1 %4247 }
 0x428   : > { %12597 = vst [vmem:[#allocation56_spill] sm:$0xff] %v10278_v60  ;;  %v10280_v50 = vpop.permute.xlu0 %4242  ;;  %4799 = vperm.xlu1 %7187, %v9827_v8   ;;  %v6817_v60 = vld [vmem:[%s11970_s1 + $0x2] ss:$0 sm:$0xff] }
 0x429   : > { %12598 = vst [vmem:[#allocation57_spill] sm:$0xff] %v10280_v50  ;;  %4794 = vperm.xlu0 %7186, %v9835_v24  }
 0x42b   : > { %v10284_v59 = vpop.permute.xlu1 %4257 }
 0x42c   : > { %12599 = vst [vmem:[#allocation58_spill] sm:$0xff] %v10284_v59  ;;  %v10286_v37 = vpop.permute.xlu0 %4252  ;;  %4809 = vperm.xlu1 %7187, %v10117_v58  }
 0x42d   : > { %12600 = vst [vmem:[#allocation59_spill] sm:$0xff] %v10286_v37  ;;  %4804 = vperm.xlu0 %7186, %v10120_v42  }
 0x42f   : > { %v10296_v11 = vpop.permute.xlu1 %4267 }
 0x430   : > { %12601 = vst [vmem:[#allocation60_spill] sm:$0xff] %v10296_v11  ;;  %v10298_v50 = vpop.permute.xlu0 %4262  ;;  %4819 = vperm.xlu1 %7187, %v10291_v39  }
 0x431   : > { %12602 = vst [vmem:[#allocation103_spill] sm:$0xff] %v10298_v50  ;;  %4814 = vperm.xlu0 %7186, %v10294_v22  }
 0x433   : > { %v10302_v8 = vpop.permute.xlu1 %4306 }
 0x434   : > { %12603 = vst [vmem:[#allocation61_spill] sm:$0xff] %v10302_v8  ;;  %v10304_v24 = vpop.permute.xlu0 %4301  ;;  %4858 = vperm.xlu1 %7187, %v10135_v33   ;;  %v10324_v33 = vld [vmem:[%s7626_s23 + $0xe1] sm:$0xff] }
 0x435   : > { %12604 = vst [vmem:[#allocation62_spill] sm:$0xff] %v10304_v24  ;;  %4853 = vperm.xlu0 %7186, %v10138_v36   ;;  %v10321_v24 = vld [vmem:[%s7626_s23 + $0xe9] sm:$0xff] }
 0x437   : > { %v10308_v37 = vpop.permute.xlu1 %4316 }
 0x438   : > { %12605 = vst [vmem:[#allocation63_spill] sm:$0xff] %v10308_v37  ;;  %v10310_v59 = vpop.permute.xlu0 %4311  ;;  %4868 = vperm.xlu1 %7187, %v9917_v57   ;;  %v10839_v37 = vld [vmem:[#allocation2 + $0x61] sm:$0xff] }
 0x439   : > { %12606 = vst [vmem:[#allocation64_spill] sm:$0xff] %v10310_v59  ;;  %4863 = vperm.xlu0 %7186, %v9923_v45  }
 0x43b   : > { %v10314_v50 = vpop.permute.xlu1 %4326 }
 0x43c   : > { %12607 = vst [vmem:[#allocation65_spill] sm:$0xff] %v10314_v50  ;;  %v10316_v11 = vpop.permute.xlu0 %4321  ;;  %4878 = vperm.xlu1 %7187, %v10153_v5  }
 0x43d   : > { %12608 = vst [vmem:[#allocation66_spill] sm:$0xff] %v10316_v11  ;;  %4873 = vperm.xlu0 %7186, %v10156_v63  }
 0x43f   : > { %v10326_v36 = vpop.permute.xlu1 %4336 }
 0x440   : > { %12609 = vst [vmem:[#allocation68_spill] sm:$0xff] %v10326_v36  ;;  %v10328_v59 = vpop.permute.xlu0 %4331  ;;  %4888 = vperm.xlu1 %7187, %v10321_v24  }
 0x441   : > { %12610 = vst [vmem:[#allocation69_spill] sm:$0xff] %v10328_v59  ;;  %4883 = vperm.xlu0 %7186, %v10324_v33  }
 0x443   : > { %v10332_v57 = vpop.permute.xlu1 %4375 }
 0x444   : > { %12611 = vst [vmem:[#allocation70_spill] sm:$0xff] %v10332_v57  ;;  %v10334_v45 = vpop.permute.xlu0 %4370  ;;  %4927 = vperm.xlu1 %7187, %v10171_v32   ;;  %v10351_v57 = vld [vmem:[%s7626_s23 + $0xea] sm:$0xff]  ;;  %v10354_v32 = vld [vmem:[%s7626_s23 + $0xe2] sm:$0xff] }
 0x445   : > { %12612 = vst [vmem:[#allocation120_spill] sm:$0xff] %v10334_v45  ;;  %4922 = vperm.xlu0 %7186, %v10174_v38   ;;  %v10837_v45 = vld [vmem:[#allocation2 + $0x63] sm:$0xff] }
 0x447   : > { %v10338_v11 = vpop.permute.xlu1 %4385 }
 0x448   : > { %12613 = vst [vmem:[#allocation71_spill] sm:$0xff] %v10338_v11  ;;  %v10340_v50 = vpop.permute.xlu0 %4380  ;;  %4937 = vperm.xlu1 %7187, %v10001_v49  }
 0x449   : > { %12614 = vst [vmem:[#allocation72_spill] sm:$0xff] %v10340_v50  ;;  %4932 = vperm.xlu0 %7186, %v10004_v27  }
 0x44b   : > { %v10344_v59 = vpop.permute.xlu1 %4395 }
 0x44c   : > { %12615 = vst [vmem:[#allocation73_spill] sm:$0xff] %v10344_v59  ;;  %v10346_v36 = vpop.permute.xlu0 %4390  ;;  %4947 = vperm.xlu1 %7187, %v10189_v48  }
 0x44d   : > { %12616 = vst [vmem:[#allocation74_spill] sm:$0xff] %v10346_v36  ;;  %4942 = vperm.xlu0 %7186, %v10192_v62  }
 0x44f   : > { %v10356_v38 = vpop.permute.xlu1 %4405 }
 0x450   : > { %12617 = vst [vmem:[#allocation75_spill] sm:$0xff] %v10356_v38  ;;  %v10358_v50 = vpop.permute.xlu0 %4400  ;;  %4957 = vperm.xlu1 %7187, %v10351_v57  }
 0x451   : > { %12618 = vst [vmem:[#allocation78_spill] sm:$0xff] %v10358_v50  ;;  %4952 = vperm.xlu0 %7186, %v10354_v32  }
 0x453   : > { %v10362_v49 = vpop.permute.xlu1 %4444 }
 0x454   : > { %12619 = vst [vmem:[#allocation79_spill] sm:$0xff] %v10362_v49  ;;  %v10364_v27 = vpop.permute.xlu0 %4439  ;;  %4996 = vperm.xlu1 %7187, %v10207_v19   ;;  %v10381_v49 = vld [vmem:[%s7626_s23 + $0xeb] sm:$0xff]  ;;  %v10384_v19 = vld [vmem:[%s7626_s23 + $0xe3] sm:$0xff] }
 0x455   : > { %12620 = vst [vmem:[#allocation80_spill] sm:$0xff] %v10364_v27  ;;  %4991 = vperm.xlu0 %7186, %v10210_v28  }
 0x457   : > { %v10368_v36 = vpop.permute.xlu1 %4454 }
 0x458   : > { %12621 = vst [vmem:[#allocation81_spill] sm:$0xff] %v10368_v36  ;;  %v10370_v59 = vpop.permute.xlu0 %4449  ;;  %5006 = vperm.xlu1 %7187, %v10045_v31  }
 0x459   : > { %12622 = vst [vmem:[#allocation82_spill] sm:$0xff] %v10370_v59  ;;  %5001 = vperm.xlu0 %7186, %v10048_v55  }
 0x45b   : > { %v10374_v50 = vpop.permute.xlu1 %4464 }
 0x45c   : > { %12623 = vst [vmem:[#allocation83_spill] sm:$0xff] %v10374_v50  ;;  %v10376_v38 = vpop.permute.xlu0 %4459  ;;  %5016 = vperm.xlu1 %7187, %v10225_v43  }
 0x45d   : > { %12624 = vst [vmem:[#allocation84_spill] sm:$0xff] %v10376_v38  ;;  %5011 = vperm.xlu0 %7186, %v10228_v53  }
 0x45f   : > { %v10386_v28 = vpop.permute.xlu1 %4474 }
 0x460   : > { %12625 = vst [vmem:[#allocation86_spill] sm:$0xff] %v10386_v28  ;;  %v10388_v59 = vpop.permute.xlu0 %4469  ;;  %5026 = vperm.xlu1 %7187, %v10381_v49  }
 0x461   : > { %12626 = vst [vmem:[#allocation67_spill] sm:$0xff] %v10388_v59  ;;  %5021 = vperm.xlu0 %7186, %v10384_v19  }
 0x463   : > { %v10392_v31 = vpop.permute.xlu1 %4513 }
 0x464   : > { %12627 = vst [vmem:[#allocation87_spill] sm:$0xff] %v10392_v31  ;;  %v10394_v55 = vpop.permute.xlu0 %4508  ;;  %5065 = vperm.xlu1 %7187, %v10243_v34   ;;  %v10411_v34 = vld [vmem:[%s7626_s23 + $0xec] sm:$0xff] }
 0x465   : > { %12628 = vst [vmem:[#allocation88_spill] sm:$0xff] %v10394_v55  ;;  %5060 = vperm.xlu0 %7186, %v10246_v52   ;;  %v10414_v52 = vld [vmem:[%s7626_s23 + $0xe4] sm:$0xff] }
 0x467   : > { %v10398_v38 = vpop.permute.xlu1 %4523 }
 0x468   : > { %12629 = vst [vmem:[#allocation89_spill] sm:$0xff] %v10398_v38  ;;  %v10400_v28 = vpop.permute.xlu0 %4518  ;;  %5075 = vperm.xlu1 %7187, %v10081_v54   ;;  %v5119_v54 = vld [vmem:[%s7626_s23 + $0xc8] sm:$0xff] }
 0x469   : > { %12630 = vst [vmem:[#allocation90_spill] sm:$0xff] %v10400_v28  ;;  %5070 = vperm.xlu0 %7186, %v10084_v23  }
 0x46b   : > { %v10404_v59 = vpop.permute.xlu1 %4533 }
 0x46c   : > { %12631 = vst [vmem:[#allocation91_spill] sm:$0xff] %v10404_v59  ;;  %v10406_v50 = vpop.permute.xlu0 %4528  ;;  %5085 = vperm.xlu1 %7187, %v10261_v10  }
 0x46d   : > { %12632 = vst [vmem:[#allocation92_spill] sm:$0xff] %v10406_v50  ;;  %5080 = vperm.xlu0 %7186, %v10264_v21   ;;  %v5118_v50 = vld [vmem:[%s7626_s23 + $0xc0] sm:$0xff] }
 0x46f   : > { %v10416_v31 = vpop.permute.xlu1 %4543 }
 0x470   : > { %12633 = vst [vmem:[#allocation94_spill] sm:$0xff] %v10416_v31  ;;  %v10418_v38 = vpop.permute.xlu0 %4538  ;;  %5095 = vperm.xlu1 %7187, %v10411_v34  }
 0x471   : > { %12634 = vst [vmem:[#allocation95_spill] sm:$0xff] %v10418_v38  ;;  %5090 = vperm.xlu0 %7186, %v10414_v52  }
 0x473   : > { %v10424_v59 = vpop.permute.xlu1 %4582 }
 0x474   : > { %12635 = vst [vmem:[#allocation97_spill] sm:$0xff] %v10424_v59  ;;  %v10426_v28 = vpop.permute.xlu0 %4577  ;;  %5134 = vperm.xlu1 %7187, %v5119_v54   ;;  %v5187_v54 = vld [vmem:[%s7626_s23 + $0xc1] sm:$0xff] }
 0x475   : > { %12636 = vst [vmem:[#allocation98_spill] sm:$0xff] %v10426_v28  ;;  %5129 = vperm.xlu0 %7186, %v5118_v50   ;;  %v5124_v50 = vld [vmem:[%s7626_s23 + $0xf0] sm:$0xff]  ;;  %v6816_v28 = vld [vmem:[%s11970_s1 + $0x1] ss:$0 sm:$0xff] }
 0x477   : > { %v10428_v36 = vpop.permute.xlu1 %4592 }
 0x478   : > { %12637 = vst [vmem:[#allocation85_spill] sm:$0xff] %v10428_v36  ;;  %v10430_v31 = vpop.permute.xlu0 %4587  ;;  %5144 = vperm.xlu1 %7187, %v10117_v58   ;;  %v5256_v58 = vld [vmem:[%s7626_s23 + $0xc2] sm:$0xff] }
 0x479   : > { %12638 = vst [vmem:[#allocation99_spill] sm:$0xff] %v10430_v31  ;;  %5139 = vperm.xlu0 %7186, %v10120_v42   ;;  %v5188_v42 = vld [vmem:[%s7626_s23 + $0xc9] sm:$0xff] }
 0x47b   : > { %v10434_v38 = vpop.permute.xlu1 %4602 }
 0x47c   : > { %12639 = vst [vmem:[#allocation100_spill] sm:$0xff] %v10434_v38  ;;  %v10436_v55 = vpop.permute.xlu0 %4597  ;;  %5154 = vperm.xlu1 %7187, %v10291_v39   ;;  %v5257_v39 = vld [vmem:[%s7626_s23 + $0xca] sm:$0xff] }
 0x47d   : > { %12640 = vst [vmem:[#allocation101_spill] sm:$0xff] %v10436_v55  ;;  %5149 = vperm.xlu0 %7186, %v10294_v22  }
 0x47f   : > { %v10442_v59 = vpop.permute.xlu1 %4612 }
 0x480   : > { %12641 = vst [vmem:[#allocation102_spill] sm:$0xff] %v10442_v59  ;;  %v10444_v36 = vpop.permute.xlu0 %4607  ;;  %5198 = vperm.xlu1 %7187, %v5187_v54   ;;  %v5326_v59 = vld [vmem:[%s7626_s23 + $0xcb] sm:$0xff] }
 0x481   : > { %12642 = vst [vmem:[#allocation116_spill] sm:$0xff] %v10444_v36  ;;  %5159 = vperm.xlu0 %7186, %v5124_v50   ;;  %v5325_v36 = vld [vmem:[%s7626_s23 + $0xc3] sm:$0xff] }
 0x483   : > { %v10448_v38 = vpop.permute.xlu1 %4651 }
 0x484   : > { %12643 = vst [vmem:[#allocation117_spill] sm:$0xff] %v10448_v38  ;;  %v10450_v31 = vpop.permute.xlu0 %4646  ;;  %5267 = vperm.xlu1 %7187, %v5256_v58  }
 0x485   : > { %12644 = vst [vmem:[#allocation104_spill] sm:$0xff] %v10450_v31  ;;  %5203 = vperm.xlu0 %7186, %v5188_v42   ;;  %v6185_v31 = vld [vmem:[%s11972_s3 + $0x168] sm:$0xff] }
 0x487   : > { %v10453_v22 = vpop.permute.xlu1 %4661 }
 0x488   : > { %12645 = vst [vmem:[#allocation105_spill] sm:$0xff] %v10453_v22  ;;  %v10455_v55 = vpop.permute.xlu0 %4656  ;;  %5272 = vperm.xlu1 %7187, %v5257_v39   ;;  %v6194_v22 = vld [vmem:[%s11972_s3 + $0x1b0] sm:$0xff] }
 0x489   : > { %12646 = vst [vmem:[#allocation106_spill] sm:$0xff] %v10455_v55  ;;  %5208 = vperm.xlu0 %7186, %v10156_v63  }
 0x48b   : > { %v10459_v54 = vpop.permute.xlu1 %4671 }
 0x48c   : > { %12647 = vst [vmem:[#allocation107_spill] sm:$0xff] %v10459_v54  ;;  %v10461_v50 = vpop.permute.xlu0 %4666  ;;  %5213 = vperm.xlu1 %7187, %v10153_v5   ;;  %v6193_v54 = vld [vmem:[%s11972_s3 + $0x1a8] sm:$0xff] }
 0x48d   : > { %12648 = vst [vmem:[#allocation108_spill] sm:$0xff] %v10461_v50  ;;  %5336 = vperm.xlu0 %7186, %v5325_v36  }
 0x48f   : > { %v10465_v58 = vpop.permute.xlu1 %4681 }
 0x490   : > { %12649 = vst [vmem:[#allocation109_spill] sm:$0xff] %v10465_v58  ;;  %v10467_v42 = vpop.permute.xlu0 %4676  ;;  %5341 = vperm.xlu1 %7187, %v5326_v59   ;;  %v5395_v59 = vld [vmem:[%s7626_s23 + $0xcc] sm:$0xff] }
 0x491   : > { %12650 = vst [vmem:[#allocation110_spill] sm:$0xff] %v10467_v42  ;;  %5277 = vperm.xlu0 %7186, %v10192_v62  }
 0x493   : > { %v10470_v39 = vpop.permute.xlu1 %4720 }
 0x494   : > { %12651 = vst [vmem:[#allocation111_spill] sm:$0xff] %v10470_v39  ;;  %v10472_v63 = vpop.permute.xlu0 %4715  ;;  %5218 = vperm.xlu1 %7187, %v10324_v33  }
 0x495   : > { %12652 = vst [vmem:[#allocation112_spill] sm:$0xff] %v10472_v63  ;;  %5405 = vperm.xlu0 %7186, %v10084_v23   ;;  %v10745_v63 = vld [vmem:[#allocation2 + $0x40] sm:$0xff] }
 0x497   : > { %v10476_v50 = vpop.permute.xlu1 %4730 }
 0x498   : > { %12653 = vst [vmem:[#allocation113_spill] sm:$0xff] %v10476_v50  ;;  %v10478_v5 = vpop.permute.xlu0 %4725  ;;  %5346 = vperm.xlu1 %7187, %v10228_v53   ;;  %v5125_v53 = vld [vmem:[%s7626_s23 + $0xf8] sm:$0xff] }
 0x499   : > { %12654 = vst [vmem:[#allocation114_spill] sm:$0xff] %v10478_v5  ;;  %5282 = vperm.xlu0 %7186, %v10189_v48   ;;  %v10659_v5 = vld [vmem:[#allocation2 + $0x23] sm:$0xff] }
 0x49b   : > { %v10483_v36 = vpop.permute.xlu1 %4740 }
 0x49c   : > { %12655 = vst [vmem:[#allocation115_spill] sm:$0xff] %v10483_v36  ;;  %v10485_v62 = vpop.permute.xlu0 %4735  ;;  %5223 = vperm.xlu1 %7187, %v10321_v24  }
 0x49d   : > { %12656 = vst [vmem:[#allocation118_spill] sm:$0xff] %v10485_v62  ;;  %5410 = vperm.xlu0 %7186, %v5395_v59  }
 0x49f   : > { %v10488_v33 = vpop.permute.xlu1 %4750 }
 0x4a0   : > { %12657 = vst [vmem:[#allocation119_spill] sm:$0xff] %v10488_v33  ;;  %v10490_v23 = vpop.permute.xlu0 %4745  ;;  %5351 = vperm.xlu1 %7187, %v10225_v43   ;;  %v5193_v43 = vld [vmem:[%s7626_s23 + $0xf1] sm:$0xff] }
 0x4a1   : > { %12658 = vst [vmem:[#allocation76_spill] sm:$0xff] %v10490_v23  ;;  %5287 = vperm.xlu0 %7186, %v10354_v32  }
 0x4a3   : > { %v10495_v50 = vpop.permute.xlu1 %4789 }
 0x4a4   : > { %12659 = vst [vmem:[#allocation77_spill] sm:$0xff] %v10495_v50  ;;  %v10497_v48 = vpop.permute.xlu0 %4784  ;;  %5164 = vperm.xlu1 %7187, %v5125_v53   ;;  %v6156_v53 = vld [vmem:[%s11972_s3 + $0x80] sm:$0xff]  ;;  %v6197_v50 = vld [vmem:[%s11972_s3 + $0x1c8] sm:$0xff] }
 0x4a5   : > { %12660 = vst [vmem:[#allocation121_spill] sm:$0xff] %v10497_v48  ;;  %5415 = vperm.xlu0 %7186, %v10264_v21   ;;  %v6157_v21 = vld [vmem:[%s11972_s3 + $0x88] sm:$0xff] }
 0x4a7   : > { %v10500_v62 = vpop.permute.xlu1 %4799 }
 0x4a8   : > { %12661 = vst [vmem:[#allocation122_spill] sm:$0xff] %v10500_v62  ;;  %v10502_v24 = vpop.permute.xlu0 %4794  ;;  %5356 = vperm.xlu1 %7187, %v10384_v19   ;;  %v7053_v19 = vpack.c.bf16 %v6157_v21, %v6156_v53  ;;  %v6159_v53 = vld [vmem:[%s11972_s3 + $0x98] sm:$0xff] }
 0x4a9   : > { %12662 = vst [vmem:[#allocation123_spill] sm:$0xff] %v10502_v24  ;;  %5292 = vperm.xlu0 %7186, %v10351_v57   ;;  %v6140_v57 = vld [vmem:[%s11972_s3] sm:$0xff]  ;;  %v5262_v21 = vld [vmem:[%s7626_s23 + $0xf2] sm:$0xff] }
 0x4aa   : > { %7054 = vmatprep.subr.bf16.mxu0 %v7053_v19  ;;  %v6142_v19 = vld [vmem:[%s11972_s3 + $0x10] sm:$0xff] }
 0x4ab   : > { %v10507_v59 = vpop.permute.xlu1 %4809 }
 0x4ac   : > { %12663 = vst [vmem:[#allocation124_spill] sm:$0xff] %v10507_v59  ;;  %v10509_v32 = vpop.permute.xlu0 %4804  ;;  %5228 = vperm.xlu1 %7187, %v5193_v43   ;;  %v6141_v43 = vld [vmem:[%s11972_s3 + $0x8] sm:$0xff] }
 0x4ad   : > { %12664 = vst [vmem:[#allocation125_spill] sm:$0xff] %v10509_v32  ;;  %5420 = vperm.xlu0 %7186, %v10261_v10   ;;  %v5194_v32 = vld [vmem:[%s7626_s23 + $0xf9] sm:$0xff]  ;;  %v7055_v59 = vpack.c.bf16 %v6141_v43, %v6140_v57  ;;  %v6158_v10 = vld [vmem:[%s11972_s3 + $0x90] sm:$0xff] }
 0x4ae   : > { %v7057_v57 = vpack.c.bf16 %v6159_v53, %v6158_v10  ;;  %v6161_v10 = vld [vmem:[%s11972_s3 + $0xa8] sm:$0xff] }
 0x4af   : > { %v10525_v23 = vpop.permute.xlu1 %4819  ;;  %7056 = vmatpush3.bf16.msra.mxu0 %v7055_v59 }
 0x4b0   : > { %12665 = vst [vmem:[#allocation128_spill] sm:$0xff] %v10525_v23  ;;  %v10527_v33 = vpop.permute.xlu0 %4814  ;;  %5361 = vperm.xlu1 %7187, %v10381_v49   ;;  %v6143_v49 = vld [vmem:[%s11972_s3 + $0x18] sm:$0xff]  ;;  %7058 = vmatprep.subr.bf16.mxu0 %v7057_v57 }
 0x4b1   : > { %12666 = vst [vmem:[#allocation129_spill] sm:$0xff] %v10527_v33  ;;  %5233 = vperm.xlu0 %7186, %v5194_v32   ;;  %v7059_v59 = vpack.c.bf16 %v6143_v49, %v6142_v19  ;;  %v6160_v32 = vld [vmem:[%s11972_s3 + $0xa0] sm:$0xff] }
 0x4b2   : > { %v7061_v53 = vpack.c.bf16 %v6161_v10, %v6160_v32  ;;  %v6144_v19 = vld [vmem:[%s11972_s3 + $0x20] sm:$0xff]  ;;  %v6189_v32 = vld [vmem:[%s11972_s3 + $0x188] sm:$0xff] }
 0x4b3   : > { %v10543_v43 = vpop.permute.xlu1 %4858  ;;  %7060 = vmatpush3.bf16.msra.mxu0 %v7059_v59  ;;  %v5263_v57 = vld [vmem:[%s7626_s23 + $0xfa] sm:$0xff] }
 0x4b4   : > { %12667 = vst [vmem:[#allocation126_spill] sm:$0xff] %v10543_v43  ;;  %v10545_v33 = vpop.permute.xlu0 %4853  ;;  %5297 = vperm.xlu1 %7187, %v5262_v21   ;;  %v6145_v21 = vld [vmem:[%s11972_s3 + $0x28] sm:$0xff]  ;;  %v5332_v23 = vld [vmem:[%s7626_s23 + $0xfb] sm:$0xff]  ;;  %7062 = vmatprep.subr.bf16.mxu0 %v7061_v53 }
 0x4b5   : > { %12668 = vst [vmem:[#allocation127_spill] sm:$0xff] %v10545_v33  ;;  %5425 = vperm.xlu0 %7186, %v10414_v52   ;;  %v7063_v49 = vpack.c.bf16 %v6145_v21, %v6144_v19  ;;  %v6188_v52 = vld [vmem:[%s11972_s3 + $0x180] sm:$0xff]  ;;  %v6162_v21 = vld [vmem:[%s11972_s3 + $0xb0] sm:$0xff]  ;;  %v6163_v53 = vld [vmem:[%s11972_s3 + $0xb8] sm:$0xff] }
 0x4b6   : > { %v7085_v19 = vpack.c.bf16 %v6189_v32, %v6188_v52  ;;  %v7065_v36 = vpack.c.bf16 %v6163_v53, %v6162_v21  ;;  %v6147_v52 = vld [vmem:[%s11972_s3 + $0x38] sm:$0xff]  ;;  %v6190_v21 = vld [vmem:[%s11972_s3 + $0x190] sm:$0xff]  ;;  %v6196_v43 = vld [vmem:[%s11972_s3 + $0x1c0] sm:$0xff] }
 0x4b7   : > { %v10561_v59 = vpop.permute.xlu1 %4868  ;;  %7064 = vmatpush3.bf16.msra.mxu0 %v7063_v49  ;;  %v6146_v49 = vld [vmem:[%s11972_s3 + $0x30] sm:$0xff]  ;;  %v6191_v53 = vld [vmem:[%s11972_s3 + $0x198] sm:$0xff] }
 0x4b8   : > { %12669 = vst [vmem:[#allocation93_spill] sm:$0xff] %v10561_v59  ;;  %v10570_v10 = vpop.permute.xlu0 %4863  ;;  %5430 = vperm.xlu1 %7187, %v10411_v34   ;;  %v6172_v59 = vld [vmem:[%s11972_s3 + $0x100] sm:$0xff]  ;;  %v6173_v34 = vld [vmem:[%s11972_s3 + $0x108] sm:$0xff]  ;;  %v5331_v32 = vld [vmem:[%s7626_s23 + $0xf3] sm:$0xff]  ;;  %7086 = vmatprep.subr.bf16.mxu1 %v7085_v19  ;;  %v7067_v42 = vpack.c.bf16 %v6147_v52, %v6146_v49  ;;  %v7089_v19 = vpack.c.bf16 %v6191_v53, %v6190_v21 }
 0x4b9   : > { %12670 = vst [vmem:[#allocation12_spill] sm:$0xff] %v10570_v10  ;;  %5302 = vperm.xlu0 %7186, %v5263_v57   ;;  %v7087_v62 = vpack.c.bf16 %v6173_v34, %v6172_v59  ;;  %v5401_v57 = vld [vmem:[%s7626_s23 + $0xfc] sm:$0xff]  ;;  %7066 = vmatprep.subr.bf16.mxu0 %v7065_v36  ;;  %v6165_v36 = vld [vmem:[%s11972_s3 + $0xc8] sm:$0xff]  ;;  %v6174_v34 = vld [vmem:[%s11972_s3 + $0x110] sm:$0xff] }
 0x4ba   : > { %v6164_v59 = vld [vmem:[%s11972_s3 + $0xc0] sm:$0xff]  ;;  %v6149_v52 = vld [vmem:[%s11972_s3 + $0x48] sm:$0xff]  ;;  %v5400_v21 = vld [vmem:[%s7626_s23 + $0xf4] sm:$0xff]  ;;  %s7580_s23 = smov 32  }
 0x4bb   : > { %v10592_v58 = vpop.permute.xlu1 %4878  ;;  %7088 = vmatpush3.bf16.msra.mxu1 %v7087_v62  ;;  %7068 = vmatpush3.bf16.msra.mxu0 %v7067_v42  ;;  %v7069_v49 = vpack.c.bf16 %v6165_v36, %v6164_v59  ;;  %v6175_v62 = vld [vmem:[%s11972_s3 + $0x118] sm:$0xff]  ;;  %v5510_v59 = vld [vmem:[#allocation2 + $0x2] sm:$0xff]  ;;  %v5495_v36 = vld [vmem:[#allocation2 + $0x10] sm:$0xff] }
 0x4bc   : > { %12671 = vst [vmem:[#allocation9_spill] sm:$0xff] %v10592_v58  ;;  %v10601_v10 = vpop.permute.xlu0 %4873  ;;  %5371 = vperm.xlu1 %7187, %v5332_v23   ;;  %v6148_v23 = vld [vmem:[%s11972_s3 + $0x40] sm:$0xff]  ;;  %v10622_v53 = vld [vmem:[#allocation2 + $0x11] sm:$0xff]  ;;  %7090 = vmatprep.subr.bf16.mxu1 %v7089_v19  ;;  %v7091_v58 = vpack.c.bf16 %v6175_v62, %v6174_v34 }
 0x4bd   : > { %12672 = vst [vmem:[#allocation15_spill] sm:$0xff] %v10601_v10  ;;  %5366 = vperm.xlu0 %7186, %v5331_v32   ;;  %v7071_v32 = vpack.c.bf16 %v6149_v52, %v6148_v23  ;;  %7070 = vmatprep.subr.bf16.mxu0 %v7069_v49  ;;  %v6192_v10 = vld [vmem:[%s11972_s3 + $0x1a0] sm:$0xff]  ;;  %v6166_v34 = vld [vmem:[%s11972_s3 + $0xd0] sm:$0xff]  ;;  %v6167_v49 = vld [vmem:[%s11972_s3 + $0xd8] sm:$0xff] }
 0x4be   : > { %v7093_v19 = vpack.c.bf16 %v6193_v54, %v6192_v10  ;;  %v6176_v62 = vld [vmem:[%s11972_s3 + $0x120] sm:$0xff]  ;;  %v7073_v23 = vpack.c.bf16 %v6167_v49, %v6166_v34  ;;  %v6150_v54 = vld [vmem:[%s11972_s3 + $0x50] sm:$0xff]  ;;  %v6151_v10 = vld [vmem:[%s11972_s3 + $0x58] sm:$0xff] }
 0x4bf   : > { %v10624_v42 = vpop.permute.xlu1 %4888  ;;  %7092 = vmatpush3.bf16.msra.mxu1 %v7091_v58  ;;  %7072 = vmatpush3.bf16.msra.mxu0 %v7071_v32  ;;  %v6177_v58 = vld [vmem:[%s11972_s3 + $0x128] sm:$0xff]  ;;  %v7075_v34 = vpack.c.bf16 %v6151_v10, %v6150_v54  ;;  %v6152_v54 = vld [vmem:[%s11972_s3 + $0x60] sm:$0xff] }
 0x4c0   : > { %12673 = vst [vmem:[#allocation16_spill] sm:$0xff] %v10624_v42  ;;  %v10632_v24 = vpop.permute.xlu0 %4883  ;;  %5440 = vperm.xlu1 %7187, %v5401_v57   ;;  %v7193_v57 = vpack.i.bf16 %v5510_v59, %v10622_v53  ;;  %v5502_v52 = vld [vmem:[#allocation2 + $0x1] sm:$0xff]  ;;  %7094 = vmatprep.subr.bf16.mxu1 %v7093_v19  ;;  %v7095_v32 = vpack.c.bf16 %v6177_v58, %v6176_v62  ;;  %v6195_v59 = vld [vmem:[%s11972_s3 + $0x1b8] sm:$0xff] }
 0x4c1   : > { %12674 = vst [vmem:[#allocation10_spill] sm:$0xff] %v10632_v24  ;;  %5435 = vperm.xlu0 %7186, %v5400_v21   ;;  %v10653_v24 = vld [vmem:[#allocation2 + $0x20] sm:$0xff]  ;;  %v10655_v21 = vld [vmem:[#allocation2 + $0x12] sm:$0xff]  ;;  %v7188_v42 = vpack.i.bf16 %v5502_v52, %v5495_v36  ;;  %7074 = vmatprep.subr.bf16.mxu0 %v7073_v23  ;;  %v7097_v19 = vpack.c.bf16 %v6195_v59, %v6194_v22  ;;  %v6169_v62 = vld [vmem:[%s11972_s3 + $0xe8] sm:$0xff] }
 0x4c2   : > { %v6168_v36 = vld [vmem:[%s11972_s3 + $0xe0] sm:$0xff]  ;;  %v6178_v23 = vld [vmem:[%s11972_s3 + $0x130] sm:$0xff]  ;;  %v6179_v22 = vld [vmem:[%s11972_s3 + $0x138] sm:$0xff]  ;;  %v7218_v48 = vpack.i.bf16 %v10653_v24, %v10655_v21 }
 0x4c3   : > { %v10657_v49 = vpop.permute.xlu1 %4927  ;;  %7096 = vmatpush3.bf16.msra.mxu1 %v7095_v32  ;;  %7076 = vmatpush3.bf16.msra.mxu0 %v7075_v34  ;;  %v7077_v58 = vpack.c.bf16 %v6169_v62, %v6168_v36  ;;  %v6153_v10 = vld [vmem:[%s11972_s3 + $0x68] sm:$0xff]  ;;  %v7099_v34 = vpack.c.bf16 %v6179_v22, %v6178_v23  ;;  %v10707_v23 = vld [vmem:[#allocation2 + $0x33] sm:$0xff]  ;;  %v7101_v22 = vpack.c.bf16 %v6197_v50, %v6196_v43 }
 0x4c4   : > { %12675 = vst [vmem:[#allocation11_spill] sm:$0xff] %v10657_v49  ;;  %v10667_v55 = vpop.permute.xlu0 %4922  ;;  %7194 = vrot.lane.b32.xlu1 %v7193_v57, %s7579_s27  ;;  %v7203_v57 = vpack.i.bf16 %v10659_v5, %v10653_v24  ;;  %v5518_v52 = vld [vmem:[#allocation2 + $0x3] sm:$0xff]  ;;  %7098 = vmatprep.subr.bf16.mxu1 %v7097_v19  ;;  %v7079_v59 = vpack.c.bf16 %v6153_v10, %v6152_v54  ;;  %v10705_v19 = vld [vmem:[#allocation2 + $0x30] sm:$0xff]  ;;  %v6171_v54 = vld [vmem:[%s11972_s3 + $0xf8] sm:$0xff] }
 0x4c5   : > { %12676 = vst [vmem:[#allocation3_spill] sm:$0xff] %v10667_v55  ;;  %7189 = vrot.lane.b32.xlu0 %v7188_v42, %s7580_s23  ;;  %v10691_v32 = vld [vmem:[#allocation2 + $0x21] sm:$0xff]  ;;  %v5527_v42 = vld [vmem:[#allocation2 + $0x14] sm:$0xff]  ;;  %v7198_v62 = vpack.i.bf16 %v5518_v52, %v10655_v21  ;;  %7078 = vmatprep.subr.bf16.mxu0 %v7077_v58 }
 0x4c6   : > { %v5528_v49 = vld [vmem:[#allocation2 + $0x24] sm:$0xff]  ;;  %v6170_v58 = vld [vmem:[%s11972_s3 + $0xf0] sm:$0xff]  ;;  %v7208_v33 = vpack.i.bf16 %v5527_v42, %v10622_v53 }
 0x4c7   : > { %v10693_v36 = vpop.permute.xlu1 %4937  ;;  %7100 = vmatpush3.bf16.msra.mxu1 %v7099_v34  ;;  %v6180_v10 = vld [vmem:[%s11972_s3 + $0x140] sm:$0xff]  ;;  %7080 = vmatpush3.bf16.msra.mxu0 %v7079_v59  ;;  %v7081_v52 = vpack.c.bf16 %v6171_v54, %v6170_v58  ;;  %v6181_v50 = vld [vmem:[%s11972_s3 + $0x148] sm:$0xff]  ;;  %v6154_v43 = vld [vmem:[%s11972_s3 + $0x70] sm:$0xff]  ;;  %v10736_v59 = vpack.i.bf16 %v5528_v49, %v10691_v32 }
 0x4c8   : > { %12677 = vst [vmem:[#allocation4_spill] sm:$0xff] %v10693_v36  ;;  %v10702_v39 = vpop.permute.xlu0 %4932  ;;  %7204 = vrot.lane.b32.xlu1 %v7203_v57, %s7580_s23  ;;  %v10719_v57 = vld [vmem:[#allocation2 + $0x13] sm:$0xff]  ;;  %v5512_v58 = vld [vmem:[#allocation2 + $0x22] sm:$0xff]  ;;  %7102 = vmatprep.subr.bf16.mxu1 %v7101_v22 }
 0x4c9   : > { %12678 = vst [vmem:[#allocation5_spill] sm:$0xff] %v10702_v39  ;;  %7199 = vrot.lane.b32.xlu0 %v7198_v62, %s7581_s29  ;;  %v6155_v34 = vld [vmem:[%s11972_s3 + $0x78] sm:$0xff]  ;;  %v10733_v62 = vld [vmem:[%s11970_s1] ss:$0 sm:$0xff]  ;;  %v7103_v39 = vpack.c.bf16 %v6181_v50, %v6180_v10  ;;  %7082 = vmatprep.subr.bf16.mxu0 %v7081_v52  ;;  %v6198_v49 = vld [vmem:[%s11972_s3 + $0x1d0] sm:$0xff]  ;;  %v10769_v50 = vpack.i.bf16 %v10705_v19, %v5512_v58 }
 0x4ca   : > { %v10738_v54 = vld [vmem:[#allocation2 + $0x31] sm:$0xff]  ;;  %v7083_v55 = vpack.c.bf16 %v6155_v34, %v6154_v43  ;;  %v10759_v24 = vld [vmem:[#allocation2 + $0x43] sm:$0xff]  ;;  %v7233_v43 = vpack.i.bf16 %v10707_v23, %v10705_v19  ;;  %v10786_v19 = vmul.f32 %v10733_v62, %v10014_v18  ;;  %v3793_v11 = vmul.f32 %v10733_v62, %v10033_v51 }
 0x4cb   : > { %v5529_v36 = vld [vmem:[#allocation2 + $0x34] sm:$0xff]  ;;  %v10740_v38 = vpop.permute.xlu1 %4947  ;;  %7104 = vmatpush3.bf16.msra.mxu1 %v7103_v39  ;;  %v10773_v34 = vld [vmem:[#allocation2 + $0x41] sm:$0xff] }
 0x4cc   : > { %12679 = vst [vmem:[#allocation6_spill] sm:$0xff] %v10740_v38  ;;  %v6199_v22 = vld [vmem:[%s11972_s3 + $0x1d8] sm:$0xff]  ;;  %v10753_v10 = vpop.permute.xlu0 %4942  ;;  %7214 = vrot.lane.b32.xlu1 %v10736_v59, %s7579_s27  ;;  %v6182_v42 = vld [vmem:[%s11972_s3 + $0x150] sm:$0xff]  ;;  %v5530_v39 = vld [vmem:[#allocation2 + $0x44] sm:$0xff]  ;;  %7084 = vmatpush3.bf16.msra.mxu0 %v7083_v55  ;;  %v10790_v55 = vmul.f32 %v10733_v62, %v10018_v61 }
 0x4cd   : > { %12680 = vst [vmem:[#allocation7_spill] sm:$0xff] %v10753_v10  ;;  %v7105_v21 = vpack.c.bf16 %v6199_v22, %v6198_v49  ;;  %v6183_v52 = vld [vmem:[%s11972_s3 + $0x158] sm:$0xff]  ;;  %7209 = vrot.lane.b32.xlu0 %v7208_v33, %s7580_s23  ;;  %v10776_v22 = vpack.i.bf16 %v5529_v36, %v10738_v54  ;;  %v10780_v10 = vld [vmem:[#allocation2 + $0x50] sm:$0xff]  ;;  %v6201_v18 = vld [vmem:[%s11972_s3 + $0x1e8] sm:$0xff] }
 0x4ce   : > { %v7107_v49 = vpack.c.bf16 %v6183_v52, %v6182_v42  ;;  %v5513_v53 = vld [vmem:[#allocation2 + $0x32] sm:$0xff] }
 0x4cf   : > { %v10782_v33 = vld [vmem:[#allocation2 + $0x53] sm:$0xff]  ;;  %7106 = vmatprep.subr.bf16.mxu1 %v7105_v21  ;;  %v10792_v58 = vpop.permute.xlu1 %4957  ;;  %v10795_v36 = vpack.i.bf16 %v10745_v63, %v5513_v53  ;;  %v6200_v21 = vld [vmem:[%s11972_s3 + $0x1e0] sm:$0xff]  ;;  %v10812_v53 = vpack.i.bf16 %v5530_v39, %v10773_v34 }
 0x4d0   : > { %12681 = vst [vmem:[#allocation8_spill] sm:$0xff] %v10792_v58  ;;  %v10799_v52 = vld [vmem:[#allocation2 + $0x51] sm:$0xff]  ;;  %v10807_v61 = vpop.permute.xlu0 %4952  ;;  %7224 = vrot.lane.b32.xlu1 %v10769_v50, %s7581_s29  ;;  %7108 = vmatpush3.bf16.msra.mxu1 %v7107_v49  ;;  %v7109_v42 = vpack.c.bf16 %v6201_v18, %v6200_v21  ;;  %v6184_v58 = vld [vmem:[%s11972_s3 + $0x160] sm:$0xff]  ;;  %v3796_v49 = vmul.f32 %v10733_v62, %v10038_v40 }
 0x4d1   : > { %12682 = vst [vmem:[#allocation13_spill] sm:$0xff] %v10799_v52  ;;  %12683 = vst [vmem:[#allocation17_spill] sm:$0xff] %v10807_v61  ;;  %v5531_v38 = vld [vmem:[#allocation2 + $0x54] sm:$0xff]  ;;  %v3794_v61 = vmul.f32 %v10733_v62, %v10030_v20  ;;  %7219 = vrot.lane.b32.xlu0 %v7218_v48, %s7579_s27  ;;  %v5514_v39 = vld [vmem:[#allocation2 + $0x42] sm:$0xff]  ;;  %v7111_v18 = vpack.c.bf16 %v6185_v31, %v6184_v58  ;;  %v3795_v40 = vmul.f32 %v10733_v62, %v10040_v44 }
 0x4d2   : > { %v10828_v21 = vld [vmem:[#allocation2 + $0x60] sm:$0xff]  ;;  %v10833_v27 = vpack.i.bf16 %v10780_v10, %v5514_v39  ;;  %7110 = vmatprep.subr.bf16.mxu1 %v7109_v42  ;;  %v10846_v31 = vpack.i.bf16 %v5531_v38, %v10799_v52  ;;  %v5515_v51 = vld [vmem:[#allocation2 + $0x52] sm:$0xff]  ;;  %v12688_v44 = vpack.i.bf16 %v10691_v32, %v10719_v57 }
 0x4d3   : > { %v5532_v48 = vld [vmem:[#allocation2 + $0x64] sm:$0xff]  ;;  %v10843_v8 = vpop.permute.xlu1 %4996  ;;  %v6202_v39 = vld [vmem:[%s11972_s3 + $0x1f0] sm:$0xff]  ;;  %v6203_v42 = vld [vmem:[%s11972_s3 + $0x1f8] sm:$0xff]  ;;  %v10862_v38 = vpack.i.bf16 %v10828_v21, %v5515_v51 }
 0x4d4   : > { %12684 = vst [vmem:[#allocation18_spill] sm:$0xff] %v10843_v8  ;;  %12685 = vst [vmem:[#allocation23_spill] sm:$0xff] %v10846_v31  ;;  %v10858_v20 = vpop.permute.xlu0 %4991  ;;  %7234 = vrot.lane.b32.xlu1 %v7233_v43, %s7580_s23  ;;  %v10864_v8 = vld [vmem:[#allocation2 + $0x70] sm:$0xff]  ;;  %7112 = vmatpush3.bf16.msra.mxu1 %v7111_v18  ;;  %v7113_v58 = vpack.c.bf16 %v6203_v42, %v6202_v39  ;;  %v6187_v31 = vld [vmem:[%s11972_s3 + $0x178] sm:$0xff]  ;;  %v10879_v51 = vpack.i.bf16 %v5532_v48, %v10839_v37 }
 0x4d5   : > { %12686 = vst [vmem:[#allocation14_spill] sm:$0xff] %v10858_v20  ;;  %12687 = vst [vmem:[#allocation130_spill] sm:$0xff] %v10862_v38  ;;  %v6186_v52 = vld [vmem:[%s11972_s3 + $0x170] sm:$0xff]  ;;  %7229 = vrot.lane.b32.xlu0 %v12688_v44, %s7581_s29  ;;  %v3798_v42 = vmul.f32 %v10733_v62, %v10050_v4  ;;  %v3861_v20 = vmul.f32 %v6816_v28, %v10056_v1  ;;  %v5516_v38 = vld [vmem:[#allocation2 + $0x62] sm:$0xff]  ;;  %v3797_v48 = vmul.f32 %v10733_v62, %v10052_v15 }
 0x4d6   : > { %v10881_v18 = vld [vmem:[#allocation2 + $0x73] sm:$0xff]  ;;  %v7115_v39 = vpack.c.bf16 %v6187_v31, %v6186_v52  ;;  %7114 = vmatprep.subr.bf16.mxu1 %v7113_v58  ;;  %v3860_v44 = vmul.f32 %v6816_v28, %v10058_v13  ;;  %v3863_v52 = vmul.f32 %v6816_v28, %v10068_v9  ;;  %v10897_v4 = vpack.i.bf16 %v10864_v8, %v5516_v38 }
 0x4d7   : > { %v10888_v32 = vld [vmem:[#allocation2 + $0x71] sm:$0xff]  ;;  %v10894_v31 = vpop.permute.xlu1 %5006  ;;  %v3862_v1 = vmul.f32 %v6816_v28, %v10070_v56  ;;  %v3865_v13 = vmul.f32 %v6816_v28, %v10074_v30  ;;  %v3864_v9 = vmul.f32 %v6816_v28, %v10076_v47  ;;  %v3869_v58 = vadd.f32 %v3861_v20, %v10786_v19 }
 0x4d8   : > { %v5533_v57 = vld [vmem:[#allocation2 + $0x74] sm:$0xff]  ;;  %12689 = vst [vmem:[#allocation26_spill] sm:$0xff] %v10894_v31  ;;  %v10903_v43 = vpop.permute.xlu0 %5001  ;;  %7244 = vrot.lane.b32.xlu1 %v10776_v22, %s7579_s27  ;;  %7116 = vmatpush3.bf16.msra.mxu1 %v7115_v39  ;;  %v3867_v38 = vmul.f32 %v6816_v28, %v10086_v14  ;;  %v3866_v15 = vmul.f32 %v6816_v28, %v10088_v46 }
 0x4d9   : > { %7239 = vrot.lane.b32.xlu0 %v10736_v59, %s7580_s23  ;;  %v10914_v56 = vpack.i.bf16 %v5533_v57, %v10888_v32  ;;  %v3868_v39 = vadd.f32 %v3860_v44, %v10790_v55  ;;  %v3871_v30 = vadd.f32 %v3863_v52, %v3794_v61  ;;  %v3930_v47 = vmul.f32 %v6817_v60, %v10092_v12  ;;  %v6818_v59 = vld [vmem:[%s11970_s1 + $0x3] ss:$0 sm:$0xff] }
 0x4da   : > { %v3929_v31 = vmul.f32 %v6817_v60, %v10094_v41  ;;  %v3870_v62 = vadd.f32 %v3862_v1, %v3793_v11  ;;  %v3932_v19 = vmul.f32 %v6817_v60, %v10104_v7  ;;  %v3931_v14 = vmul.f32 %v6817_v60, %v10106_v0 }
 0x4db   : > { %v10927_v57 = vpop.permute.xlu1 %5016  ;;  %v3934_v46 = vmul.f32 %v6817_v60, %v10110_v29  ;;  %v3873_v12 = vadd.f32 %v3865_v13, %v3796_v49  ;;  %v3872_v41 = vadd.f32 %v3864_v9, %v3795_v40  ;;  %v3933_v55 = vmul.f32 %v6817_v60, %v10112_v25 }
 0x4dc   : > { %v10932_v28 = vpop.permute.xlu0 %5011  ;;  %7254 = vrot.lane.b32.xlu1 %v10795_v36, %s7581_s29  ;;  %v3936_v61 = vmul.f32 %v6817_v60, %v10122_v17  ;;  %v3875_v11 = vadd.f32 %v3867_v38, %v3798_v42  ;;  %v3874_v7 = vadd.f32 %v3866_v15, %v3797_v48  ;;  %v3935_v0 = vmul.f32 %v6817_v60, %v10124_v3  ;;  %v12693_v60 = vld [vmem:[#allocation28_spill] sm:$0xff]  ;;  %v12694_v48 = vld [vmem:[#allocation29_spill] sm:$0xff]  ;;  %v12697_v38 = vld [vmem:[#allocation31_spill] sm:$0xff] }
 0x4dd   : > { %7249 = vrot.lane.b32.xlu0 %v10769_v50, %s7579_s27  ;;  %v3999_v29 = vmul.f32 %v6818_v59, %v10128_v26  ;;  %v3938_v20 = vadd.f32 %v3930_v47, %v3869_v58  ;;  %v3937_v44 = vadd.f32 %v3929_v31, %v3868_v39  ;;  %v3998_v52 = vmul.f32 %v6818_v59, %v10130_v2  ;;  %v6819_v50 = vld [vmem:[%s11970_s1 + $0x4] ss:$0 sm:$0xff]  ;;  %v12698_v47 = vld [vmem:[#allocation32_spill] sm:$0xff] }
 0x4de   : > { %v4001_v49 = vmul.f32 %v6818_v59, %v10140_v16  ;;  %v3940_v25 = vadd.f32 %v3932_v19, %v3871_v30  ;;  %v3939_v1 = vadd.f32 %v3931_v14, %v3870_v62  ;;  %v3942_v17 = vadd.f32 %v3934_v46, %v3873_v12  ;;  %v12696_v62 = vld [vmem:[#allocation30_spill] sm:$0xff]  ;;  %v12699_v14 = vld [vmem:[#allocation33_spill] sm:$0xff]  ;;  %v6820_v12 = vld [vmem:[%s11970_s1 + $0x5] ss:$0 sm:$0xff] }
 0x4df   : > { %v10944_v40 = vpop.permute.xlu1 %5026  ;;  %v4000_v13 = vmul.f32 %v6818_v59, %v10142_v6  ;;  %v12692_v26 = vpack.i.bf16 %v10759_v24, %v10745_v63  ;;  %v3941_v2 = vadd.f32 %v3933_v55, %v3872_v41  ;;  %v3944_v16 = vadd.f32 %v3936_v61, %v3875_v11  ;;  %v12701_v61 = vld [vmem:[#allocation35_spill] sm:$0xff] }
 0x4e0   : > { %12690 = vst [vmem:[#allocation27_spill] sm:$0xff] %v10944_v40  ;;  %v10950_v3 = vpop.permute.xlu0 %5021  ;;  %v4003_v42 = vmul.f32 %v6818_v59, %v12693_v60  ;;  %v4002_v31 = vmul.f32 %v6818_v59, %v12694_v48  ;;  %v12695_v6 = vpack.i.bf16 %v10738_v54, %v10659_v5  ;;  %v3943_v15 = vadd.f32 %v3935_v0, %v3874_v7  ;;  %v12700_v54 = vld [vmem:[#allocation34_spill] sm:$0xff]  ;;  %v12702_v7 = vld [vmem:[#allocation36_spill] sm:$0xff]  ;;  %v12706_v48 = vld [vmem:[#allocation39_spill] sm:$0xff] }
 0x4e1   : > { %12691 = vst [vmem:[#allocation19_spill] sm:$0xff] %v10950_v3  ;;  %7264 = vrot.lane.b32.xlu1 %v12692_v26, %s7580_s23  ;;  %v4007_v9 = vadd.f32 %v3999_v29, %v3938_v20  ;;  %v4005_v58 = vmul.f32 %v6818_v59, %v12696_v62  ;;  %v4004_v39 = vmul.f32 %v6818_v59, %v12697_v38  ;;  %v12705_v26 = vld [vmem:[#allocation96_spill] sm:$0xff]  ;;  %v12780_v3 = vld [vmem:[#allocation95_spill] sm:$0xff] }
 0x4e2   : > { %7259 = vrot.lane.b32.xlu0 %v12695_v6, %s7581_s29  ;;  %v4006_v30 = vadd.f32 %v3998_v52, %v3937_v44  ;;  %v4009_v63 = vadd.f32 %v4001_v49, %v3940_v25  ;;  %v4068_v19 = vmul.f32 %v6819_v50, %v12698_v47  ;;  %v4067_v46 = vmul.f32 %v6819_v50, %v12699_v14  ;;  %v12703_v44 = vld [vmem:[#allocation37_spill] sm:$0xff]  ;;  %v12704_v49 = vld [vmem:[#allocation38_spill] sm:$0xff]  ;;  %v12707_v47 = vld [vmem:[#allocation40_spill] sm:$0xff] }
 0x4e3   : > { %v10969_v41 = vpop.permute.xlu1 %5065  ;;  %v4008_v5 = vadd.f32 %v4000_v13, %v3939_v1  ;;  %v4070_v55 = vmul.f32 %v6819_v50, %v12700_v54  ;;  %v4069_v11 = vmul.f32 %v6819_v50, %v12701_v61  ;;  %v4072_v0 = vmul.f32 %v6819_v50, %v12702_v7  ;;  %v12708_v54 = vld [vmem:[#allocation41_spill] sm:$0xff]  ;;  %v12709_v7 = vld [vmem:[#allocation42_spill] sm:$0xff] }
 0x4e4   : > { %v10974_v59 = vpop.permute.xlu0 %5060  ;;  %v4011_v29 = vadd.f32 %v4003_v42, %v3942_v17  ;;  %v4010_v20 = vadd.f32 %v4002_v31, %v3941_v2  ;;  %v4071_v52 = vmul.f32 %v6819_v50, %v12703_v44  ;;  %v4074_v25 = vmul.f32 %v6819_v50, %v12704_v49  ;;  %v12714_v49 = vld [vmem:[#allocation47_spill] sm:$0xff] }
 0x4e5   : > { %7274 = vrot.lane.b32.xlu1 %v10812_v53, %s7579_s27  ;;  %v4013_v1 = vadd.f32 %v4005_v58, %v3944_v16  ;;  %v4012_v13 = vadd.f32 %v4004_v39, %v3943_v15  ;;  %v4073_v60 = vmul.f32 %v6819_v50, %v12705_v26  ;;  %v4137_v6 = vmul.f32 %v6820_v12, %v12706_v48  ;;  %v12711_v39 = vld [vmem:[#allocation44_spill] sm:$0xff] }
 0x4e6   : > { %7269 = vrot.lane.b32.xlu0 %v10776_v22, %s7580_s23  ;;  %v4076_v62 = vadd.f32 %v4068_v19, %v4007_v9  ;;  %v4075_v38 = vadd.f32 %v4067_v46, %v4006_v30  ;;  %v4136_v14 = vmul.f32 %v6820_v12, %v12707_v47  ;;  %v4139_v17 = vmul.f32 %v6820_v12, %v12708_v54  ;;  %v6821_v22 = vld [vmem:[%s11970_s1 + $0x6] ss:$0 sm:$0xff]  ;;  %v12712_v46 = vld [vmem:[#allocation45_spill] sm:$0xff]  ;;  %v12715_v48 = vld [vmem:[#allocation48_spill] sm:$0xff] }
 0x4e7   : > { %v10986_v2 = vpop.permute.xlu1 %5075  ;;  %v4078_v42 = vadd.f32 %v4070_v55, %v4009_v63  ;;  %v4077_v31 = vadd.f32 %v4069_v11, %v4008_v5  ;;  %v4080_v61 = vadd.f32 %v4072_v0, %v4011_v29  ;;  %v4138_v44 = vmul.f32 %v6820_v12, %v12709_v7  ;;  %v12710_v9 = vld [vmem:[#allocation43_spill] sm:$0xff]  ;;  %v12713_v55 = vld [vmem:[#allocation46_spill] sm:$0xff]  ;;  %v12721_v7 = vld [vmem:[#allocation53_spill] sm:$0xff] }
 0x4e8   : > { %v10992_v50 = vpop.permute.xlu0 %5070  ;;  %v4079_v16 = vadd.f32 %v4071_v52, %v4010_v20  ;;  %v4082_v15 = vadd.f32 %v4074_v25, %v4013_v1  ;;  %v4141_v58 = vmul.f32 %v6820_v12, %v12710_v9  ;;  %v4140_v30 = vmul.f32 %v6820_v12, %v12711_v39  ;;  %v6822_v52 = vld [vmem:[%s11970_s1 + $0x7] ss:$0 sm:$0xff] }
 0x4e9   : > { %7284 = vrot.lane.b32.xlu1 %v10833_v27, %s7581_s29  ;;  %v4081_v63 = vadd.f32 %v4073_v60, %v4012_v13  ;;  %v4145_v19 = vadd.f32 %v4137_v6, %v4076_v62  ;;  %v4143_v5 = vmul.f32 %v6820_v12, %v12712_v46  ;;  %v4142_v11 = vmul.f32 %v6820_v12, %v12713_v55  ;;  %v12717_v60 = vld [vmem:[#allocation50_spill] sm:$0xff]  ;;  %v12718_v62 = vld [vmem:[#allocation51_spill] sm:$0xff] }
 0x4ea   : > { %7279 = vrot.lane.b32.xlu0 %v10795_v36, %s7579_s27  ;;  %v4144_v0 = vadd.f32 %v4136_v14, %v4075_v38  ;;  %v4147_v29 = vadd.f32 %v4139_v17, %v4078_v42  ;;  %v4206_v26 = vmul.f32 %v6821_v22, %v12714_v49  ;;  %v4205_v20 = vmul.f32 %v6821_v22, %v12715_v48  ;;  %v12716_v36 = vld [vmem:[#allocation49_spill] sm:$0xff]  ;;  %v12720_v17 = vld [vmem:[#allocation52_spill] sm:$0xff]  ;;  %v12723_v46 = vld [vmem:[#allocation54_spill] sm:$0xff] }
 0x4eb   : > { %v11007_v25 = vpop.permute.xlu1 %5085  ;;  %v4146_v1 = vadd.f32 %v4138_v44, %v4077_v31  ;;  %v4208_v13 = vmul.f32 %v6821_v22, %v12716_v36  ;;  %v4207_v6 = vmul.f32 %v6821_v22, %v12717_v60  ;;  %v4210_v47 = vmul.f32 %v6821_v22, %v12718_v62  ;;  %v12724_v36 = vld [vmem:[#allocation55_spill] sm:$0xff] }
 0x4ec   : > { %v11012_v12 = vpop.permute.xlu0 %5080  ;;  %v12719_v38 = vpack.i.bf16 %v10782_v33, %v10780_v10  ;;  %v4149_v14 = vadd.f32 %v4141_v58, %v4080_v61  ;;  %v4148_v54 = vadd.f32 %v4140_v30, %v4079_v16  ;;  %v4209_v42 = vmul.f32 %v6821_v22, %v12720_v17  ;;  %v12725_v16 = vld [vmem:[#allocation56_spill] sm:$0xff]  ;;  %v12727_v17 = vld [vmem:[#allocation57_spill] sm:$0xff] }
 0x4ed   : > { %v4212_v9 = vmul.f32 %v6821_v22, %v12721_v7  ;;  %v12722_v31 = vpack.i.bf16 %v10773_v34, %v10707_v23  ;;  %v4151_v44 = vadd.f32 %v4143_v5, %v4082_v15  ;;  %v4150_v39 = vadd.f32 %v4142_v11, %v4081_v63  ;;  %v6823_v34 = vld [vmem:[%s11970_s1 + $0x8] ss:$0 sm:$0xff]  ;;  %v12731_v11 = vld [vmem:[#allocation59_spill] sm:$0xff] }
 0x4ee   : > { %7294 = vrot.lane.b32.xlu1 %v12719_v38, %s7580_s23  ;;  %v4211_v55 = vmul.f32 %v6821_v22, %v12723_v46  ;;  %v4275_v49 = vmul.f32 %v6822_v52, %v10272_v35  ;;  %v4214_v48 = vadd.f32 %v4206_v26, %v4145_v19  ;;  %v4213_v10 = vadd.f32 %v4205_v20, %v4144_v0  ;;  %v12729_v35 = vld [vmem:[#allocation23_spill] sm:$0xff]  ;;  %v12730_v19 = vld [vmem:[#allocation58_spill] sm:$0xff]  ;;  %v12732_v20 = vld [vmem:[#allocation60_spill] sm:$0xff] }
 0x4ef   : > { %7289 = vrot.lane.b32.xlu0 %v12722_v31, %s7581_s29  ;;  %v4274_v61 = vmul.f32 %v6822_v52, %v12724_v36  ;;  %v4277_v58 = vmul.f32 %v6822_v52, %v12725_v16  ;;  %v11028_v30 = vpop.permute.xlu1 %5095  ;;  %v4216_v60 = vadd.f32 %v4208_v13, %v4147_v29  ;;  %v4215_v62 = vadd.f32 %v4207_v6, %v4146_v1  ;;  %v12733_v13 = vld [vmem:[#allocation103_spill] sm:$0xff] }
 0x4f0   : > { %12726 = vst [vmem:[#allocation20_spill] sm:$0xff] %v11028_v30  ;;  %v4218_v38 = vadd.f32 %v4210_v47, %v4149_v14  ;;  %v4276_v23 = vmul.f32 %v6822_v52, %v12727_v17  ;;  %v11034_v22 = vpop.permute.xlu0 %5090  ;;  %v4217_v15 = vadd.f32 %v4209_v42, %v4148_v54  ;;  %v4220_v63 = vadd.f32 %v4212_v9, %v4151_v44  ;;  %v6824_v47 = vld [vmem:[%s11970_s1 + $0x9] ss:$0 sm:$0xff]  ;;  %v12734_v42 = vld [vmem:[#allocation61_spill] sm:$0xff]  ;;  %v12735_v9 = vld [vmem:[#allocation62_spill] sm:$0xff] }
 0x4f1   : > { %12728 = vst [vmem:[#allocation21_spill] sm:$0xff] %v11034_v22  ;;  %v4279_v5 = vmul.f32 %v6822_v52, %v12730_v19  ;;  %v4278_v0 = vmul.f32 %v6822_v52, %v12731_v11  ;;  %v4219_v29 = vadd.f32 %v4211_v55, %v4150_v39  ;;  %v4283_v26 = vadd.f32 %v4275_v49, %v4214_v48  ;;  %v12737_v55 = vld [vmem:[#allocation64_spill] sm:$0xff]  ;;  %v12738_v48 = vld [vmem:[#allocation65_spill] sm:$0xff] }
 0x4f2   : > { %7304 = vrot.lane.b32.xlu1 %v12729_v35, %s7579_s27  ;;  %v4281_v1 = vmul.f32 %v6822_v52, %v12732_v20  ;;  %v4280_v6 = vmul.f32 %v6822_v52, %v12733_v13  ;;  %v4282_v14 = vadd.f32 %v4274_v61, %v4213_v10  ;;  %v4285_v54 = vadd.f32 %v4277_v58, %v4216_v60  ;;  %v11057_v52 = vld [vmem:[%s11970_s1 + $0xa] ss:$0 sm:$0xff]  ;;  %v12739_v61 = vld [vmem:[#allocation130_spill] sm:$0xff]  ;;  %v11150_v22 = vld [vmem:[%s11970_s1 + $0x10] ss:$0 sm:$0xff] }
 0x4f3   : > { %7299 = vrot.lane.b32.xlu0 %v10812_v53, %s7580_s23  ;;  %v4344_v7 = vmul.f32 %v6823_v34, %v12734_v42  ;;  %v4343_v31 = vmul.f32 %v6823_v34, %v12735_v9  ;;  %v11049_v44 = vpop.permute.xlu1 %5134  ;;  %v4284_v46 = vadd.f32 %v4276_v23, %v4215_v62  ;;  %v12736_v53 = vld [vmem:[#allocation63_spill] sm:$0xff]  ;;  %v4345_v49 = vmul.f32 %v6823_v34, %v12737_v55  ;;  %v12740_v60 = vld [vmem:[#allocation66_spill] sm:$0xff]  ;;  %v12741_v17 = vld [vmem:[#allocation120_spill] sm:$0xff] }
 0x4f4   : > { %v4346_v39 = vmul.f32 %v6823_v34, %v12736_v53  ;;  %v4348_v36 = vmul.f32 %v6823_v34, %v12738_v48  ;;  %v11059_v10 = vpop.permute.xlu0 %5129  ;;  %v4287_v16 = vadd.f32 %v4279_v5, %v4218_v38  ;;  %v4286_v58 = vadd.f32 %v4278_v0, %v4217_v15  ;;  %v12742_v20 = vld [vmem:[#allocation68_spill] sm:$0xff]  ;;  %v12743_v42 = vld [vmem:[#allocation69_spill] sm:$0xff]  ;;  %v12744_v5 = vld [vmem:[#allocation70_spill] sm:$0xff] }
 0x4f5   : > { %v4347_v62 = vmul.f32 %v6823_v34, %v12740_v60  ;;  %v4412_v23 = vmul.f32 %v6824_v47, %v12741_v17  ;;  %v4289_v19 = vadd.f32 %v4281_v1, %v4220_v63  ;;  %v4288_v11 = vadd.f32 %v4280_v6, %v4219_v29  ;;  %v11072_v53 = vld [vmem:[%s11970_s1 + $0xb] ss:$0 sm:$0xff]  ;;  %v12746_v1 = vld [vmem:[#allocation71_spill] sm:$0xff] }
 0x4f6   : > { %7314 = vrot.lane.b32.xlu1 %v12739_v61, %s7581_s29  ;;  %v4350_v13 = vmul.f32 %v6823_v34, %v12742_v20  ;;  %v4349_v9 = vmul.f32 %v6823_v34, %v12743_v42  ;;  %v4352_v38 = vadd.f32 %v4344_v7, %v4283_v26  ;;  %v4351_v15 = vadd.f32 %v4343_v31, %v4282_v14  ;;  %v12745_v55 = vld [vmem:[#allocation80_spill] sm:$0xff]  ;;  %v12752_v42 = vld [vmem:[#allocation73_spill] sm:$0xff] }
 0x4f7   : > { %7309 = vrot.lane.b32.xlu0 %v10833_v27, %s7579_s27  ;;  %v4413_v0 = vmul.f32 %v6824_v47, %v12744_v5  ;;  %v4481_v48 = vmul.f32 %v11057_v52, %v12745_v55  ;;  %v11077_v60 = vpop.permute.xlu1 %5144  ;;  %v4354_v27 = vadd.f32 %v4346_v39, %v4285_v54  ;;  %v4353_v63 = vadd.f32 %v4345_v49, %v4284_v46  ;;  %v11083_v34 = vld [vmem:[%s11970_s1 + $0xc] ss:$0 sm:$0xff]  ;;  %v12750_v49 = vld [vmem:[#allocation13_spill] sm:$0xff]  ;;  %v12753_v55 = vld [vmem:[#allocation74_spill] sm:$0xff] }
 0x4f8   : > { %v4356_v29 = vadd.f32 %v4348_v36, %v4287_v16  ;;  %v4415_v6 = vmul.f32 %v6824_v47, %v12746_v1  ;;  %v11085_v17 = vpop.permute.xlu0 %5139  ;;  %v12747_v26 = vpack.i.bf16 %v10837_v45, %v10828_v21  ;;  %v4355_v14 = vadd.f32 %v4347_v62, %v4286_v58  ;;  %v12748_v31 = vld [vmem:[#allocation72_spill] sm:$0xff]  ;;  %v12754_v62 = vld [vmem:[#allocation75_spill] sm:$0xff] }
 0x4f9   : > { %v4420_v7 = vadd.f32 %v4412_v23, %v4351_v15  ;;  %v4414_v54 = vmul.f32 %v6824_v47, %v12748_v31  ;;  %v12749_v46 = vld [vmem:[#allocation88_spill] sm:$0xff]  ;;  %v12751_v36 = vpack.i.bf16 %v12750_v49, %v10759_v24  ;;  %v4358_v16 = vadd.f32 %v4350_v13, %v4289_v19  ;;  %v12758_v49 = vld [vmem:[#allocation81_spill] sm:$0xff] }
 0x4fa   : > { %7324 = vrot.lane.b32.xlu1 %v12747_v26, %s7580_s23  ;;  %v4550_v39 = vmul.f32 %v11072_v53, %v12749_v46  ;;  %v4357_v20 = vadd.f32 %v4349_v9, %v4288_v11  ;;  %v4417_v5 = vmul.f32 %v6824_v47, %v12752_v42  ;;  %v4416_v1 = vmul.f32 %v6824_v47, %v12753_v55  ;;  %v11103_v21 = vld [vmem:[%s11970_s1 + $0xd] ss:$0 sm:$0xff]  ;;  %v12755_v26 = vld [vmem:[#allocation98_spill] sm:$0xff]  ;;  %v12757_v9 = vld [vmem:[#allocation79_spill] sm:$0xff] }
 0x4fb   : > { %7319 = vrot.lane.b32.xlu0 %v12751_v36, %s7581_s29  ;;  %v4421_v58 = vadd.f32 %v4413_v0, %v4352_v38  ;;  %v4419_v23 = vmul.f32 %v6824_v47, %v12754_v62  ;;  %v4489_v15 = vadd.f32 %v4481_v48, %v4420_v7  ;;  %v4619_v31 = vmul.f32 %v11083_v34, %v12755_v26  ;;  %v11108_v24 = vpop.permute.xlu1 %5154  ;;  %v12756_v11 = vld [vmem:[#allocation78_spill] sm:$0xff]  ;;  %v11118_v38 = vld [vmem:[%s11970_s1 + $0xe] ss:$0 sm:$0xff]  ;;  %v12761_v26 = vld [vmem:[#allocation83_spill] sm:$0xff] }
 0x4fc   : > { %v4423_v19 = vadd.f32 %v4415_v6, %v4354_v27  ;;  %v4418_v13 = vmul.f32 %v6824_v47, %v12756_v11  ;;  %v4482_v46 = vmul.f32 %v11057_v52, %v12757_v9  ;;  %v4484_v36 = vmul.f32 %v11057_v52, %v12758_v49  ;;  %v11120_v0 = vpop.permute.xlu0 %5149  ;;  %v12759_v27 = vld [vmem:[#allocation82_spill] sm:$0xff]  ;;  %v12760_v7 = vld [vmem:[#allocation104_spill] sm:$0xff] }
 0x4fd   : > { %v4422_v48 = vadd.f32 %v4414_v54, %v4353_v63  ;;  %v4483_v47 = vmul.f32 %v11057_v52, %v12759_v27  ;;  %v4558_v6 = vadd.f32 %v4550_v39, %v4489_v15  ;;  %v4688_v42 = vmul.f32 %v11103_v21, %v12760_v7  ;;  %v12762_v9 = vld [vmem:[#allocation84_spill] sm:$0xff]  ;;  %v12763_v39 = vld [vmem:[#allocation86_spill] sm:$0xff] }
 0x4fe   : > { %7334 = vrot.lane.b32.xlu1 %v10879_v51, %s7579_s27  ;;  %v4425_v55 = vadd.f32 %v4417_v5, %v4356_v29  ;;  %v4424_v62 = vadd.f32 %v4416_v1, %v4355_v14  ;;  %v4486_v11 = vmul.f32 %v11057_v52, %v12761_v26  ;;  %v4485_v49 = vmul.f32 %v11057_v52, %v12762_v9  ;;  %v11137_v63 = vld [vmem:[%s11970_s1 + $0xf] ss:$0 sm:$0xff]  ;;  %v12765_v26 = vld [vmem:[#allocation67_spill] sm:$0xff] }
 0x4ff   : > { %7329 = vrot.lane.b32.xlu0 %v12729_v35, %s7580_s23  ;;  %v4427_v54 = vadd.f32 %v4419_v23, %v4358_v16  ;;  %v4488_v15 = vmul.f32 %v11057_v52, %v12763_v39  ;;  %v4627_v27 = vadd.f32 %v4619_v31, %v4558_v6  ;;  %v12764_v7 = vld [vmem:[#allocation112_spill] sm:$0xff]  ;;  %v11143_v29 = vpop.permute.xlu1 %5198  ;;  %v4426_v14 = vadd.f32 %v4418_v13, %v4357_v20  ;;  %v12767_v31 = vld [vmem:[#allocation87_spill] sm:$0xff]  ;;  %v12770_v39 = vld [vmem:[#allocation90_spill] sm:$0xff] }
 0x500   : > { %v4757_v35 = vmul.f32 %v11118_v38, %v12764_v7  ;;  %v4490_v5 = vadd.f32 %v4482_v46, %v4421_v58  ;;  %v4492_v1 = vadd.f32 %v4484_v36, %v4423_v19  ;;  %v4487_v9 = vmul.f32 %v11057_v52, %v12765_v26  ;;  %v11152_v16 = vpop.permute.xlu0 %5159  ;;  %v12768_v58 = vld [vmem:[#allocation121_spill] sm:$0xff] }
 0x501   : > { %12766 = vst [vmem:[#allocation22_spill] sm:$0xff] %v11152_v16  ;;  %v4491_v23 = vadd.f32 %v4483_v47, %v4422_v48  ;;  %v4551_v6 = vmul.f32 %v11072_v53, %v12767_v31  ;;  %v4696_v20 = vadd.f32 %v4688_v42, %v4627_v27  ;;  %v4826_v19 = vmul.f32 %v11137_v63, %v12768_v58  ;;  %v12769_v46 = vld [vmem:[#allocation89_spill] sm:$0xff]  ;;  %v12772_v31 = vld [vmem:[#allocation127_spill] sm:$0xff]  ;;  %v12774_v58 = vld [vmem:[#allocation92_spill] sm:$0xff] }
 0x502   : > { %7344 = vrot.lane.b32.xlu1 %v10897_v4, %s7581_s29  ;;  %v4494_v52 = vadd.f32 %v4486_v11, %v4425_v55  ;;  %v4493_v13 = vadd.f32 %v4485_v49, %v4424_v62  ;;  %v4553_v36 = vmul.f32 %v11072_v53, %v12769_v46  ;;  %v4552_v7 = vmul.f32 %v11072_v53, %v12770_v39  ;;  %v11169_v48 = vld [vmem:[%s11970_s1 + $0x11] ss:$0 sm:$0xff]  ;;  %v12773_v11 = vld [vmem:[#allocation91_spill] sm:$0xff]  ;;  %v12775_v39 = vld [vmem:[#allocation94_spill] sm:$0xff] }
 0x503   : > { %7339 = vrot.lane.b32.xlu0 %v12739_v61, %s7579_s27  ;;  %v4496_v47 = vadd.f32 %v4488_v15, %v4427_v54  ;;  %v12771_v42 = vld [vmem:[#allocation97_spill] sm:$0xff]  ;;  %v4765_v26 = vadd.f32 %v4757_v35, %v4696_v20  ;;  %v4895_v61 = vmul.f32 %v11150_v22, %v12772_v31  ;;  %v11175_v55 = vpop.permute.xlu1 %5267  ;;  %v4495_v62 = vadd.f32 %v4487_v9, %v4426_v14  ;;  %v12778_v31 = vld [vmem:[#allocation3_spill] sm:$0xff] }
 0x504   : > { %v4620_v27 = vmul.f32 %v11083_v34, %v12771_v42  ;;  %v4555_v49 = vmul.f32 %v11072_v53, %v12773_v11  ;;  %v4554_v46 = vmul.f32 %v11072_v53, %v12774_v58  ;;  %v4557_v16 = vmul.f32 %v11072_v53, %v12775_v39  ;;  %v11186_v54 = vld [vmem:[%s11970_s1 + $0x12] ss:$0 sm:$0xff]  ;;  %v11188_v15 = vpop.permute.xlu0 %5203 }
 0x505   : > { %v12776_v35 = vpack.i.bf16 %v10881_v18, %v10864_v8  ;;  %v4559_v14 = vadd.f32 %v4551_v6, %v4490_v5  ;;  %v12777_v9 = vld [vmem:[#allocation117_spill] sm:$0xff]  ;;  %v4834_v42 = vadd.f32 %v4826_v19, %v4765_v26  ;;  %v4964_v11 = vmul.f32 %v11169_v48, %v12778_v31  ;;  %v12782_v26 = vld [vmem:[#allocation111_spill] sm:$0xff] }
 0x506   : > { %v4689_v20 = vmul.f32 %v11103_v21, %v12777_v9  ;;  %v12779_v58 = vpack.i.bf16 %v10839_v37, %v10782_v33  ;;  %v4561_v39 = vadd.f32 %v4553_v36, %v4492_v1  ;;  %v4560_v30 = vadd.f32 %v4552_v7, %v4491_v23  ;;  %v12781_v8 = vld [vmem:[#allocation85_spill] sm:$0xff]  ;;  %v12783_v37 = vld [vmem:[#allocation14_spill] sm:$0xff]  ;;  %v12784_v36 = vld [vmem:[#allocation99_spill] sm:$0xff] }
 0x507   : > { %7354 = vrot.lane.b32.xlu1 %v12776_v35, %s7580_s23  ;;  %v4556_v40 = vmul.f32 %v11072_v53, %v12780_v3  ;;  %v4622_v5 = vmul.f32 %v11083_v34, %v12781_v8  ;;  %v11209_v6 = vld [vmem:[%s11970_s1 + $0x13] ss:$0 sm:$0xff]  ;;  %v4628_v19 = vadd.f32 %v4620_v27, %v4559_v14  ;;  %v4758_v35 = vmul.f32 %v11118_v38, %v12782_v26  ;;  %v11215_v1 = vpop.permute.xlu1 %5272  ;;  %v11222_v31 = vld [vmem:[%s11970_s1 + $0x14] ss:$0 sm:$0xff] }
 0x508   : > { %7349 = vrot.lane.b32.xlu0 %v12779_v58, %s7581_s29  ;;  %v4903_v9 = vadd.f32 %v4895_v61, %v4834_v42  ;;  %v5033_v33 = vmul.f32 %v11186_v54, %v12783_v37  ;;  %v4563_v23 = vadd.f32 %v4555_v49, %v4494_v52  ;;  %v4562_v3 = vadd.f32 %v4554_v46, %v4493_v13  ;;  %v11224_v27 = vpop.permute.xlu0 %5208  ;;  %v12785_v14 = vld [vmem:[#allocation77_spill] sm:$0xff]  ;;  %v12786_v49 = vld [vmem:[#allocation100_spill] sm:$0xff] }
 0x509   : > { %v4565_v53 = vadd.f32 %v4557_v16, %v4496_v47  ;;  %v4621_v7 = vmul.f32 %v11083_v34, %v12784_v36  ;;  %v4697_v61 = vadd.f32 %v4689_v20, %v4628_v19  ;;  %v4827_v42 = vmul.f32 %v11137_v63, %v12785_v14  ;;  %v12787_v58 = vld [vmem:[#allocation101_spill] sm:$0xff]  ;;  %v12788_v19 = vld [vmem:[#allocation126_spill] sm:$0xff] }
 0x50a   : > { %v4972_v52 = vadd.f32 %v4964_v11, %v4903_v9  ;;  %v5102_v16 = vmul.f32 %v11209_v6, %v10974_v59  ;;  %v4564_v13 = vadd.f32 %v4556_v40, %v4495_v62  ;;  %v4630_v47 = vadd.f32 %v4622_v5, %v4561_v39  ;;  %v11241_v20 = vld [vmem:[%s11970_s1 + $0x15] ss:$0 sm:$0xff]  ;;  %v12789_v39 = vld [vmem:[#allocation102_spill] sm:$0xff]  ;;  %v12790_v9 = vld [vmem:[#allocation116_spill] sm:$0xff] }
 0x50b   : > { %7364 = vrot.lane.b32.xlu1 %v10914_v56, %s7579_s27  ;;  %v4624_v46 = vmul.f32 %v11083_v34, %v12786_v49  ;;  %v4623_v8 = vmul.f32 %v11083_v34, %v12787_v58  ;;  %v4766_v11 = vadd.f32 %v4758_v35, %v4697_v61  ;;  %v4896_v59 = vmul.f32 %v11150_v22, %v12788_v19  ;;  %v11247_v40 = vpop.permute.xlu1 %5213  ;;  %v12791_v36 = vld [vmem:[#allocation106_spill] sm:$0xff]  ;;  %v11258_v35 = vld [vmem:[%s11970_s1 + $0x16] ss:$0 sm:$0xff] }
 0x50c   : > { %7359 = vrot.lane.b32.xlu0 %v10879_v51, %s7580_s23  ;;  %v5041_v26 = vadd.f32 %v5033_v33, %v4972_v52  ;;  %v5171_v51 = vmul.f32 %v11222_v31, %v11059_v10  ;;  %v4629_v62 = vadd.f32 %v4621_v7, %v4560_v30  ;;  %v4626_v5 = vmul.f32 %v11083_v34, %v12789_v39  ;;  %v5337_v33 = vpop.permute.xlu0 %5336  ;;  %v12792_v10 = vld [vmem:[#allocation11_spill] sm:$0xff]  ;;  %v12793_v58 = vld [vmem:[#allocation105_spill] sm:$0xff]  ;;  %v12794_v39 = vld [vmem:[#allocation114_spill] sm:$0xff] }
 0x50d   : > { %v4625_v37 = vmul.f32 %v11083_v34, %v12790_v9  ;;  %v4690_v14 = vmul.f32 %v11103_v21, %v12791_v36  ;;  %v4835_v61 = vadd.f32 %v4827_v42, %v4766_v11  ;;  %v4965_v52 = vmul.f32 %v11169_v48, %v12792_v10  ;;  %v11273_v42 = vld [vmem:[%s11970_s1 + $0x17] ss:$0 sm:$0xff]  ;;  %v12795_v11 = vld [vmem:[#allocation18_spill] sm:$0xff]  ;;  %v12796_v36 = vld [vmem:[#allocation123_spill] sm:$0xff] }
 0x50e   : > { %v5110_v30 = vadd.f32 %v5102_v16, %v5041_v26  ;;  %v5240_v7 = vmul.f32 %v11241_v20, %v11143_v29  ;;  %v4632_v34 = vadd.f32 %v4624_v46, %v4563_v23  ;;  %v4631_v49 = vadd.f32 %v4623_v8, %v4562_v3 }
 0x50f   : > { %v4691_v19 = vmul.f32 %v11103_v21, %v12793_v58  ;;  %v4759_v9 = vmul.f32 %v11118_v38, %v12794_v39  ;;  %v4904_v16 = vadd.f32 %v4896_v59, %v4835_v61  ;;  %v5034_v29 = vmul.f32 %v11186_v54, %v12795_v11  ;;  %v5342_v23 = vpop.permute.xlu1 %5341 }
 0x510   : > { %7369 = vrot.lane.b32.xlu0 %v10897_v4, %s7579_s27  ;;  %v5179_v26 = vadd.f32 %v5171_v51, %v5110_v30  ;;  %v5309_v4 = vmul.f32 %v11258_v35, %v11175_v55  ;;  %v4634_v3 = vadd.f32 %v4626_v5, %v4565_v53  ;;  %v4633_v46 = vadd.f32 %v4625_v37, %v4564_v13  ;;  %v11281_v58 = vpop.permute.xlu0 %5277  ;;  %v12798_v53 = vld [vmem:[#allocation107_spill] sm:$0xff]  ;;  %v12799_v51 = vld [vmem:[#allocation108_spill] sm:$0xff] }
 0x511   : > { %v4698_v8 = vadd.f32 %v4690_v14, %v4629_v62  ;;  %v4828_v10 = vmul.f32 %v11137_v63, %v12796_v36  ;;  %v4973_v39 = vadd.f32 %v4965_v52, %v4904_v16  ;;  %v5103_v59 = vmul.f32 %v11209_v6, %v10969_v41  ;;  %v12800_v37 = vld [vmem:[#allocation12_spill] sm:$0xff]  ;;  %v11299_v41 = vld [vmem:[%s11970_s1 + $0x18] ss:$0 sm:$0xff]  ;;  %v12803_v36 = vld [vmem:[#allocation5_spill] sm:$0xff] }
 0x512   : > { %v5248_v61 = vadd.f32 %v5240_v7, %v5179_v26  ;;  %v5378_v11 = vmul.f32 %v11273_v42, %v5337_v33  ;;  %v12797_v55 = vpack.i.bf16 %v10888_v32, %v10837_v45  ;;  %v4693_v13 = vmul.f32 %v11103_v21, %v12798_v53  ;;  %v12801_v7 = vld [vmem:[#allocation109_spill] sm:$0xff] }
 0x513   : > { %v4692_v62 = vmul.f32 %v11103_v21, %v12799_v51  ;;  %v4767_v5 = vadd.f32 %v4759_v9, %v4698_v8  ;;  %v4897_v14 = vmul.f32 %v11150_v22, %v12800_v37  ;;  %v4699_v33 = vadd.f32 %v4691_v19, %v4630_v47  ;;  %v11303_v30 = vpop.permute.xlu1 %5218  ;;  %v12802_v9 = vld [vmem:[#allocation110_spill] sm:$0xff] }
 0x514   : > { %7379 = vrot.lane.b32.xlu0 %v12797_v55, %s7581_s29  ;;  %v5042_v52 = vadd.f32 %v5034_v29, %v4973_v39  ;;  %v5172_v45 = vmul.f32 %v11222_v31, %v11049_v44  ;;  %v5317_v32 = vadd.f32 %v5309_v4, %v5248_v61  ;;  %v4695_v16 = vmul.f32 %v11103_v21, %v12801_v7  ;;  %v5406_v53 = vpop.permute.xlu0 %5405  ;;  %v12804_v39 = vld [vmem:[#allocation113_spill] sm:$0xff]  ;;  %v11321_v61 = vld [vmem:[%s11971_s2] ss:$0 sm:$0xff] }
 0x515   : > { %v4694_v26 = vmul.f32 %v11103_v21, %v12802_v9  ;;  %v4836_v8 = vadd.f32 %v4828_v10, %v4767_v5  ;;  %v4966_v55 = vmul.f32 %v11169_v48, %v12803_v36  ;;  %v5241_v47 = vmul.f32 %v11241_v20, %v11188_v15 }
 0x516   : > { %v5111_v51 = vadd.f32 %v5103_v59, %v5042_v52  ;;  %v5386_v19 = vadd.f32 %v5378_v11, %v5317_v32  ;;  %v5447_v44 = vmul.f32 %v11299_v41, %v5406_v53  ;;  %v4701_v29 = vadd.f32 %v4693_v13, %v4632_v34  ;;  %v12805_v13 = vld [vmem:[#allocation122_spill] sm:$0xff] }
 0x517   : > { %v4700_v4 = vadd.f32 %v4692_v62, %v4631_v49  ;;  %v4760_v21 = vmul.f32 %v11118_v38, %v12804_v39  ;;  %v4905_v10 = vadd.f32 %v4897_v14, %v4836_v8  ;;  %v5035_v15 = vmul.f32 %v11186_v54, %v10903_v43 }
 0x518   : > { %7389 = vrot.lane.b32.xlu0 %v10914_v56, %s7580_s23  ;;  %v5180_v59 = vadd.f32 %v5172_v45, %v5111_v51  ;;  %v5310_v11 = vmul.f32 %v11258_v35, %v11215_v1  ;;  %v5455_v5 = vadd.f32 %v5447_v44, %v5386_v19  ;;  %v5347_v56 = vpop.permute.xlu1 %5346  ;;  %v4703_v34 = vadd.f32 %v4695_v16, %v4634_v3  ;;  %v11329_v14 = vpop.permute.xlu0 %5282  ;;  %v12806_v1 = vld [vmem:[#allocation115_spill] sm:$0xff]  ;;  %v12807_v3 = vld [vmem:[#allocation118_spill] sm:$0xff]  ;;  %v12808_v16 = vld [vmem:[#allocation93_spill] sm:$0xff] }
 0x519   : > { %v4702_v49 = vadd.f32 %v4694_v26, %v4633_v46  ;;  %v4829_v62 = vmul.f32 %v11137_v63, %v12805_v13  ;;  %v4974_v37 = vadd.f32 %v4966_v55, %v4905_v10  ;;  %v5104_v52 = vmul.f32 %v11209_v6, %v10992_v50  ;;  %v12810_v51 = vld [vmem:[#allocation76_spill] sm:$0xff] }
 0x51a   : > { %v5249_v32 = vadd.f32 %v5241_v47, %v5180_v59  ;;  %v5379_v43 = vmul.f32 %v11273_v42, %v5342_v23  ;;  %v5470_v45 = vadd.f32 %v11321_v61, %v5455_v5  ;;  %v4768_v7 = vadd.f32 %v4760_v21, %v4699_v33  ;;  %v12809_v23 = vld [vmem:[#allocation119_spill] sm:$0xff]  ;;  %v12811_v44 = vld [vmem:[#allocation4_spill] sm:$0xff] }
 0x51b   : > { %v4762_v9 = vmul.f32 %v11118_v38, %v12806_v1  ;;  %v4761_v46 = vmul.f32 %v11118_v38, %v12807_v3  ;;  %v4898_v26 = vmul.f32 %v11150_v22, %v12808_v16  ;;  %v5043_v8 = vadd.f32 %v5035_v15, %v4974_v37  ;;  %v12812_v5 = vld [vmem:[#allocation124_spill] sm:$0xff] }
 0x51c   : > { %v5173_v36 = vmul.f32 %v11222_v31, %v11085_v17  ;;  %v5318_v50 = vadd.f32 %v5310_v11, %v5249_v32  ;;  %v5478_v55 = vmax.f32 %v5470_v45, 0.0  ;;  %v11343_v53 = vpop.permute.xlu1 %5223  ;;  %v4764_v33 = vmul.f32 %v11118_v38, %v12809_v23  ;;  %v5411_v21 = vpop.permute.xlu0 %5410  ;;  %v12814_v32 = vld [vmem:[#allocation125_spill] sm:$0xff]  ;;  %v12815_v23 = vld [vmem:[#allocation15_spill] sm:$0xff] }
 0x51d   : > { %v4763_v47 = vmul.f32 %v11118_v38, %v12810_v51  ;;  %v4837_v19 = vadd.f32 %v4829_v62, %v4768_v7  ;;  %v4967_v39 = vmul.f32 %v11169_v48, %v12811_v44  ;;  %v5112_v10 = vadd.f32 %v5104_v52, %v5043_v8  ;;  %v12813_v38 = vld [vmem:[#allocation26_spill] sm:$0xff]  ;;  %v12818_v44 = vld [vmem:[#allocation7_spill] sm:$0xff] }
 0x51e   : > { %v5242_v15 = vmul.f32 %v11241_v20, %v11224_v27  ;;  %v5387_v17 = vadd.f32 %v5379_v43, %v5318_v50  ;;  %5486 = vst.msk [vmem:[#allocation2 + $0x80] sm:$0xff] %vm1973_vm0, %v5478_v55  ;;  %v5448_v59 = vmul.f32 %v11299_v41, %v5411_v21  ;;  %v4770_v11 = vadd.f32 %v4762_v9, %v4701_v29 }
 0x51f   : > { %v4831_v13 = vmul.f32 %v11137_v63, %v12812_v5  ;;  %v4906_v37 = vadd.f32 %v4898_v26, %v4837_v19  ;;  %v5036_v62 = vmul.f32 %v11186_v54, %v12813_v38  ;;  %v4830_v45 = vmul.f32 %v11137_v63, %v12814_v32  ;;  %v6221_v32 = vld [vmem:[%s11972_s3 + $0x288] sm:$0xff] }
 0x520   : > { %v5181_v52 = vadd.f32 %v5173_v36, %v5112_v10  ;;  %v5311_v27 = vmul.f32 %v11258_v35, %v11281_v58  ;;  %v5456_v43 = vadd.f32 %v5448_v59, %v5387_v17  ;;  %v5352_v7 = vpop.permute.xlu1 %5351  ;;  %v4769_v1 = vadd.f32 %v4761_v46, %v4700_v4  ;;  %v11365_v9 = vpop.permute.xlu0 %5287  ;;  %v12816_v46 = vld [vmem:[#allocation128_spill] sm:$0xff] }
 0x521   : > { %v4772_v3 = vadd.f32 %v4764_v33, %v4703_v34  ;;  %v4975_v16 = vadd.f32 %v4967_v39, %v4906_v37  ;;  %v5105_v29 = vmul.f32 %v11209_v6, %v10986_v2  ;;  %v4771_v26 = vadd.f32 %v4763_v47, %v4702_v49  ;;  %v12817_v47 = vld [vmem:[#allocation129_spill] sm:$0xff] }
 0x522   : > { %v5250_v8 = vadd.f32 %v5242_v15, %v5181_v52  ;;  %v5380_v50 = vmul.f32 %v11273_v42, %v5347_v56  ;;  %v5471_v55 = vadd.f32 %v11321_v61, %v5456_v43  ;;  %v4839_v36 = vadd.f32 %v4831_v13, %v4770_v11  ;;  %v12819_v13 = vld [vmem:[#allocation9_spill] sm:$0xff] }
 0x523   : > { %v4899_v58 = vmul.f32 %v11150_v22, %v12815_v23  ;;  %v5044_v51 = vadd.f32 %v5036_v62, %v4975_v16  ;;  %v5174_v4 = vmul.f32 %v11222_v31, %v11077_v60  ;;  %v4838_v34 = vadd.f32 %v4830_v45, %v4769_v1  ;;  %v11383_v60 = vld [vmem:[#allocation2 + $0x72] sm:$0xff] }
 0x524   : > { %v4833_v2 = vmul.f32 %v11137_v63, %v12816_v46  ;;  %v5319_v33 = vadd.f32 %v5311_v27, %v5250_v8  ;;  %v5479_v19 = vmax.f32 %v5471_v55, 0.0  ;;  %v11375_v49 = vpop.permute.xlu1 %5164  ;;  %v4832_v56 = vmul.f32 %v11137_v63, %v12817_v47  ;;  %v5416_v15 = vpop.permute.xlu0 %5415  ;;  %v12820_v1 = vld [vmem:[#allocation6_spill] sm:$0xff] }
 0x525   : > { %v4968_v39 = vmul.f32 %v11169_v48, %v12818_v44  ;;  %v5113_v21 = vadd.f32 %v5105_v29, %v5044_v51  ;;  %v5243_v10 = vmul.f32 %v11241_v20, %v11247_v40  ;;  %v5534_v17 = vld [vmem:[#allocation2 + $0x80] sm:$0xff]  ;;  %v5449_v11 = vmul.f32 %v11299_v41, %v5416_v15 }
 0x526   : > { %v5388_v59 = vadd.f32 %v5380_v50, %v5319_v33  ;;  %5487 = vst.msk [vmem:[#allocation2 + $0x88] sm:$0xff] %vm1973_vm0, %v5479_v19  ;;  %v7398_v5 = vpack.i.bf16 %v5534_v17, %v11383_v60  ;;  %v4900_v63 = vmul.f32 %v11150_v22, %v12819_v13  ;;  %v4907_v37 = vadd.f32 %v4899_v58, %v4838_v34  ;;  %v6220_v40 = vld [vmem:[%s11972_s3 + $0x280] sm:$0xff]  ;;  %v12821_v34 = vld [vmem:[#allocation16_spill] sm:$0xff] }
 0x527   : > { %v5037_v38 = vmul.f32 %v11186_v54, %v10932_v28  ;;  %v5182_v62 = vadd.f32 %v5174_v4, %v5113_v21  ;;  %v5312_v45 = vmul.f32 %v11258_v35, %v11329_v14  ;;  %v7117_v43 = vpack.c.bf16 %v6221_v32, %v6220_v40 }
 0x528   : > { %v5457_v52 = vadd.f32 %v5449_v11, %v5388_v59  ;;  %7399 = vrot.lane.b32.xlu0 %v7398_v5, %s7579_s27  ;;  %7374 = vrot.lane.b32.xlu1 %v7398_v5, %s7581_s29  ;;  %v5357_v27 = vpop.permute.xlu1 %5356  ;;  %v4841_v28 = vadd.f32 %v4833_v2, %v4772_v3  ;;  %v4969_v16 = vmul.f32 %v11169_v48, %v12820_v1  ;;  %v5293_v50 = vpop.permute.xlu0 %5292  ;;  %v12823_v59 = vld [vmem:[#allocation8_spill] sm:$0xff] }
 0x529   : > { %v4976_v29 = vadd.f32 %v4968_v39, %v4907_v37  ;;  %v5106_v8 = vmul.f32 %v11209_v6, %v11012_v12  ;;  %v5251_v55 = vadd.f32 %v5243_v10, %v5182_v62  ;;  %v5381_v23 = vmul.f32 %v11273_v42, %v5352_v7  ;;  %7118 = vmatprep.subr.bf16.mxu0 %v7117_v43 }
 0x52a   : > { %v5472_v14 = vadd.f32 %v11321_v61, %v5457_v52  ;;  %7157 = vmatprep.subr.bf16.mxu1 %v7117_v43  ;;  %v4840_v58 = vadd.f32 %v4832_v56, %v4771_v26  ;;  %v4908_v51 = vadd.f32 %v4900_v63, %v4839_v36  ;;  %v5038_v3 = vmul.f32 %v11186_v54, %v10927_v57 }
 0x52b   : > { %v5045_v4 = vadd.f32 %v5037_v38, %v4976_v29  ;;  %v4902_v46 = vmul.f32 %v11150_v22, %v12821_v34  ;;  %v5175_v12 = vmul.f32 %v11222_v31, %v11120_v0  ;;  %v5320_v2 = vadd.f32 %v5312_v45, %v5251_v55  ;;  %v12824_v38 = vld [vmem:[#allocation17_spill] sm:$0xff]  ;;  %v12826_v55 = vld [vmem:[#allocation19_spill] sm:$0xff] }
 0x52c   : > { %v5480_v33 = vmax.f32 %v5472_v14, 0.0  ;;  %v11414_v19 = vpop.permute.xlu1 %5228  ;;  %v4977_v7 = vadd.f32 %v4969_v16, %v4908_v51  ;;  %v5107_v47 = vmul.f32 %v11209_v6, %v11007_v25  ;;  %v5244_v36 = vmul.f32 %v11241_v20, %v11303_v30  ;;  %v5421_v57 = vpop.permute.xlu0 %5420  ;;  %v12822_v25 = vld [vmem:[#allocation10_spill] sm:$0xff]  ;;  %v12825_v16 = vld [vmem:[#allocation27_spill] sm:$0xff] }
 0x52d   : > { %v5114_v26 = vadd.f32 %v5106_v8, %v5045_v4  ;;  %v11420_v56 = vld [vmem:[#allocation2 + $0x83] sm:$0xff]  ;;  %v5389_v39 = vadd.f32 %v5381_v23, %v5320_v2  ;;  %v5450_v0 = vmul.f32 %v11299_v41, %v5421_v57  ;;  %v4901_v15 = vmul.f32 %v11150_v22, %v12822_v25  ;;  %v12828_v2 = vld [vmem:[#allocation21_spill] sm:$0xff] }
 0x52e   : > { %v11422_v44 = vld [vmem:[#allocation2 + $0x81] sm:$0xff]  ;;  %5488 = vst.msk [vmem:[#allocation2 + $0x90] sm:$0xff] %vm1973_vm0, %v5480_v33  ;;  %v7383_v21 = vpack.i.bf16 %v11420_v56, %v5534_v17  ;;  %v4971_v30 = vmul.f32 %v11169_v48, %v12823_v59  ;;  %v5046_v11 = vadd.f32 %v5038_v3, %v4977_v7  ;;  %v5176_v5 = vmul.f32 %v11222_v31, %v11108_v24 }
 0x52f   : > { %v7408_v10 = vpack.i.bf16 %v11422_v44, %v10881_v18  ;;  %v11435_v13 = vld [vmem:[#allocation2 + $0x84] sm:$0xff]  ;;  %v5183_v63 = vadd.f32 %v5175_v12, %v5114_v26  ;;  %v5313_v37 = vmul.f32 %v11258_v35, %v11365_v9  ;;  %v5458_v17 = vadd.f32 %v5450_v0, %v5389_v39  ;;  %v12829_v0 = vld [vmem:[#allocation22_spill] sm:$0xff] }
 0x530   : > { %7384 = vrot.lane.b32.xlu1 %v7383_v21, %s7580_s23  ;;  %v5362_v18 = vpop.permute.xlu1 %5361  ;;  %v4910_v22 = vadd.f32 %v4902_v46, %v4841_v28  ;;  %v4970_v62 = vmul.f32 %v11169_v48, %v12824_v38  ;;  %v5115_v40 = vadd.f32 %v5107_v47, %v5046_v11  ;;  %v5245_v24 = vmul.f32 %v11241_v20, %v11343_v53  ;;  %v5234_v32 = vpop.permute.xlu0 %5233  ;;  %v12827_v3 = vld [vmem:[#allocation20_spill] sm:$0xff] }
 0x531   : > { %7409 = vrot.lane.b32.xlu0 %v7408_v10, %s7581_s29  ;;  %v5252_v45 = vadd.f32 %v5244_v36, %v5183_v63  ;;  %v5382_v52 = vmul.f32 %v11273_v42, %v5357_v27  ;;  %v5473_v9 = vadd.f32 %v11321_v61, %v5458_v17  ;;  %v7393_v43 = vpack.i.bf16 %v11435_v13, %v11422_v44  ;;  %v11458_v12 = vld [vmem:[#allocation2 + $0x82] sm:$0xff] }
 0x532   : > { %v4909_v1 = vadd.f32 %v4901_v15, %v4840_v58  ;;  %v5040_v28 = vmul.f32 %v11186_v54, %v12825_v16  ;;  %v5184_v29 = vadd.f32 %v5176_v5, %v5115_v40  ;;  %v5314_v48 = vmul.f32 %v11258_v35, %v5293_v50 }
 0x533   : > { %v4979_v8 = vadd.f32 %v4971_v30, %v4910_v22  ;;  %v5039_v53 = vmul.f32 %v11186_v54, %v12826_v55  ;;  %v5321_v23 = vadd.f32 %v5313_v37, %v5252_v45  ;;  %v5481_v14 = vmax.f32 %v5473_v9, 0.0 }
 0x534   : > { %7394 = vrot.lane.b32.xlu1 %v7393_v43, %s7579_s27  ;;  %v5298_v27 = vpop.permute.xlu1 %5297  ;;  %v4978_v51 = vadd.f32 %v4970_v62, %v4909_v1  ;;  %v5109_v4 = vmul.f32 %v11209_v6, %v12827_v3  ;;  %v5253_v58 = vadd.f32 %v5245_v24, %v5184_v29  ;;  %v5383_v34 = vmul.f32 %v11273_v42, %v5362_v18  ;;  %v5426_v46 = vpop.permute.xlu0 %5425 }
 0x535   : > { %v5539_v50 = vld [vmem:[#allocation2 + $0x90] sm:$0xff]  ;;  %v5108_v33 = vmul.f32 %v11209_v6, %v12828_v2  ;;  %v5390_v54 = vadd.f32 %v5382_v52, %v5321_v23  ;;  %5489 = vst.msk [vmem:[#allocation2 + $0x98] sm:$0xff] %vm1973_vm0, %v5481_v14  ;;  %v5451_v7 = vmul.f32 %v11299_v41, %v5426_v46  ;;  %v5048_v26 = vadd.f32 %v5040_v28, %v4979_v8 }
 0x536   : > { %v7403_v47 = vpack.i.bf16 %v5539_v50, %v11458_v12  ;;  %v5178_v36 = vmul.f32 %v11222_v31, %v11375_v49  ;;  %v5322_v57 = vadd.f32 %v5314_v48, %v5253_v58  ;;  %v5047_v39 = vadd.f32 %v5039_v53, %v4978_v51 }
 0x537   : > { %v5177_v21 = vmul.f32 %v11222_v31, %v12829_v0  ;;  %v5459_v10 = vadd.f32 %v5451_v7, %v5390_v54  ;;  %v5117_v25 = vadd.f32 %v5109_v4, %v5048_v26  ;;  %v5247_v59 = vmul.f32 %v11241_v20, %v5234_v32  ;;  %v5526_v54 = vld [vmem:[#allocation2 + $0x4] sm:$0xff] }
 0x538   : > { %7404 = vrot.lane.b32.xlu1 %v7403_v47, %s7581_s29  ;;  %v5431_v6 = vpop.permute.xlu1 %5430  ;;  %v5391_v15 = vadd.f32 %v5383_v34, %v5322_v57  ;;  %v5303_v11 = vpop.permute.xlu0 %5302  ;;  %v5116_v5 = vadd.f32 %v5108_v33, %v5047_v39  ;;  %v5246_v49 = vmul.f32 %v11241_v20, %v11414_v19  ;;  %v5315_v22 = vmul.f32 %v11258_v35, %v5298_v27  ;;  %v5494_v7 = vld [vmem:[#allocation2] sm:$0xff] }
 0x539   : > { %v5452_v30 = vmul.f32 %v11299_v41, %v5431_v6  ;;  %v5474_v63 = vadd.f32 %v11321_v61, %v5459_v10  ;;  %v5186_v37 = vadd.f32 %v5178_v36, %v5117_v25  ;;  %v5316_v31 = vmul.f32 %v11258_v35, %v5303_v11  ;;  %v6204_v47 = vld [vmem:[%s11972_s3 + $0x200] sm:$0xff]  ;;  %v11520_v6 = vld [vmem:[#allocation2 + $0x32] sm:$0xff] }
 0x53a   : > { %v5185_v18 = vadd.f32 %v5177_v21, %v5116_v5  ;;  %v6205_v21 = vld [vmem:[%s11972_s3 + $0x208] sm:$0xff]  ;;  %v6223_v11 = vld [vmem:[%s11972_s3 + $0x298] sm:$0xff] }
 0x53b   : > { %v5460_v17 = vadd.f32 %v5452_v30, %v5391_v15  ;;  %v5482_v38 = vmax.f32 %v5474_v63, 0.0  ;;  %v5255_v40 = vadd.f32 %v5247_v59, %v5186_v37  ;;  %v11524_v15 = vld [vmem:[#allocation2 + $0x34] sm:$0xff] }
 0x53c   : > { %v5372_v62 = vpop.permute.xlu1 %5371  ;;  %v5367_v45 = vpop.permute.xlu0 %5366  ;;  %v11479_v52 = vld [vmem:[#allocation2 + $0x94] sm:$0xff]  ;;  %v5254_v19 = vadd.f32 %v5246_v49, %v5185_v18 }
 0x53d   : > { %v5475_v24 = vadd.f32 %v11321_v61, %v5460_v17  ;;  %v5385_v32 = vmul.f32 %v11273_v42, %v5372_v62  ;;  %v11481_v20 = vld [vmem:[#allocation2 + $0x93] sm:$0xff]  ;;  %5490 = vst.msk [vmem:[#allocation2 + $0xa0] sm:$0xff] %vm1973_vm0, %v5482_v38  ;;  %v5384_v9 = vmul.f32 %v11273_v42, %v5367_v45  ;;  %v7418_v43 = vpack.i.bf16 %v5539_v50, %v11479_v52  ;;  %v6224_v45 = vld [vmem:[%s11972_s3 + $0x2a0] sm:$0xff] }
 0x53e   : > { %v11488_v35 = vpack.i.bf16 %v11435_v13, %v11481_v20  ;;  %v5324_v16 = vadd.f32 %v5316_v31, %v5255_v40  ;;  %v5323_v28 = vadd.f32 %v5315_v22, %v5254_v19  ;;  %v11497_v3 = vld [vmem:[#allocation2 + $0x91] sm:$0xff]  ;;  %v11540_v31 = vpack.c.bf16 %v6205_v21, %v6204_v47  ;;  %v6225_v19 = vld [vmem:[%s11972_s3 + $0x2a8] sm:$0xff] }
 0x53f   : > { %v5483_v1 = vmax.f32 %v5475_v24, 0.0  ;;  %7419 = vrot.lane.b32.xlu0 %v7418_v43, %s7579_s27  ;;  %v6222_v30 = vld [vmem:[%s11972_s3 + $0x290] sm:$0xff] }
 0x540   : > { %7414 = vrot.lane.b32.xlu1 %v11488_v35, %s7580_s23  ;;  %v5441_v29 = vpop.permute.xlu1 %5440  ;;  %v5393_v48 = vadd.f32 %v5385_v32, %v5324_v16  ;;  %v5436_v8 = vpop.permute.xlu0 %5435  ;;  %v5392_v55 = vadd.f32 %v5384_v9, %v5323_v28  ;;  %v6206_v18 = vld [vmem:[%s11972_s3 + $0x210] sm:$0xff]  ;;  %v11549_v24 = vpack.c.bf16 %v6223_v11, %v6222_v30  ;;  %v6207_v32 = vld [vmem:[%s11972_s3 + $0x218] sm:$0xff] }
 0x541   : > { %5491 = vst.msk [vmem:[#allocation2 + $0xa8] sm:$0xff] %vm1973_vm0, %v5483_v1  ;;  %v5454_v42 = vmul.f32 %v11299_v41, %v5441_v29  ;;  %v5453_v53 = vmul.f32 %v11299_v41, %v5436_v8  ;;  %v11563_v1 = vld [vmem:[#allocation2 + $0x33] sm:$0xff]  ;;  %v6208_v29 = vld [vmem:[%s11972_s3 + $0x220] sm:$0xff] }
 0x542   : > { %v11567_v28 = vld [vmem:[#allocation2 + $0x92] sm:$0xff] }
 0x543   : > { %v5462_v13 = vadd.f32 %v5454_v42, %v5393_v48  ;;  %v5461_v23 = vadd.f32 %v5453_v53, %v5392_v55  ;;  %v6209_v48 = vld [vmem:[%s11972_s3 + $0x228] sm:$0xff]  ;;  %v6226_v47 = vld [vmem:[%s11972_s3 + $0x2b0] sm:$0xff] }
 0x544   : > { %v7195_v14 = vpop.permute.xlu1 %7194  ;;  %v7190_v51 = vpop.permute.xlu0 %7189  ;;  %v11499_v4 = vld [vmem:[#allocation2 + $0xa0] sm:$0xff] }
 0x545   : > { %v5477_v27 = vadd.f32 %v11321_v61, %v5462_v13  ;;  %v5476_v58 = vadd.f32 %v11321_v61, %v5461_v23  ;;  %v7192_v34 = vunpack.i.h.bf16 %v7190_v51  ;;  %v7191_v46 = vunpack.i.l.bf16 %v7190_v51  ;;  %v11575_v55 = vld [vmem:[#allocation2 + $0x43] sm:$0xff] }
 0x546   : > { %v7428_v50 = vpack.i.bf16 %v11497_v3, %v11499_v4  ;;  %v7197_v33 = vunpack.i.h.bf16 %v7195_v14  ;;  %v7196_v41 = vunpack.i.l.bf16 %v7195_v14  ;;  %v7448_v53 = vpack.i.bf16 %v11481_v20, %v11575_v55 }
 0x547   : > { %v5485_v2 = vmax.f32 %v5477_v27, 0.0  ;;  %v5484_v26 = vmax.f32 %v5476_v58, 0.0  ;;  %v5916_v39 = vsel %vm1973_vm0, %v5526_v54, %v7191_v46  ;;  %v5890_v0 = vsel %vm1973_vm0, %v5494_v7, %v7192_v34  ;;  %v11586_v27 = vld [vmem:[#allocation2 + $0x42] sm:$0xff]  ;;  %v7540_v54 = vld [vmem:[#allocation2 + $0x14] sm:$0xff] }
 0x548   : > { %7429 = vrot.lane.b32.xlu0 %v7428_v50, %s7581_s29  ;;  %v11508_v36 = vpop.permute.xlu1 %7204  ;;  %v11510_v61 = vld [vmem:[#allocation2 + $0xa1] sm:$0xff]  ;;  %v7200_v10 = vpop.permute.xlu0 %7199  ;;  %v5924_v37 = vsel %vm5898_vm1, %v5916_v39, %v7196_v41  ;;  %v5899_v17 = vsel %vm5898_vm1, %v5890_v0, %v7197_v33  ;;  %v11581_v13 = vpack.c.bf16 %v6207_v32, %v6206_v18  ;;  %v11583_v23 = vpack.c.bf16 %v6225_v19, %v6224_v45  ;;  %v11603_v39 = vld [vmem:[#allocation2 + $0x52] sm:$0xff] }
 0x549   : > { %v11512_v57 = vld [vmem:[#allocation2 + $0xa3] sm:$0xff]  ;;  %5493 = vst.msk [vmem:[#allocation2 + $0xb8] sm:$0xff] %vm1973_vm0, %v5485_v2  ;;  %v7423_v25 = vpack.i.bf16 %v11510_v61, %v11520_v6  ;;  %5492 = vst.msk [vmem:[#allocation2 + $0xb0] sm:$0xff] %vm1973_vm0, %v5484_v26  ;;  %v7202_v5 = vunpack.i.h.bf16 %v7200_v10  ;;  %v7201_v49 = vunpack.i.l.bf16 %v7200_v10  ;;  %v7207_v22 = vunpack.i.h.bf16 %v11508_v36  ;;  %v6227_v26 = vld [vmem:[%s11972_s3 + $0x2b8] sm:$0xff] }
 0x54a   : > { %v7438_v59 = vpack.i.bf16 %v11512_v57, %v11524_v15  ;;  %v11535_v63 = vld [vmem:[#allocation2 + $0xa2] sm:$0xff]  ;;  %v7206_v9 = vunpack.i.l.bf16 %v11508_v36  ;;  %v7443_v51 = vpack.i.bf16 %v11567_v28, %v11586_v27  ;;  %v11592_v20 = vpack.c.bf16 %v6209_v48, %v6208_v29  ;;  %v6211_v32 = vld [vmem:[%s11972_s3 + $0x238] sm:$0xff] }
 0x54b   : > { %7424 = vrot.lane.b32.xlu1 %v7423_v25, %s7580_s23  ;;  %v5932_v62 = vsel %vm5907_vm2, %v5924_v37, %v7201_v49  ;;  %v5908_v40 = vsel %vm5907_vm2, %v5899_v17, %v7202_v5  ;;  %v7433_v16 = vpack.i.bf16 %v11535_v63, %v11563_v1  ;;  %v7539_v58 = vld [vmem:[#allocation2 + $0x22] sm:$0xff]  ;;  %v11615_v37 = vpack.c.bf16 %v6227_v26, %v6226_v47  ;;  %v6230_v26 = vld [vmem:[%s11972_s3 + $0x2d0] sm:$0xff] }
 0x54c   : > { %7439 = vrot.lane.b32.xlu0 %v7438_v59, %s7581_s29  ;;  %v7215_v38 = vpop.permute.xlu1 %7214  ;;  %v11561_v43 = vpop.permute.xlu0 %7209  ;;  %6328 = vmatprep.mubr.f32.mxu0 %v5932_v62  ;;  %v5964_v34 = vsel %vm1973_vm0, %v7539_v58, %v7207_v22  ;;  %v5917_v7 = vsel %vm1973_vm0, %v7540_v54, %v7206_v9  ;;  %v11617_v18 = vld [vmem:[#allocation2 + $0x44] sm:$0xff]  ;;  %v11629_v9 = vld [vmem:[#allocation2 + $0x53] sm:$0xff] }
 0x54d   : > { %v7217_v42 = vunpack.i.h.bf16 %v7215_v38  ;;  %v7216_v8 = vunpack.i.l.bf16 %v7215_v38  ;;  %6329 = vmatmul.mubr.f32.vlgmr.msra.gmra.mrb[0].mxu0 %v5908_v40  ;;  %v7211_v46 = vunpack.i.l.bf16 %v11561_v43  ;;  %v7212_v36 = vunpack.i.h.bf16 %v11561_v43  ;;  %v7543_v38 = vld [vmem:[#allocation2 + $0x10] sm:$0xff]  ;;  %v6228_v29 = vld [vmem:[%s11972_s3 + $0x2c0] sm:$0xff]  ;;  %v6229_v48 = vld [vmem:[%s11972_s3 + $0x2c8] sm:$0xff] }
 0x54e   : > { %7120 = vmatpush3.bf16.msra.mxu0 %v11540_v31  ;;  %v7453_v22 = vpack.i.bf16 %v11479_v52, %v11617_v18  ;;  %v6210_v40 = vld [vmem:[%s11972_s3 + $0x230] sm:$0xff]  ;;  %v6213_v47 = vld [vmem:[%s11972_s3 + $0x248] sm:$0xff] }
 0x54f   : > { %7434 = vrot.lane.b32.xlu1 %v7433_v16, %s7579_s27  ;;  %7122 = vmatprep.subr.bf16.mxu0 %v11549_v24  ;;  %v5972_v21 = vsel %vm5898_vm1, %v5964_v34, %v7217_v42  ;;  %v5925_v10 = vsel %vm5898_vm1, %v5917_v7, %v7216_v8  ;;  %v5891_v62 = vsel %vm1973_vm0, %v7543_v38, %v7211_v46  ;;  %v7545_v52 = vld [vmem:[#allocation2 + $0x13] sm:$0xff]  ;;  %v6212_v46 = vld [vmem:[%s11972_s3 + $0x240] sm:$0xff] }
 0x550   : > { %7449 = vrot.lane.b32.xlu0 %v7448_v53, %s7579_s27  ;;  %v7225_v14 = vpop.permute.xlu1 %7224  ;;  %v7220_v33 = vpop.permute.xlu0 %7219  ;;  %v5550_v41 = vld [vmem:[#allocation2 + $0xb1] sm:$0xff]  ;;  %v5940_v16 = vsel %vm1973_vm0, %v7545_v52, %v7212_v36  ;;  %v11647_v34 = vpack.c.bf16 %v6211_v32, %v6210_v40  ;;  %v11660_v7 = vpack.c.bf16 %v6229_v48, %v6228_v29 }
 0x551   : > { %v7227_v50 = vunpack.i.h.bf16 %v7225_v14  ;;  %v7226_v2 = vunpack.i.l.bf16 %v7225_v14  ;;  %v7458_v0 = vpack.i.bf16 %v11603_v39, %v5550_v41  ;;  %v7222_v25 = vunpack.i.h.bf16 %v7220_v33  ;;  %v5551_v5 = vld [vmem:[#allocation2 + $0xb2] sm:$0xff]  ;;  %v11656_v41 = vld [vmem:[#allocation2 + $0x62] sm:$0xff] }
 0x552   : > { %v7221_v59 = vunpack.i.l.bf16 %v7220_v33  ;;  %7124 = vmatpush3.bf16.msra.mxu0 %v11581_v13  ;;  %v7468_v43 = vpack.i.bf16 %v11629_v9, %v5551_v5  ;;  %v5552_v53 = vld [vmem:[#allocation2 + $0xb3] sm:$0xff]  ;;  %v7463_v54 = vpack.i.bf16 %v11656_v41, %v11535_v63  ;;  %v11685_v5 = vpack.c.bf16 %v6213_v47, %v6212_v46 }
 0x553   : > { %7444 = vrot.lane.b32.xlu1 %v7443_v51, %s7580_s23  ;;  %v5980_v30 = vsel %vm5907_vm2, %v5972_v21, %v7227_v50  ;;  %v5933_v11 = vsel %vm5907_vm2, %v5925_v10, %v7226_v2  ;;  %7126 = vmatprep.subr.bf16.mxu0 %v11583_v23  ;;  %v5948_v8 = vsel %vm5898_vm1, %v5940_v16, %v7222_v25  ;;  %v6231_v36 = vld [vmem:[%s11972_s3 + $0x2d8] sm:$0xff] }
 0x554   : > { %7459 = vrot.lane.b32.xlu0 %v7458_v0, %s7580_s23  ;;  %v11613_v49 = vpop.permute.xlu1 %7234  ;;  %6433 = vmatprep.mubr.f32.mxu1 %v5980_v30  ;;  %v7230_v17 = vpop.permute.xlu0 %7229  ;;  %v5900_v42 = vsel %vm5898_vm1, %v5891_v62, %v7221_v59  ;;  %v11671_v10 = vld [vmem:[#allocation2 + $0x54] sm:$0xff]  ;;  %v7488_v25 = vpack.i.bf16 %v11383_v60, %v11422_v44  ;;  %v11680_v30 = vld [vmem:[#allocation2 + $0x63] sm:$0xff] }
 0x555   : > { %6333 = vmatprep.mubr.f32.mxu0 %v5933_v11  ;;  %v7232_v45 = vunpack.i.h.bf16 %v7230_v17  ;;  %v7231_v19 = vunpack.i.l.bf16 %v7230_v17  ;;  %v7237_v50 = vunpack.i.h.bf16 %v11613_v49  ;;  %v7236_v2 = vunpack.i.l.bf16 %v11613_v49  ;;  %v7549_v44 = vld [vmem:[#allocation2 + $0x24] sm:$0xff] }
 0x556   : > { %7128 = vmatpush3.bf16.msra.mxu0 %v11592_v20  ;;  %v7478_v63 = vpack.i.bf16 %v11671_v10, %v5552_v53  ;;  %v7473_v11 = vpack.i.bf16 %v11680_v30, %v11512_v57  ;;  %v11715_v53 = vld [vmem:[#allocation2 + $0x74] sm:$0xff] }
 0x557   : > { %7454 = vrot.lane.b32.xlu1 %v7453_v22, %s7581_s29  ;;  %v5909_v51 = vsel %vm5907_vm2, %v5900_v42, %v7231_v19  ;;  %v5956_v58 = vsel %vm5907_vm2, %v5948_v8, %v7232_v45  ;;  %7130 = vmatprep.subr.bf16.mxu0 %v11615_v37  ;;  %v5965_v38 = vsel %vm1973_vm0, %v11520_v6, %v7237_v50  ;;  %v11697_v45 = vld [vmem:[#allocation2 + $0xa4] sm:$0xff]  ;;  %v6214_v19 = vld [vmem:[%s11972_s3 + $0x250] sm:$0xff]  ;;  %v6215_v6 = vld [vmem:[%s11972_s3 + $0x258] sm:$0xff] }
 0x558   : > { %7469 = vrot.lane.b32.xlu0 %v7468_v43, %s7579_s27  ;;  %v7245_v14 = vpop.permute.xlu1 %7244  ;;  %v11654_v33 = vpop.permute.xlu0 %7239  ;;  %6334 = vmatmul.mubr.f32.gmra.mrb[2].mxu0 %v5909_v51  ;;  %v11711_v42 = vld [vmem:[#allocation2 + $0x64] sm:$0xff]  ;;  %v11720_v51 = vpack.c.bf16 %v6215_v6, %v6214_v19 }
 0x559   : > { %6434 = vmatmul.mubr.f32.vlgmr.msra.gmra.mrb[0].mxu1 %v5956_v58  ;;  %v7247_v0 = vunpack.i.h.bf16 %v7245_v14  ;;  %v7246_v21 = vunpack.i.l.bf16 %v7245_v14  ;;  %v7242_v62 = vunpack.i.h.bf16 %v11654_v33  ;;  %v7241_v57 = vunpack.i.l.bf16 %v11654_v33  ;;  %v6233_v58 = vld [vmem:[%s11972_s3 + $0x2e8] sm:$0xff] }
 0x55a   : > { %7165 = vmatpush3.bf16.msra.mxu1 %v11540_v31  ;;  %7132 = vmatpush3.bf16.msra.mxu0 %v11647_v34  ;;  %v11687_v31 = vpack.c.bf16 %v6231_v36, %v6230_v26  ;;  %v7483_v8 = vpack.i.bf16 %v11711_v42, %v11697_v45  ;;  %v7498_v14 = vpack.i.bf16 %v11715_v53, %v11420_v56 }
 0x55b   : > { %7464 = vrot.lane.b32.xlu1 %v7463_v54, %s7580_s23  ;;  %7158 = vmatprep.subr.bf16.mxu1 %v11549_v24  ;;  %v5918_v24 = vsel %vm1973_vm0, %v7549_v44, %v7236_v2  ;;  %v5973_v32 = vsel %vm5898_vm1, %v5965_v38, %v7247_v0  ;;  %v7552_v2 = vld [vmem:[#allocation2 + $0x20] sm:$0xff]  ;;  %v6218_v38 = vld [vmem:[%s11972_s3 + $0x270] sm:$0xff] }
 0x55c   : > { %7479 = vrot.lane.b32.xlu0 %v7478_v63, %s7581_s29  ;;  %v7255_v59 = vpop.permute.xlu1 %7254  ;;  %v7250_v22 = vpop.permute.xlu0 %7249  ;;  %7134 = vmatprep.subr.bf16.mxu0 %v11660_v7  ;;  %v5926_v40 = vsel %vm5898_vm1, %v5918_v24, %v7246_v21  ;;  %v5892_v33 = vsel %vm1973_vm0, %v7552_v2, %v7241_v57  ;;  %v7553_v54 = vld [vmem:[#allocation2 + $0x23] sm:$0xff]  ;;  %v6235_v24 = vld [vmem:[%s11972_s3 + $0x2f8] sm:$0xff] }
 0x55d   : > { %v7257_v49 = vunpack.i.h.bf16 %v7255_v59  ;;  %v7256_v17 = vunpack.i.l.bf16 %v7255_v59  ;;  %v7252_v43 = vunpack.i.h.bf16 %v7250_v22  ;;  %v7251_v52 = vunpack.i.l.bf16 %v7250_v22  ;;  %v6216_v0 = vld [vmem:[%s11972_s3 + $0x260] sm:$0xff]  ;;  %v6217_v21 = vld [vmem:[%s11972_s3 + $0x268] sm:$0xff]  ;;  %v11748_v22 = vld [vmem:[#allocation2 + $0x73] sm:$0xff] }
 0x55e   : > { %7166 = vmatpush3.bf16.msra.mxu1 %v11581_v13  ;;  %7136 = vmatpush3.bf16.msra.mxu0 %v11685_v5  ;;  %v5941_v47 = vsel %vm1973_vm0, %v7553_v54, %v7242_v62  ;;  %v7493_v44 = vpack.i.bf16 %v11748_v22, %v11458_v12  ;;  %v6219_v62 = vld [vmem:[%s11972_s3 + $0x278] sm:$0xff]  ;;  %v7143_v19 = vpack.c.bf16 %v6217_v21, %v6216_v0 }
 0x55f   : > { %7474 = vrot.lane.b32.xlu1 %v7473_v11, %s7579_s27  ;;  %v5934_v16 = vsel %vm5907_vm2, %v5926_v40, %v7256_v17  ;;  %v5981_v29 = vsel %vm5907_vm2, %v5973_v32, %v7257_v49  ;;  %7159 = vmatprep.subr.bf16.mxu1 %v11583_v23  ;;  %v6232_v23 = vld [vmem:[%s11972_s3 + $0x2e0] sm:$0xff]  ;;  %v5901_v26 = vsel %vm5898_vm1, %v5892_v33, %v7251_v52 }
 0x560   : > { %7489 = vrot.lane.b32.xlu0 %v7488_v25, %s7580_s23  ;;  %v7265_v13 = vpop.permute.xlu1 %7264  ;;  %6338 = vmatprep.mubr.f32.mxu0 %v5934_v16  ;;  %v7260_v48 = vpop.permute.xlu0 %7259  ;;  %v5949_v36 = vsel %vm5898_vm1, %v5941_v47, %v7252_v43  ;;  %v7141_v59 = vpack.c.bf16 %v6233_v58, %v6232_v23  ;;  %v7508_v32 = vpack.i.bf16 %v11420_v56, %v11567_v28 }
 0x561   : > { %6438 = vmatprep.mubr.f32.mxu1 %v5981_v29  ;;  %v7262_v46 = vunpack.i.h.bf16 %v7260_v48  ;;  %v7261_v50 = vunpack.i.l.bf16 %v7260_v48  ;;  %7138 = vmatprep.subr.bf16.mxu0 %v11687_v31  ;;  %v7267_v11 = vunpack.i.h.bf16 %v7265_v13  ;;  %v7266_v49 = vunpack.i.l.bf16 %v7265_v13 }
 0x562   : > { %7167 = vmatpush3.bf16.msra.mxu1 %v11592_v20  ;;  %7140 = vmatpush3.bf16.msra.mxu0 %v11720_v51  ;;  %v7503_v43 = vpack.i.bf16 %v11458_v12, %v11497_v3  ;;  %v7147_v16 = vpack.c.bf16 %v6219_v62, %v6218_v38 }
 0x563   : > { %7484 = vrot.lane.b32.xlu1 %v7483_v8, %s7581_s29  ;;  %7160 = vmatprep.subr.bf16.mxu1 %v11615_v37  ;;  %v5910_v63 = vsel %vm5907_vm2, %v5901_v26, %v7261_v50  ;;  %v5957_v25 = vsel %vm5907_vm2, %v5949_v36, %v7262_v46  ;;  %v6234_v37 = vld [vmem:[%s11972_s3 + $0x2f0] sm:$0xff]  ;;  %v5966_v8 = vsel %vm1973_vm0, %v11586_v27, %v7267_v11 }
 0x564   : > { %7499 = vrot.lane.b32.xlu0 %v7498_v14, %s7581_s29  ;;  %v7275_v20 = vpop.permute.xlu1 %7274  ;;  %v7270_v17 = vpop.permute.xlu0 %7269  ;;  %6339 = vmatmul.mubr.f32.gmra.mrb[4].mxu0 %v5910_v63  ;;  %v7145_v52 = vpack.c.bf16 %v6235_v24, %v6234_v37  ;;  %v7555_v26 = vld [vmem:[#allocation2 + $0x30] sm:$0xff] }
 0x565   : > { %6439 = vmatmul.mubr.f32.gmra.mrb[2].mxu1 %v5957_v25  ;;  %v7277_v57 = vunpack.i.h.bf16 %v7275_v20  ;;  %v7276_v40 = vunpack.i.l.bf16 %v7275_v20  ;;  %7142 = vmatprep.subr.bf16.mxu0 %v7141_v59  ;;  %v7272_v14 = vunpack.i.h.bf16 %v7270_v17 }
 0x566   : > { %7168 = vmatpush3.bf16.msra.mxu1 %v11647_v34  ;;  %v5919_v34 = vsel %vm1973_vm0, %v11524_v15, %v7266_v49  ;;  %7144 = vmatpush3.bf16.msra.mxu0 %v7143_v19 }
 0x567   : > { %7494 = vrot.lane.b32.xlu1 %v7493_v44, %s7579_s27  ;;  %7161 = vmatprep.subr.bf16.mxu1 %v11660_v7  ;;  %v7271_v7 = vunpack.i.l.bf16 %v7270_v17  ;;  %v5927_v23 = vsel %vm5898_vm1, %v5919_v34, %v7276_v40  ;;  %v5974_v58 = vsel %vm5898_vm1, %v5966_v8, %v7277_v57  ;;  %v5942_v36 = vsel %vm1973_vm0, %v11563_v1, %v7272_v14  ;;  %v6236_v1 = vld [vmem:[%s11972_s3 + $0x300] sm:$0xff] }
 0x568   : > { %7509 = vrot.lane.b32.xlu0 %v7508_v32, %s7579_s27  ;;  %v7285_v6 = vpop.permute.xlu1 %7284  ;;  %v7280_v48 = vpop.permute.xlu0 %7279  ;;  %7146 = vmatprep.subr.bf16.mxu0 %v7145_v52  ;;  %v7556_v14 = vld [vmem:[#allocation2 + $0x40] sm:$0xff] }
 0x569   : > { %v7287_v29 = vunpack.i.h.bf16 %v7285_v6  ;;  %v7286_v13 = vunpack.i.l.bf16 %v7285_v6  ;;  %v7282_v46 = vunpack.i.h.bf16 %v7280_v48  ;;  %v7281_v50 = vunpack.i.l.bf16 %v7280_v48 }
 0x56a   : > { %7169 = vmatpush3.bf16.msra.mxu1 %v11685_v5  ;;  %v5893_v5 = vsel %vm1973_vm0, %v7555_v26, %v7271_v7  ;;  %7148 = vmatpush3.bf16.msra.mxu0 %v7147_v16 }
 0x56b   : > { %7504 = vrot.lane.b32.xlu1 %v7503_v43, %s7580_s23  ;;  %v5935_v2 = vsel %vm5907_vm2, %v5927_v23, %v7286_v13  ;;  %v5982_v15 = vsel %vm5907_vm2, %v5974_v58, %v7287_v29  ;;  %7162 = vmatprep.subr.bf16.mxu1 %v11687_v31  ;;  %v5902_v31 = vsel %vm5898_vm1, %v5893_v5, %v7281_v50 }
 0x56c   : > { %v7295_v27 = vpop.permute.xlu1 %7294  ;;  %6343 = vmatprep.mubr.f32.mxu0 %v5935_v2  ;;  %6443 = vmatprep.mubr.f32.mxu1 %v5982_v15  ;;  %v7290_v33 = vpop.permute.xlu0 %7289  ;;  %v5950_v0 = vsel %vm5898_vm1, %v5942_v36, %v7282_v46 }
 0x56d   : > { %v7292_v54 = vunpack.i.h.bf16 %v7290_v33  ;;  %v7291_v47 = vunpack.i.l.bf16 %v7290_v33  ;;  %v7297_v25 = vunpack.i.h.bf16 %v7295_v27 }
 0x56e   : > { %7170 = vmatpush3.bf16.msra.mxu1 %v11720_v51  ;;  %v6237_v51 = vld [vmem:[%s11972_s3 + $0x308] sm:$0xff] }
 0x56f   : > { %7514 = vrot.lane.b32.xlu1 %v11488_v35, %s7581_s29  ;;  %7163 = vmatprep.subr.bf16.mxu1 %v7141_v59  ;;  %v5911_v20 = vsel %vm5907_vm2, %v5902_v31, %v7291_v47  ;;  %v5958_v63 = vsel %vm5907_vm2, %v5950_v0, %v7292_v54  ;;  %v7296_v35 = vunpack.i.l.bf16 %v7295_v27  ;;  %v11797_v49 = vpack.c.bf16 %v6237_v51, %v6236_v1 }
 0x570   : > { %v7305_v21 = vpop.permute.xlu1 %7304  ;;  %v7300_v37 = vpop.permute.xlu0 %7299  ;;  %6344 = vmatmul.mubr.f32.gmra.mrb[6].mxu0 %v5911_v20  ;;  %6444 = vmatmul.mubr.f32.gmra.mrb[4].mxu1 %v5958_v63  ;;  %v5967_v57 = vsel %vm1973_vm0, %v11603_v39, %v7297_v25 }
 0x571   : > { %v7307_v11 = vunpack.i.h.bf16 %v7305_v21  ;;  %v7306_v59 = vunpack.i.l.bf16 %v7305_v21  ;;  %v5920_v62 = vsel %vm1973_vm0, %v11617_v18, %v7296_v35  ;;  %v7302_v40 = vunpack.i.h.bf16 %v7300_v37 }
 0x572   : > { %7171 = vmatpush3.bf16.msra.mxu1 %v7143_v19  ;;  %v7301_v32 = vunpack.i.l.bf16 %v7300_v37 }
 0x573   : > { %7164 = vmatprep.subr.bf16.mxu1 %v7145_v52  ;;  %v5928_v6 = vsel %vm5898_vm1, %v5920_v62, %v7306_v59  ;;  %v5975_v43 = vsel %vm5898_vm1, %v5967_v57, %v7307_v11 }
 0x574   : > { %v7315_v17 = vpop.permute.xlu1 %7314  ;;  %v7310_v38 = vpop.permute.xlu0 %7309  ;;  %v5894_v7 = vsel %vm1973_vm0, %v7556_v14, %v7301_v32 }
 0x575   : > { %v7317_v44 = vunpack.i.h.bf16 %v7315_v17  ;;  %v7316_v24 = vunpack.i.l.bf16 %v7315_v17  ;;  %v7312_v19 = vunpack.i.h.bf16 %v7310_v38  ;;  %v7311_v52 = vunpack.i.l.bf16 %v7310_v38 }
 0x576   : > { %7172 = vmatpush3.bf16.msra.mxu1 %v7147_v16  ;;  %v5943_v16 = vsel %vm1973_vm0, %v11575_v55, %v7302_v40 }
 0x577   : > { %v5936_v29 = vsel %vm5907_vm2, %v5928_v6, %v7316_v24  ;;  %v5983_v13 = vsel %vm5907_vm2, %v5975_v43, %v7317_v44  ;;  %7150 = vmatprep.subr.bf16.mxu1 %v11797_v49  ;;  %v5903_v23 = vsel %vm5898_vm1, %v5894_v7, %v7311_v52  ;;  %v5951_v58 = vsel %vm5898_vm1, %v5943_v16, %v7312_v19  ;;  %v7557_v44 = vld [vmem:[#allocation2 + $0x50] sm:$0xff] }
 0x578   : > { %v7325_v48 = vpop.permute.xlu1 %7324  ;;  %6348 = vmatprep.mubr.f32.mxu0 %v5936_v29  ;;  %6448 = vmatprep.mubr.f32.mxu1 %v5983_v13  ;;  %v7320_v34 = vpop.permute.xlu0 %7319 }
 0x579   : > { %v7322_v39 = vunpack.i.h.bf16 %v7320_v34  ;;  %v7321_v8 = vunpack.i.l.bf16 %v7320_v34  ;;  %v7327_v15 = vunpack.i.h.bf16 %v7325_v48  ;;  %v7326_v27 = vunpack.i.l.bf16 %v7325_v48 }
 0x57b   : > { %v11814_v50 = vsel %vm5907_vm2, %v5903_v23, %v7321_v8  ;;  %v5959_v2 = vsel %vm5907_vm2, %v5951_v58, %v7322_v39  ;;  %v5921_v31 = vsel %vm1973_vm0, %v11671_v10, %v7326_v27  ;;  %v5968_v0 = vsel %vm1973_vm0, %v11656_v41, %v7327_v15 }
 0x57c   : > { %v7335_v46 = vpop.permute.xlu1 %7334  ;;  %v7330_v33 = vpop.permute.xlu0 %7329  ;;  %6349 = vmatmul.mubr.f32.gmra.mrb[8].mxu0 %v11814_v50  ;;  %6449 = vmatmul.mubr.f32.gmra.mrb[6].mxu1 %v5959_v2 }
 0x57d   : > { %v7337_v54 = vunpack.i.h.bf16 %v7335_v46  ;;  %v7336_v47 = vunpack.i.l.bf16 %v7335_v46  ;;  %v7332_v21 = vunpack.i.h.bf16 %v7330_v33  ;;  %v7331_v20 = vunpack.i.l.bf16 %v7330_v33 }
 0x57f   : > { %v5929_v63 = vsel %vm5898_vm1, %v5921_v31, %v7336_v47  ;;  %v5976_v1 = vsel %vm5898_vm1, %v5968_v0, %v7337_v54  ;;  %v5895_v41 = vsel %vm1973_vm0, %v7557_v44, %v7331_v20  ;;  %v5944_v24 = vsel %vm1973_vm0, %v11629_v9, %v7332_v21  ;;  %v7558_v54 = vld [vmem:[#allocation2 + $0x60] sm:$0xff] }
 0x580   : > { %v7345_v26 = vpop.permute.xlu1 %7344  ;;  %v7340_v36 = vpop.permute.xlu0 %7339 }
 0x581   : > { %v7347_v55 = vunpack.i.h.bf16 %v7345_v26  ;;  %v7346_v5 = vunpack.i.l.bf16 %v7345_v26  ;;  %v7342_v51 = vunpack.i.h.bf16 %v7340_v36  ;;  %v7341_v25 = vunpack.i.l.bf16 %v7340_v36 }
 0x583   : > { %v5937_v35 = vsel %vm5907_vm2, %v5929_v63, %v7346_v5  ;;  %v5984_v37 = vsel %vm5907_vm2, %v5976_v1, %v7347_v55  ;;  %v5904_v38 = vsel %vm5898_vm1, %v5895_v41, %v7341_v25  ;;  %v5952_v62 = vsel %vm5898_vm1, %v5944_v24, %v7342_v51 }
 0x584   : > { %6353 = vmatprep.mubr.f32.mxu0 %v5937_v35  ;;  %6453 = vmatprep.mubr.f32.mxu1 %v5984_v37  ;;  %v7350_v11 = vpop.permute.xlu0 %7349  ;;  %v7355_v6 = vpop.permute.xlu1 %7354 }
 0x585   : > { %v7352_v59 = vunpack.i.h.bf16 %v7350_v11  ;;  %v7351_v17 = vunpack.i.l.bf16 %v7350_v11  ;;  %v7357_v52 = vunpack.i.h.bf16 %v7355_v6  ;;  %v7356_v29 = vunpack.i.l.bf16 %v7355_v6 }
 0x587   : > { %v11832_v57 = vsel %vm5907_vm2, %v5904_v38, %v7351_v17  ;;  %v5960_v40 = vsel %vm5907_vm2, %v5952_v62, %v7352_v59  ;;  %v5922_v2 = vsel %vm1973_vm0, %v11711_v42, %v7356_v29  ;;  %v5969_v15 = vsel %vm1973_vm0, %v11383_v60, %v7357_v52  ;;  %v7559_v52 = vld [vmem:[#allocation2 + $0x70] sm:$0xff] }
 0x588   : > { %6354 = vmatmul.mubr.f32.gmra.mrb[10].mxu0 %v11832_v57  ;;  %6454 = vmatmul.mubr.f32.gmra.mrb[8].mxu1 %v5960_v40  ;;  %v7360_v32 = vpop.permute.xlu0 %7359  ;;  %v7365_v19 = vpop.permute.xlu1 %7364 }
 0x589   : > { %v7367_v9 = vunpack.i.h.bf16 %v7365_v19  ;;  %v7366_v48 = vunpack.i.l.bf16 %v7365_v19  ;;  %v7362_v34 = vunpack.i.h.bf16 %v7360_v32  ;;  %v7361_v39 = vunpack.i.l.bf16 %v7360_v32 }
 0x58b   : > { %v5930_v27 = vsel %vm5898_vm1, %v5922_v2, %v7366_v48  ;;  %v5977_v33 = vsel %vm5898_vm1, %v5969_v15, %v7367_v9  ;;  %v5896_v47 = vsel %vm1973_vm0, %v7558_v54, %v7361_v39  ;;  %v5945_v26 = vsel %vm1973_vm0, %v11680_v30, %v7362_v34 }
 0x58c   : > { %v7370_v43 = vpop.permute.xlu0 %7369 }
 0x58d   : > { %v7372_v8 = vunpack.i.h.bf16 %v7370_v43  ;;  %v7371_v14 = vunpack.i.l.bf16 %v7370_v43 }
 0x58f   : > { %v5905_v31 = vsel %vm5898_vm1, %v5896_v47, %v7371_v14  ;;  %v5953_v0 = vsel %vm5898_vm1, %v5945_v26, %v7372_v8 }
 0x590   : > { %v7380_v13 = vpop.permute.xlu0 %7379 }
 0x591   : > { %v7382_v7 = vunpack.i.h.bf16 %v7380_v13  ;;  %v7381_v16 = vunpack.i.l.bf16 %v7380_v13 }
 0x593   : > { %v11850_v60 = vsel %vm5907_vm2, %v5905_v31, %v7381_v16  ;;  %v5961_v21 = vsel %vm5907_vm2, %v5953_v0, %v7382_v7 }
 0x594   : > { %v7390_v55 = vpop.permute.xlu0 %7389 }
 0x595   : > { %v7392_v35 = vunpack.i.h.bf16 %v7390_v55  ;;  %v7391_v37 = vunpack.i.l.bf16 %v7390_v55 }
 0x597   : > { %v5897_v29 = vsel %vm1973_vm0, %v7559_v52, %v7391_v37  ;;  %v5946_v13 = vsel %vm1973_vm0, %v11748_v22, %v7392_v35 }
 0x59a   : > { %v7375_v23 = vpop.permute.xlu1 %7374  ;;  %v7400_v20 = vpop.permute.xlu0 %7399 }
 0x59b   : > { %v7377_v58 = vunpack.i.h.bf16 %v7375_v23  ;;  %v7376_v46 = vunpack.i.l.bf16 %v7375_v23  ;;  %v7402_v17 = vunpack.i.h.bf16 %v7400_v20  ;;  %v7401_v44 = vunpack.i.l.bf16 %v7400_v20 }
 0x59d   : > { %v5938_v5 = vsel %vm5907_vm2, %v5930_v27, %v7376_v46  ;;  %v5985_v36 = vsel %vm5907_vm2, %v5977_v33, %v7377_v58  ;;  %v5906_v34 = vsel %vm5898_vm1, %v5897_v29, %v7401_v44  ;;  %v5954_v39 = vsel %vm5898_vm1, %v5946_v13, %v7402_v17 }
 0x59e   : > { %6358 = vmatprep.mubr.f32.mxu0 %v5938_v5  ;;  %6458 = vmatprep.mubr.f32.mxu1 %v5985_v36 }
 0x59f   : > { %6359 = vmatmul.mubr.f32.gmra.mrb[12].mxu0 %v11850_v60  ;;  %6459 = vmatmul.mubr.f32.gmra.mrb[10].mxu1 %v5961_v21 }
 0x5a2   : > { %v7385_v30 = vpop.permute.xlu1 %7384 }
 0x5a3   : > { %v7387_v1 = vunpack.i.h.bf16 %v7385_v30  ;;  %v7386_v51 = vunpack.i.l.bf16 %v7385_v30  ;;  %v7410_v25 = vpop.permute.xlu0 %7409  ;;  %v7560_v30 = vld [vmem:[#allocation2 + $0x31] sm:$0xff] }
 0x5a4   : > { %v7412_v41 = vunpack.i.h.bf16 %v7410_v25  ;;  %v7411_v24 = vunpack.i.l.bf16 %v7410_v25 }
 0x5a5   : > { %v5923_v32 = vsel %vm1973_vm0, %v11715_v53, %v7386_v51  ;;  %v5970_v6 = vsel %vm1973_vm0, %v11458_v12, %v7387_v1 }
 0x5a6   : > { %v7395_v63 = vpop.permute.xlu1 %7394  ;;  %v11868_v12 = vsel %vm5907_vm2, %v5906_v34, %v7411_v24  ;;  %v5962_v8 = vsel %vm5907_vm2, %v5954_v39, %v7412_v41  ;;  %v6239_v24 = vld [vmem:[%s11972_s3 + $0x318] sm:$0xff] }
 0x5a7   : > { %v7397_v11 = vunpack.i.h.bf16 %v7395_v63  ;;  %v7396_v59 = vunpack.i.l.bf16 %v7395_v63 }
 0x5a9   : > { %v5931_v43 = vsel %vm5898_vm1, %v5923_v32, %v7396_v59  ;;  %v5978_v19 = vsel %vm5898_vm1, %v5970_v6, %v7397_v11 }
 0x5aa   : > { %v7405_v38 = vpop.permute.xlu1 %7404 }
 0x5ab   : > { %v7407_v62 = vunpack.i.h.bf16 %v7405_v38  ;;  %v7406_v40 = vunpack.i.l.bf16 %v7405_v38 }
 0x5ad   : > { %v5939_v9 = vsel %vm5907_vm2, %v5931_v43, %v7406_v40  ;;  %v5986_v48 = vsel %vm5907_vm2, %v5978_v19, %v7407_v62  ;;  %v7561_v62 = vld [vmem:[#allocation2 + $0x41] sm:$0xff] }
 0x5ae   : > { %6363 = vmatprep.mubr.f32.mxu0 %v5939_v9  ;;  %6463 = vmatprep.mubr.f32.mxu1 %v5986_v48 }
 0x5af   : > { %6364 = vmatmul.mubr.f32.gmra.mrb[14].mxu0 %v11868_v12  ;;  %6464 = vmatmul.mubr.f32.gmra.mrb[12].mxu1 %v5962_v8 }
 0x5b0   : > { %6538 = vmatprep.mubr.f32.mxu0 %v11814_v50 }
 0x5b1   : > { %v7420_v16 = vpop.permute.xlu0 %7419 }
 0x5b2   : > { %v7415_v22 = vpop.permute.xlu1 %7414  ;;  %v7422_v23 = vunpack.i.h.bf16 %v7420_v16  ;;  %v7421_v58 = vunpack.i.l.bf16 %v7420_v16  ;;  %v5549_v16 = vld [vmem:[#allocation2 + $0xb0] sm:$0xff] }
 0x5b3   : > { %v7417_v14 = vunpack.i.h.bf16 %v7415_v22  ;;  %v7416_v7 = vunpack.i.l.bf16 %v7415_v22 }
 0x5b5   : > { %v5971_v46 = vsel %vm1973_vm0, %v11567_v28, %v7416_v7  ;;  %v5947_v2 = vsel %vm1973_vm0, %v11420_v56, %v7417_v14 }
 0x5b6   : > { %v5979_v54 = vsel %vm5898_vm1, %v5971_v46, %v7421_v58  ;;  %v5955_v47 = vsel %vm5898_vm1, %v5947_v2, %v7422_v23  ;;  %v7562_v46 = vld [vmem:[#allocation2 + $0x51] sm:$0xff] }
 0x5ba   : > { %v7430_v15 = vpop.permute.xlu0 %7429 }
 0x5bb   : > { %v7432_v27 = vunpack.i.h.bf16 %v7430_v15  ;;  %v7431_v33 = vunpack.i.l.bf16 %v7430_v15 }
 0x5bd   : > { %v7425_v50 = vpop.permute.xlu1 %7424  ;;  %v5987_v26 = vsel %vm5907_vm2, %v5979_v54, %v7431_v33  ;;  %v5963_v55 = vsel %vm5907_vm2, %v5955_v47, %v7432_v27 }
 0x5be   : > { %v7440_v5 = vpop.permute.xlu0 %7439  ;;  %6468 = vmatprep.mubr.f32.mxu1 %v5987_v26  ;;  %v7427_v36 = vunpack.i.h.bf16 %v7425_v50  ;;  %v7426_v31 = vunpack.i.l.bf16 %v7425_v50 }
 0x5bf   : > { %6469 = vmatmul.mubr.f32.gmra.mrb[14].mxu1 %v5963_v55  ;;  %v7442_v63 = vunpack.i.h.bf16 %v7440_v5  ;;  %v7441_v1 = vunpack.i.l.bf16 %v7440_v5 }
 0x5c0   : > { %v6104_v20 = vsel %vm1973_vm0, %v7560_v30, %v7426_v31  ;;  %v6130_v51 = vsel %vm1973_vm0, %v11499_v4, %v7427_v36  ;;  %v6238_v4 = vld [vmem:[%s11972_s3 + $0x310] sm:$0xff] }
 0x5c1   : > { %v7435_v28 = vpop.permute.xlu1 %7434  ;;  %v7153_v29 = vpack.c.bf16 %v6239_v24, %v6238_v4 }
 0x5c2   : > { %v7437_v0 = vunpack.i.h.bf16 %v7435_v28  ;;  %v7436_v56 = vunpack.i.l.bf16 %v7435_v28  ;;  %v7450_v21 = vpop.permute.xlu0 %7449 }
 0x5c3   : > { %v7452_v32 = vunpack.i.h.bf16 %v7450_v21  ;;  %v7451_v6 = vunpack.i.l.bf16 %v7450_v21 }
 0x5c4   : > { %v6112_v25 = vsel %vm5898_vm1, %v6104_v20, %v7436_v56  ;;  %v6134_v35 = vsel %vm5898_vm1, %v6130_v51, %v7437_v0  ;;  %v7563_v0 = vld [vmem:[#allocation2 + $0x61] sm:$0xff] }
 0x5c5   : > { %v7445_v37 = vpop.permute.xlu1 %7444  ;;  %v6120_v11 = vsel %vm5907_vm2, %v6112_v25, %v7441_v1  ;;  %v6138_v59 = vsel %vm5907_vm2, %v6134_v35, %v7442_v63 }
 0x5c6   : > { %v7447_v17 = vunpack.i.h.bf16 %v7445_v37  ;;  %v7446_v44 = vunpack.i.l.bf16 %v7445_v37  ;;  %v7460_v41 = vpop.permute.xlu0 %7459  ;;  %6539 = vmatmul.mubr.f32.vlgmr.msra.gmra.mrb[16].mxu0 %v6120_v11  ;;  %6568 = vmatprep.mubr.f32.mxu1 %v6138_v59 }
 0x5c7   : > { %6543 = vmatprep.mubr.f32.mxu0 %v11832_v57  ;;  %v7462_v13 = vunpack.i.h.bf16 %v7460_v41  ;;  %v7461_v9 = vunpack.i.l.bf16 %v7460_v41  ;;  %v7565_v41 = vld [vmem:[#allocation2 + $0x71] sm:$0xff] }
 0x5c8   : > { %v6110_v38 = vsel %vm1973_vm0, %v11497_v3, %v7447_v17  ;;  %v6105_v40 = vsel %vm1973_vm0, %v7561_v62, %v7446_v44  ;;  %v7564_v17 = vld [vmem:[#allocation2 + $0x80] sm:$0xff] }
 0x5c9   : > { %v7455_v43 = vpop.permute.xlu1 %7454  ;;  %v6113_v48 = vsel %vm5898_vm1, %v6105_v40, %v7451_v6  ;;  %v6118_v34 = vsel %vm5898_vm1, %v6110_v38, %v7452_v32  ;;  %v6106_v2 = vsel %vm1973_vm0, %v7562_v46, %v7462_v13  ;;  %v6131_v15 = vsel %vm1973_vm0, %v5549_v16, %v7461_v9 }
 0x5ca   : > { %v7457_v19 = vunpack.i.h.bf16 %v7455_v43  ;;  %v7456_v52 = vunpack.i.l.bf16 %v7455_v43  ;;  %v7470_v57 = vpop.permute.xlu0 %7469 }
 0x5cb   : > { %v7472_v39 = vunpack.i.h.bf16 %v7470_v57  ;;  %v7471_v8 = vunpack.i.l.bf16 %v7470_v57  ;;  %v7567_v57 = vld [vmem:[#allocation2 + $0x81] sm:$0xff] }
 0x5cc   : > { %v6121_v3 = vsel %vm5907_vm2, %v6113_v48, %v7456_v52  ;;  %v6126_v22 = vsel %vm5907_vm2, %v6118_v34, %v7457_v19  ;;  %v7566_v19 = vld [vmem:[#allocation2 + $0x90] sm:$0xff] }
 0x5cd   : > { %v7465_v14 = vpop.permute.xlu1 %7464  ;;  %6544 = vmatmul.mubr.f32.gmra.mrb[18].mxu0 %v6121_v3  ;;  %6569 = vmatmul.mubr.f32.vlgmr.msra.gmra.mrb[16].mxu1 %v6126_v22  ;;  %v6114_v27 = vsel %vm5898_vm1, %v6106_v2, %v7472_v39  ;;  %v6135_v33 = vsel %vm5898_vm1, %v6131_v15, %v7471_v8  ;;  %v7568_v39 = vld [vmem:[#allocation2 + $0x84] sm:$0xff] }
 0x5ce   : > { %v7480_v7 = vpop.permute.xlu0 %7479  ;;  %6548 = vmatprep.mubr.f32.mxu0 %v11850_v60  ;;  %7152 = vmatpush3.bf16.msra.mxu1 %v11797_v49  ;;  %v7467_v50 = vunpack.i.h.bf16 %v7465_v14  ;;  %v7466_v26 = vunpack.i.l.bf16 %v7465_v14  ;;  %v7569_v14 = vld [vmem:[#allocation2 + $0x94] sm:$0xff] }
 0x5cf   : > { %v7482_v23 = vunpack.i.h.bf16 %v7480_v7  ;;  %v7481_v58 = vunpack.i.l.bf16 %v7480_v7  ;;  %7154 = vmatprep.subr.bf16.mxu1 %v7153_v29 }
 0x5d0   : > { %v6107_v56 = vsel %vm1973_vm0, %v7563_v0, %v7467_v50  ;;  %v6111_v21 = vsel %vm1973_vm0, %v11510_v61, %v7466_v26 }
 0x5d1   : > { %v7475_v54 = vpop.permute.xlu1 %7474  ;;  %v6122_v47 = vsel %vm5907_vm2, %v6114_v27, %v7482_v23  ;;  %v6139_v60 = vsel %vm5907_vm2, %v6135_v33, %v7481_v58  ;;  %v6841_v58 = vld [vmem:[%s11973_s4] ss:$0 sm:$0xff] }
 0x5d2   : > { %v7490_v49 = vpop.permute.xlu0 %7489  ;;  %6549 = vmatmul.mubr.f32.gmra.mrb[20].mxu0 %v6122_v47  ;;  %6573 = vmatprep.mubr.f32.mxu1 %v6139_v60  ;;  %v7477_v55 = vunpack.i.h.bf16 %v7475_v54  ;;  %v7476_v5 = vunpack.i.l.bf16 %v7475_v54 }
 0x5d3   : > { %6553 = vmatprep.mubr.f32.mxu0 %v11868_v12  ;;  %7156 = vmatpush3.bf16.msra.mxu1 %v7153_v29  ;;  %v7492_v30 = vunpack.i.h.bf16 %v7490_v49  ;;  %v7491_v20 = vunpack.i.l.bf16 %v7490_v49 }
 0x5d4   : > { %v6115_v63 = vsel %vm5898_vm1, %v6107_v56, %v7477_v55  ;;  %v6119_v1 = vsel %vm5898_vm1, %v6111_v21, %v7476_v5 }
 0x5d5   : > { %v7485_v36 = vpop.permute.xlu1 %7484  ;;  %v6128_v44 = vsel %vm1973_vm0, %v7564_v17, %v7491_v20  ;;  %v6108_v4 = vsel %vm1973_vm0, %v7565_v41, %v7492_v30 }
 0x5d6   : > { %v7487_v31 = vunpack.i.h.bf16 %v7485_v36  ;;  %v7486_v28 = vunpack.i.l.bf16 %v7485_v36  ;;  %v7500_v51 = vpop.permute.xlu0 %7499 }
 0x5d7   : > { %v7502_v61 = vunpack.i.h.bf16 %v7500_v51  ;;  %v7501_v59 = vunpack.i.l.bf16 %v7500_v51 }
 0x5d8   : > { %v6123_v25 = vsel %vm5907_vm2, %v6115_v63, %v7487_v31  ;;  %v6127_v12 = vsel %vm5907_vm2, %v6119_v1, %v7486_v28 }
 0x5d9   : > { %v7495_v35 = vpop.permute.xlu1 %7494  ;;  %6554 = vmatmul.mubr.f32.gmra.mrb[22].mxu0 %v6123_v25  ;;  %6574 = vmatmul.mubr.f32.gmra.mrb[18].mxu1 %v6127_v12 }
 0x5da   : > { %v7497_v37 = vunpack.i.h.bf16 %v7495_v35  ;;  %v7496_v11 = vunpack.i.l.bf16 %v7495_v35  ;;  %7041 = vmatprep.mubr.msk.f32.mxu1 %vm1973_vm0, %v11617_v18  ;;  %v7510_v32 = vpop.permute.xlu0 %7509 }
 0x5db   : > { %v7512_v13 = vunpack.i.h.bf16 %v7510_v32 }
 0x5dc   : > { %v6132_v24 = vsel %vm5898_vm1, %v6128_v44, %v7496_v11  ;;  %v6116_v38 = vsel %vm5898_vm1, %v6108_v4, %v7497_v37 }
 0x5dd   : > { %v7505_v62 = vpop.permute.xlu1 %7504  ;;  %7042 = vmatmul.mubr.msk.f32.vlgmr.msra.gmra.mrb[20].mxu1 %vm1973_vm0, %v11671_v10  ;;  %v6136_v40 = vsel %vm5907_vm2, %v6132_v24, %v7501_v59  ;;  %v6124_v18 = vsel %vm5907_vm2, %v6116_v38, %v7502_v61  ;;  %v7511_v10 = vunpack.i.l.bf16 %v7510_v32 }
 0x5de   : > { %v7507_v6 = vunpack.i.h.bf16 %v7505_v62  ;;  %v7506_v43 = vunpack.i.l.bf16 %v7505_v62  ;;  %6558 = vmatprep.mubr.f32.mxu0 %v6136_v40  ;;  %7044 = vmatprep.mubr.msk.f32.mxu1 %vm1973_vm0, %v11711_v42 }
 0x5df   : > { %6559 = vmatmul.mubr.f32.gmra.mrb[24].mxu0 %v6124_v18 }
 0x5e0   : > { %v6129_v52 = vsel %vm1973_vm0, %v7566_v19, %v7506_v43  ;;  %v6109_v29 = vsel %vm1973_vm0, %v7567_v57, %v7507_v6 }
 0x5e1   : > { %v7515_v9 = vpop.permute.xlu1 %7514  ;;  %7045 = vmatmul.mubr.msk.f32.gmra.mrb[22].mxu1 %vm1973_vm0, %v11715_v53  ;;  %v6133_v42 = vsel %vm5898_vm1, %v6129_v52, %v7511_v10  ;;  %v6117_v8 = vsel %vm5898_vm1, %v6109_v29, %v7512_v13  ;;  %v5553_v53 = vld [vmem:[#allocation2 + $0xb4] sm:$0xff] }
 0x5e2   : > { %v7517_v48 = vunpack.i.h.bf16 %v7515_v9  ;;  %v7516_v34 = vunpack.i.l.bf16 %v7515_v9  ;;  %7047 = vmatprep.mubr.msk.f32.mxu1 %vm1973_vm0, %v7568_v39 }
 0x5e4   : > { %v6137_v3 = vsel %vm5907_vm2, %v6133_v42, %v7516_v34  ;;  %v6125_v22 = vsel %vm5907_vm2, %v6117_v8, %v7517_v48 }
 0x5e5   : > { %6563 = vmatprep.mubr.f32.mxu0 %v6137_v3  ;;  %7048 = vmatmul.mubr.msk.f32.gmra.mrb[24].mxu1 %vm1973_vm0, %v7569_v14 }
 0x5e6   : > { %6564 = vmatmul.mubr.f32.gmra.mrb[26].mxu0 %v6125_v22  ;;  %7050 = vmatprep.mubr.msk.f32.mxu1 %vm1973_vm0, %v11697_v45 }
 0x5e9   : > { %7051 = vmatmul.mubr.msk.f32.gmra.mrb[26].mxu1 %vm1973_vm0, %v5553_v53 }
 0x620   : > { %v6885_v7 = vpop.f32.mrb[0].mxu0 }
 0x621   : > { %v6886_v16 = vpop.f32.mrb[1].mxu0 }
 0x622   : > { %v6887_v23 = vadd.f32 %v6886_v16, %v6885_v7 }
 0x624   : > { %v6331_v33 = vadd.f32 %v6887_v23, %v6841_v58 }
 0x62b   : > { %v6888_v46 = vpop.f32.mrb[2].mxu0 }
 0x62c   : > { %v6941_v2 = vpop.f32.mrb[0].mxu1  ;;  %v6889_v15 = vpop.f32.mrb[3].mxu0 }
 0x62d   : > { %v6942_v27 = vpop.f32.mrb[1].mxu1  ;;  %v6890_v54 = vadd.f32 %v6889_v15, %v6888_v46 }
 0x62e   : > { %v6943_v47 = vadd.f32 %v6942_v27, %v6941_v2 }
 0x62f   : > { %v6336_v55 = vadd.f32 %v6890_v54, %v6841_v58 }
 0x630   : > { %v6436_v60 = vadd.f32 %v6943_v47, %v6331_v33 }
 0x637   : > { %v6891_v50 = vpop.f32.mrb[4].mxu0 }
 0x638   : > { %v6944_v45 = vpop.f32.mrb[2].mxu1  ;;  %v6892_v26 = vpop.f32.mrb[5].mxu0 }
 0x639   : > { %v6945_v49 = vpop.f32.mrb[3].mxu1  ;;  %v6893_v5 = vadd.f32 %v6892_v26, %v6891_v50 }
 0x63a   : > { %v6946_v36 = vadd.f32 %v6945_v49, %v6944_v45 }
 0x63b   : > { %v6341_v30 = vadd.f32 %v6893_v5, %v6841_v58 }
 0x63c   : > { %v6441_v31 = vadd.f32 %v6946_v36, %v6336_v55 }
 0x643   : > { %v6894_v28 = vpop.f32.mrb[6].mxu0  ;;  %v6947_v0 = vpop.f32.mrb[4].mxu1 }
 0x644   : > { %v6895_v56 = vpop.f32.mrb[7].mxu0  ;;  %v6948_v21 = vpop.f32.mrb[5].mxu1 }
 0x645   : > { %v6896_v20 = vadd.f32 %v6895_v56, %v6894_v28  ;;  %v6949_v63 = vadd.f32 %v6948_v21, %v6947_v0 }
 0x647   : > { %v6446_v1 = vadd.f32 %v6949_v63, %v6341_v30  ;;  %v6346_v37 = vadd.f32 %v6896_v20, %v6841_v58 }
 0x64f   : > { %v6897_v51 = vpop.f32.mrb[8].mxu0  ;;  %v6950_v25 = vpop.f32.mrb[6].mxu1 }
 0x650   : > { %v6898_v12 = vpop.f32.mrb[9].mxu0  ;;  %v6951_v35 = vpop.f32.mrb[7].mxu1 }
 0x651   : > { %v6899_v11 = vadd.f32 %v6898_v12, %v6897_v51  ;;  %v6952_v61 = vadd.f32 %v6951_v35, %v6950_v25 }
 0x653   : > { %v6451_v59 = vadd.f32 %v6952_v61, %v6346_v37  ;;  %v6351_v24 = vadd.f32 %v6899_v11, %v6841_v58 }
 0x65b   : > { %v6900_v17 = vpop.f32.mrb[10].mxu0  ;;  %v6953_v44 = vpop.f32.mrb[8].mxu1 }
 0x65c   : > { %v6901_v41 = vpop.f32.mrb[11].mxu0  ;;  %v6954_v4 = vpop.f32.mrb[9].mxu1 }
 0x65d   : > { %v6902_v38 = vadd.f32 %v6901_v41, %v6900_v17  ;;  %v6955_v62 = vadd.f32 %v6954_v4, %v6953_v44 }
 0x65f   : > { %v11946_v40 = vadd.f32 %v6955_v62, %v6351_v24  ;;  %v6356_v19 = vadd.f32 %v6902_v38, %v6841_v58 }
 0x672   : > { %v6903_v18 = vpop.f32.mrb[12].mxu0  ;;  %v6956_v32 = vpop.f32.mrb[10].mxu1 }
 0x673   : > { %v6904_v6 = vpop.f32.mrb[13].mxu0  ;;  %v6957_v43 = vpop.f32.mrb[11].mxu1 }
 0x674   : > { %v6905_v52 = vadd.f32 %v6904_v6, %v6903_v18  ;;  %v6958_v57 = vadd.f32 %v6957_v43, %v6956_v32 }
 0x676   : > { %v11948_v29 = vadd.f32 %v6958_v57, %v6356_v19  ;;  %v6361_v34 = vadd.f32 %v6905_v52, %v6841_v58 }
 0x682   : > { %v6906_v13 = vpop.f32.mrb[14].mxu0  ;;  %v6959_v10 = vpop.f32.mrb[12].mxu1 }
 0x683   : > { %v6907_v9 = vpop.f32.mrb[15].mxu0  ;;  %v6960_v48 = vpop.f32.mrb[13].mxu1 }
 0x684   : > { %v6908_v39 = vadd.f32 %v6907_v9, %v6906_v13  ;;  %v6961_v42 = vadd.f32 %v6960_v48, %v6959_v10 }
 0x686   : > { %v6466_v8 = vadd.f32 %v6961_v42, %v6361_v34  ;;  %v6366_v14 = vadd.f32 %v6908_v39, %v6841_v58 }
 0x692   : > { %v6962_v3 = vpop.f32.mrb[14].mxu1 }
 0x693   : > { %v6963_v22 = vpop.f32.mrb[15].mxu1 }
 0x694   : > { %v6964_v53 = vadd.f32 %v6963_v22, %v6962_v3 }
 0x696   : > { %v6471_v7 = vadd.f32 %v6964_v53, %v6366_v14 }
 0x699   : > { %v6997_v16 = vpop.f32.mrb[16].mxu0 }
 0x69a   : > { %v6998_v23 = vpop.f32.mrb[17].mxu0 }
 0x69b   : > { %v6999_v46 = vadd.f32 %v6998_v23, %v6997_v16 }
 0x69d   : > { %v6541_v2 = vadd.f32 %v6999_v46, %v6436_v60 }
 0x6a0   : > { %v7000_v15 = vpop.f32.mrb[18].mxu0  ;;  %v7015_v27 = vpop.f32.mrb[16].mxu1 }
 0x6a1   : > { %v7001_v33 = vpop.f32.mrb[19].mxu0  ;;  %v7016_v54 = vpop.f32.mrb[17].mxu1 }
 0x6a2   : > { %v7002_v47 = vadd.f32 %v7001_v33, %v7000_v15  ;;  %v7017_v50 = vadd.f32 %v7016_v54, %v7015_v27 }
 0x6a4   : > { %v6546_v45 = vadd.f32 %v7002_v47, %v6441_v31  ;;  %v6571_v26 = vadd.f32 %v7017_v50, %v6466_v8 }
 0x6a5   : > { %v7003_v49 = vpop.f32.mrb[20].mxu0 }
 0x6a6   : > { %v7004_v55 = vpop.f32.mrb[21].mxu0 }
 0x6a7   : > { %v7005_v5 = vadd.f32 %v7004_v55, %v7003_v49 }
 0x6a9   : > { %v6551_v36 = vadd.f32 %v7005_v5, %v6446_v1 }
 0x6ac   : > { %v7006_v58 = vpop.f32.mrb[22].mxu0  ;;  %v7018_v28 = vpop.f32.mrb[18].mxu1 }
 0x6ad   : > { %v7007_v0 = vpop.f32.mrb[23].mxu0  ;;  %v7019_v56 = vpop.f32.mrb[19].mxu1 }
 0x6ae   : > { %v7008_v21 = vadd.f32 %v7007_v0, %v7006_v58  ;;  %v7020_v30 = vadd.f32 %v7019_v56, %v7018_v28 }
 0x6b0   : > { %v7043_v60 = vpop.f32.mrb[20].mxu1  ;;  %v6556_v20 = vadd.f32 %v7008_v21, %v6451_v59  ;;  %v6576_v63 = vadd.f32 %v7020_v30, %v6471_v7 }
 0x6b1   : > { %v6651_v51 = vadd.f32 %v7043_v60, %v6546_v45  ;;  %v6645_v25 = vpop.f32.mrb[21].mxu1 }
 0x6b2   : > { %v6646_v31 = vadd.f32 %v6645_v25, %v6541_v2  ;;  %v7009_v1 = vpop.f32.mrb[24].mxu0 }
 0x6b3   : > { %v6685_v12 = vmax.f32 %v6651_v51, 0.0  ;;  %v7010_v35 = vpop.f32.mrb[25].mxu0 }
 0x6b4   : > { %v6684_v37 = vmax.f32 %v6646_v31, 0.0  ;;  %v7011_v11 = vadd.f32 %v7010_v35, %v7009_v1  ;;  %v7046_v61 = vpop.f32.mrb[22].mxu1 }
 0x6b5   : > { %6693 = vst [vmem:[%s11954_s24 + $0x8] sm:$0xff] %v6685_v12  ;;  %v6661_v59 = vadd.f32 %v7046_v61, %v6556_v20  ;;  %v6655_v17 = vpop.f32.mrb[23].mxu1 }
 0x6b6   : > { %6692 = vst [vmem:[%s11954_s24] sm:$0xff] %v6684_v37  ;;  %v6656_v44 = vadd.f32 %v6655_v17, %v6551_v36  ;;  %v6561_v41 = vadd.f32 %v7011_v11, %v11946_v40 }
 0x6b7   : > { %v6687_v4 = vmax.f32 %v6661_v59, 0.0 }
 0x6b8   : > { %v6686_v24 = vmax.f32 %v6656_v44, 0.0  ;;  %v7049_v38 = vpop.f32.mrb[24].mxu1 }
 0x6b9   : > { %6695 = vst [vmem:[%s11954_s24 + $0x18] sm:$0xff] %v6687_v4  ;;  %v7012_v62 = vpop.f32.mrb[26].mxu0  ;;  %v6665_v18 = vpop.f32.mrb[25].mxu1 }
 0x6ba   : > { %6694 = vst [vmem:[%s11954_s24 + $0x10] sm:$0xff] %v6686_v24  ;;  %v6666_v32 = vadd.f32 %v6665_v18, %v6561_v41  ;;  %v7013_v6 = vpop.f32.mrb[27].mxu0 }
 0x6bb   : > { %v7014_v43 = vadd.f32 %v7013_v6, %v7012_v62 }
 0x6bc   : > { %v6688_v19 = vmax.f32 %v6666_v32, 0.0  ;;  %v7052_v52 = vpop.f32.mrb[26].mxu1 }
 0x6bd   : > { %v6566_v57 = vadd.f32 %v7014_v43, %v11948_v29  ;;  %v6681_v13 = vadd.f32 %v7052_v52, %v6576_v63  ;;  %v6675_v40 = vpop.f32.mrb[27].mxu1 }
 0x6be   : > { %6696 = vst [vmem:[%s11954_s24 + $0x20] sm:$0xff] %v6688_v19  ;;  %v6676_v10 = vadd.f32 %v6675_v40, %v6571_v26 }
 0x6bf   : > { %v6671_v9 = vadd.f32 %v7049_v38, %v6566_v57  ;;  %v6691_v48 = vmax.f32 %v6681_v13, 0.0 }
 0x6c0   : > { %v6690_v34 = vmax.f32 %v6676_v10, 0.0 }
 0x6c1   : > { %v6689_v39 = vmax.f32 %v6671_v9, 0.0  ;;  %6699 = vst [vmem:[%s11954_s24 + $0x38] sm:$0xff] %v6691_v48 }
 0x6c2   : > { %6698 = vst [vmem:[%s11954_s24 + $0x30] sm:$0xff] %v6690_v34 }
 0x6c3   : > { %6697 = vst [vmem:[%s11954_s24 + $0x28] sm:$0xff] %v6689_v39 }
 0x6c4 PF: > { %s15_s18 = sadd.s32 1, %s7576_s18  }
 0x6c5   : > { %p12_p4 = scmp.ge.s32.totalorder %s15_s18, 4  }
 0x6c7   :  { %14 = sbr.rel (!%p12_p4) target bundleno = 1 (0x1), region = 70 }

</bundles_post_ra>
